<compile_context>
chip_gen: v7x
topology: tpu7x:2x2x1
jax: 0.10.0
libtpu: 0.0.40
codegen_flags: <defaults>
</compile_context>

<pallas_src>
import functools

import jax
import jax.numpy as jnp
from jax.experimental import pallas as pl
from jax.experimental.pallas import tpu as pltpu

_EPS = 1e-5
_VMEM_LIMIT = 48 * 1024 * 1024     # <= ~48 MiB keeps v7x (64 MiB VMEM) headroom


def _round_up(v, m):
    return (v + m - 1) // m * m


def _pick_row_tile(m, cap=1024):
    # largest row tile <= cap that divides m (m is always a multiple of 8 here)
    if m <= cap:
        return m
    for t in range(cap, 7, -8):
        if m % t == 0:
            return t
    return 8


def _bn_scale_shift(stats, gamma, beta, count, eps):
    # stats: (2, C) = [sum, sum_of_squares] over `count` elements (batch stats).
    # NOTE: single-pass E[x^2]-E[x]^2 in f32, clamped at 0 (see review note on
    # cancellation for very large activations).
    mean = stats[0:1, :] * (1.0 / count)
    var = jnp.maximum(stats[1:2, :] * (1.0 / count) - mean * mean, 0.0)
    scale = gamma * jax.lax.rsqrt(var + eps)
    shift = beta - mean * scale
    return scale, shift


# --------------------------------------------------------------------------
# Kernel 1: fused conv1 (1x1) + shortcut conv (1x1), both with per-tile
# partial BatchNorm statistics.  Grid over row tiles, fully parallel.
# --------------------------------------------------------------------------

def _conv1_sc_kernel(x_ref, w1_ref, *rest, with_sc):
    if with_sc:
        wsc_ref, y1_ref, st1_ref, ys_ref, stsc_ref = rest
    else:
        y1_ref, st1_ref = rest

    x = x_ref[...]                                                # bf16 (tm, K)
    y = jnp.dot(x, w1_ref[...], preferred_element_type=jnp.float32)
    y1_ref[...] = y.astype(y1_ref.dtype)
    st1_ref[0] = jnp.concatenate(
        [jnp.sum(y, axis=0, keepdims=True),
         jnp.sum(y * y, axis=0, keepdims=True)], axis=0)

    if with_sc:
        ys = jnp.dot(x, wsc_ref[...], preferred_element_type=jnp.float32)
        ys_ref[...] = ys.astype(ys_ref.dtype)
        stsc_ref[0] = jnp.concatenate(
            [jnp.sum(ys, axis=0, keepdims=True),
             jnp.sum(ys * ys, axis=0, keepdims=True)], axis=0)


def conv1_shortcut(x_rows, w1, w_sc):
    m, k = x_rows.shape
    n1 = w1.shape[1]
    tm = _pick_row_tile(m)
    nt = m // tm

    in_specs = [pl.BlockSpec((tm, k), lambda i: (i, 0)),
                pl.BlockSpec((k, n1), lambda i: (0, 0))]
    args = [x_rows, w1]
    out_specs = [pl.BlockSpec((tm, n1), lambda i: (i, 0)),
                 pl.BlockSpec((1, 2, n1), lambda i: (i, 0, 0))]
    out_shape = [jax.ShapeDtypeStruct((m, n1), jnp.bfloat16),
                 jax.ShapeDtypeStruct((nt, 2, n1), jnp.float32)]
    if w_sc is not None:
        n2 = w_sc.shape[1]
        in_specs.append(pl.BlockSpec((k, n2), lambda i: (0, 0)))
        args.append(w_sc)
        out_specs += [pl.BlockSpec((tm, n2), lambda i: (i, 0)),
                      pl.BlockSpec((1, 2, n2), lambda i: (i, 0, 0))]
        out_shape += [jax.ShapeDtypeStruct((m, n2), jnp.bfloat16),
                      jax.ShapeDtypeStruct((nt, 2, n2), jnp.float32)]

    kernel = functools.partial(_conv1_sc_kernel, with_sc=w_sc is not None)
    return pl.pallas_call(
        kernel,
        grid=(nt,),
        in_specs=in_specs,
        out_specs=tuple(out_specs),
        out_shape=tuple(out_shape),
        compiler_params=pltpu.CompilerParams(
            dimension_semantics=("parallel",),
            vmem_limit_bytes=_VMEM_LIMIT),
    )(*args)


# --------------------------------------------------------------------------
# Kernel 2: fused AdaptConv2d.  Per batch element: BN1+ReLU (from stats),
# LayerGate, ChannelGate, the main 3x3/s1/p1 conv via 9 contiguous flat taps
# of a VMEM-staged zero-padded image, the 0/1 gated blend, and per-batch
# partial BatchNorm2 statistics.
# --------------------------------------------------------------------------

def _adapt_kernel(y1_ref, mask_ref, cgm_ref, s1_ref, g1_ref, b1_ref,
                  w_ac_ref, w_cg_ref, b_cg_ref, w_cgfc_ref, b_cgfc_ref,
                  w_lg1_ref, b_lg1_ref, w_lgih_ref, b_lgsum_ref,
                  w_lgfc_ref, b_lgfc_ref,
                  y2_ref, s2_ref, xpf_ref,
                  *, Hs, Ws, Wp, Hcg, H2, W2, count1, eps):
    Cp = y1_ref.shape[2]
    HWp = Hs * Wp

    # ---- BN1 + ReLU (f32) on the bf16 conv1 rows; re-zero the pad columns ----
    scale, shift = _bn_scale_shift(s1_ref[...], g1_ref[...], b1_ref[...],
                                   count1, eps)
    mask = mask_ref[...]                                          # (HWp, 1)
    x1 = jnp.maximum(y1_ref[0].astype(jnp.float32) * scale + shift, 0.0) * mask
    x1_bf = x1.astype(jnp.bfloat16)

    # ---- stage the zero-padded image into VMEM (flat (Hp*Wp, Cp) layout).
    # Pad rows are re-zeroed every step (megacore-safe); the interior store at
    # offset Wp+1 places x1[r, c] at padded position (1+r, 1+c).
    zero = jnp.zeros((2 * Wp, Cp), jnp.bfloat16)
    xpf_ref[pl.ds(0, 2 * Wp), :] = zero
    xpf_ref[pl.ds((Hs + 1) * Wp, 2 * Wp), :] = zero
    xpf_ref[pl.ds(Wp + 1, HWp), :] = x1_bf

    # ---- LayerGate: GAP -> 1x1 conv -> ReLU -> 1-step LSTM -> fc -> sigmoid
    pooled = jnp.sum(x1, axis=0, keepdims=True) * (1.0 / (Hs * Ws))   # (1, Cp)
    z = jnp.maximum(jnp.dot(pooled, w_lg1_ref[...],
                            preferred_element_type=jnp.float32) + b_lg1_ref[...],
                    0.0)                                          # (1, 10)
    gates = jnp.dot(z, w_lgih_ref[...],
                    preferred_element_type=jnp.float32) + b_lgsum_ref[...]
    i_g = jax.nn.sigmoid(gates[:, 0:10])                          # PyTorch i,f,g,o
    g_g = jnp.tanh(gates[:, 20:30])
    o_g = jax.nn.sigmoid(gates[:, 30:40])
    h = o_g * jnp.tanh(i_g * g_g)                                 # h0 = c0 = 0
    lg = jnp.maximum(jnp.dot(h, w_lgfc_ref[...],
                             preferred_element_type=jnp.float32) + b_lgfc_ref[...],
                     0.0)
    layer_gate = jnp.round(jax.nn.sigmoid(lg))                    # (1, 1) in {0,1}

    # ---- ChannelGate: 3x3/s2 conv + bias -> ReLU -> GAP -> fc -> sigmoid ----
    # Taps are contiguous flat slices of the staged image; the stride-2
    # selection is a precomputed {0,1} column mask (no in-kernel iota mask).
    # TODO(synk): phase-decompose the stride-2 conv to drop ~4x redundant MXU work.
    cg = jnp.zeros((Hcg * Wp, Cp), jnp.float32)
    for t in range(9):
        dy, dx = t // 3, t % 3
        win = xpf_ref[pl.ds((1 + dy) * Wp + 1 + dx, Hcg * Wp), :]
        cg = cg + jnp.dot(win, w_cg_ref[t], preferred_element_type=jnp.float32)
    cg = jnp.maximum(cg + b_cg_ref[...], 0.0) * cgm_ref[...]
    pooled_cg = jnp.sum(cg, axis=0, keepdims=True) * (1.0 / (H2 * W2))
    cfc = jnp.maximum(jnp.dot(pooled_cg, w_cgfc_ref[...],
                              preferred_element_type=jnp.float32) + b_cgfc_ref[...],
                      0.0)
    channel_gate = jnp.round(jax.nn.sigmoid(cfc))                 # (1, Cp) in {0,1}

    # "skip layer / skip all channels": gates are exact 0/1 so the masked blend
    # reproduces the per-batch branch of the PyTorch module.
    keep = jnp.logical_and(layer_gate != 0.0,
                           jnp.sum(channel_gate, axis=1, keepdims=True) != 0.0)
    gate = jnp.where(keep, channel_gate, 0.0)                     # (1, Cp)

    # ---- main 3x3 conv (stride 1, pad 1, no bias): 9 contiguous flat taps ----
    # TODO(synk): wrap in pl.when(keep) to skip the 9 dots for gated-off batches.
    acc = jnp.zeros((HWp, Cp), jnp.float32)
    for t in range(9):
        dy, dx = t // 3, t % 3
        win = x1_bf if t == 4 else xpf_ref[pl.ds(dy * Wp + dx, HWp), :]
        acc = acc + jnp.dot(win, w_ac_ref[t], preferred_element_type=jnp.float32)

    blended = (gate * acc + (1.0 - gate) * x1) * mask             # pad cols -> 0
    y2_ref[0] = blended.astype(jnp.bfloat16)
    s2_ref[0] = jnp.concatenate(
        [jnp.sum(blended, axis=0, keepdims=True),
         jnp.sum(blended * blended, axis=0, keepdims=True)], axis=0)


def adapt_conv_block(y1_blocks, mask_rows, cg_mask, stats1, prm, *, Hs, Ws, Wp,
                     count1):
    N, HWp, Cp = y1_blocks.shape
    Hp = Hs + 3
    H2, W2 = (Hs - 3) // 2 + 1, (Ws - 3) // 2 + 1
    Hcg = 2 * H2 - 1

    def _const_spec(a):
        r = a.ndim
        return pl.BlockSpec(a.shape, lambda n, r=r: (0,) * r)

    # TODO(synk): pl.Buffered(1) on these constant operands would halve their
    #             VMEM footprint (matters at Cp>=512 inside v7x's 64 MiB VMEM).
    # TODO(synk): for very large Hs*Ws, add a row-block grid axis with a 1-row
    #             halo (two-phase GAP/gates) to fit the v7x VMEM budget.
    consts = [mask_rows, cg_mask, stats1, prm['bn1_g'], prm['bn1_b'],
              prm['ac_w'], prm['cg_w'], prm['cg_b'], prm['cg_fc_w'],
              prm['cg_fc_b'], prm['lg_conv_w'], prm['lg_conv_b'], prm['lg_wih'],
              prm['lg_bsum'], prm['lg_fc_w'], prm['lg_fc_b']]
    in_specs = ([pl.BlockSpec((1, HWp, Cp), lambda n: (n, 0, 0))]
                + [_const_spec(a) for a in consts])

    kernel = functools.partial(_adapt_kernel, Hs=Hs, Ws=Ws, Wp=Wp, Hcg=Hcg,
                               H2=H2, W2=W2, count1=float(count1), eps=_EPS)
    return pl.pallas_call(
        kernel,
        grid=(N,),
        in_specs=in_specs,
        out_specs=(pl.BlockSpec((1, HWp, Cp), lambda n: (n, 0, 0)),
                   pl.BlockSpec((1, 2, Cp), lambda n: (n, 0, 0))),
        out_shape=(jax.ShapeDtypeStruct((N, HWp, Cp), jnp.bfloat16),
                   jax.ShapeDtypeStruct((N, 2, Cp), jnp.float32)),
        scratch_shapes=[pltpu.VMEM((Hp * Wp, Cp), jnp.bfloat16)],
        compiler_params=pltpu.CompilerParams(
            dimension_semantics=("parallel",),
            vmem_limit_bytes=_VMEM_LIMIT),
    )(y1_blocks, *consts)


# --------------------------------------------------------------------------
# Kernel 3: conv3 (1x1 -> 4*Cout) with BN2+ReLU (+ pad-row re-zeroing) fused
# as prologue and per-tile partial BN3 statistics.
# --------------------------------------------------------------------------

def _conv3_kernel(y2_ref, mask_ref, s2_ref, g2_ref, b2_ref, w3_ref,
                  y3_ref, st3_ref, *, count, eps):
    scale, shift = _bn_scale_shift(s2_ref[...], g2_ref[...], b2_ref[...],
                                   count, eps)
    x = jnp.maximum(y2_ref[...].astype(jnp.float32) * scale + shift, 0.0)
    x = x * mask_ref[...]                                         # pad rows -> 0
    y = jnp.dot(x.astype(jnp.bfloat16), w3_ref[...],
                preferred_element_type=jnp.float32)
    y3_ref[...] = y
    st3_ref[0] = jnp.concatenate(
        [jnp.sum(y, axis=0, keepdims=True),
         jnp.sum(y * y, axis=0, keepdims=True)], axis=0)


def conv3_bn_relu(y2_rows, row_mask, stats2, g2, b2, w3, count):
    m, k = y2_rows.shape
    n = w3.shape[1]
    tm = _pick_row_tile(m)
    nt = m // tm
    kernel = functools.partial(_conv3_kernel, count=float(count), eps=_EPS)
    return pl.pallas_call(
        kernel,
        grid=(nt,),
        in_specs=[pl.BlockSpec((tm, k), lambda i: (i, 0)),
                  pl.BlockSpec((tm, 1), lambda i: (i, 0)),
                  pl.BlockSpec((2, k), lambda i: (0, 0)),
                  pl.BlockSpec((1, k), lambda i: (0, 0)),
                  pl.BlockSpec((1, k), lambda i: (0, 0)),
                  pl.BlockSpec((k, n), lambda i: (0, 0))],
        out_specs=(pl.BlockSpec((tm, n), lambda i: (i, 0)),
                   pl.BlockSpec((1, 2, n), lambda i: (i, 0, 0))),
        out_shape=(jax.ShapeDtypeStruct((m, n), jnp.float32),
                   jax.ShapeDtypeStruct((nt, 2, n), jnp.float32)),
        compiler_params=pltpu.CompilerParams(
            dimension_semantics=("parallel",),
            vmem_limit_bytes=_VMEM_LIMIT),
    )(y2_rows, row_mask, stats2, g2, b2, w3)


# --------------------------------------------------------------------------
# Kernel 4: BN3 (+ shortcut BN) + residual add + final ReLU.
# --------------------------------------------------------------------------

def _bn_add_relu_kernel(*refs, shortcut_bn, count, eps):
    if shortcut_bn:
        (y_ref, yst_ref, yg_ref, yb_ref,
         s_ref, sst_ref, sg_ref, sb_ref, o_ref) = refs
    else:
        y_ref, yst_ref, yg_ref, yb_ref, s_ref, o_ref = refs

    ysc, ysh = _bn_scale_shift(yst_ref[...], yg_ref[...], yb_ref[...], count, eps)
    y = y_ref[...] * ysc + ysh
    s = s_ref[...].astype(jnp.float32)
    if shortcut_bn:
        ssc, ssh = _bn_scale_shift(sst_ref[...], sg_ref[...], sb_ref[...],
                                   count, eps)
        s = s * ssc + ssh
    o_ref[...] = jnp.maximum(y + s, 0.0)


def bn_add_relu(y3, stats3, g3, b3, s, s_bn, count):
    m, c = y3.shape
    tm = _pick_row_tile(m)
    tile = pl.BlockSpec((tm, c), lambda i: (i, 0))
    cst2 = pl.BlockSpec((2, c), lambda i: (0, 0))
    cst1 = pl.BlockSpec((1, c), lambda i: (0, 0))

    args = [y3, stats3, g3, b3, s]
    in_specs = [tile, cst2, cst1, cst1, tile]
    if s_bn is not None:
        sst, sg, sb = s_bn
        args += [sst, sg, sb]
        in_specs += [cst2, cst1, cst1]

    kernel = functools.partial(_bn_add_relu_kernel, shortcut_bn=s_bn is not None,
                               count=float(count), eps=_EPS)
    return pl.pallas_call(
        kernel,
        grid=(m // tm,),
        in_specs=in_specs,
        out_specs=tile,
        out_shape=jax.ShapeDtypeStruct((m, c), jnp.float32),
        compiler_params=pltpu.CompilerParams(
            dimension_semantics=("parallel",),
            vmem_limit_bytes=_VMEM_LIMIT),
    )(*args)


# --------------------------------------------------------------------------
# ResidualBlock forward (PyTorch-facing NCHW interface)
# --------------------------------------------------------------------------

def residual_block(x_nchw, prm, stride=1):
    x = jnp.transpose(x_nchw, (0, 2, 3, 1)).astype(jnp.float32)   # NCHW -> NHWC
    N, H, W, Cin = x.shape
    Cin_p, Cout_p, Cexp_p = prm['Cin_p'], prm['Cout_p'], prm['Cexp_p']
    Cout = prm['out_channels']
    Cexp = Cout * 4

    if stride != 1:
        x = x[:, ::stride, ::stride, :]                           # 1x1 conv stride
    N, Hs, Ws, _ = x.shape
    assert Hs >= 3 and Ws >= 3, "ChannelGate 3x3/s2 conv needs spatial >= 3"

    # Row layout used by every kernel: rows = (n, h, padded w) with
    # Wp = round_up(Ws+2, 8).  The >=2 right-pad columns give the 3x3 convs
    # their halo; padded rows/channels stay exactly 0 through the pipeline, so
    # every BatchNorm only needs the true element count.
    Wp = _round_up(Ws + 2, 8)
    Mp = N * Hs * Wp
    count = N * Hs * Ws

    xpad = jnp.pad(x, ((0, 0), (0, 0), (0, Wp - Ws), (0, Cin_p - Cin)))
    x_rows = xpad.reshape(Mp, Cin_p).astype(jnp.bfloat16)

    # tiny precomputed masks: real-column mask and ChannelGate stride-2 mask
    col = jnp.arange(Hs * Wp, dtype=jnp.int32) % Wp
    mask_rows = (col < Ws).astype(jnp.float32).reshape(Hs * Wp, 1)
    mask_full = jnp.tile(mask_rows, (N, 1))
    H2, W2 = (Hs - 3) // 2 + 1, (Ws - 3) // 2 + 1
    Hcg = 2 * H2 - 1
    q = jnp.arange(Hcg * Wp, dtype=jnp.int32)
    r_cg, c_cg = q // Wp, q % Wp
    cg_mask = ((r_cg % 2 == 0) & (c_cg % 2 == 0)
               & (c_cg <= 2 * (W2 - 1))).astype(jnp.float32).reshape(Hcg * Wp, 1)

    has_proj = (stride != 1) or (Cin != Cexp)

    # conv1 (1x1) fused with the shortcut 1x1 conv: one HBM read of the input
    if has_proj:
        y1, st1p, ys, stscp = conv1_shortcut(x_rows, prm['w_conv1'], prm['w_sc'])
        stsc = jnp.sum(stscp, axis=0)
    else:
        y1, st1p = conv1_shortcut(x_rows, prm['w_conv1'], None)
    st1 = jnp.sum(st1p, axis=0)

    # fused BN1+ReLU + LayerGate + ChannelGate + gated 3x3 conv + blend + BN2 stats
    y2, st2p = adapt_conv_block(y1.reshape(N, Hs * Wp, Cout_p), mask_rows,
                                cg_mask, st1, prm, Hs=Hs, Ws=Ws, Wp=Wp,
                                count1=count)
    st2 = jnp.sum(st2p, axis=0)

    # conv3 (1x1 -> 4*Cout, no bias) with BN2+ReLU fused into its prologue
    y3, st3p = conv3_bn_relu(y2.reshape(Mp, Cout_p), mask_full, st2,
                             prm['bn2_g'], prm['bn2_b'], prm['w_conv3'], count)
    st3 = jnp.sum(st3p, axis=0)

    # BN3 (+ shortcut BN) + residual add + final ReLU in one fused pass
    if has_proj:
        out_rows = bn_add_relu(y3, st3, prm['bn3_g'], prm['bn3_b'], ys,
                               (stsc, prm['sc_bn_g'], prm['sc_bn_b']), count)
    else:
        # identity shortcut is added from the bf16 row buffer (intentional tradeoff)
        out_rows = bn_add_relu(y3, st3, prm['bn3_g'], prm['bn3_b'], x_rows,
                               None, count)

    out = out_rows.reshape(N, Hs, Wp, Cexp_p)[:, :, :Ws, :Cexp]
    return jnp.transpose(out, (0, 3, 1, 2))                       # NHWC -> NCHW


# --------------------------------------------------------------------------
# Deterministic parameters + padded/bf16 preparation
# --------------------------------------------------------------------------

def make_params(key, in_channels, out_channels):
    keys = jax.random.split(key, 16)

    def nrm(k, shape, scale=0.2):
        return (scale * jax.random.normal(k, shape)).astype(jnp.float32)

    Cexp = out_channels * 4
    return dict(
        out_channels=out_channels,
        w_conv1=nrm(keys[0], (1, 1, in_channels, out_channels)),
        bn1_g=jnp.ones((out_channels,), jnp.float32),
        bn1_b=jnp.zeros((out_channels,), jnp.float32),
        # AdaptConv2d(out_channels, out_channels): LayerGate
        lg_conv_w=nrm(keys[1], (out_channels, 10)),
        lg_conv_b=nrm(keys[2], (10,)),
        lg_wih=nrm(keys[3], (10, 40)),           # LSTM W_ih^T (i|f|g|o)
        lg_bsum=nrm(keys[4], (40,)),             # b_ih + b_hh pre-summed
        lg_fc_w=nrm(keys[5], (10, 1)),
        lg_fc_b=nrm(keys[6], (1,)),
        # ChannelGate
        cg_conv_w=nrm(keys[7], (3, 3, out_channels, out_channels)),
        cg_conv_b=nrm(keys[8], (out_channels,)),
        cg_fc_w=nrm(keys[9], (out_channels, out_channels)),
        cg_fc_b=nrm(keys[10], (out_channels,)),
        # gated 3x3 conv (no bias)
        ac_conv_w=nrm(keys[11], (3, 3, out_channels, out_channels)),
        bn2_g=jnp.ones((out_channels,), jnp.float32),
        bn2_b=jnp.zeros((out_channels,), jnp.float32),
        w_conv3=nrm(keys[12], (1, 1, out_channels, Cexp)),
        bn3_g=jnp.ones((Cexp,), jnp.float32),
        bn3_b=jnp.zeros((Cexp,), jnp.float32),
        w_sc=nrm(keys[13], (1, 1, in_channels, Cexp)),
        sc_bn_g=jnp.ones((Cexp,), jnp.float32),
        sc_bn_b=jnp.zeros((Cexp,), jnp.float32),
    )


def prepare_params(p, in_channels):
    Cout = p['out_channels']
    Cexp = Cout * 4
    Cin_p = _round_up(in_channels, 128)
    Cout_p = _round_up(Cout, 128)
    Cexp_p = _round_up(Cexp, 128)

    def pad2(a, r, c):
        return jnp.pad(a, ((0, r - a.shape[0]), (0, c - a.shape[1])))

    def pad_vec(a, c, fill=0.0):
        return jnp.pad(a, ((0, c - a.shape[0]),),
                       constant_values=fill).reshape(1, c)

    def w1x1(w, rp, cp):                        # (1,1,I,O) -> (I_p, O_p) bf16
        return pad2(w.reshape(w.shape[2], w.shape[3]), rp, cp).astype(jnp.bfloat16)

    def w3x3(w, rp, cp):                        # (3,3,I,O) -> (9, I_p, O_p) bf16
        wp = jnp.pad(w, ((0, 0), (0, 0),
                         (0, rp - w.shape[2]), (0, cp - w.shape[3])))
        return wp.reshape(9, rp, cp).astype(jnp.bfloat16)

    return dict(
        out_channels=Cout, Cin_p=Cin_p, Cout_p=Cout_p, Cexp_p=Cexp_p,
        w_conv1=w1x1(p['w_conv1'], Cin_p, Cout_p),
        bn1_g=pad_vec(p['bn1_g'], Cout_p, 1.0),
        bn1_b=pad_vec(p['bn1_b'], Cout_p, 0.0),
        ac_w=w3x3(p['ac_conv_w'], Cout_p, Cout_p),
        cg_w=w3x3(p['cg_conv_w'], Cout_p, Cout_p),
        cg_b=pad_vec(p['cg_conv_b'], Cout_p),
        cg_fc_w=pad2(p['cg_fc_w'], Cout_p, Cout_p),
        cg_fc_b=pad_vec(p['cg_fc_b'], Cout_p),
        lg_conv_w=jnp.pad(p['lg_conv_w'], ((0, Cout_p - Cout), (0, 0))),
        lg_conv_b=p['lg_conv_b'].reshape(1, 10),
        lg_wih=p['lg_wih'],
        lg_bsum=p['lg_bsum'].reshape(1, 40),
        lg_fc_w=p['lg_fc_w'],
        lg_fc_b=p['lg_fc_b'].reshape(1, 1),
        bn2_g=pad_vec(p['bn2_g'], Cout_p, 1.0),
        bn2_b=pad_vec(p['bn2_b'], Cout_p, 0.0),
        w_conv3=w1x1(p['w_conv3'], Cout_p, Cexp_p),
        bn3_g=pad_vec(p['bn3_g'], Cexp_p, 1.0),
        bn3_b=pad_vec(p['bn3_b'], Cexp_p, 0.0),
        w_sc=w1x1(p['w_sc'], Cin_p, Cexp_p),
        sc_bn_g=pad_vec(p['sc_bn_g'], Cexp_p, 1.0),
        sc_bn_b=pad_vec(p['sc_bn_b'], Cexp_p, 0.0),
    )


if __name__ == "__main__":
    key = jax.random.PRNGKey(0)
    k_params, k_x = jax.random.split(key)

    N, Cin, H, W = 2, 16, 8, 8
    Cout = 8                 # ResidualBlock(in_channels=16, out_channels=8, stride=1)

    raw = make_params(k_params, Cin, Cout)
    prm = prepare_params(raw, Cin)
    x = jax.random.normal(k_x, (N, Cin, H, W), dtype=jnp.float32)   # NCHW

    fwd = jax.jit(lambda xx: residual_block(xx, prm, stride=1))
    out = jax.block_until_ready(fwd(x))

    assert out.shape == (N, Cout * 4, H, W), out.shape
    assert bool(jnp.all(out >= 0.0))          # final ReLU
    assert bool(jnp.all(jnp.isfinite(out)))
    print("KERNEL_OK")
</pallas_src>

<mosaic_0001>
module attributes {stable_mosaic.version = 11 : i64} {
  func.func @_conv1_sc_kernel(%arg0: i32, %arg1: memref<256x128xbf16, #tpu.memory_space<vmem>>, %arg2: memref<128x128xbf16, #tpu.memory_space<vmem>>, %arg3: memref<128x128xbf16, #tpu.memory_space<vmem>>, %arg4: memref<256x128xbf16, #tpu.memory_space<vmem>>, %arg5: memref<1x2x128xf32, #tpu.memory_space<vmem>>, %arg6: memref<256x128xbf16, #tpu.memory_space<vmem>>, %arg7: memref<1x2x128xf32, #tpu.memory_space<vmem>>) attributes {dimension_semantics = [#tpu.dimension_semantics<parallel>], iteration_bounds = array<i64: 1>, scalar_prefetch = 0 : i64, scratch_operands = 0 : i64, tpu.core_type = #tpu.core_type<tc>, window_params = [{transform_indices = @transform_0, window_bounds = array<i64: 256, 128>}, {pipeline_mode = #tpu.pipeline_mode<synchronous>, transform_indices = @transform_1, window_bounds = array<i64: 128, 128>}, {pipeline_mode = #tpu.pipeline_mode<synchronous>, transform_indices = @transform_2, window_bounds = array<i64: 128, 128>}, {transform_indices = @transform_3, window_bounds = array<i64: 256, 128>}, {transform_indices = @transform_4, window_bounds = array<i64: 1, 2, 128>}, {transform_indices = @transform_5, window_bounds = array<i64: 256, 128>}, {transform_indices = @transform_6, window_bounds = array<i64: 1, 2, 128>}]} {
    %c0 = arith.constant 0 : index
    %c0_0 = arith.constant 0 : index
    %0 = vector.load %arg1[%c0, %c0_0] : memref<256x128xbf16, #tpu.memory_space<vmem>>, vector<256x128xbf16>
    %c0_1 = arith.constant 0 : index
    %c0_2 = arith.constant 0 : index
    %1 = vector.load %arg2[%c0_1, %c0_2] : memref<128x128xbf16, #tpu.memory_space<vmem>>, vector<128x128xbf16>
    %cst = arith.constant dense<0.000000e+00> : vector<256x128xf32>
    %2 = tpu.matmul %0, %1, %cst {dimension_numbers = #tpu.dot_dimension_numbers<[1], [0], [0], [1], [0, 0, 1, 1], [], []>} : vector<256x128xbf16>, vector<128x128xbf16>, vector<256x128xf32> -> vector<256x128xf32>
    %3 = arith.truncf %2 : vector<256x128xf32> to vector<256x128xbf16>
    %c0_3 = arith.constant 0 : index
    %c0_4 = arith.constant 0 : index
    %4 = vector.load %arg4[%c0_3, %c0_4] : memref<256x128xbf16, #tpu.memory_space<vmem>>, vector<256x128xbf16>
    tpu.vector_store %arg4[%c0_3, %c0_4], %3 {strides = array<i32>} : memref<256x128xbf16, #tpu.memory_space<vmem>>, vector<256x128xbf16>,
    %cst_5 = arith.constant dense<0.000000e+00> : vector<128xf32>
    %5 = vector.multi_reduction <add>, %2, %cst_5 [0] : vector<256x128xf32> to vector<128xf32>
    %6 = vector.shape_cast %5 : vector<128xf32> to vector<1x128xf32>
    %7 = arith.mulf %2, %2 : vector<256x128xf32>
    %cst_6 = arith.constant dense<0.000000e+00> : vector<128xf32>
    %8 = vector.multi_reduction <add>, %7, %cst_6 [0] : vector<256x128xf32> to vector<128xf32>
    %9 = vector.shape_cast %8 : vector<128xf32> to vector<1x128xf32>
    %10 = tpu.concatenate %6, %9 in 0 : vector<1x128xf32>, vector<1x128xf32> -> vector<2x128xf32>
    %c0_7 = arith.constant 0 : index
    %c0_8 = arith.constant 0 : index
    %c0_9 = arith.constant 0 : index
    %11 = vector.load %arg5[%c0_7, %c0_8, %c0_9] : memref<1x2x128xf32, #tpu.memory_space<vmem>>, vector<1x2x128xf32>
    %12 = vector.shape_cast %11 : vector<1x2x128xf32> to vector<2x128xf32>
    %13 = vector.shape_cast %10 : vector<2x128xf32> to vector<1x2x128xf32>
    tpu.vector_store %arg5[%c0_7, %c0_8, %c0_9], %13 {strides = array<i32>} : memref<1x2x128xf32, #tpu.memory_space<vmem>>, vector<1x2x128xf32>,
    %c0_10 = arith.constant 0 : index
    %c0_11 = arith.constant 0 : index
    %14 = vector.load %arg3[%c0_10, %c0_11] : memref<128x128xbf16, #tpu.memory_space<vmem>>, vector<128x128xbf16>
    %cst_12 = arith.constant dense<0.000000e+00> : vector<256x128xf32>
    %15 = tpu.matmul %0, %14, %cst_12 {dimension_numbers = #tpu.dot_dimension_numbers<[1], [0], [0], [1], [0, 0, 1, 1], [], []>} : vector<256x128xbf16>, vector<128x128xbf16>, vector<256x128xf32> -> vector<256x128xf32>
    %16 = arith.truncf %15 : vector<256x128xf32> to vector<256x128xbf16>
    %c0_13 = arith.constant 0 : index
    %c0_14 = arith.constant 0 : index
    %17 = vector.load %arg6[%c0_13, %c0_14] : memref<256x128xbf16, #tpu.memory_space<vmem>>, vector<256x128xbf16>
    tpu.vector_store %arg6[%c0_13, %c0_14], %16 {strides = array<i32>} : memref<256x128xbf16, #tpu.memory_space<vmem>>, vector<256x128xbf16>,
    %cst_15 = arith.constant dense<0.000000e+00> : vector<128xf32>
    %18 = vector.multi_reduction <add>, %15, %cst_15 [0] : vector<256x128xf32> to vector<128xf32>
    %19 = vector.shape_cast %18 : vector<128xf32> to vector<1x128xf32>
    %20 = arith.mulf %15, %15 : vector<256x128xf32>
    %cst_16 = arith.constant dense<0.000000e+00> : vector<128xf32>
    %21 = vector.multi_reduction <add>, %20, %cst_16 [0] : vector<256x128xf32> to vector<128xf32>
    %22 = vector.shape_cast %21 : vector<128xf32> to vector<1x128xf32>
    %23 = tpu.concatenate %19, %22 in 0 : vector<1x128xf32>, vector<1x128xf32> -> vector<2x128xf32>
    %c0_17 = arith.constant 0 : index
    %c0_18 = arith.constant 0 : index
    %c0_19 = arith.constant 0 : index
    %24 = vector.load %arg7[%c0_17, %c0_18, %c0_19] : memref<1x2x128xf32, #tpu.memory_space<vmem>>, vector<1x2x128xf32>
    %25 = vector.shape_cast %24 : vector<1x2x128xf32> to vector<2x128xf32>
    %26 = vector.shape_cast %23 : vector<2x128xf32> to vector<1x2x128xf32>
    tpu.vector_store %arg7[%c0_17, %c0_18, %c0_19], %26 {strides = array<i32>} : memref<1x2x128xf32, #tpu.memory_space<vmem>>, vector<1x2x128xf32>,
    return
  }
  func.func @transform_0(%arg0: i32) -> (i32, i32) {
    %c0_i32 = arith.constant 0 : i32
    %c0_i32_0 = arith.constant 0 : i32
    return %arg0, %c0_i32 : i32, i32
  }
  func.func @transform_1(%arg0: i32) -> (i32, i32) {
    %c0_i32 = arith.constant 0 : i32
    %c0_i32_0 = arith.constant 0 : i32
    %c0_i32_1 = arith.constant 0 : i32
    return %c0_i32, %c0_i32_0 : i32, i32
  }
  func.func @transform_2(%arg0: i32) -> (i32, i32) {
    %c0_i32 = arith.constant 0 : i32
    %c0_i32_0 = arith.constant 0 : i32
    %c0_i32_1 = arith.constant 0 : i32
    return %c0_i32, %c0_i32_0 : i32, i32
  }
  func.func @transform_3(%arg0: i32) -> (i32, i32) {
    %c0_i32 = arith.constant 0 : i32
    %c0_i32_0 = arith.constant 0 : i32
    return %arg0, %c0_i32 : i32, i32
  }
  func.func @transform_4(%arg0: i32) -> (i32, i32, i32) {
    %c0_i32 = arith.constant 0 : i32
    %c0_i32_0 = arith.constant 0 : i32
    %c0_i32_1 = arith.constant 0 : i32
    return %arg0, %c0_i32, %c0_i32_0 : i32, i32, i32
  }
  func.func @transform_5(%arg0: i32) -> (i32, i32) {
    %c0_i32 = arith.constant 0 : i32
    %c0_i32_0 = arith.constant 0 : i32
    return %arg0, %c0_i32 : i32, i32
  }
  func.func @transform_6(%arg0: i32) -> (i32, i32, i32) {
    %c0_i32 = arith.constant 0 : i32
    %c0_i32_0 = arith.constant 0 : i32
    %c0_i32_1 = arith.constant 0 : i32
    return %arg0, %c0_i32, %c0_i32_0 : i32, i32, i32
  }
}

module attributes {stable_mosaic.version = 11 : i64} {
  func.func @_conv3_kernel(%arg0: i32, %arg1: memref<256x128xbf16, #tpu.memory_space<vmem>>, %arg2: memref<256x1xf32, #tpu.memory_space<vmem>>, %arg3: memref<2x128xf32, #tpu.memory_space<vmem>>, %arg4: memref<1x128xf32, #tpu.memory_space<vmem>>, %arg5: memref<1x128xf32, #tpu.memory_space<vmem>>, %arg6: memref<128x128xbf16, #tpu.memory_space<vmem>>, %arg7: memref<256x128xf32, #tpu.memory_space<vmem>>, %arg8: memref<1x2x128xf32, #tpu.memory_space<vmem>>) attributes {dimension_semantics = [#tpu.dimension_semantics<parallel>], iteration_bounds = array<i64: 1>, scalar_prefetch = 0 : i64, scratch_operands = 0 : i64, tpu.core_type = #tpu.core_type<tc>, window_params = [{transform_indices = @transform_0, window_bounds = array<i64: 256, 128>}, {transform_indices = @transform_1, window_bounds = array<i64: 256, 1>}, {pipeline_mode = #tpu.pipeline_mode<synchronous>, transform_indices = @transform_2, window_bounds = array<i64: 2, 128>}, {pipeline_mode = #tpu.pipeline_mode<synchronous>, transform_indices = @transform_3, window_bounds = array<i64: 1, 128>}, {pipeline_mode = #tpu.pipeline_mode<synchronous>, transform_indices = @transform_4, window_bounds = array<i64: 1, 128>}, {pipeline_mode = #tpu.pipeline_mode<synchronous>, transform_indices = @transform_5, window_bounds = array<i64: 128, 128>}, {transform_indices = @transform_6, window_bounds = array<i64: 256, 128>}, {transform_indices = @transform_7, window_bounds = array<i64: 1, 2, 128>}]} {
    %c0 = arith.constant 0 : index
    %c0_0 = arith.constant 0 : index
    %0 = vector.load %arg3[%c0, %c0_0] : memref<2x128xf32, #tpu.memory_space<vmem>>, vector<2x128xf32>
    %c0_1 = arith.constant 0 : index
    %c0_2 = arith.constant 0 : index
    %1 = vector.load %arg4[%c0_1, %c0_2] : memref<1x128xf32, #tpu.memory_space<vmem>>, vector<1x128xf32>
    %c0_3 = arith.constant 0 : index
    %c0_4 = arith.constant 0 : index
    %2 = vector.load %arg5[%c0_3, %c0_4] : memref<1x128xf32, #tpu.memory_space<vmem>>, vector<1x128xf32>
    %3 = vector.extract_strided_slice %0 {offsets = [0, 0], sizes = [1, 128], strides = [1, 1]} : vector<2x128xf32> to vector<1x128xf32>
    %cst = arith.constant 7.812500e-03 : f32
    %4 = vector.broadcast %cst : f32 to vector<1x128xf32>
    %5 = arith.mulf %3, %4 : vector<1x128xf32>
    %6 = vector.extract_strided_slice %0 {offsets = [1, 0], sizes = [1, 128], strides = [1, 1]} : vector<2x128xf32> to vector<1x128xf32>
    %cst_5 = arith.constant 7.812500e-03 : f32
    %7 = vector.broadcast %cst_5 : f32 to vector<1x128xf32>
    %8 = arith.mulf %6, %7 : vector<1x128xf32>
    %9 = arith.mulf %5, %5 : vector<1x128xf32>
    %10 = arith.subf %8, %9 : vector<1x128xf32>
    %cst_6 = arith.constant 0.000000e+00 : f32
    %11 = vector.broadcast %cst_6 : f32 to vector<1x128xf32>
    %12 = arith.maximumf %10, %11 : vector<1x128xf32>
    %cst_7 = arith.constant 9.99999974E-6 : f32
    %13 = vector.broadcast %cst_7 : f32 to vector<1x128xf32>
    %14 = arith.addf %12, %13 : vector<1x128xf32>
    %15 = math.rsqrt %14 : vector<1x128xf32>
    %16 = arith.mulf %1, %15 : vector<1x128xf32>
    %17 = arith.mulf %5, %16 : vector<1x128xf32>
    %18 = arith.subf %2, %17 : vector<1x128xf32>
    %c0_8 = arith.constant 0 : index
    %c0_9 = arith.constant 0 : index
    %19 = vector.load %arg1[%c0_8, %c0_9] : memref<256x128xbf16, #tpu.memory_space<vmem>>, vector<256x128xbf16>
    %20 = arith.extf %19 : vector<256x128xbf16> to vector<256x128xf32>
    %21 = vector.broadcast %16 : vector<1x128xf32> to vector<256x128xf32>
    %22 = arith.mulf %20, %21 : vector<256x128xf32>
    %23 = vector.broadcast %18 : vector<1x128xf32> to vector<256x128xf32>
    %24 = arith.addf %22, %23 : vector<256x128xf32>
    %cst_10 = arith.constant 0.000000e+00 : f32
    %25 = vector.broadcast %cst_10 : f32 to vector<256x128xf32>
    %26 = arith.maximumf %24, %25 : vector<256x128xf32>
    %c0_11 = arith.constant 0 : index
    %c0_12 = arith.constant 0 : index
    %27 = vector.load %arg2[%c0_11, %c0_12] : memref<256x1xf32, #tpu.memory_space<vmem>>, vector<256x1xf32>
    %28 = vector.broadcast %27 : vector<256x1xf32> to vector<256x128xf32>
    %29 = arith.mulf %26, %28 : vector<256x128xf32>
    %30 = arith.truncf %29 : vector<256x128xf32> to vector<256x128xbf16>
    %c0_13 = arith.constant 0 : index
    %c0_14 = arith.constant 0 : index
    %31 = vector.load %arg6[%c0_13, %c0_14] : memref<128x128xbf16, #tpu.memory_space<vmem>>, vector<128x128xbf16>
    %cst_15 = arith.constant dense<0.000000e+00> : vector<256x128xf32>
    %32 = tpu.matmul %30, %31, %cst_15 {dimension_numbers = #tpu.dot_dimension_numbers<[1], [0], [0], [1], [0, 0, 1, 1], [], []>} : vector<256x128xbf16>, vector<128x128xbf16>, vector<256x128xf32> -> vector<256x128xf32>
    %c0_16 = arith.constant 0 : index
    %c0_17 = arith.constant 0 : index
    %33 = vector.load %arg7[%c0_16, %c0_17] : memref<256x128xf32, #tpu.memory_space<vmem>>, vector<256x128xf32>
    tpu.vector_store %arg7[%c0_16, %c0_17], %32 {strides = array<i32>} : memref<256x128xf32, #tpu.memory_space<vmem>>, vector<256x128xf32>,
    %cst_18 = arith.constant dense<0.000000e+00> : vector<128xf32>
    %34 = vector.multi_reduction <add>, %32, %cst_18 [0] : vector<256x128xf32> to vector<128xf32>
    %35 = vector.shape_cast %34 : vector<128xf32> to vector<1x128xf32>
    %36 = arith.mulf %32, %32 : vector<256x128xf32>
    %cst_19 = arith.constant dense<0.000000e+00> : vector<128xf32>
    %37 = vector.multi_reduction <add>, %36, %cst_19 [0] : vector<256x128xf32> to vector<128xf32>
    %38 = vector.shape_cast %37 : vector<128xf32> to vector<1x128xf32>
    %39 = tpu.concatenate %35, %38 in 0 : vector<1x128xf32>, vector<1x128xf32> -> vector<2x128xf32>
    %c0_20 = arith.constant 0 : index
    %c0_21 = arith.constant 0 : index
    %c0_22 = arith.constant 0 : index
    %40 = vector.load %arg8[%c0_20, %c0_21, %c0_22] : memref<1x2x128xf32, #tpu.memory_space<vmem>>, vector<1x2x128xf32>
    %41 = vector.shape_cast %40 : vector<1x2x128xf32> to vector<2x128xf32>
    %42 = vector.shape_cast %39 : vector<2x128xf32> to vector<1x2x128xf32>
    tpu.vector_store %arg8[%c0_20, %c0_21, %c0_22], %42 {strides = array<i32>} : memref<1x2x128xf32, #tpu.memory_space<vmem>>, vector<1x2x128xf32>,
    return
  }
  func.func @transform_0(%arg0: i32) -> (i32, i32) {
    %c0_i32 = arith.constant 0 : i32
    %c0_i32_0 = arith.constant 0 : i32
    return %arg0, %c0_i32 : i32, i32
  }
  func.func @transform_1(%arg0: i32) -> (i32, i32) {
    %c0_i32 = arith.constant 0 : i32
    %c0_i32_0 = arith.constant 0 : i32
    return %arg0, %c0_i32 : i32, i32
  }
  func.func @transform_2(%arg0: i32) -> (i32, i32) {
    %c0_i32 = arith.constant 0 : i32
    %c0_i32_0 = arith.constant 0 : i32
    %c0_i32_1 = arith.constant 0 : i32
    return %c0_i32, %c0_i32_0 : i32, i32
  }
  func.func @transform_3(%arg0: i32) -> (i32, i32) {
    %c0_i32 = arith.constant 0 : i32
    %c0_i32_0 = arith.constant 0 : i32
    %c0_i32_1 = arith.constant 0 : i32
    return %c0_i32, %c0_i32_0 : i32, i32
  }
  func.func @transform_4(%arg0: i32) -> (i32, i32) {
    %c0_i32 = arith.constant 0 : i32
    %c0_i32_0 = arith.constant 0 : i32
    %c0_i32_1 = arith.constant 0 : i32
    return %c0_i32, %c0_i32_0 : i32, i32
  }
  func.func @transform_5(%arg0: i32) -> (i32, i32) {
    %c0_i32 = arith.constant 0 : i32
    %c0_i32_0 = arith.constant 0 : i32
    %c0_i32_1 = arith.constant 0 : i32
    return %c0_i32, %c0_i32_0 : i32, i32
  }
  func.func @transform_6(%arg0: i32) -> (i32, i32) {
    %c0_i32 = arith.constant 0 : i32
    %c0_i32_0 = arith.constant 0 : i32
    return %arg0, %c0_i32 : i32, i32
  }
  func.func @transform_7(%arg0: i32) -> (i32, i32, i32) {
    %c0_i32 = arith.constant 0 : i32
    %c0_i32_0 = arith.constant 0 : i32
    %c0_i32_1 = arith.constant 0 : i32
    return %arg0, %c0_i32, %c0_i32_0 : i32, i32, i32
  }
}

module attributes {stable_mosaic.version = 11 : i64} {
  func.func @_adapt_kernel(%arg0: i32, %arg1: memref<1x128x128xbf16, #tpu.memory_space<vmem>>, %arg2: memref<128x1xf32, #tpu.memory_space<vmem>>, %arg3: memref<80x1xf32, #tpu.memory_space<vmem>>, %arg4: memref<2x128xf32, #tpu.memory_space<vmem>>, %arg5: memref<1x128xf32, #tpu.memory_space<vmem>>, %arg6: memref<1x128xf32, #tpu.memory_space<vmem>>, %arg7: memref<9x128x128xbf16, #tpu.memory_space<vmem>>, %arg8: memref<9x128x128xbf16, #tpu.memory_space<vmem>>, %arg9: memref<1x128xf32, #tpu.memory_space<vmem>>, %arg10: memref<128x128xf32, #tpu.memory_space<vmem>>, %arg11: memref<1x128xf32, #tpu.memory_space<vmem>>, %arg12: memref<128x10xf32, #tpu.memory_space<vmem>>, %arg13: memref<1x10xf32, #tpu.memory_space<vmem>>, %arg14: memref<10x40xf32, #tpu.memory_space<vmem>>, %arg15: memref<1x40xf32, #tpu.memory_space<vmem>>, %arg16: memref<10x1xf32, #tpu.memory_space<vmem>>, %arg17: memref<1x1xf32, #tpu.memory_space<vmem>>, %arg18: memref<1x128x128xbf16, #tpu.memory_space<vmem>>, %arg19: memref<1x2x128xf32, #tpu.memory_space<vmem>>, %arg20: memref<176x128xbf16, #tpu.memory_space<vmem>>) attributes {dimension_semantics = [#tpu.dimension_semantics<parallel>], iteration_bounds = array<i64: 2>, scalar_prefetch = 0 : i64, scratch_operands = 1 : i64, tpu.core_type = #tpu.core_type<tc>, window_params = [{transform_indices = @transform_0, window_bounds = array<i64: 1, 128, 128>}, {pipeline_mode = #tpu.pipeline_mode<synchronous>, transform_indices = @transform_1, window_bounds = array<i64: 128, 1>}, {pipeline_mode = #tpu.pipeline_mode<synchronous>, transform_indices = @transform_2, window_bounds = array<i64: 80, 1>}, {pipeline_mode = #tpu.pipeline_mode<synchronous>, transform_indices = @transform_3, window_bounds = array<i64: 2, 128>}, {pipeline_mode = #tpu.pipeline_mode<synchronous>, transform_indices = @transform_4, window_bounds = array<i64: 1, 128>}, {pipeline_mode = #tpu.pipeline_mode<synchronous>, transform_indices = @transform_5, window_bounds = array<i64: 1, 128>}, {pipeline_mode = #tpu.pipeline_mode<synchronous>, transform_indices = @transform_6, window_bounds = array<i64: 9, 128, 128>}, {pipeline_mode = #tpu.pipeline_mode<synchronous>, transform_indices = @transform_7, window_bounds = array<i64: 9, 128, 128>}, {pipeline_mode = #tpu.pipeline_mode<synchronous>, transform_indices = @transform_8, window_bounds = array<i64: 1, 128>}, {pipeline_mode = #tpu.pipeline_mode<synchronous>, transform_indices = @transform_9, window_bounds = array<i64: 128, 128>}, {pipeline_mode = #tpu.pipeline_mode<synchronous>, transform_indices = @transform_10, window_bounds = array<i64: 1, 128>}, {pipeline_mode = #tpu.pipeline_mode<synchronous>, transform_indices = @transform_11, window_bounds = array<i64: 128, 10>}, {pipeline_mode = #tpu.pipeline_mode<synchronous>, transform_indices = @transform_12, window_bounds = array<i64: 1, 10>}, {pipeline_mode = #tpu.pipeline_mode<synchronous>, transform_indices = @transform_13, window_bounds = array<i64: 10, 40>}, {pipeline_mode = #tpu.pipeline_mode<synchronous>, transform_indices = @transform_14, window_bounds = array<i64: 1, 40>}, {pipeline_mode = #tpu.pipeline_mode<synchronous>, transform_indices = @transform_15, window_bounds = array<i64: 10, 1>}, {pipeline_mode = #tpu.pipeline_mode<synchronous>, transform_indices = @transform_16, window_bounds = array<i64: 1, 1>}, {transform_indices = @transform_17, window_bounds = array<i64: 1, 128, 128>}, {transform_indices = @transform_18, window_bounds = array<i64: 1, 2, 128>}]} {
    %c0 = arith.constant 0 : index
    %c0_0 = arith.constant 0 : index
    %0 = vector.load %arg4[%c0, %c0_0] : memref<2x128xf32, #tpu.memory_space<vmem>>, vector<2x128xf32>
    %c0_1 = arith.constant 0 : index
    %c0_2 = arith.constant 0 : index
    %1 = vector.load %arg5[%c0_1, %c0_2] : memref<1x128xf32, #tpu.memory_space<vmem>>, vector<1x128xf32>
    %c0_3 = arith.constant 0 : index
    %c0_4 = arith.constant 0 : index
    %2 = vector.load %arg6[%c0_3, %c0_4] : memref<1x128xf32, #tpu.memory_space<vmem>>, vector<1x128xf32>
    %3 = vector.extract_strided_slice %0 {offsets = [0, 0], sizes = [1, 128], strides = [1, 1]} : vector<2x128xf32> to vector<1x128xf32>
    %cst = arith.constant 7.812500e-03 : f32
    %4 = vector.broadcast %cst : f32 to vector<1x128xf32>
    %5 = arith.mulf %3, %4 : vector<1x128xf32>
    %6 = vector.extract_strided_slice %0 {offsets = [1, 0], sizes = [1, 128], strides = [1, 1]} : vector<2x128xf32> to vector<1x128xf32>
    %cst_5 = arith.constant 7.812500e-03 : f32
    %7 = vector.broadcast %cst_5 : f32 to vector<1x128xf32>
    %8 = arith.mulf %6, %7 : vector<1x128xf32>
    %9 = arith.mulf %5, %5 : vector<1x128xf32>
    %10 = arith.subf %8, %9 : vector<1x128xf32>
    %cst_6 = arith.constant 0.000000e+00 : f32
    %11 = vector.broadcast %cst_6 : f32 to vector<1x128xf32>
    %12 = arith.maximumf %10, %11 : vector<1x128xf32>
    %cst_7 = arith.constant 9.99999974E-6 : f32
    %13 = vector.broadcast %cst_7 : f32 to vector<1x128xf32>
    %14 = arith.addf %12, %13 : vector<1x128xf32>
    %15 = math.rsqrt %14 : vector<1x128xf32>
    %16 = arith.mulf %1, %15 : vector<1x128xf32>
    %17 = arith.mulf %5, %16 : vector<1x128xf32>
    %18 = arith.subf %2, %17 : vector<1x128xf32>
    %c0_8 = arith.constant 0 : index
    %c0_9 = arith.constant 0 : index
    %19 = vector.load %arg2[%c0_8, %c0_9] : memref<128x1xf32, #tpu.memory_space<vmem>>, vector<128x1xf32>
    %c0_10 = arith.constant 0 : index
    %c0_11 = arith.constant 0 : index
    %c0_12 = arith.constant 0 : index
    %20 = vector.load %arg1[%c0_10, %c0_11, %c0_12] : memref<1x128x128xbf16, #tpu.memory_space<vmem>>, vector<1x128x128xbf16>
    %21 = vector.shape_cast %20 : vector<1x128x128xbf16> to vector<128x128xbf16>
    %22 = arith.extf %21 : vector<128x128xbf16> to vector<128x128xf32>
    %23 = vector.broadcast %16 : vector<1x128xf32> to vector<128x128xf32>
    %24 = arith.mulf %22, %23 : vector<128x128xf32>
    %25 = vector.broadcast %18 : vector<1x128xf32> to vector<128x128xf32>
    %26 = arith.addf %24, %25 : vector<128x128xf32>
    %cst_13 = arith.constant 0.000000e+00 : f32
    %27 = vector.broadcast %cst_13 : f32 to vector<128x128xf32>
    %28 = arith.maximumf %26, %27 : vector<128x128xf32>
    %29 = vector.broadcast %19 : vector<128x1xf32> to vector<128x128xf32>
    %30 = arith.mulf %28, %29 : vector<128x128xf32>
    %31 = arith.truncf %30 : vector<128x128xf32> to vector<128x128xbf16>
    %cst_14 = arith.constant 0.000000e+00 : bf16
    %32 = vector.broadcast %cst_14 : bf16 to vector<32x128xbf16>
    %c0_15 = arith.constant 0 : index
    %c0_16 = arith.constant 0 : index
    %33 = vector.load %arg20[%c0_15, %c0_16] : memref<176x128xbf16, #tpu.memory_space<vmem>>, vector<32x128xbf16>
    tpu.vector_store %arg20[%c0_15, %c0_16], %32 {strides = array<i32>} : memref<176x128xbf16, #tpu.memory_space<vmem>>, vector<32x128xbf16>,
    %c144 = arith.constant 144 : index
    %c0_17 = arith.constant 0 : index
    %34 = vector.load %arg20[%c144, %c0_17] : memref<176x128xbf16, #tpu.memory_space<vmem>>, vector<32x128xbf16>
    tpu.vector_store %arg20[%c144, %c0_17], %32 {strides = array<i32>} : memref<176x128xbf16, #tpu.memory_space<vmem>>, vector<32x128xbf16>,
    %c17 = arith.constant 17 : index
    %c0_18 = arith.constant 0 : index
    %35 = vector.load %arg20[%c17, %c0_18] : memref<176x128xbf16, #tpu.memory_space<vmem>>, vector<128x128xbf16>
    tpu.vector_store %arg20[%c17, %c0_18], %31 {strides = array<i32>} : memref<176x128xbf16, #tpu.memory_space<vmem>>, vector<128x128xbf16>,
    %cst_19 = arith.constant dense<0.000000e+00> : vector<128xf32>
    %36 = vector.multi_reduction <add>, %30, %cst_19 [0] : vector<128x128xf32> to vector<128xf32>
    %37 = vector.shape_cast %36 : vector<128xf32> to vector<1x128xf32>
    %cst_20 = arith.constant 1.562500e-02 : f32
    %38 = vector.broadcast %cst_20 : f32 to vector<1x128xf32>
    %39 = arith.mulf %37, %38 : vector<1x128xf32>
    %c0_21 = arith.constant 0 : index
    %c0_22 = arith.constant 0 : index
    %40 = vector.load %arg12[%c0_21, %c0_22] : memref<128x10xf32, #tpu.memory_space<vmem>>, vector<128x10xf32>
    %cst_23 = arith.constant dense<0.000000e+00> : vector<1x10xf32>
    %41 = tpu.matmul %39, %40, %cst_23 {dimension_numbers = #tpu.dot_dimension_numbers<[1], [0], [0], [1], [0, 0, 1, 1], [], []>} : vector<1x128xf32>, vector<128x10xf32>, vector<1x10xf32> -> vector<1x10xf32>
    %c0_24 = arith.constant 0 : index
    %c0_25 = arith.constant 0 : index
    %42 = vector.load %arg13[%c0_24, %c0_25] : memref<1x10xf32, #tpu.memory_space<vmem>>, vector<1x10xf32>
    %43 = arith.addf %41, %42 : vector<1x10xf32>
    %cst_26 = arith.constant 0.000000e+00 : f32
    %44 = vector.broadcast %cst_26 : f32 to vector<1x10xf32>
    %45 = arith.maximumf %43, %44 : vector<1x10xf32>
    %c0_27 = arith.constant 0 : index
    %c0_28 = arith.constant 0 : index
    %46 = vector.load %arg14[%c0_27, %c0_28] : memref<10x40xf32, #tpu.memory_space<vmem>>, vector<10x40xf32>
    %cst_29 = arith.constant dense<0.000000e+00> : vector<1x40xf32>
    %47 = tpu.matmul %45, %46, %cst_29 {dimension_numbers = #tpu.dot_dimension_numbers<[1], [0], [0], [1], [0, 0, 1, 1], [], []>} : vector<1x10xf32>, vector<10x40xf32>, vector<1x40xf32> -> vector<1x40xf32>
    %c0_30 = arith.constant 0 : index
    %c0_31 = arith.constant 0 : index
    %48 = vector.load %arg15[%c0_30, %c0_31] : memref<1x40xf32, #tpu.memory_space<vmem>>, vector<1x40xf32>
    %49 = arith.addf %47, %48 : vector<1x40xf32>
    %50 = vector.extract_strided_slice %49 {offsets = [0, 0], sizes = [1, 10], strides = [1, 1]} : vector<1x40xf32> to vector<1x10xf32>
    %51 = arith.negf %50 : vector<1x10xf32>
    %52 = math.exp %51 : vector<1x10xf32>
    %cst_32 = arith.constant 1.000000e+00 : f32
    %53 = vector.broadcast %cst_32 : f32 to vector<1x10xf32>
    %54 = arith.addf %53, %52 : vector<1x10xf32>
    %55 = arith.divf %53, %54 : vector<1x10xf32>
    %56 = vector.extract_strided_slice %49 {offsets = [0, 20], sizes = [1, 10], strides = [1, 1]} : vector<1x40xf32> to vector<1x10xf32>
    %57 = math.tanh %56 : vector<1x10xf32>
    %58 = vector.extract_strided_slice %49 {offsets = [0, 30], sizes = [1, 10], strides = [1, 1]} : vector<1x40xf32> to vector<1x10xf32>
    %59 = arith.negf %58 : vector<1x10xf32>
    %60 = math.exp %59 : vector<1x10xf32>
    %cst_33 = arith.constant 1.000000e+00 : f32
    %61 = vector.broadcast %cst_33 : f32 to vector<1x10xf32>
    %62 = arith.addf %61, %60 : vector<1x10xf32>
    %63 = arith.divf %61, %62 : vector<1x10xf32>
    %64 = arith.mulf %55, %57 : vector<1x10xf32>
    %65 = math.tanh %64 : vector<1x10xf32>
    %66 = arith.mulf %63, %65 : vector<1x10xf32>
    %c0_34 = arith.constant 0 : index
    %c0_35 = arith.constant 0 : index
    %67 = vector.load %arg16[%c0_34, %c0_35] : memref<10x1xf32, #tpu.memory_space<vmem>>, vector<10x1xf32>
    %cst_36 = arith.constant dense<0.000000e+00> : vector<1x1xf32>
    %68 = tpu.matmul %66, %67, %cst_36 {dimension_numbers = #tpu.dot_dimension_numbers<[1], [0], [0], [1], [0, 0, 1, 1], [], []>} : vector<1x10xf32>, vector<10x1xf32>, vector<1x1xf32> -> vector<1x1xf32>
    %c0_37 = arith.constant 0 : index
    %c0_38 = arith.constant 0 : index
    %69 = vector.load %arg17[%c0_37, %c0_38] : memref<1x1xf32, #tpu.memory_space<vmem>>, vector<1x1xf32>
    %70 = arith.addf %68, %69 : vector<1x1xf32>
    %cst_39 = arith.constant 0.000000e+00 : f32
    %71 = vector.broadcast %cst_39 : f32 to vector<1x1xf32>
    %72 = arith.maximumf %70, %71 : vector<1x1xf32>
    %73 = arith.negf %72 : vector<1x1xf32>
    %74 = math.exp %73 : vector<1x1xf32>
    %cst_40 = arith.constant 1.000000e+00 : f32
    %75 = vector.broadcast %cst_40 : f32 to vector<1x1xf32>
    %76 = arith.addf %75, %74 : vector<1x1xf32>
    %77 = arith.divf %75, %76 : vector<1x1xf32>
    %78 = math.roundeven %77 : vector<1x1xf32>
    %cst_41 = arith.constant 0.000000e+00 : f32
    %79 = vector.broadcast %cst_41 : f32 to vector<80x128xf32>
    %c17_42 = arith.constant 17 : index
    %c0_43 = arith.constant 0 : index
    %80 = vector.load %arg20[%c17_42, %c0_43] : memref<176x128xbf16, #tpu.memory_space<vmem>>, vector<80x128xbf16>
    %c0_44 = arith.constant 0 : index
    %c0_45 = arith.constant 0 : index
    %c0_46 = arith.constant 0 : index
    %81 = vector.load %arg8[%c0_44, %c0_45, %c0_46] : memref<9x128x128xbf16, #tpu.memory_space<vmem>>, vector<1x128x128xbf16>
    %82 = vector.shape_cast %81 : vector<1x128x128xbf16> to vector<128x128xbf16>
    %cst_47 = arith.constant dense<0.000000e+00> : vector<80x128xf32>
    %83 = tpu.matmul %80, %82, %cst_47 {dimension_numbers = #tpu.dot_dimension_numbers<[1], [0], [0], [1], [0, 0, 1, 1], [], []>} : vector<80x128xbf16>, vector<128x128xbf16>, vector<80x128xf32> -> vector<80x128xf32>
    %84 = arith.addf %79, %83 : vector<80x128xf32>
    %c18 = arith.constant 18 : index
    %c0_48 = arith.constant 0 : index
    %85 = vector.load %arg20[%c18, %c0_48] : memref<176x128xbf16, #tpu.memory_space<vmem>>, vector<80x128xbf16>
    %c1 = arith.constant 1 : index
    %c0_49 = arith.constant 0 : index
    %c0_50 = arith.constant 0 : index
    %86 = vector.load %arg8[%c1, %c0_49, %c0_50] : memref<9x128x128xbf16, #tpu.memory_space<vmem>>, vector<1x128x128xbf16>
    %87 = vector.shape_cast %86 : vector<1x128x128xbf16> to vector<128x128xbf16>
    %cst_51 = arith.constant dense<0.000000e+00> : vector<80x128xf32>
    %88 = tpu.matmul %85, %87, %cst_51 {dimension_numbers = #tpu.dot_dimension_numbers<[1], [0], [0], [1], [0, 0, 1, 1], [], []>} : vector<80x128xbf16>, vector<128x128xbf16>, vector<80x128xf32> -> vector<80x128xf32>
    %89 = arith.addf %84, %88 : vector<80x128xf32>
    %c19 = arith.constant 19 : index
    %c0_52 = arith.constant 0 : index
    %90 = vector.load %arg20[%c19, %c0_52] : memref<176x128xbf16, #tpu.memory_space<vmem>>, vector<80x128xbf16>
    %c2 = arith.constant 2 : index
    %c0_53 = arith.constant 0 : index
    %c0_54 = arith.constant 0 : index
    %91 = vector.load %arg8[%c2, %c0_53, %c0_54] : memref<9x128x128xbf16, #tpu.memory_space<vmem>>, vector<1x128x128xbf16>
    %92 = vector.shape_cast %91 : vector<1x128x128xbf16> to vector<128x128xbf16>
    %cst_55 = arith.constant dense<0.000000e+00> : vector<80x128xf32>
    %93 = tpu.matmul %90, %92, %cst_55 {dimension_numbers = #tpu.dot_dimension_numbers<[1], [0], [0], [1], [0, 0, 1, 1], [], []>} : vector<80x128xbf16>, vector<128x128xbf16>, vector<80x128xf32> -> vector<80x128xf32>
    %94 = arith.addf %89, %93 : vector<80x128xf32>
    %c33 = arith.constant 33 : index
    %c0_56 = arith.constant 0 : index
    %95 = vector.load %arg20[%c33, %c0_56] : memref<176x128xbf16, #tpu.memory_space<vmem>>, vector<80x128xbf16>
    %c3 = arith.constant 3 : index
    %c0_57 = arith.constant 0 : index
    %c0_58 = arith.constant 0 : index
    %96 = vector.load %arg8[%c3, %c0_57, %c0_58] : memref<9x128x128xbf16, #tpu.memory_space<vmem>>, vector<1x128x128xbf16>
    %97 = vector.shape_cast %96 : vector<1x128x128xbf16> to vector<128x128xbf16>
    %cst_59 = arith.constant dense<0.000000e+00> : vector<80x128xf32>
    %98 = tpu.matmul %95, %97, %cst_59 {dimension_numbers = #tpu.dot_dimension_numbers<[1], [0], [0], [1], [0, 0, 1, 1], [], []>} : vector<80x128xbf16>, vector<128x128xbf16>, vector<80x128xf32> -> vector<80x128xf32>
    %99 = arith.addf %94, %98 : vector<80x128xf32>
    %c34 = arith.constant 34 : index
    %c0_60 = arith.constant 0 : index
    %100 = vector.load %arg20[%c34, %c0_60] : memref<176x128xbf16, #tpu.memory_space<vmem>>, vector<80x128xbf16>
    %c4 = arith.constant 4 : index
    %c0_61 = arith.constant 0 : index
    %c0_62 = arith.constant 0 : index
    %101 = vector.load %arg8[%c4, %c0_61, %c0_62] : memref<9x128x128xbf16, #tpu.memory_space<vmem>>, vector<1x128x128xbf16>
    %102 = vector.shape_cast %101 : vector<1x128x128xbf16> to vector<128x128xbf16>
    %cst_63 = arith.constant dense<0.000000e+00> : vector<80x128xf32>
    %103 = tpu.matmul %100, %102, %cst_63 {dimension_numbers = #tpu.dot_dimension_numbers<[1], [0], [0], [1], [0, 0, 1, 1], [], []>} : vector<80x128xbf16>, vector<128x128xbf16>, vector<80x128xf32> -> vector<80x128xf32>
    %104 = arith.addf %99, %103 : vector<80x128xf32>
    %c35 = arith.constant 35 : index
    %c0_64 = arith.constant 0 : index
    %105 = vector.load %arg20[%c35, %c0_64] : memref<176x128xbf16, #tpu.memory_space<vmem>>, vector<80x128xbf16>
    %c5 = arith.constant 5 : index
    %c0_65 = arith.constant 0 : index
    %c0_66 = arith.constant 0 : index
    %106 = vector.load %arg8[%c5, %c0_65, %c0_66] : memref<9x128x128xbf16, #tpu.memory_space<vmem>>, vector<1x128x128xbf16>
    %107 = vector.shape_cast %106 : vector<1x128x128xbf16> to vector<128x128xbf16>
    %cst_67 = arith.constant dense<0.000000e+00> : vector<80x128xf32>
    %108 = tpu.matmul %105, %107, %cst_67 {dimension_numbers = #tpu.dot_dimension_numbers<[1], [0], [0], [1], [0, 0, 1, 1], [], []>} : vector<80x128xbf16>, vector<128x128xbf16>, vector<80x128xf32> -> vector<80x128xf32>
    %109 = arith.addf %104, %108 : vector<80x128xf32>
    %c49 = arith.constant 49 : index
    %c0_68 = arith.constant 0 : index
    %110 = vector.load %arg20[%c49, %c0_68] : memref<176x128xbf16, #tpu.memory_space<vmem>>, vector<80x128xbf16>
    %c6 = arith.constant 6 : index
    %c0_69 = arith.constant 0 : index
    %c0_70 = arith.constant 0 : index
    %111 = vector.load %arg8[%c6, %c0_69, %c0_70] : memref<9x128x128xbf16, #tpu.memory_space<vmem>>, vector<1x128x128xbf16>
    %112 = vector.shape_cast %111 : vector<1x128x128xbf16> to vector<128x128xbf16>
    %cst_71 = arith.constant dense<0.000000e+00> : vector<80x128xf32>
    %113 = tpu.matmul %110, %112, %cst_71 {dimension_numbers = #tpu.dot_dimension_numbers<[1], [0], [0], [1], [0, 0, 1, 1], [], []>} : vector<80x128xbf16>, vector<128x128xbf16>, vector<80x128xf32> -> vector<80x128xf32>
    %114 = arith.addf %109, %113 : vector<80x128xf32>
    %c50 = arith.constant 50 : index
    %c0_72 = arith.constant 0 : index
    %115 = vector.load %arg20[%c50, %c0_72] : memref<176x128xbf16, #tpu.memory_space<vmem>>, vector<80x128xbf16>
    %c7 = arith.constant 7 : index
    %c0_73 = arith.constant 0 : index
    %c0_74 = arith.constant 0 : index
    %116 = vector.load %arg8[%c7, %c0_73, %c0_74] : memref<9x128x128xbf16, #tpu.memory_space<vmem>>, vector<1x128x128xbf16>
    %117 = vector.shape_cast %116 : vector<1x128x128xbf16> to vector<128x128xbf16>
    %cst_75 = arith.constant dense<0.000000e+00> : vector<80x128xf32>
    %118 = tpu.matmul %115, %117, %cst_75 {dimension_numbers = #tpu.dot_dimension_numbers<[1], [0], [0], [1], [0, 0, 1, 1], [], []>} : vector<80x128xbf16>, vector<128x128xbf16>, vector<80x128xf32> -> vector<80x128xf32>
    %119 = arith.addf %114, %118 : vector<80x128xf32>
    %c51 = arith.constant 51 : index
    %c0_76 = arith.constant 0 : index
    %120 = vector.load %arg20[%c51, %c0_76] : memref<176x128xbf16, #tpu.memory_space<vmem>>, vector<80x128xbf16>
    %c8 = arith.constant 8 : index
    %c0_77 = arith.constant 0 : index
    %c0_78 = arith.constant 0 : index
    %121 = vector.load %arg8[%c8, %c0_77, %c0_78] : memref<9x128x128xbf16, #tpu.memory_space<vmem>>, vector<1x128x128xbf16>
    %122 = vector.shape_cast %121 : vector<1x128x128xbf16> to vector<128x128xbf16>
    %cst_79 = arith.constant dense<0.000000e+00> : vector<80x128xf32>
    %123 = tpu.matmul %120, %122, %cst_79 {dimension_numbers = #tpu.dot_dimension_numbers<[1], [0], [0], [1], [0, 0, 1, 1], [], []>} : vector<80x128xbf16>, vector<128x128xbf16>, vector<80x128xf32> -> vector<80x128xf32>
    %124 = arith.addf %119, %123 : vector<80x128xf32>
    %c0_80 = arith.constant 0 : index
    %c0_81 = arith.constant 0 : index
    %125 = vector.load %arg9[%c0_80, %c0_81] : memref<1x128xf32, #tpu.memory_space<vmem>>, vector<1x128xf32>
    %126 = vector.broadcast %125 : vector<1x128xf32> to vector<80x128xf32>
    %127 = arith.addf %124, %126 : vector<80x128xf32>
    %cst_82 = arith.constant 0.000000e+00 : f32
    %128 = vector.broadcast %cst_82 : f32 to vector<80x128xf32>
    %129 = arith.maximumf %127, %128 : vector<80x128xf32>
    %c0_83 = arith.constant 0 : index
    %c0_84 = arith.constant 0 : index
    %130 = vector.load %arg3[%c0_83, %c0_84] : memref<80x1xf32, #tpu.memory_space<vmem>>, vector<80x1xf32>
    %131 = vector.broadcast %130 : vector<80x1xf32> to vector<80x128xf32>
    %132 = arith.mulf %129, %131 : vector<80x128xf32>
    %cst_85 = arith.constant dense<0.000000e+00> : vector<128xf32>
    %133 = vector.multi_reduction <add>, %132, %cst_85 [0] : vector<80x128xf32> to vector<128xf32>
    %134 = vector.shape_cast %133 : vector<128xf32> to vector<1x128xf32>
    %cst_86 = arith.constant 0.111111112 : f32
    %135 = vector.broadcast %cst_86 : f32 to vector<1x128xf32>
    %136 = arith.mulf %134, %135 : vector<1x128xf32>
    %c0_87 = arith.constant 0 : index
    %c0_88 = arith.constant 0 : index
    %137 = vector.load %arg10[%c0_87, %c0_88] : memref<128x128xf32, #tpu.memory_space<vmem>>, vector<128x128xf32>
    %cst_89 = arith.constant dense<0.000000e+00> : vector<1x128xf32>
    %138 = tpu.matmul %136, %137, %cst_89 {dimension_numbers = #tpu.dot_dimension_numbers<[1], [0], [0], [1], [0, 0, 1, 1], [], []>} : vector<1x128xf32>, vector<128x128xf32>, vector<1x128xf32> -> vector<1x128xf32>
    %c0_90 = arith.constant 0 : index
    %c0_91 = arith.constant 0 : index
    %139 = vector.load %arg11[%c0_90, %c0_91] : memref<1x128xf32, #tpu.memory_space<vmem>>, vector<1x128xf32>
    %140 = arith.addf %138, %139 : vector<1x128xf32>
    %cst_92 = arith.constant 0.000000e+00 : f32
    %141 = vector.broadcast %cst_92 : f32 to vector<1x128xf32>
    %142 = arith.maximumf %140, %141 : vector<1x128xf32>
    %143 = arith.negf %142 : vector<1x128xf32>
    %144 = math.exp %143 : vector<1x128xf32>
    %cst_93 = arith.constant 1.000000e+00 : f32
    %145 = vector.broadcast %cst_93 : f32 to vector<1x128xf32>
    %146 = arith.addf %145, %144 : vector<1x128xf32>
    %147 = arith.divf %145, %146 : vector<1x128xf32>
    %148 = math.roundeven %147 : vector<1x128xf32>
    %cst_94 = arith.constant 0.000000e+00 : f32
    %149 = vector.broadcast %cst_94 : f32 to vector<1x1xf32>
    %150 = arith.cmpf one, %78, %149 : vector<1x1xf32>
    %cst_95 = arith.constant dense<0.000000e+00> : vector<1xf32>
    %151 = vector.multi_reduction <add>, %148, %cst_95 [1] : vector<1x128xf32> to vector<1xf32>
    %152 = vector.shape_cast %151 : vector<1xf32> to vector<1x1xf32>
    %cst_96 = arith.constant 0.000000e+00 : f32
    %153 = vector.broadcast %cst_96 : f32 to vector<1x1xf32>
    %154 = arith.cmpf one, %152, %153 : vector<1x1xf32>
    %155 = arith.andi %150, %154 : vector<1x1xi1>
    %cst_97 = arith.constant 0.000000e+00 : f32
    %156 = vector.shape_cast %155 : vector<1x1xi1> to vector<1x1xi1>
    %157 = vector.broadcast %156 : vector<1x1xi1> to vector<1x128xi1>
    %158 = vector.broadcast %cst_97 : f32 to vector<1x128xf32>
    %159 = arith.select %157, %148, %158 : vector<1x128xi1>, vector<1x128xf32>
    %cst_98 = arith.constant 0.000000e+00 : f32
    %160 = vector.broadcast %cst_98 : f32 to vector<128x128xf32>
    %c0_99 = arith.constant 0 : index
    %c0_100 = arith.constant 0 : index
    %161 = vector.load %arg20[%c0_99, %c0_100] : memref<176x128xbf16, #tpu.memory_space<vmem>>, vector<128x128xbf16>
    %c0_101 = arith.constant 0 : index
    %c0_102 = arith.constant 0 : index
    %c0_103 = arith.constant 0 : index
    %162 = vector.load %arg7[%c0_101, %c0_102, %c0_103] : memref<9x128x128xbf16, #tpu.memory_space<vmem>>, vector<1x128x128xbf16>
    %163 = vector.shape_cast %162 : vector<1x128x128xbf16> to vector<128x128xbf16>
    %cst_104 = arith.constant dense<0.000000e+00> : vector<128x128xf32>
    %164 = tpu.matmul %161, %163, %cst_104 {dimension_numbers = #tpu.dot_dimension_numbers<[1], [0], [0], [1], [0, 0, 1, 1], [], []>} : vector<128x128xbf16>, vector<128x128xbf16>, vector<128x128xf32> -> vector<128x128xf32>
    %165 = arith.addf %160, %164 : vector<128x128xf32>
    %c1_105 = arith.constant 1 : index
    %c0_106 = arith.constant 0 : index
    %166 = vector.load %arg20[%c1_105, %c0_106] : memref<176x128xbf16, #tpu.memory_space<vmem>>, vector<128x128xbf16>
    %c1_107 = arith.constant 1 : index
    %c0_108 = arith.constant 0 : index
    %c0_109 = arith.constant 0 : index
    %167 = vector.load %arg7[%c1_107, %c0_108, %c0_109] : memref<9x128x128xbf16, #tpu.memory_space<vmem>>, vector<1x128x128xbf16>
    %168 = vector.shape_cast %167 : vector<1x128x128xbf16> to vector<128x128xbf16>
    %cst_110 = arith.constant dense<0.000000e+00> : vector<128x128xf32>
    %169 = tpu.matmul %166, %168, %cst_110 {dimension_numbers = #tpu.dot_dimension_numbers<[1], [0], [0], [1], [0, 0, 1, 1], [], []>} : vector<128x128xbf16>, vector<128x128xbf16>, vector<128x128xf32> -> vector<128x128xf32>
    %170 = arith.addf %165, %169 : vector<128x128xf32>
    %c2_111 = arith.constant 2 : index
    %c0_112 = arith.constant 0 : index
    %171 = vector.load %arg20[%c2_111, %c0_112] : memref<176x128xbf16, #tpu.memory_space<vmem>>, vector<128x128xbf16>
    %c2_113 = arith.constant 2 : index
    %c0_114 = arith.constant 0 : index
    %c0_115 = arith.constant 0 : index
    %172 = vector.load %arg7[%c2_113, %c0_114, %c0_115] : memref<9x128x128xbf16, #tpu.memory_space<vmem>>, vector<1x128x128xbf16>
    %173 = vector.shape_cast %172 : vector<1x128x128xbf16> to vector<128x128xbf16>
    %cst_116 = arith.constant dense<0.000000e+00> : vector<128x128xf32>
    %174 = tpu.matmul %171, %173, %cst_116 {dimension_numbers = #tpu.dot_dimension_numbers<[1], [0], [0], [1], [0, 0, 1, 1], [], []>} : vector<128x128xbf16>, vector<128x128xbf16>, vector<128x128xf32> -> vector<128x128xf32>
    %175 = arith.addf %170, %174 : vector<128x128xf32>
    %c16 = arith.constant 16 : index
    %c0_117 = arith.constant 0 : index
    %176 = vector.load %arg20[%c16, %c0_117] : memref<176x128xbf16, #tpu.memory_space<vmem>>, vector<128x128xbf16>
    %c3_118 = arith.constant 3 : index
    %c0_119 = arith.constant 0 : index
    %c0_120 = arith.constant 0 : index
    %177 = vector.load %arg7[%c3_118, %c0_119, %c0_120] : memref<9x128x128xbf16, #tpu.memory_space<vmem>>, vector<1x128x128xbf16>
    %178 = vector.shape_cast %177 : vector<1x128x128xbf16> to vector<128x128xbf16>
    %cst_121 = arith.constant dense<0.000000e+00> : vector<128x128xf32>
    %179 = tpu.matmul %176, %178, %cst_121 {dimension_numbers = #tpu.dot_dimension_numbers<[1], [0], [0], [1], [0, 0, 1, 1], [], []>} : vector<128x128xbf16>, vector<128x128xbf16>, vector<128x128xf32> -> vector<128x128xf32>
    %180 = arith.addf %175, %179 : vector<128x128xf32>
    %c4_122 = arith.constant 4 : index
    %c0_123 = arith.constant 0 : index
    %c0_124 = arith.constant 0 : index
    %181 = vector.load %arg7[%c4_122, %c0_123, %c0_124] : memref<9x128x128xbf16, #tpu.memory_space<vmem>>, vector<1x128x128xbf16>
    %182 = vector.shape_cast %181 : vector<1x128x128xbf16> to vector<128x128xbf16>
    %cst_125 = arith.constant dense<0.000000e+00> : vector<128x128xf32>
    %183 = tpu.matmul %31, %182, %cst_125 {dimension_numbers = #tpu.dot_dimension_numbers<[1], [0], [0], [1], [0, 0, 1, 1], [], []>} : vector<128x128xbf16>, vector<128x128xbf16>, vector<128x128xf32> -> vector<128x128xf32>
    %184 = arith.addf %180, %183 : vector<128x128xf32>
    %c18_126 = arith.constant 18 : index
    %c0_127 = arith.constant 0 : index
    %185 = vector.load %arg20[%c18_126, %c0_127] : memref<176x128xbf16, #tpu.memory_space<vmem>>, vector<128x128xbf16>
    %c5_128 = arith.constant 5 : index
    %c0_129 = arith.constant 0 : index
    %c0_130 = arith.constant 0 : index
    %186 = vector.load %arg7[%c5_128, %c0_129, %c0_130] : memref<9x128x128xbf16, #tpu.memory_space<vmem>>, vector<1x128x128xbf16>
    %187 = vector.shape_cast %186 : vector<1x128x128xbf16> to vector<128x128xbf16>
    %cst_131 = arith.constant dense<0.000000e+00> : vector<128x128xf32>
    %188 = tpu.matmul %185, %187, %cst_131 {dimension_numbers = #tpu.dot_dimension_numbers<[1], [0], [0], [1], [0, 0, 1, 1], [], []>} : vector<128x128xbf16>, vector<128x128xbf16>, vector<128x128xf32> -> vector<128x128xf32>
    %189 = arith.addf %184, %188 : vector<128x128xf32>
    %c32 = arith.constant 32 : index
    %c0_132 = arith.constant 0 : index
    %190 = vector.load %arg20[%c32, %c0_132] : memref<176x128xbf16, #tpu.memory_space<vmem>>, vector<128x128xbf16>
    %c6_133 = arith.constant 6 : index
    %c0_134 = arith.constant 0 : index
    %c0_135 = arith.constant 0 : index
    %191 = vector.load %arg7[%c6_133, %c0_134, %c0_135] : memref<9x128x128xbf16, #tpu.memory_space<vmem>>, vector<1x128x128xbf16>
    %192 = vector.shape_cast %191 : vector<1x128x128xbf16> to vector<128x128xbf16>
    %cst_136 = arith.constant dense<0.000000e+00> : vector<128x128xf32>
    %193 = tpu.matmul %190, %192, %cst_136 {dimension_numbers = #tpu.dot_dimension_numbers<[1], [0], [0], [1], [0, 0, 1, 1], [], []>} : vector<128x128xbf16>, vector<128x128xbf16>, vector<128x128xf32> -> vector<128x128xf32>
    %194 = arith.addf %189, %193 : vector<128x128xf32>
    %c33_137 = arith.constant 33 : index
    %c0_138 = arith.constant 0 : index
    %195 = vector.load %arg20[%c33_137, %c0_138] : memref<176x128xbf16, #tpu.memory_space<vmem>>, vector<128x128xbf16>
    %c7_139 = arith.constant 7 : index
    %c0_140 = arith.constant 0 : index
    %c0_141 = arith.constant 0 : index
    %196 = vector.load %arg7[%c7_139, %c0_140, %c0_141] : memref<9x128x128xbf16, #tpu.memory_space<vmem>>, vector<1x128x128xbf16>
    %197 = vector.shape_cast %196 : vector<1x128x128xbf16> to vector<128x128xbf16>
    %cst_142 = arith.constant dense<0.000000e+00> : vector<128x128xf32>
    %198 = tpu.matmul %195, %197, %cst_142 {dimension_numbers = #tpu.dot_dimension_numbers<[1], [0], [0], [1], [0, 0, 1, 1], [], []>} : vector<128x128xbf16>, vector<128x128xbf16>, vector<128x128xf32> -> vector<128x128xf32>
    %199 = arith.addf %194, %198 : vector<128x128xf32>
    %c34_143 = arith.constant 34 : index
    %c0_144 = arith.constant 0 : index
    %200 = vector.load %arg20[%c34_143, %c0_144] : memref<176x128xbf16, #tpu.memory_space<vmem>>, vector<128x128xbf16>
    %c8_145 = arith.constant 8 : index
    %c0_146 = arith.constant 0 : index
    %c0_147 = arith.constant 0 : index
    %201 = vector.load %arg7[%c8_145, %c0_146, %c0_147] : memref<9x128x128xbf16, #tpu.memory_space<vmem>>, vector<1x128x128xbf16>
    %202 = vector.shape_cast %201 : vector<1x128x128xbf16> to vector<128x128xbf16>
    %cst_148 = arith.constant dense<0.000000e+00> : vector<128x128xf32>
    %203 = tpu.matmul %200, %202, %cst_148 {dimension_numbers = #tpu.dot_dimension_numbers<[1], [0], [0], [1], [0, 0, 1, 1], [], []>} : vector<128x128xbf16>, vector<128x128xbf16>, vector<128x128xf32> -> vector<128x128xf32>
    %204 = arith.addf %199, %203 : vector<128x128xf32>
    %205 = vector.broadcast %159 : vector<1x128xf32> to vector<128x128xf32>
    %206 = arith.mulf %205, %204 : vector<128x128xf32>
    %cst_149 = arith.constant 1.000000e+00 : f32
    %207 = vector.broadcast %cst_149 : f32 to vector<1x128xf32>
    %208 = arith.subf %207, %159 : vector<1x128xf32>
    %209 = vector.broadcast %208 : vector<1x128xf32> to vector<128x128xf32>
    %210 = arith.mulf %209, %30 : vector<128x128xf32>
    %211 = arith.addf %206, %210 : vector<128x128xf32>
    %212 = vector.broadcast %19 : vector<128x1xf32> to vector<128x128xf32>
    %213 = arith.mulf %211, %212 : vector<128x128xf32>
    %214 = arith.truncf %213 : vector<128x128xf32> to vector<128x128xbf16>
    %c0_150 = arith.constant 0 : index
    %c0_151 = arith.constant 0 : index
    %c0_152 = arith.constant 0 : index
    %215 = vector.load %arg18[%c0_150, %c0_151, %c0_152] : memref<1x128x128xbf16, #tpu.memory_space<vmem>>, vector<1x128x128xbf16>
    %216 = vector.shape_cast %215 : vector<1x128x128xbf16> to vector<128x128xbf16>
    %217 = vector.shape_cast %214 : vector<128x128xbf16> to vector<1x128x128xbf16>
    tpu.vector_store %arg18[%c0_150, %c0_151, %c0_152], %217 {strides = array<i32>} : memref<1x128x128xbf16, #tpu.memory_space<vmem>>, vector<1x128x128xbf16>,
    %cst_153 = arith.constant dense<0.000000e+00> : vector<128xf32>
    %218 = vector.multi_reduction <add>, %213, %cst_153 [0] : vector<128x128xf32> to vector<128xf32>
    %219 = vector.shape_cast %218 : vector<128xf32> to vector<1x128xf32>
    %220 = arith.mulf %213, %213 : vector<128x128xf32>
    %cst_154 = arith.constant dense<0.000000e+00> : vector<128xf32>
    %221 = vector.multi_reduction <add>, %220, %cst_154 [0] : vector<128x128xf32> to vector<128xf32>
    %222 = vector.shape_cast %221 : vector<128xf32> to vector<1x128xf32>
    %223 = tpu.concatenate %219, %222 in 0 : vector<1x128xf32>, vector<1x128xf32> -> vector<2x128xf32>
    %c0_155 = arith.constant 0 : index
    %c0_156 = arith.constant 0 : index
    %c0_157 = arith.constant 0 : index
    %224 = vector.load %arg19[%c0_155, %c0_156, %c0_157] : memref<1x2x128xf32, #tpu.memory_space<vmem>>, vector<1x2x128xf32>
    %225 = vector.shape_cast %224 : vector<1x2x128xf32> to vector<2x128xf32>
    %226 = vector.shape_cast %223 : vector<2x128xf32> to vector<1x2x128xf32>
    tpu.vector_store %arg19[%c0_155, %c0_156, %c0_157], %226 {strides = array<i32>} : memref<1x2x128xf32, #tpu.memory_space<vmem>>, vector<1x2x128xf32>,
    return
  }
  func.func @transform_0(%arg0: i32) -> (i32, i32, i32) {
    %c0_i32 = arith.constant 0 : i32
    %c0_i32_0 = arith.constant 0 : i32
    %c0_i32_1 = arith.constant 0 : i32
    return %arg0, %c0_i32, %c0_i32_0 : i32, i32, i32
  }
  func.func @transform_1(%arg0: i32) -> (i32, i32) {
    %c0_i32 = arith.constant 0 : i32
    %c0_i32_0 = arith.constant 0 : i32
    %c0_i32_1 = arith.constant 0 : i32
    return %c0_i32, %c0_i32_0 : i32, i32
  }
  func.func @transform_2(%arg0: i32) -> (i32, i32) {
    %c0_i32 = arith.constant 0 : i32
    %c0_i32_0 = arith.constant 0 : i32
    %c0_i32_1 = arith.constant 0 : i32
    return %c0_i32, %c0_i32_0 : i32, i32
  }
  func.func @transform_3(%arg0: i32) -> (i32, i32) {
    %c0_i32 = arith.constant 0 : i32
    %c0_i32_0 = arith.constant 0 : i32
    %c0_i32_1 = arith.constant 0 : i32
    return %c0_i32, %c0_i32_0 : i32, i32
  }
  func.func @transform_4(%arg0: i32) -> (i32, i32) {
    %c0_i32 = arith.constant 0 : i32
    %c0_i32_0 = arith.constant 0 : i32
    %c0_i32_1 = arith.constant 0 : i32
    return %c0_i32, %c0_i32_0 : i32, i32
  }
  func.func @transform_5(%arg0: i32) -> (i32, i32) {
    %c0_i32 = arith.constant 0 : i32
    %c0_i32_0 = arith.constant 0 : i32
    %c0_i32_1 = arith.constant 0 : i32
    return %c0_i32, %c0_i32_0 : i32, i32
  }
  func.func @transform_6(%arg0: i32) -> (i32, i32, i32) {
    %c0_i32 = arith.constant 0 : i32
    %c0_i32_0 = arith.constant 0 : i32
    %c0_i32_1 = arith.constant 0 : i32
    %c0_i32_2 = arith.constant 0 : i32
    return %c0_i32, %c0_i32_0, %c0_i32_1 : i32, i32, i32
  }
  func.func @transform_7(%arg0: i32) -> (i32, i32, i32) {
    %c0_i32 = arith.constant 0 : i32
    %c0_i32_0 = arith.constant 0 : i32
    %c0_i32_1 = arith.constant 0 : i32
    %c0_i32_2 = arith.constant 0 : i32
    return %c0_i32, %c0_i32_0, %c0_i32_1 : i32, i32, i32
  }
  func.func @transform_8(%arg0: i32) -> (i32, i32) {
    %c0_i32 = arith.constant 0 : i32
    %c0_i32_0 = arith.constant 0 : i32
    %c0_i32_1 = arith.constant 0 : i32
    return %c0_i32, %c0_i32_0 : i32, i32
  }
  func.func @transform_9(%arg0: i32) -> (i32, i32) {
    %c0_i32 = arith.constant 0 : i32
    %c0_i32_0 = arith.constant 0 : i32
    %c0_i32_1 = arith.constant 0 : i32
    return %c0_i32, %c0_i32_0 : i32, i32
  }
  func.func @transform_10(%arg0: i32) -> (i32, i32) {
    %c0_i32 = arith.constant 0 : i32
    %c0_i32_0 = arith.constant 0 : i32
    %c0_i32_1 = arith.constant 0 : i32
    return %c0_i32, %c0_i32_0 : i32, i32
  }
  func.func @transform_11(%arg0: i32) -> (i32, i32) {
    %c0_i32 = arith.constant 0 : i32
    %c0_i32_0 = arith.constant 0 : i32
    %c0_i32_1 = arith.constant 0 : i32
    return %c0_i32, %c0_i32_0 : i32, i32
  }
  func.func @transform_12(%arg0: i32) -> (i32, i32) {
    %c0_i32 = arith.constant 0 : i32
    %c0_i32_0 = arith.constant 0 : i32
    %c0_i32_1 = arith.constant 0 : i32
    return %c0_i32, %c0_i32_0 : i32, i32
  }
  func.func @transform_13(%arg0: i32) -> (i32, i32) {
    %c0_i32 = arith.constant 0 : i32
    %c0_i32_0 = arith.constant 0 : i32
    %c0_i32_1 = arith.constant 0 : i32
    return %c0_i32, %c0_i32_0 : i32, i32
  }
  func.func @transform_14(%arg0: i32) -> (i32, i32) {
    %c0_i32 = arith.constant 0 : i32
    %c0_i32_0 = arith.constant 0 : i32
    %c0_i32_1 = arith.constant 0 : i32
    return %c0_i32, %c0_i32_0 : i32, i32
  }
  func.func @transform_15(%arg0: i32) -> (i32, i32) {
    %c0_i32 = arith.constant 0 : i32
    %c0_i32_0 = arith.constant 0 : i32
    %c0_i32_1 = arith.constant 0 : i32
    return %c0_i32, %c0_i32_0 : i32, i32
  }
  func.func @transform_16(%arg0: i32) -> (i32, i32) {
    %c0_i32 = arith.constant 0 : i32
    %c0_i32_0 = arith.constant 0 : i32
    %c0_i32_1 = arith.constant 0 : i32
    return %c0_i32, %c0_i32_0 : i32, i32
  }
  func.func @transform_17(%arg0: i32) -> (i32, i32, i32) {
    %c0_i32 = arith.constant 0 : i32
    %c0_i32_0 = arith.constant 0 : i32
    %c0_i32_1 = arith.constant 0 : i32
    return %arg0, %c0_i32, %c0_i32_0 : i32, i32, i32
  }
  func.func @transform_18(%arg0: i32) -> (i32, i32, i32) {
    %c0_i32 = arith.constant 0 : i32
    %c0_i32_0 = arith.constant 0 : i32
    %c0_i32_1 = arith.constant 0 : i32
    return %arg0, %c0_i32, %c0_i32_0 : i32, i32, i32
  }
}

module attributes {stable_mosaic.version = 11 : i64} {
  func.func @_bn_add_relu_kernel(%arg0: i32, %arg1: memref<256x128xf32, #tpu.memory_space<vmem>>, %arg2: memref<2x128xf32, #tpu.memory_space<vmem>>, %arg3: memref<1x128xf32, #tpu.memory_space<vmem>>, %arg4: memref<1x128xf32, #tpu.memory_space<vmem>>, %arg5: memref<256x128xbf16, #tpu.memory_space<vmem>>, %arg6: memref<2x128xf32, #tpu.memory_space<vmem>>, %arg7: memref<1x128xf32, #tpu.memory_space<vmem>>, %arg8: memref<1x128xf32, #tpu.memory_space<vmem>>, %arg9: memref<256x128xf32, #tpu.memory_space<vmem>>) attributes {dimension_semantics = [#tpu.dimension_semantics<parallel>], iteration_bounds = array<i64: 1>, scalar_prefetch = 0 : i64, scratch_operands = 0 : i64, tpu.core_type = #tpu.core_type<tc>, window_params = [{transform_indices = @transform_0, window_bounds = array<i64: 256, 128>}, {pipeline_mode = #tpu.pipeline_mode<synchronous>, transform_indices = @transform_1, window_bounds = array<i64: 2, 128>}, {pipeline_mode = #tpu.pipeline_mode<synchronous>, transform_indices = @transform_2, window_bounds = array<i64: 1, 128>}, {pipeline_mode = #tpu.pipeline_mode<synchronous>, transform_indices = @transform_3, window_bounds = array<i64: 1, 128>}, {transform_indices = @transform_4, window_bounds = array<i64: 256, 128>}, {pipeline_mode = #tpu.pipeline_mode<synchronous>, transform_indices = @transform_5, window_bounds = array<i64: 2, 128>}, {pipeline_mode = #tpu.pipeline_mode<synchronous>, transform_indices = @transform_6, window_bounds = array<i64: 1, 128>}, {pipeline_mode = #tpu.pipeline_mode<synchronous>, transform_indices = @transform_7, window_bounds = array<i64: 1, 128>}, {transform_indices = @transform_8, window_bounds = array<i64: 256, 128>}]} {
    %c0 = arith.constant 0 : index
    %c0_0 = arith.constant 0 : index
    %0 = vector.load %arg2[%c0, %c0_0] : memref<2x128xf32, #tpu.memory_space<vmem>>, vector<2x128xf32>
    %c0_1 = arith.constant 0 : index
    %c0_2 = arith.constant 0 : index
    %1 = vector.load %arg3[%c0_1, %c0_2] : memref<1x128xf32, #tpu.memory_space<vmem>>, vector<1x128xf32>
    %c0_3 = arith.constant 0 : index
    %c0_4 = arith.constant 0 : index
    %2 = vector.load %arg4[%c0_3, %c0_4] : memref<1x128xf32, #tpu.memory_space<vmem>>, vector<1x128xf32>
    %3 = vector.extract_strided_slice %0 {offsets = [0, 0], sizes = [1, 128], strides = [1, 1]} : vector<2x128xf32> to vector<1x128xf32>
    %cst = arith.constant 7.812500e-03 : f32
    %4 = vector.broadcast %cst : f32 to vector<1x128xf32>
    %5 = arith.mulf %3, %4 : vector<1x128xf32>
    %6 = vector.extract_strided_slice %0 {offsets = [1, 0], sizes = [1, 128], strides = [1, 1]} : vector<2x128xf32> to vector<1x128xf32>
    %cst_5 = arith.constant 7.812500e-03 : f32
    %7 = vector.broadcast %cst_5 : f32 to vector<1x128xf32>
    %8 = arith.mulf %6, %7 : vector<1x128xf32>
    %9 = arith.mulf %5, %5 : vector<1x128xf32>
    %10 = arith.subf %8, %9 : vector<1x128xf32>
    %cst_6 = arith.constant 0.000000e+00 : f32
    %11 = vector.broadcast %cst_6 : f32 to vector<1x128xf32>
    %12 = arith.maximumf %10, %11 : vector<1x128xf32>
    %cst_7 = arith.constant 9.99999974E-6 : f32
    %13 = vector.broadcast %cst_7 : f32 to vector<1x128xf32>
    %14 = arith.addf %12, %13 : vector<1x128xf32>
    %15 = math.rsqrt %14 : vector<1x128xf32>
    %16 = arith.mulf %1, %15 : vector<1x128xf32>
    %17 = arith.mulf %5, %16 : vector<1x128xf32>
    %18 = arith.subf %2, %17 : vector<1x128xf32>
    %c0_8 = arith.constant 0 : index
    %c0_9 = arith.constant 0 : index
    %19 = vector.load %arg1[%c0_8, %c0_9] : memref<256x128xf32, #tpu.memory_space<vmem>>, vector<256x128xf32>
    %20 = vector.broadcast %16 : vector<1x128xf32> to vector<256x128xf32>
    %21 = arith.mulf %19, %20 : vector<256x128xf32>
    %22 = vector.broadcast %18 : vector<1x128xf32> to vector<256x128xf32>
    %23 = arith.addf %21, %22 : vector<256x128xf32>
    %c0_10 = arith.constant 0 : index
    %c0_11 = arith.constant 0 : index
    %24 = vector.load %arg5[%c0_10, %c0_11] : memref<256x128xbf16, #tpu.memory_space<vmem>>, vector<256x128xbf16>
    %25 = arith.extf %24 : vector<256x128xbf16> to vector<256x128xf32>
    %c0_12 = arith.constant 0 : index
    %c0_13 = arith.constant 0 : index
    %26 = vector.load %arg6[%c0_12, %c0_13] : memref<2x128xf32, #tpu.memory_space<vmem>>, vector<2x128xf32>
    %c0_14 = arith.constant 0 : index
    %c0_15 = arith.constant 0 : index
    %27 = vector.load %arg7[%c0_14, %c0_15] : memref<1x128xf32, #tpu.memory_space<vmem>>, vector<1x128xf32>
    %c0_16 = arith.constant 0 : index
    %c0_17 = arith.constant 0 : index
    %28 = vector.load %arg8[%c0_16, %c0_17] : memref<1x128xf32, #tpu.memory_space<vmem>>, vector<1x128xf32>
    %29 = vector.extract_strided_slice %26 {offsets = [0, 0], sizes = [1, 128], strides = [1, 1]} : vector<2x128xf32> to vector<1x128xf32>
    %cst_18 = arith.constant 7.812500e-03 : f32
    %30 = vector.broadcast %cst_18 : f32 to vector<1x128xf32>
    %31 = arith.mulf %29, %30 : vector<1x128xf32>
    %32 = vector.extract_strided_slice %26 {offsets = [1, 0], sizes = [1, 128], strides = [1, 1]} : vector<2x128xf32> to vector<1x128xf32>
    %cst_19 = arith.constant 7.812500e-03 : f32
    %33 = vector.broadcast %cst_19 : f32 to vector<1x128xf32>
    %34 = arith.mulf %32, %33 : vector<1x128xf32>
    %35 = arith.mulf %31, %31 : vector<1x128xf32>
    %36 = arith.subf %34, %35 : vector<1x128xf32>
    %cst_20 = arith.constant 0.000000e+00 : f32
    %37 = vector.broadcast %cst_20 : f32 to vector<1x128xf32>
    %38 = arith.maximumf %36, %37 : vector<1x128xf32>
    %cst_21 = arith.constant 9.99999974E-6 : f32
    %39 = vector.broadcast %cst_21 : f32 to vector<1x128xf32>
    %40 = arith.addf %38, %39 : vector<1x128xf32>
    %41 = math.rsqrt %40 : vector<1x128xf32>
    %42 = arith.mulf %27, %41 : vector<1x128xf32>
    %43 = arith.mulf %31, %42 : vector<1x128xf32>
    %44 = arith.subf %28, %43 : vector<1x128xf32>
    %45 = vector.broadcast %42 : vector<1x128xf32> to vector<256x128xf32>
    %46 = arith.mulf %25, %45 : vector<256x128xf32>
    %47 = vector.broadcast %44 : vector<1x128xf32> to vector<256x128xf32>
    %48 = arith.addf %46, %47 : vector<256x128xf32>
    %49 = arith.addf %23, %48 : vector<256x128xf32>
    %cst_22 = arith.constant 0.000000e+00 : f32
    %50 = vector.broadcast %cst_22 : f32 to vector<256x128xf32>
    %51 = arith.maximumf %49, %50 : vector<256x128xf32>
    %c0_23 = arith.constant 0 : index
    %c0_24 = arith.constant 0 : index
    %52 = vector.load %arg9[%c0_23, %c0_24] : memref<256x128xf32, #tpu.memory_space<vmem>>, vector<256x128xf32>
    tpu.vector_store %arg9[%c0_23, %c0_24], %51 {strides = array<i32>} : memref<256x128xf32, #tpu.memory_space<vmem>>, vector<256x128xf32>,
    return
  }
  func.func @transform_0(%arg0: i32) -> (i32, i32) {
    %c0_i32 = arith.constant 0 : i32
    %c0_i32_0 = arith.constant 0 : i32
    return %arg0, %c0_i32 : i32, i32
  }
  func.func @transform_1(%arg0: i32) -> (i32, i32) {
    %c0_i32 = arith.constant 0 : i32
    %c0_i32_0 = arith.constant 0 : i32
    %c0_i32_1 = arith.constant 0 : i32
    return %c0_i32, %c0_i32_0 : i32, i32
  }
  func.func @transform_2(%arg0: i32) -> (i32, i32) {
    %c0_i32 = arith.constant 0 : i32
    %c0_i32_0 = arith.constant 0 : i32
    %c0_i32_1 = arith.constant 0 : i32
    return %c0_i32, %c0_i32_0 : i32, i32
  }
  func.func @transform_3(%arg0: i32) -> (i32, i32) {
    %c0_i32 = arith.constant 0 : i32
    %c0_i32_0 = arith.constant 0 : i32
    %c0_i32_1 = arith.constant 0 : i32
    return %c0_i32, %c0_i32_0 : i32, i32
  }
  func.func @transform_4(%arg0: i32) -> (i32, i32) {
    %c0_i32 = arith.constant 0 : i32
    %c0_i32_0 = arith.constant 0 : i32
    return %arg0, %c0_i32 : i32, i32
  }
  func.func @transform_5(%arg0: i32) -> (i32, i32) {
    %c0_i32 = arith.constant 0 : i32
    %c0_i32_0 = arith.constant 0 : i32
    %c0_i32_1 = arith.constant 0 : i32
    return %c0_i32, %c0_i32_0 : i32, i32
  }
  func.func @transform_6(%arg0: i32) -> (i32, i32) {
    %c0_i32 = arith.constant 0 : i32
    %c0_i32_0 = arith.constant 0 : i32
    %c0_i32_1 = arith.constant 0 : i32
    return %c0_i32, %c0_i32_0 : i32, i32
  }
  func.func @transform_7(%arg0: i32) -> (i32, i32) {
    %c0_i32 = arith.constant 0 : i32
    %c0_i32_0 = arith.constant 0 : i32
    %c0_i32_1 = arith.constant 0 : i32
    return %c0_i32, %c0_i32_0 : i32, i32
  }
  func.func @transform_8(%arg0: i32) -> (i32, i32) {
    %c0_i32 = arith.constant 0 : i32
    %c0_i32_0 = arith.constant 0 : i32
    return %arg0, %c0_i32 : i32, i32
  }
}

</mosaic_0001>

<bundles_post_ra>
// kernel: _lambda_.7
= control target key start
LH: loop header
LB: loop body
LE: loop exit
PB: predicated region body
PF: predicated region fallthrough
CT: control target
= control target key end

     0   :  { %v525_v13 = vmov 1966171168   ;;  %v45_v15 = vlaneseq  ;;  %s1111_s1 = inlined_call_operand.vmem [shape: f32[2,128], index: 1, kind: input, shape index: {}]   ;;  %s1112_s5 = inlined_call_operand.vmem [shape: f32[2,128], index: 5, kind: input, shape index: {}]   ;;  %s1113_s4 = inlined_call_operand.vmem [shape: bf16[256,128], index: 4, kind: input, shape index: {}]   ;;  %s1114_s2 = inlined_call_operand.vmem [shape: f32[1,128], index: 2, kind: input, shape index: {}, may-alias: {2,6}]   ;;  %s1115_s6 = inlined_call_operand.vmem [shape: f32[1,128], index: 6, kind: input, shape index: {}, may-alias: {2,6}]   ;;  %s1116_s3 = inlined_call_operand.vmem [shape: f32[1,128], index: 3, kind: input, shape index: {}, may-alias: {3,7}]   ;;  %s1117_s0 = inlined_call_operand.vmem [shape: f32[256,128], index: 0, kind: input, shape index: {}]   ;;  %s1118_s7 = inlined_call_operand.vmem [shape: f32[1,128], index: 7, kind: input, shape index: {}, may-alias: {3,7}]   ;;  %s1119_s8 = inlined_call_operand.vmem [shape: f32[256,128], index: 8, kind: output, shape index: {}]  }
   0x1   :  { %v29_v0 = vld [vmem:[%s1111_s1] sm:$0x3]  ;;  %v43_v14 = vunpack.c.l.s4 %v525_v13  ;;  %v595_v21 = vld [vmem:[%s1113_s4 + $0x8] sm:$0xff]   ;;  %v600_v22 = vld [vmem:[%s1113_s4 + $0x10] sm:$0xff]  }
   0x2   :  { %v574_v1 = vmul.f32 0.0078125, %v29_v0  ;;  %v233_v2 = vld [vmem:[%s1112_s5] sm:$0x3]  ;;  %v46_v18 = vshrl.u32 %v45_v15, 7  ;;  %v605_v23 = vld [vmem:[%s1113_s4 + $0x18] sm:$0xff]   ;;  %v447_v29 = vunpack.c.l.bf16 %v595_v21  ;;  %v448_v30 = vunpack.c.h.bf16 %v595_v21  ;;  %v621_v31 = vld [vmem:[%s1113_s4 + $0x28] sm:$0xff]  }
   0x3   :  { %v579_v3 = vmul.f32 0.0078125, %v233_v2  ;;  %v44_v17 = vunpack.c.0.s8 %v43_v14  ;;  %v590_v19 = vld [vmem:[%s1113_s4] sm:$0xff]   ;;  %v626_v32 = vld [vmem:[%s1113_s4 + $0x30] sm:$0xff]   ;;  %v451_v35 = vunpack.c.l.bf16 %v600_v22  ;;  %v452_v36 = vunpack.c.h.bf16 %v600_v22  ;;  %v634_v38 = vld [vmem:[%s1113_s4 + $0x38] sm:$0xff]  }
   0x4   :  { %v33_v4 = vmul.f32 %v574_v1, %v574_v1  ;;  %v443_v24 = vunpack.c.l.bf16 %v590_v19  ;;  %v611_v25 = vld [vmem:[%s1113_s4 + $0x20] sm:$0xff]   ;;  %v613_v27 = vsub.s32 0, %v46_v18  ;;  %v444_v28 = vunpack.c.h.bf16 %v590_v19  ;;  %v647_v44 = vld [vmem:[%s1113_s4 + $0x48] sm:$0xff]   ;;  %v655_v49 = vld [vmem:[%s1113_s4 + $0x50] sm:$0xff]  }
   0x5   :  { %v237_v5 = vmul.f32 %v579_v3, %v579_v3  ;;  %v47_v20 = vsub.s32 %v44_v17, %v46_v18  ;;  %v455_v37 = vunpack.c.l.bf16 %v605_v23  ;;  %v456_v40 = vunpack.c.h.bf16 %v605_v23  ;;  %v642_v43 = vld [vmem:[%s1113_s4 + $0x40] sm:$0xff]   ;;  %v666_v55 = vld [vmem:[%s1113_s4 + $0x58] sm:$0xff]   ;;  %v682_v62 = vld [vmem:[%s1113_s4 + $0x68] sm:$0xff]  }
   0x6   :  { %v35_v6 = vrot.slane %v33_v4, 7  ;;  %v459_v41 = vunpack.c.l.bf16 %v611_v25  ;;  %v460_v42 = vunpack.c.h.bf16 %v611_v25  ;;  %v463_v46 = vunpack.c.l.bf16 %v621_v31  ;;  %v30_v50 = vld [vmem:[%s1114_s2] sm:$0x1]  ;;  %v62_v14 = vld [vmem:[%s1117_s0 + $0x8] sm:$0xff]  ;;  %v63_v15 = vld [vmem:[%s1117_s0 + $0x10] sm:$0xff] }
   0x7   :  { %v239_v7 = vrot.slane %v237_v5, 7  ;;  %v464_v47 = vunpack.c.h.bf16 %v621_v31  ;;  %v467_v48 = vunpack.c.l.bf16 %v626_v32  ;;  %v468_v52 = vunpack.c.h.bf16 %v626_v32  ;;  %v671_v56 = vld [vmem:[%s1113_s4 + $0x60] sm:$0xff]   ;;  %v690_v5 = vld [vmem:[%s1113_s4 + $0x70] sm:$0xff]  }
   0x8   :  { %v37_v8 = vsub.f32 %v574_v1, %v35_v6  ;;  %v471_v53 = vunpack.c.l.bf16 %v634_v38  ;;  %v472_v54 = vunpack.c.h.bf16 %v634_v38  ;;  %v234_v58 = vld [vmem:[%s1115_s6] sm:$0x1]  ;;  %v475_v59 = vunpack.c.l.bf16 %v642_v43  ;;  %v67_v22 = vld [vmem:[%s1117_s0 + $0x30] sm:$0xff] }
   0x9   :  { %v241_v9 = vsub.f32 %v579_v3, %v239_v7  ;;  %v476_v60 = vunpack.c.h.bf16 %v642_v43  ;;  %v479_v61 = vunpack.c.l.bf16 %v647_v44  ;;  %v480_v0 = vunpack.c.h.bf16 %v647_v44  ;;  %v31_v6 = vld [vmem:[%s1116_s3] sm:$0x1] }
   0xa   :  { %v38_v10 = vmax.f32 %v37_v8, 0.0  ;;  %v483_v2 = vunpack.c.l.bf16 %v655_v49  ;;  %v484_v4 = vunpack.c.h.bf16 %v655_v49  ;;  %v487_v8 = vunpack.c.l.bf16 %v666_v55 }
   0xb   :  { %v242_v11 = vmax.f32 %v241_v9, 0.0  ;;  %v488_v9 = vunpack.c.h.bf16 %v666_v55  ;;  %v495_v17 = vunpack.c.l.bf16 %v682_v62 }
   0xc   :  { %v39_v12 = vadd.f32 1e-05, %v38_v10  ;;  %v491_v10 = vunpack.c.l.bf16 %v671_v56 }
   0xd   :  { %v243_v16 = vadd.f32 1e-05, %v242_v11  ;;  %v701_v11 = vld [vmem:[%s1113_s4 + $0x78] sm:$0xff]  }
   0xe   :  { %521 = vrsqrt.f32 %v39_v12  ;;  %v61_v12 = vld [vmem:[%s1117_s0] sm:$0xff] }
   0xf   :  { %523 = vrsqrt.f32 %v243_v16  ;;  %v492_v16 = vunpack.c.h.bf16 %v671_v56 }
  0x18   :  { %v522_v26 = vpop.eup %521 }
  0x19   :  { %v524_v33 = vpop.eup %523  ;;  %v48_v34 = vrot.slane %v522_v26, %v47_v20 }
  0x1a   :  { %v252_v39 = vrot.slane %v524_v33, %v47_v20  ;;  %v235_v33 = vld [vmem:[%s1118_s7] sm:$0x1] }
  0x1b   :  { %v49_v45 = vcombine.high %v48_v34, %v48_v34 }
  0x1c   :  { %v253_v51 = vcombine.high %v252_v39, %v252_v39  ;;  %v66_v39 = vld [vmem:[%s1117_s0 + $0x28] sm:$0xff] }
  0x1d   :  { %v56_v57 = vrot.slane %v49_v45, %v47_v20 }
  0x1e   :  { %v260_v63 = vrot.slane %v253_v51, %v47_v20  ;;  %v65_v51 = vld [vmem:[%s1117_s0 + $0x20] sm:$0xff] }
  0x1f   :  { %v58_v7 = vmul.f32 %v56_v57, %v30_v50  ;;  %v503_v57 = vunpack.c.l.bf16 %v701_v11 }
  0x20   :  { %v262_v13 = vmul.f32 %v260_v63, %v234_v58 }
  0x21   :  { %v59_v20 = vmul.f32 %v58_v7, %v574_v1  ;;  %v717_v26 = vrot.slane %v58_v7, %v613_v27  ;;  %v64_v1 = vld [vmem:[%s1117_s0 + $0x18] sm:$0xff] }
  0x22   :  { %v263_v45 = vmul.f32 %v262_v13, %v579_v3  ;;  %v726_v50 = vrot.slane %v262_v13, %v613_v27 }
  0x23   :  { %v60_v63 = vsub.f32 %v31_v6, %v59_v20  ;;  %v99_v7 = vmul.f32 %v717_v26, %v61_v12  ;;  %v100_v3 = vmul.f32 %v717_v26, %v62_v14  ;;  %v101_v13 = vmul.f32 %v717_v26, %v63_v15 }
  0x24   :  { %v264_v34 = vsub.f32 %v235_v33, %v263_v45  ;;  %v271_v18 = vmul.f32 %v443_v24, %v726_v50  ;;  %v272_v58 = vmul.f32 %v444_v28, %v726_v50  ;;  %v273_v6 = vmul.f32 %v447_v29, %v726_v50 }
  0x25   :  { %v752_v12 = vrot.slane %v60_v63, %v613_v27  ;;  %v102_v14 = vmul.f32 %v717_v26, %v64_v1  ;;  %v274_v15 = vmul.f32 %v448_v30, %v726_v50  ;;  %v103_v20 = vmul.f32 %v717_v26, %v65_v51 }
  0x26   :  { %v760_v24 = vrot.slane %v264_v34, %v613_v27  ;;  %v275_v19 = vmul.f32 %v451_v35, %v726_v50  ;;  %v104_v28 = vmul.f32 %v717_v26, %v66_v39  ;;  %v276_v29 = vmul.f32 %v452_v36, %v726_v50 }
  0x27   :  { %v137_v33 = vadd.f32 %v752_v12, %v99_v7  ;;  %v138_v21 = vadd.f32 %v752_v12, %v100_v3  ;;  %v139_v30 = vadd.f32 %v752_v12, %v101_v13  ;;  %v140_v45 = vadd.f32 %v752_v12, %v102_v14 }
  0x28   :  { %v309_v27 = vadd.f32 %v760_v24, %v271_v18  ;;  %v310_v34 = vadd.f32 %v760_v24, %v272_v58  ;;  %v311_v35 = vadd.f32 %v760_v24, %v273_v6  ;;  %v312_v39 = vadd.f32 %v760_v24, %v274_v15 }
  0x29   :  { %v141_v36 = vadd.f32 %v752_v12, %v103_v20  ;;  %v313_v1 = vadd.f32 %v760_v24, %v275_v19  ;;  %v142_v51 = vadd.f32 %v752_v12, %v104_v28  ;;  %v314_v63 = vadd.f32 %v760_v24, %v276_v29  ;;  %v68_v20 = vld [vmem:[%s1117_s0 + $0x38] sm:$0xff]  ;;  %v69_v19 = vld [vmem:[%s1117_s0 + $0x40] sm:$0xff] }
  0x2a   :  { %v341_v7 = vadd.f32 %v309_v27, %v137_v33  ;;  %v342_v18 = vadd.f32 %v310_v34, %v138_v21  ;;  %v343_v3 = vadd.f32 %v311_v35, %v139_v30  ;;  %v344_v58 = vadd.f32 %v312_v39, %v140_v45  ;;  %v70_v30 = vld [vmem:[%s1117_s0 + $0x48] sm:$0xff] }
  0x2b   :  { %v345_v13 = vadd.f32 %v313_v1, %v141_v36  ;;  %v346_v6 = vadd.f32 %v314_v63, %v142_v51  ;;  %v105_v14 = vmul.f32 %v717_v26, %v67_v22  ;;  %v277_v15 = vmul.f32 %v455_v37, %v726_v50  ;;  %v71_v37 = vld [vmem:[%s1117_s0 + $0x50] sm:$0xff] }
  0x2c   :  { %v373_v28 = vmax.f32 %v341_v7, 0.0  ;;  %v374_v29 = vmax.f32 %v342_v18, 0.0  ;;  %v375_v33 = vmax.f32 %v343_v3, 0.0  ;;  %v376_v21 = vmax.f32 %v344_v58, 0.0 }
  0x2d   :  { %v377_v45 = vmax.f32 %v345_v13, 0.0  ;;  %v378_v27 = vmax.f32 %v346_v6, 0.0  ;;  %v143_v34 = vadd.f32 %v752_v12, %v105_v14  ;;  %v315_v35 = vadd.f32 %v760_v24, %v277_v15  ;;  %v73_v13 = vld [vmem:[%s1117_s0 + $0x60] sm:$0xff] }
  0x2e   :  { %405 = vst [vmem:[%s1119_s8] sm:$0xff] %v373_v28  ;;  %406 = vst [vmem:[%s1119_s8 + $0x8] sm:$0xff] %v374_v29  ;;  %v106_v39 = vmul.f32 %v717_v26, %v68_v20  ;;  %v278_v22 = vmul.f32 %v456_v40, %v726_v50  ;;  %v107_v36 = vmul.f32 %v717_v26, %v69_v19 }
  0x2f   :  { %407 = vst [vmem:[%s1119_s8 + $0x10] sm:$0xff] %v375_v33  ;;  %408 = vst [vmem:[%s1119_s8 + $0x18] sm:$0xff] %v376_v21  ;;  %v279_v1 = vmul.f32 %v459_v41, %v726_v50  ;;  %v347_v51 = vadd.f32 %v315_v35, %v143_v34  ;;  %v108_v63 = vmul.f32 %v717_v26, %v70_v30  ;;  %v72_v41 = vld [vmem:[%s1117_s0 + $0x58] sm:$0xff] }
  0x30   :  { %409 = vst [vmem:[%s1119_s8 + $0x20] sm:$0xff] %v377_v45  ;;  %410 = vst [vmem:[%s1119_s8 + $0x28] sm:$0xff] %v378_v27  ;;  %v280_v23 = vmul.f32 %v460_v42, %v726_v50  ;;  %v109_v40 = vmul.f32 %v717_v26, %v71_v37  ;;  %v144_v7 = vadd.f32 %v752_v12, %v106_v39  ;;  %v75_v37 = vld [vmem:[%s1117_s0 + $0x70] sm:$0xff] }
  0x31   :  { %v316_v18 = vadd.f32 %v760_v24, %v278_v22  ;;  %v145_v3 = vadd.f32 %v752_v12, %v107_v36  ;;  %v317_v58 = vadd.f32 %v760_v24, %v279_v1  ;;  %v379_v25 = vmax.f32 %v347_v51, 0.0 }
  0x32   :  { %v146_v42 = vadd.f32 %v752_v12, %v108_v63  ;;  %v318_v6 = vadd.f32 %v760_v24, %v280_v23  ;;  %v147_v14 = vadd.f32 %v752_v12, %v109_v40  ;;  %v281_v19 = vmul.f32 %v463_v46, %v726_v50  ;;  %v74_v46 = vld [vmem:[%s1117_s0 + $0x68] sm:$0xff] }
  0x33   :  { %v348_v15 = vadd.f32 %v316_v18, %v144_v7  ;;  %v349_v20 = vadd.f32 %v317_v58, %v145_v3  ;;  %v110_v28 = vmul.f32 %v717_v26, %v72_v41  ;;  %411 = vst [vmem:[%s1119_s8 + $0x30] sm:$0xff] %v379_v25  ;;  %v282_v33 = vmul.f32 %v464_v47, %v726_v50  ;;  %v76_v47 = vld [vmem:[%s1117_s0 + $0x78] sm:$0xff]  ;;  %v77_v18 = vld [vmem:[%s1117_s0 + $0x80] sm:$0xff] }
  0x34   :  { %v350_v29 = vadd.f32 %v318_v6, %v146_v42  ;;  %v111_v21 = vmul.f32 %v717_v26, %v73_v13  ;;  %v283_v30 = vmul.f32 %v467_v48, %v726_v50  ;;  %v319_v34 = vadd.f32 %v760_v24, %v281_v19  ;;  %v78_v13 = vld [vmem:[%s1117_s0 + $0x88] sm:$0xff] }
  0x35   :  { %v380_v45 = vmax.f32 %v348_v15, 0.0  ;;  %v381_v27 = vmax.f32 %v349_v20, 0.0  ;;  %v148_v31 = vadd.f32 %v752_v12, %v110_v28  ;;  %v320_v48 = vadd.f32 %v760_v24, %v282_v33 }
  0x36   :  { %v382_v35 = vmax.f32 %v350_v29, 0.0  ;;  %v149_v39 = vadd.f32 %v752_v12, %v111_v21  ;;  %v321_v22 = vadd.f32 %v760_v24, %v283_v30  ;;  %v351_v36 = vadd.f32 %v319_v34, %v147_v14 }
  0x37   :  { %412 = vst [vmem:[%s1119_s8 + $0x38] sm:$0xff] %v380_v45  ;;  %413 = vst [vmem:[%s1119_s8 + $0x40] sm:$0xff] %v381_v27  ;;  %v112_v1 = vmul.f32 %v717_v26, %v74_v46  ;;  %v284_v51 = vmul.f32 %v468_v52, %v726_v50  ;;  %v113_v63 = vmul.f32 %v717_v26, %v75_v37  ;;  %v81_v45 = vld [vmem:[%s1117_s0 + $0xa0] sm:$0xff] }
  0x38   :  { %414 = vst [vmem:[%s1119_s8 + $0x48] sm:$0xff] %v382_v35  ;;  %v352_v23 = vadd.f32 %v320_v48, %v148_v31  ;;  %v353_v40 = vadd.f32 %v321_v22, %v149_v39  ;;  %v285_v41 = vmul.f32 %v471_v53, %v726_v50  ;;  %v114_v7 = vmul.f32 %v717_v26, %v76_v47  ;;  %v79_v53 = vld [vmem:[%s1117_s0 + $0x90] sm:$0xff] }
  0x39   :  { %v383_v32 = vmax.f32 %v351_v36, 0.0  ;;  %v150_v52 = vadd.f32 %v752_v12, %v112_v1  ;;  %v322_v3 = vadd.f32 %v760_v24, %v284_v51  ;;  %v151_v58 = vadd.f32 %v752_v12, %v113_v63  ;;  %v83_v51 = vld [vmem:[%s1117_s0 + $0xb0] sm:$0xff] }
  0x3a   :  { %v384_v25 = vmax.f32 %v352_v23, 0.0  ;;  %v385_v42 = vmax.f32 %v353_v40, 0.0  ;;  %v323_v6 = vadd.f32 %v760_v24, %v285_v41  ;;  %v152_v14 = vadd.f32 %v752_v12, %v114_v7 }
  0x3b   :  { %415 = vst [vmem:[%s1119_s8 + $0x50] sm:$0xff] %v383_v32  ;;  %v354_v15 = vadd.f32 %v322_v3, %v150_v52  ;;  %v286_v20 = vmul.f32 %v472_v54, %v726_v50  ;;  %v115_v19 = vmul.f32 %v717_v26, %v77_v18  ;;  %v287_v28 = vmul.f32 %v475_v59, %v726_v50  ;;  %v80_v59 = vld [vmem:[%s1117_s0 + $0x98] sm:$0xff] }
  0x3c   :  { %416 = vst [vmem:[%s1119_s8 + $0x58] sm:$0xff] %v384_v25  ;;  %417 = vst [vmem:[%s1119_s8 + $0x60] sm:$0xff] %v385_v42  ;;  %v355_v29 = vadd.f32 %v323_v6, %v151_v58  ;;  %v116_v33 = vmul.f32 %v717_v26, %v78_v13  ;;  %v288_v38 = vmul.f32 %v476_v60, %v726_v50  ;;  %v85_v6 = vld [vmem:[%s1117_s0 + $0xc0] sm:$0xff] }
  0x3d   :  { %v117_v54 = vmul.f32 %v717_v26, %v79_v53  ;;  %v386_v21 = vmax.f32 %v354_v15, 0.0  ;;  %v324_v30 = vadd.f32 %v760_v24, %v286_v20  ;;  %v153_v46 = vadd.f32 %v752_v12, %v115_v19  ;;  %v86_v20 = vld [vmem:[%s1117_s0 + $0xc8] sm:$0xff] }
  0x3e   :  { %v325_v37 = vadd.f32 %v760_v24, %v287_v28  ;;  %v387_v27 = vmax.f32 %v355_v29, 0.0  ;;  %v154_v43 = vadd.f32 %v752_v12, %v116_v33  ;;  %v326_v60 = vadd.f32 %v760_v24, %v288_v38 }
  0x3f   :  { %v155_v34 = vadd.f32 %v752_v12, %v117_v54  ;;  %418 = vst [vmem:[%s1119_s8 + $0x68] sm:$0xff] %v386_v21  ;;  %v356_v31 = vadd.f32 %v324_v30, %v152_v14  ;;  %v289_v35 = vmul.f32 %v479_v61, %v726_v50  ;;  %v118_v48 = vmul.f32 %v717_v26, %v80_v59  ;;  %v82_v61 = vld [vmem:[%s1117_s0 + $0xa8] sm:$0xff] }
  0x40   :  { %v357_v47 = vadd.f32 %v325_v37, %v153_v46  ;;  %419 = vst [vmem:[%s1119_s8 + $0x70] sm:$0xff] %v387_v27  ;;  %v358_v39 = vadd.f32 %v326_v60, %v154_v43  ;;  %v290_v22 = vmul.f32 %v480_v0, %v726_v50  ;;  %v119_v36 = vmul.f32 %v717_v26, %v81_v45  ;;  %v84_v0 = vld [vmem:[%s1117_s0 + $0xb8] sm:$0xff]  ;;  %v89_v60 = vld [vmem:[%s1117_s0 + $0xe0] sm:$0xff] }
  0x41   :  { %v291_v1 = vmul.f32 %v483_v2, %v726_v50  ;;  %v388_v63 = vmax.f32 %v356_v31, 0.0  ;;  %v327_v40 = vadd.f32 %v760_v24, %v289_v35  ;;  %v156_v44 = vadd.f32 %v752_v12, %v118_v48 }
  0x42   :  { %v389_v23 = vmax.f32 %v357_v47, 0.0  ;;  %v390_v41 = vmax.f32 %v358_v39, 0.0  ;;  %v328_v2 = vadd.f32 %v760_v24, %v290_v22  ;;  %v157_v7 = vadd.f32 %v752_v12, %v119_v36 }
  0x43   :  { %v329_v18 = vadd.f32 %v760_v24, %v291_v1  ;;  %420 = vst [vmem:[%s1119_s8 + $0x78] sm:$0xff] %v388_v63  ;;  %v359_v32 = vadd.f32 %v327_v40, %v155_v34  ;;  %v120_v52 = vmul.f32 %v717_v26, %v82_v61  ;;  %v292_v3 = vmul.f32 %v484_v4, %v726_v50 }
  0x44   :  { %421 = vst [vmem:[%s1119_s8 + $0x80] sm:$0xff] %v389_v23  ;;  %v121_v58 = vmul.f32 %v717_v26, %v83_v51  ;;  %422 = vst [vmem:[%s1119_s8 + $0x88] sm:$0xff] %v390_v41  ;;  %v360_v13 = vadd.f32 %v328_v2, %v156_v44  ;;  %v293_v25 = vmul.f32 %v487_v8, %v726_v50  ;;  %v87_v8 = vld [vmem:[%s1117_s0 + $0xd0] sm:$0xff]  ;;  %v1120_v36 = vunpack.c.h.bf16 %v682_v62  ;;  %v92_v41 = vld [vmem:[%s1117_s0 + $0xf8] sm:$0xff] }
  0x45   :  { %v361_v53 = vadd.f32 %v329_v18, %v157_v7  ;;  %v122_v42 = vmul.f32 %v717_v26, %v84_v0  ;;  %v391_v49 = vmax.f32 %v359_v32, 0.0  ;;  %v158_v4 = vadd.f32 %v752_v12, %v120_v52  ;;  %v91_v23 = vld [vmem:[%s1117_s0 + $0xf0] sm:$0xff] }
  0x46   :  { %v330_v14 = vadd.f32 %v760_v24, %v292_v3  ;;  %v159_v15 = vadd.f32 %v752_v12, %v121_v58  ;;  %v392_v19 = vmax.f32 %v360_v13, 0.0  ;;  %v331_v29 = vadd.f32 %v760_v24, %v293_v25 }
  0x47   :  { %v393_v28 = vmax.f32 %v361_v53, 0.0  ;;  %v160_v33 = vadd.f32 %v752_v12, %v122_v42  ;;  %423 = vst [vmem:[%s1119_s8 + $0x90] sm:$0xff] %v391_v49  ;;  %v294_v54 = vmul.f32 %v488_v9, %v726_v50  ;;  %v123_v59 = vmul.f32 %v717_v26, %v85_v6 }
  0x48   :  { %v362_v38 = vadd.f32 %v330_v14, %v158_v4  ;;  %v295_v21 = vmul.f32 %v491_v10, %v726_v50  ;;  %424 = vst [vmem:[%s1119_s8 + $0x98] sm:$0xff] %v392_v19  ;;  %v363_v30 = vadd.f32 %v331_v29, %v159_v15  ;;  %v124_v46 = vmul.f32 %v717_v26, %v86_v20  ;;  %v88_v10 = vld [vmem:[%s1117_s0 + $0xd8] sm:$0xff] }
  0x49   :  { %425 = vst [vmem:[%s1119_s8 + $0xa0] sm:$0xff] %v393_v28  ;;  %v296_v55 = vmul.f32 %v492_v16, %v726_v50  ;;  %v125_v9 = vmul.f32 %v717_v26, %v87_v8  ;;  %v332_v45 = vadd.f32 %v760_v24, %v294_v54  ;;  %v161_v27 = vadd.f32 %v752_v12, %v123_v59 }
  0x4a   :  { %v394_v37 = vmax.f32 %v362_v38, 0.0  ;;  %v333_v43 = vadd.f32 %v760_v24, %v295_v21  ;;  %v395_v34 = vmax.f32 %v363_v30, 0.0  ;;  %v162_v56 = vadd.f32 %v752_v12, %v124_v46 }
  0x4b   :  { %v334_v16 = vadd.f32 %v760_v24, %v296_v55  ;;  %v163_v31 = vadd.f32 %v752_v12, %v125_v9  ;;  %v364_v47 = vadd.f32 %v332_v45, %v160_v33  ;;  %v297_v48 = vmul.f32 %v495_v17, %v726_v50  ;;  %v90_v17 = vld [vmem:[%s1117_s0 + $0xe8] sm:$0xff] }
  0x4c   :  { %426 = vst [vmem:[%s1119_s8 + $0xa8] sm:$0xff] %v394_v37  ;;  %v365_v35 = vadd.f32 %v333_v43, %v161_v27  ;;  %v126_v39 = vmul.f32 %v717_v26, %v88_v10  ;;  %427 = vst [vmem:[%s1119_s8 + $0xb0] sm:$0xff] %v395_v34  ;;  %v298_v1 = vmul.f32 %v1120_v36, %v726_v50  ;;  %v1121_v51 = vunpack.c.l.bf16 %v690_v5 }
  0x4d   :  { %v366_v22 = vadd.f32 %v334_v16, %v162_v56  ;;  %v127_v61 = vmul.f32 %v717_v26, %v89_v60  ;;  %v396_v40 = vmax.f32 %v364_v47, 0.0  ;;  %v335_v0 = vadd.f32 %v760_v24, %v297_v48 }
  0x4e   :  { %v299_v63 = vmul.f32 %v1121_v51, %v726_v50  ;;  %v397_v44 = vmax.f32 %v365_v35, 0.0  ;;  %v164_v62 = vadd.f32 %v752_v12, %v126_v39  ;;  %v336_v7 = vadd.f32 %v760_v24, %v298_v1 }
  0x4f   :  { %v398_v2 = vmax.f32 %v366_v22, 0.0  ;;  %v165_v18 = vadd.f32 %v752_v12, %v127_v61  ;;  %428 = vst [vmem:[%s1119_s8 + $0xb8] sm:$0xff] %v396_v40  ;;  %v367_v52 = vadd.f32 %v335_v0, %v163_v31  ;;  %v128_v3 = vmul.f32 %v717_v26, %v90_v17 }
  0x50   :  { %v337_v32 = vadd.f32 %v760_v24, %v299_v63  ;;  %429 = vst [vmem:[%s1119_s8 + $0xc0] sm:$0xff] %v397_v44  ;;  %v1122_v58 = vunpack.c.h.bf16 %v690_v5  ;;  %v129_v53 = vmul.f32 %v717_v26, %v91_v23  ;;  %v368_v25 = vadd.f32 %v336_v7, %v164_v62 }
  0x51   :  { %430 = vst [vmem:[%s1119_s8 + $0xc8] sm:$0xff] %v398_v2  ;;  %v301_v6 = vmul.f32 %v503_v57, %v726_v50  ;;  %v130_v49 = vmul.f32 %v717_v26, %v92_v41  ;;  %v399_v4 = vmax.f32 %v367_v52, 0.0  ;;  %v166_v14 = vadd.f32 %v752_v12, %v128_v3 }
  0x52   :  { %v300_v13 = vmul.f32 %v1122_v58, %v726_v50  ;;  %v369_v42 = vadd.f32 %v337_v32, %v165_v18  ;;  %v167_v15 = vadd.f32 %v752_v12, %v129_v53  ;;  %v400_v20 = vmax.f32 %v368_v25, 0.0 }
  0x53   :  { %v339_v19 = vadd.f32 %v760_v24, %v301_v6  ;;  %431 = vst [vmem:[%s1119_s8 + $0xd0] sm:$0xff] %v399_v4  ;;  %v168_v57 = vadd.f32 %v752_v12, %v130_v49  ;;  %v1123_v26 = vunpack.c.h.bf16 %v701_v11 }
  0x54   :  { %v338_v5 = vadd.f32 %v760_v24, %v300_v13  ;;  %v401_v8 = vmax.f32 %v369_v42, 0.0  ;;  %432 = vst [vmem:[%s1119_s8 + $0xd8] sm:$0xff] %v400_v20 }
  0x55   :  { %v302_v29 = vmul.f32 %v1123_v26, %v726_v50  ;;  %v371_v33 = vadd.f32 %v339_v19, %v167_v15 }
  0x56   :  { %v370_v28 = vadd.f32 %v338_v5, %v166_v14  ;;  %433 = vst [vmem:[%s1119_s8 + $0xe0] sm:$0xff] %v401_v8 }
  0x57   :  { %v340_v54 = vadd.f32 %v760_v24, %v302_v29  ;;  %v403_v59 = vmax.f32 %v371_v33, 0.0 }
  0x58   :  { %v402_v38 = vmax.f32 %v370_v28, 0.0 }
  0x59   :  { %v372_v12 = vadd.f32 %v340_v54, %v168_v57  ;;  %435 = vst [vmem:[%s1119_s8 + $0xf0] sm:$0xff] %v403_v59 }
  0x5a   :  { %434 = vst [vmem:[%s1119_s8 + $0xe8] sm:$0xff] %v402_v38 }
  0x5b   :  { %v404_v11 = vmax.f32 %v372_v12, 0.0 }
  0x5d   :  { %436 = vst [vmem:[%s1119_s8 + $0xf8] sm:$0xff] %v404_v11 }

// kernel: _lambda_.6
= control target key start
LH: loop header
LB: loop body
LE: loop exit
PB: predicated region body
PF: predicated region fallthrough
CT: control target
= control target key end

     0   :  { %v1033_v0 = vmov 0   ;;  %v1034_v48 = vmov 1966171168   ;;  %v42_v50 = vlaneseq  ;;  %vm833_vm0 = vcmask 1040384   ;;  %s1419_s1 = inlined_call_operand.vmem [shape: f32[256,1], index: 1, kind: input, shape index: {}]   ;;  %s1420_s5 = inlined_call_operand.vmem [shape: bf16[128,128], index: 5, kind: input, shape index: {}]   ;;  %s1421_s2 = inlined_call_operand.vmem [shape: f32[2,128], index: 2, kind: input, shape index: {}]   ;;  %s1422_s3 = inlined_call_operand.vmem [shape: f32[1,128], index: 3, kind: input, shape index: {}]   ;;  %s1423_s0 = inlined_call_operand.vmem [shape: bf16[256,128], index: 0, kind: input, shape index: {}]   ;;  %s1424_s4 = inlined_call_operand.vmem [shape: f32[1,128], index: 4, kind: input, shape index: {}]   ;;  %s1425_s6 = inlined_call_operand.vmem [shape: f32[256,128], index: 6, kind: output, shape index: {0}]   ;;  %s1426_s7 = inlined_call_operand.vmem [shape: f32[1,2,128], index: 7, kind: output, shape index: {1}]  }
   0x1   :  { %1022 = vset.pattern.permute.xlu1 %v1033_v0  ;;  %1021 = vset.pattern.permute.xlu0 %v1033_v0  ;;  %v232_v1 = vld [vmem:[%s1419_s1 + $0x10] sm:$0xff]  ;;  %v230_v2 = vld [vmem:[%s1419_s1] sm:$0xff]  ;;  %v233_v3 = vld [vmem:[%s1419_s1 + $0x18] sm:$0xff]  ;;  %v40_v49 = vunpack.c.l.s4 %v1034_v48 }
   0x2   :  { %274 = vperm.xlu1 %1022, %v232_v1   ;;  %264 = vperm.xlu0 %1021, %v230_v2   ;;  %v231_v4 = vld [vmem:[%s1419_s1 + $0x8] sm:$0xff]  ;;  %v234_v6 = vld [vmem:[%s1419_s1 + $0x20] sm:$0xff]  ;;  %v237_v7 = vld [vmem:[%s1419_s1 + $0x38] sm:$0xff]  ;;  %v43_v52 = vshrl.u32 %v42_v50, 7 }
   0x3   :  { %v235_v5 = vld [vmem:[%s1419_s1 + $0x28] sm:$0xff]  ;;  %v236_v8 = vld [vmem:[%s1419_s1 + $0x30] sm:$0xff]  ;;  %v1023_v9 = vld [vmem:[%s1420_s5] sm:$0xff]   ;;  %v41_v51 = vunpack.c.0.s8 %v40_v49 }
   0x4   :  { %v1024_v10 = vld [vmem:[%s1420_s5 + $0x8] sm:$0xff]   ;;  %v238_v12 = vld [vmem:[%s1419_s1 + $0x40] sm:$0xff]  ;;  %955 = vmatprep.subr.bf16.mxu0 %v1023_v9  ;;  %1003 = vmatprep.subr.bf16.mxu1 %v1023_v9  ;;  %v1025_v13 = vld [vmem:[%s1420_s5 + $0x10] sm:$0xff]   ;;  %v125_v60 = vsub.s32 0, %v43_v52 }
   0x5   :  { %v239_v11 = vld [vmem:[%s1419_s1 + $0x48] sm:$0xff]  ;;  %956 = vmatpush3.bf16.msra.mxu0 %v1023_v9  ;;  %1011 = vmatpush3.bf16.msra.mxu1 %v1023_v9  ;;  %v241_v14 = vld [vmem:[%s1419_s1 + $0x58] sm:$0xff]  ;;  %v240_v15 = vld [vmem:[%s1419_s1 + $0x50] sm:$0xff]  ;;  %v44_v53 = vsub.s32 %v41_v51, %v43_v52 }
   0x6   :  { %279 = vperm.xlu1 %1022, %v233_v3   ;;  %269 = vperm.xlu0 %1021, %v231_v4   ;;  %v1026_v16 = vld [vmem:[%s1420_s5 + $0x18] sm:$0xff]   ;;  %v243_v17 = vld [vmem:[%s1419_s1 + $0x68] sm:$0xff]  ;;  %v242_v18 = vld [vmem:[%s1419_s1 + $0x60] sm:$0xff] }
   0x7   :  { %957 = vmatprep.subr.bf16.mxu0 %v1024_v10  ;;  %1004 = vmatprep.subr.bf16.mxu1 %v1024_v10  ;;  %v1027_v19 = vld [vmem:[%s1420_s5 + $0x20] sm:$0xff]   ;;  %v245_v20 = vld [vmem:[%s1419_s1 + $0x78] sm:$0xff]  ;;  %v244_v21 = vld [vmem:[%s1419_s1 + $0x70] sm:$0xff] }
   0x8   :  { %v1028_v22 = vld [vmem:[%s1420_s5 + $0x28] sm:$0xff]   ;;  %v246_v24 = vld [vmem:[%s1419_s1 + $0x80] sm:$0xff]  ;;  %v1029_v25 = vld [vmem:[%s1420_s5 + $0x30] sm:$0xff]  }
   0x9   :  { %958 = vmatpush3.bf16.msra.mxu0 %v1024_v10  ;;  %1012 = vmatpush3.bf16.msra.mxu1 %v1024_v10  ;;  %v247_v23 = vld [vmem:[%s1419_s1 + $0x88] sm:$0xff]  ;;  %v249_v26 = vld [vmem:[%s1419_s1 + $0x98] sm:$0xff]  ;;  %v248_v27 = vld [vmem:[%s1419_s1 + $0x90] sm:$0xff] }
   0xa   :  { %289 = vperm.xlu1 %1022, %v235_v5   ;;  %284 = vperm.xlu0 %1021, %v234_v6   ;;  %v1030_v28 = vld [vmem:[%s1420_s5 + $0x38] sm:$0xff]   ;;  %v251_v29 = vld [vmem:[%s1419_s1 + $0xa8] sm:$0xff]  ;;  %v250_v30 = vld [vmem:[%s1419_s1 + $0xa0] sm:$0xff] }
   0xb   :  { %959 = vmatprep.subr.bf16.mxu0 %v1025_v13  ;;  %1005 = vmatprep.subr.bf16.mxu1 %v1025_v13  ;;  %v253_v31 = vld [vmem:[%s1419_s1 + $0xb8] sm:$0xff]  ;;  %v252_v32 = vld [vmem:[%s1419_s1 + $0xb0] sm:$0xff]  ;;  %v255_v33 = vld [vmem:[%s1419_s1 + $0xc8] sm:$0xff] }
   0xc   :  { %v254_v34 = vld [vmem:[%s1419_s1 + $0xc0] sm:$0xff]  ;;  %v257_v35 = vld [vmem:[%s1419_s1 + $0xd8] sm:$0xff]  ;;  %v256_v36 = vld [vmem:[%s1419_s1 + $0xd0] sm:$0xff] }
   0xd   :  { %960 = vmatpush3.bf16.msra.mxu0 %v1025_v13  ;;  %1013 = vmatpush3.bf16.msra.mxu1 %v1025_v13  ;;  %v259_v37 = vld [vmem:[%s1419_s1 + $0xe8] sm:$0xff]  ;;  %v258_v38 = vld [vmem:[%s1419_s1 + $0xe0] sm:$0xff]  ;;  %v261_v40 = vld [vmem:[%s1419_s1 + $0xf8] sm:$0xff] }
   0xe   :  { %299 = vperm.xlu1 %1022, %v237_v7   ;;  %294 = vperm.xlu0 %1021, %v236_v8   ;;  %v26_v39 = vld [vmem:[%s1421_s2] sm:$0x3]  ;;  %v260_v41 = vld [vmem:[%s1419_s1 + $0xf0] sm:$0xff]  ;;  %v916_v62 = vld [vmem:[%s1423_s0 + $0x8] sm:$0xff]  }
   0xf   :  { %961 = vmatprep.subr.bf16.mxu0 %v1026_v16  ;;  %1006 = vmatprep.subr.bf16.mxu1 %v1026_v16  ;;  %v29_v42 = vmul.f32 0.0078125, %v26_v39  ;;  %v27_v58 = vld [vmem:[%s1422_s3] sm:$0x1]  ;;  %v858_v2 = vunpack.c.l.bf16 %v916_v62  ;;  %v859_v5 = vunpack.c.h.bf16 %v916_v62  ;;  %v917_v7 = vld [vmem:[%s1423_s0 + $0x10] sm:$0xff]  }
  0x10   :  { %v28_v63 = vld [vmem:[%s1424_s4] sm:$0x1]  ;;  %v863_v9 = vunpack.c.h.bf16 %v917_v7  ;;  %v862_v10 = vunpack.c.l.bf16 %v917_v7  ;;  %v921_v48 = vld [vmem:[%s1423_s0 + $0x30] sm:$0xff]  }
  0x11   :  { %962 = vmatpush3.bf16.msra.mxu0 %v1026_v16  ;;  %1014 = vmatpush3.bf16.msra.mxu1 %v1026_v16  ;;  %v30_v43 = vmul.f32 %v29_v42, %v29_v42  ;;  %v853_v0 = vld [vmem:[%s1423_s0] sm:$0xff]  }
  0x12   :  { %309 = vperm.xlu1 %1022, %v239_v11   ;;  %304 = vperm.xlu0 %1021, %v238_v12   ;;  %v854_v4 = vunpack.c.l.bf16 %v853_v0  ;;  %v855_v6 = vunpack.c.h.bf16 %v853_v0 }
  0x13   :  { %963 = vmatprep.subr.bf16.mxu0 %v1027_v19  ;;  %1007 = vmatprep.subr.bf16.mxu1 %v1027_v19  ;;  %v32_v44 = vrot.slane %v30_v43, 7 }
  0x15   :  { %964 = vmatpush3.bf16.msra.mxu0 %v1027_v19  ;;  %1015 = vmatpush3.bf16.msra.mxu1 %v1027_v19  ;;  %v34_v45 = vsub.f32 %v29_v42, %v32_v44 }
  0x16   :  { %319 = vperm.xlu1 %1022, %v241_v14   ;;  %314 = vperm.xlu0 %1021, %v240_v15   ;;  %v918_v15 = vld [vmem:[%s1423_s0 + $0x18] sm:$0xff]  }
  0x17   :  { %965 = vmatprep.subr.bf16.mxu0 %v1028_v22  ;;  %1008 = vmatprep.subr.bf16.mxu1 %v1028_v22  ;;  %v35_v46 = vmax.f32 %v34_v45, 0.0  ;;  %v866_v19 = vunpack.c.l.bf16 %v918_v15 }
  0x19   :  { %966 = vmatpush3.bf16.msra.mxu0 %v1028_v22  ;;  %1016 = vmatpush3.bf16.msra.mxu1 %v1028_v22  ;;  %v36_v47 = vadd.f32 1e-05, %v35_v46 }
  0x1a   :  { %329 = vperm.xlu1 %1022, %v243_v17   ;;  %324 = vperm.xlu0 %1021, %v242_v18   ;;  %v867_v18 = vunpack.c.h.bf16 %v918_v15  ;;  %v923_v15 = vld [vmem:[%s1423_s0 + $0x40] sm:$0xff]  }
  0x1b   :  { %967 = vmatprep.subr.bf16.mxu0 %v1029_v25  ;;  %1009 = vmatprep.subr.bf16.mxu1 %v1029_v25  ;;  %1031 = vrsqrt.f32 %v36_v47 }
  0x1d   :  { %968 = vmatpush3.bf16.msra.mxu0 %v1029_v25  ;;  %1017 = vmatpush3.bf16.msra.mxu1 %v1029_v25 }
  0x1e   :  { %339 = vperm.xlu1 %1022, %v245_v20   ;;  %334 = vperm.xlu0 %1021, %v244_v21   ;;  %v919_v20 = vld [vmem:[%s1423_s0 + $0x20] sm:$0xff]  }
  0x1f   :  { %969 = vmatprep.subr.bf16.mxu0 %v1030_v28  ;;  %1010 = vmatprep.subr.bf16.mxu1 %v1030_v28  ;;  %v871_v25 = vunpack.c.h.bf16 %v919_v20 }
  0x21   :  { %970 = vmatpush3.bf16.msra.mxu0 %v1030_v28  ;;  %1018 = vmatpush3.bf16.msra.mxu1 %v1030_v28 }
  0x22   :  { %349 = vperm.xlu1 %1022, %v247_v23   ;;  %344 = vperm.xlu0 %1021, %v246_v24  }
  0x25   :  { %v1032_v54 = vpop.eup %1031 }
  0x26   :  { %359 = vperm.xlu1 %1022, %v249_v26   ;;  %354 = vperm.xlu0 %1021, %v248_v27   ;;  %v45_v55 = vrot.slane %v1032_v54, %v44_v53  ;;  %v870_v26 = vunpack.c.l.bf16 %v919_v20 }
  0x28   :  { %v46_v56 = vcombine.high %v45_v55, %v45_v55  ;;  %v879_v55 = vunpack.c.h.bf16 %v921_v48 }
  0x2a   :  { %369 = vperm.xlu1 %1022, %v251_v29   ;;  %364 = vperm.xlu0 %1021, %v250_v30   ;;  %v53_v57 = vrot.slane %v46_v56, %v44_v53  ;;  %v878_v56 = vunpack.c.l.bf16 %v921_v48 }
  0x2c   :  { %v55_v59 = vmul.f32 %v53_v57, %v27_v58 }
  0x2e   :  { %379 = vperm.xlu1 %1022, %v253_v31   ;;  %374 = vperm.xlu0 %1021, %v252_v32   ;;  %v56_v61 = vmul.f32 %v55_v59, %v29_v42  ;;  %v1210_v1 = vrot.slane %v55_v59, %v125_v60 }
  0x30   :  { %v57_v3 = vsub.f32 %v28_v63, %v56_v61  ;;  %v130_v8 = vmul.f32 %v858_v2, %v1210_v1  ;;  %v128_v12 = vmul.f32 %v854_v4, %v1210_v1  ;;  %v131_v13 = vmul.f32 %v859_v5, %v1210_v1  ;;  %v922_v63 = vld [vmem:[%s1423_s0 + $0x38] sm:$0xff]  }
  0x31   :  { %v129_v14 = vmul.f32 %v855_v6, %v1210_v1  ;;  %v133_v16 = vmul.f32 %v863_v9, %v1210_v1  ;;  %v132_v17 = vmul.f32 %v862_v10, %v1210_v1  ;;  %v135_v31 = vmul.f32 %v867_v18, %v1210_v1 }
  0x32   :  { %389 = vperm.xlu1 %1022, %v255_v33   ;;  %384 = vperm.xlu0 %1021, %v254_v34   ;;  %v1216_v11 = vrot.slane %v57_v3, %v125_v60  ;;  %v134_v32 = vmul.f32 %v866_v19, %v1210_v1  ;;  %v920_v33 = vld [vmem:[%s1423_s0 + $0x28] sm:$0xff]   ;;  %v136_v39 = vmul.f32 %v870_v26, %v1210_v1  ;;  %v883_v6 = vunpack.c.h.bf16 %v922_v63 }
  0x33   :  { %v882_v7 = vunpack.c.l.bf16 %v922_v63 }
  0x34   :  { %v168_v21 = vadd.f32 %v1216_v11, %v130_v8  ;;  %v166_v22 = vadd.f32 %v1216_v11, %v128_v12  ;;  %v169_v23 = vadd.f32 %v1216_v11, %v131_v13  ;;  %v167_v24 = vadd.f32 %v1216_v11, %v129_v14 }
  0x35   :  { %v171_v29 = vadd.f32 %v1216_v11, %v133_v16  ;;  %v170_v30 = vadd.f32 %v1216_v11, %v132_v17  ;;  %v173_v46 = vadd.f32 %v1216_v11, %v135_v31  ;;  %v172_v47 = vadd.f32 %v1216_v11, %v134_v32 }
  0x36   :  { %399 = vperm.xlu1 %1022, %v257_v35   ;;  %394 = vperm.xlu0 %1021, %v256_v36   ;;  %v200_v34 = vmax.f32 %v168_v21, 0.0  ;;  %v198_v35 = vmax.f32 %v166_v22, 0.0  ;;  %v201_v36 = vmax.f32 %v169_v23, 0.0  ;;  %v174_v4 = vadd.f32 %v1216_v11, %v136_v39 }
  0x37   :  { %v203_v44 = vmax.f32 %v171_v29, 0.0  ;;  %v202_v45 = vmax.f32 %v170_v30, 0.0  ;;  %v205_v59 = vmax.f32 %v173_v46, 0.0  ;;  %v204_v60 = vmax.f32 %v172_v47, 0.0  ;;  %v924_v29 = vld [vmem:[%s1423_s0 + $0x48] sm:$0xff]  }
  0x38   :  { %v141_v13 = vmul.f32 %v879_v55, %v1210_v1  ;;  %v140_v14 = vmul.f32 %v878_v56, %v1210_v1  ;;  %v206_v19 = vmax.f32 %v174_v4, 0.0  ;;  %v887_v21 = vunpack.c.h.bf16 %v923_v15 }
  0x39   :  { %v886_v22 = vunpack.c.l.bf16 %v923_v15 }
  0x3a   :  { %409 = vperm.xlu1 %1022, %v259_v37   ;;  %404 = vperm.xlu0 %1021, %v258_v38   ;;  %v199_v37 = vmax.f32 %v167_v24, 0.0  ;;  %v137_v38 = vmul.f32 %v871_v25, %v1210_v1  ;;  %v179_v26 = vadd.f32 %v1216_v11, %v141_v13 }
  0x3b   :  { %v144_v47 = vmul.f32 %v886_v22, %v1210_v1 }
  0x3c   :  { %v175_v3 = vadd.f32 %v1216_v11, %v137_v38  ;;  %v211_v39 = vmax.f32 %v179_v26, 0.0 }
  0x3e   :  { %419 = vperm.xlu1 %1022, %v261_v40   ;;  %414 = vperm.xlu0 %1021, %v260_v41   ;;  %v875_v40 = vunpack.c.h.bf16 %v920_v33  ;;  %v874_v41 = vunpack.c.l.bf16 %v920_v33  ;;  %v207_v18 = vmax.f32 %v175_v3, 0.0  ;;  %v178_v33 = vadd.f32 %v1216_v11, %v140_v14 }
  0x40   :  { %v139_v61 = vmul.f32 %v875_v40, %v1210_v1  ;;  %v138_v62 = vmul.f32 %v874_v41, %v1210_v1  ;;  %v210_v46 = vmax.f32 %v178_v33, 0.0 }
  0x42   :  { %v177_v10 = vadd.f32 %v1216_v11, %v139_v61  ;;  %v176_v12 = vadd.f32 %v1216_v11, %v138_v62  ;;  %v182_v61 = vadd.f32 %v1216_v11, %v144_v47 }
  0x44   :  { %v209_v25 = vmax.f32 %v177_v10, 0.0  ;;  %v208_v32 = vmax.f32 %v176_v12, 0.0  ;;  %v214_v13 = vmax.f32 %v182_v61, 0.0 }
  0x81   :  { %v275_v27 = vpop.permute.xlu1 %274  ;;  %v265_v28 = vpop.permute.xlu0 %264 }
  0x82   :  { %v424_v49 = vmul.f32 %v275_v27, %v200_v34  ;;  %v422_v50 = vmul.f32 %v265_v28, %v198_v35  ;;  %v143_v27 = vmul.f32 %v883_v6, %v1210_v1  ;;  %v142_v28 = vmul.f32 %v882_v7, %v1210_v1 }
  0x83   :  { %v891_v35 = vunpack.c.h.bf16 %v924_v29 }
  0x84   :  { %v181_v40 = vadd.f32 %v1216_v11, %v143_v27  ;;  %v180_v41 = vadd.f32 %v1216_v11, %v142_v28 }
  0x85   :  { %v280_v42 = vpop.permute.xlu1 %279  ;;  %v270_v43 = vpop.permute.xlu0 %269  ;;  %v147_v55 = vmul.f32 %v891_v35, %v1210_v1 }
  0x86   :  { %v425_v51 = vmul.f32 %v280_v42, %v201_v36  ;;  %v423_v52 = vmul.f32 %v270_v43, %v199_v37  ;;  %v890_v36 = vunpack.c.l.bf16 %v924_v29  ;;  %v145_v42 = vmul.f32 %v887_v21, %v1210_v1  ;;  %v925_v43 = vld [vmem:[%s1423_s0 + $0x50] sm:$0xff]  }
  0x87   :  { %v185_v4 = vadd.f32 %v1216_v11, %v147_v55 }
  0x88   :  { %v455_v53 = vpack.c.bf16 %v425_v51, %v424_v49  ;;  %v454_v54 = vpack.c.bf16 %v423_v52, %v422_v50  ;;  %v895_v49 = vunpack.c.h.bf16 %v925_v43  ;;  %v894_v50 = vunpack.c.l.bf16 %v925_v43 }
  0x89   :  { %v290_v57 = vpop.permute.xlu1 %289  ;;  %v285_v58 = vpop.permute.xlu0 %284  ;;  %v146_v56 = vmul.f32 %v890_v36, %v1210_v1 }
  0x8a   :  { %v427_v0 = vmul.f32 %v290_v57, %v203_v44  ;;  %v426_v2 = vmul.f32 %v285_v58, %v202_v45  ;;  %971 = vmatprep.mubr.bf16.mxu0 %v454_v54  ;;  %v212_v54 = vmax.f32 %v180_v41, 0.0  ;;  %v926_v57 = vld [vmem:[%s1423_s0 + $0x58] sm:$0xff]   ;;  %v149_v6 = vmul.f32 %v895_v49, %v1210_v1 }
  0x8b   :  { %972 = vmatmul.mubr.bf16.vlgmr.msra.gmra.mrb[0].mxu0 %v455_v53  ;;  %v213_v53 = vmax.f32 %v181_v40, 0.0  ;;  %v899_v63 = vunpack.c.h.bf16 %v926_v57  ;;  %v148_v7 = vmul.f32 %v894_v50, %v1210_v1 }
  0x8c   :  { %v456_v5 = vpack.c.bf16 %v427_v0, %v426_v2  ;;  %v898_v0 = vunpack.c.l.bf16 %v926_v57 }
  0x8d   :  { %v300_v8 = vpop.permute.xlu1 %299  ;;  %v295_v9 = vpop.permute.xlu0 %294  ;;  %v151_v21 = vmul.f32 %v899_v63, %v1210_v1  ;;  %v186_v27 = vadd.f32 %v1216_v11, %v148_v7 }
  0x8e   :  { %v429_v16 = vmul.f32 %v300_v8, %v205_v59  ;;  %v428_v17 = vmul.f32 %v295_v9, %v204_v60  ;;  %975 = vmatprep.mubr.bf16.mxu0 %v456_v5  ;;  %v183_v60 = vadd.f32 %v1216_v11, %v145_v42  ;;  %v184_v5 = vadd.f32 %v1216_v11, %v146_v56  ;;  %v927_v8 = vld [vmem:[%s1423_s0 + $0x60] sm:$0xff]  }
  0x8f   :  { %v903_v15 = vunpack.c.h.bf16 %v927_v8  ;;  %v150_v22 = vmul.f32 %v898_v0, %v1210_v1  ;;  %v218_v40 = vmax.f32 %v186_v27, 0.0 }
  0x90   :  { %v457_v20 = vpack.c.bf16 %v429_v16, %v428_v17  ;;  %v215_v12 = vmax.f32 %v183_v60, 0.0  ;;  %v902_v16 = vunpack.c.l.bf16 %v927_v8  ;;  %v216_v26 = vmax.f32 %v184_v5, 0.0 }
  0x91   :  { %v310_v23 = vpop.permute.xlu1 %309  ;;  %v305_v24 = vpop.permute.xlu0 %304  ;;  %v188_v35 = vadd.f32 %v1216_v11, %v150_v22  ;;  %v153_v36 = vmul.f32 %v903_v15, %v1210_v1 }
  0x92   :  { %v431_v30 = vmul.f32 %v310_v23, %v207_v18  ;;  %v430_v31 = vmul.f32 %v305_v24, %v206_v19  ;;  %v217_v19 = vmax.f32 %v185_v4, 0.0  ;;  %v928_v23 = vld [vmem:[%s1423_s0 + $0x68] sm:$0xff]   ;;  %v152_v41 = vmul.f32 %v902_v16, %v1210_v1 }
  0x93   :  { %976 = vmatmul.mubr.bf16.gmra.mrb[4].mxu0 %v457_v20  ;;  %v187_v20 = vadd.f32 %v1216_v11, %v149_v6  ;;  %v907_v29 = vunpack.c.h.bf16 %v928_v23 }
  0x94   :  { %v458_v34 = vpack.c.bf16 %v431_v30, %v430_v31  ;;  %v906_v30 = vunpack.c.l.bf16 %v928_v23  ;;  %v190_v55 = vadd.f32 %v1216_v11, %v152_v41 }
  0x95   :  { %v320_v37 = vpop.permute.xlu1 %319  ;;  %v315_v38 = vpop.permute.xlu0 %314  ;;  %v219_v33 = vmax.f32 %v187_v20, 0.0  ;;  %v155_v49 = vmul.f32 %v907_v29, %v1210_v1 }
  0x96   :  { %v433_v44 = vmul.f32 %v320_v37, %v209_v25  ;;  %v432_v45 = vmul.f32 %v315_v38, %v208_v32  ;;  %979 = vmatprep.mubr.bf16.mxu0 %v458_v34  ;;  %v189_v34 = vadd.f32 %v1216_v11, %v151_v21  ;;  %v929_v37 = vld [vmem:[%s1423_s0 + $0x70] sm:$0xff]   ;;  %v154_v50 = vmul.f32 %v906_v30, %v1210_v1 }
  0x97   :  { %v911_v43 = vunpack.c.h.bf16 %v929_v37  ;;  %v193_v61 = vadd.f32 %v1216_v11, %v155_v49  ;;  %v222_v5 = vmax.f32 %v190_v55, 0.0 }
  0x98   :  { %v459_v48 = vpack.c.bf16 %v433_v44, %v432_v45  ;;  %v910_v44 = vunpack.c.l.bf16 %v929_v37  ;;  %v221_v47 = vmax.f32 %v189_v34, 0.0 }
  0x99   :  { %v330_v51 = vpop.permute.xlu1 %329  ;;  %v325_v52 = vpop.permute.xlu0 %324  ;;  %v157_v57 = vmul.f32 %v911_v43, %v1210_v1 }
  0x9a   :  { %v435_v58 = vmul.f32 %v330_v51, %v211_v39  ;;  %v434_v59 = vmul.f32 %v325_v52, %v210_v46  ;;  %v930_v51 = vld [vmem:[%s1423_s0 + $0x78] sm:$0xff]   ;;  %v156_v63 = vmul.f32 %v910_v44, %v1210_v1 }
  0x9b   :  { %980 = vmatmul.mubr.bf16.gmra.mrb[8].mxu0 %v459_v48  ;;  %v220_v48 = vmax.f32 %v188_v35, 0.0  ;;  %v914_v0 = vunpack.c.l.bf16 %v930_v51 }
  0x9c   :  { %v460_v62 = vpack.c.bf16 %v435_v58, %v434_v59  ;;  %v915_v58 = vunpack.c.h.bf16 %v930_v51  ;;  %v194_v16 = vadd.f32 %v1216_v11, %v156_v63 }
  0x9d   :  { %v340_v2 = vpop.permute.xlu1 %339  ;;  %v335_v3 = vpop.permute.xlu0 %334 }
  0x9e   :  { %v437_v9 = vmul.f32 %v340_v2, %v213_v53  ;;  %v436_v10 = vmul.f32 %v335_v3, %v212_v54  ;;  %983 = vmatprep.mubr.bf16.mxu0 %v460_v62  ;;  %v191_v54 = vadd.f32 %v1216_v11, %v153_v36  ;;  %v192_v62 = vadd.f32 %v1216_v11, %v154_v50 }
  0xa0   :  { %v461_v14 = vpack.c.bf16 %v437_v9, %v436_v10  ;;  %v223_v4 = vmax.f32 %v191_v54, 0.0  ;;  %v225_v9 = vmax.f32 %v193_v61, 0.0  ;;  %v224_v10 = vmax.f32 %v192_v62, 0.0 }
  0xa1   :  { %v350_v17 = vpop.permute.xlu1 %349  ;;  %v345_v18 = vpop.permute.xlu0 %344 }
  0xa2   :  { %v439_v24 = vmul.f32 %v350_v17, %v215_v12  ;;  %v438_v25 = vmul.f32 %v345_v18, %v214_v13  ;;  %v195_v12 = vadd.f32 %v1216_v11, %v157_v57  ;;  %v159_v13 = vmul.f32 %v915_v58, %v1210_v1 }
  0xa3   :  { %984 = vmatmul.mubr.bf16.gmra.mrb[12].mxu0 %v461_v14  ;;  %v158_v17 = vmul.f32 %v914_v0, %v1210_v1 }
  0xa4   :  { %v462_v28 = vpack.c.bf16 %v439_v24, %v438_v25  ;;  %v227_v21 = vmax.f32 %v195_v12, 0.0  ;;  %v197_v22 = vadd.f32 %v1216_v11, %v159_v13  ;;  %v226_v25 = vmax.f32 %v194_v16, 0.0 }
  0xa5   :  { %v360_v31 = vpop.permute.xlu1 %359  ;;  %v355_v32 = vpop.permute.xlu0 %354 }
  0xa6   :  { %v441_v38 = vmul.f32 %v360_v31, %v217_v19  ;;  %v440_v39 = vmul.f32 %v355_v32, %v216_v26  ;;  %987 = vmatprep.mubr.bf16.mxu1 %v462_v28  ;;  %v196_v26 = vadd.f32 %v1216_v11, %v158_v17  ;;  %v229_v32 = vmax.f32 %v197_v22, 0.0 }
  0xa8   :  { %v463_v42 = vpack.c.bf16 %v441_v38, %v440_v39  ;;  %v228_v1 = vmax.f32 %v196_v26, 0.0 }
  0xa9   :  { %v370_v45 = vpop.permute.xlu1 %369  ;;  %v365_v46 = vpop.permute.xlu0 %364 }
  0xaa   :  { %v443_v52 = vmul.f32 %v370_v45, %v219_v33  ;;  %v442_v53 = vmul.f32 %v365_v46, %v218_v40  ;;  %988 = vmatmul.mubr.bf16.vlgmr.msra.gmra.mrb[0].mxu1 %v463_v42 }
  0xac   :  { %v464_v56 = vpack.c.bf16 %v443_v52, %v442_v53 }
  0xad   :  { %v380_v59 = vpop.permute.xlu1 %379  ;;  %v375_v60 = vpop.permute.xlu0 %374 }
  0xae   :  { %v445_v2 = vmul.f32 %v380_v59, %v221_v47  ;;  %v444_v3 = vmul.f32 %v375_v60, %v220_v48  ;;  %991 = vmatprep.mubr.bf16.mxu1 %v464_v56 }
  0xb0   :  { %v465_v6 = vpack.c.bf16 %v445_v2, %v444_v3 }
  0xb1   :  { %v390_v7 = vpop.permute.xlu1 %389  ;;  %v385_v8 = vpop.permute.xlu0 %384 }
  0xb2   :  { %v447_v14 = vmul.f32 %v390_v7, %v223_v4  ;;  %v446_v15 = vmul.f32 %v385_v8, %v222_v5  ;;  %992 = vmatmul.mubr.bf16.gmra.mrb[4].mxu1 %v465_v6 }
  0xb4   :  { %v466_v18 = vpack.c.bf16 %v447_v14, %v446_v15 }
  0xb5   :  { %v400_v19 = vpop.permute.xlu1 %399  ;;  %v395_v20 = vpop.permute.xlu0 %394 }
  0xb6   :  { %v449_v23 = vmul.f32 %v400_v19, %v225_v9  ;;  %v448_v24 = vmul.f32 %v395_v20, %v224_v10  ;;  %995 = vmatprep.mubr.bf16.mxu1 %v466_v18 }
  0xb8   :  { %v467_v27 = vpack.c.bf16 %v449_v23, %v448_v24 }
  0xb9   :  { %v410_v28 = vpop.permute.xlu1 %409  ;;  %v405_v29 = vpop.permute.xlu0 %404 }
  0xba   :  { %v451_v30 = vmul.f32 %v410_v28, %v227_v21  ;;  %v450_v31 = vmul.f32 %v405_v29, %v226_v25  ;;  %996 = vmatmul.mubr.bf16.gmra.mrb[8].mxu1 %v467_v27 }
  0xbc   :  { %v468_v33 = vpack.c.bf16 %v451_v30, %v450_v31 }
  0xbd   :  { %v420_v34 = vpop.permute.xlu1 %419  ;;  %v415_v35 = vpop.permute.xlu0 %414 }
  0xbe   :  { %v453_v36 = vmul.f32 %v420_v34, %v229_v32  ;;  %v452_v37 = vmul.f32 %v415_v35, %v228_v1  ;;  %999 = vmatprep.mubr.bf16.mxu1 %v468_v33 }
  0xc0   :  { %v469_v38 = vpack.c.bf16 %v453_v36, %v452_v37 }
  0xc2   :  { %1000 = vmatmul.mubr.bf16.gmra.mrb[12].mxu1 %v469_v38 }
 0x15e   :  { %v973_v39 = vpop.f32.mrb[0].mxu0 }
 0x15f   :  { %697 = vst [vmem:[%s1425_s6 + $0x10] sm:$0xff] %v973_v39  ;;  %v568_v11 = vpop.f32.mrb[1].mxu0  ;;  %v766_v45 = vmul.f32 %v973_v39, %v973_v39 }
 0x160   :  { %695 = vst [vmem:[%s1425_s6] sm:$0xff] %v568_v11  ;;  %v974_v40 = vpop.f32.mrb[2].mxu0  ;;  %v764_v42 = vmul.f32 %v568_v11, %v568_v11 }
 0x161   :  { %698 = vst [vmem:[%s1425_s6 + $0x18] sm:$0xff] %v974_v40  ;;  %v571_v41 = vpop.f32.mrb[3].mxu0  ;;  %v767_v48 = vmul.f32 %v974_v40, %v974_v40 }
 0x162   :  { %696 = vst [vmem:[%s1425_s6 + $0x8] sm:$0xff] %v571_v41  ;;  %v727_v43 = vadd.f32 %v571_v41, %v568_v11  ;;  %v765_v44 = vmul.f32 %v571_v41, %v571_v41 }
 0x164   :  { %v728_v46 = vadd.f32 %v973_v39, %v727_v43  ;;  %v796_v47 = vadd.f32 %v765_v44, %v764_v42 }
 0x166   :  { %v797_v49 = vadd.f32 %v796_v47, %v766_v45  ;;  %v977_v50 = vpop.f32.mrb[4].mxu0  ;;  %v729_v51 = vadd.f32 %v974_v40, %v728_v46 }
 0x167   :  { %701 = vst [vmem:[%s1425_s6 + $0x30] sm:$0xff] %v977_v50  ;;  %v584_v52 = vpop.f32.mrb[5].mxu0  ;;  %v770_v61 = vmul.f32 %v977_v50, %v977_v50 }
 0x168   :  { %699 = vst [vmem:[%s1425_s6 + $0x20] sm:$0xff] %v584_v52  ;;  %v730_v53 = vadd.f32 %v729_v51, %v584_v52  ;;  %v768_v54 = vmul.f32 %v584_v52, %v584_v52  ;;  %v798_v55 = vadd.f32 %v797_v49, %v767_v48  ;;  %v978_v56 = vpop.f32.mrb[6].mxu0 }
 0x169   :  { %702 = vst [vmem:[%s1425_s6 + $0x38] sm:$0xff] %v978_v56  ;;  %v587_v57 = vpop.f32.mrb[7].mxu0  ;;  %v771_v0 = vmul.f32 %v978_v56, %v978_v56 }
 0x16a   :  { %v799_v58 = vadd.f32 %v798_v55, %v768_v54  ;;  %700 = vst [vmem:[%s1425_s6 + $0x28] sm:$0xff] %v587_v57  ;;  %v731_v59 = vadd.f32 %v730_v53, %v587_v57  ;;  %v769_v60 = vmul.f32 %v587_v57, %v587_v57 }
 0x16c   :  { %v732_v62 = vadd.f32 %v977_v50, %v731_v59  ;;  %v800_v63 = vadd.f32 %v799_v58, %v769_v60 }
 0x16e   :  { %v801_v2 = vadd.f32 %v800_v63, %v770_v61  ;;  %v981_v3 = vpop.f32.mrb[8].mxu0  ;;  %v733_v4 = vadd.f32 %v978_v56, %v732_v62 }
 0x16f   :  { %705 = vst [vmem:[%s1425_s6 + $0x50] sm:$0xff] %v981_v3  ;;  %v600_v5 = vpop.f32.mrb[9].mxu0  ;;  %v774_v15 = vmul.f32 %v981_v3, %v981_v3 }
 0x170   :  { %703 = vst [vmem:[%s1425_s6 + $0x40] sm:$0xff] %v600_v5  ;;  %v734_v6 = vadd.f32 %v733_v4, %v600_v5  ;;  %v772_v7 = vmul.f32 %v600_v5, %v600_v5  ;;  %v802_v8 = vadd.f32 %v801_v2, %v771_v0  ;;  %v982_v9 = vpop.f32.mrb[10].mxu0 }
 0x171   :  { %706 = vst [vmem:[%s1425_s6 + $0x58] sm:$0xff] %v982_v9  ;;  %v603_v10 = vpop.f32.mrb[11].mxu0  ;;  %v775_v18 = vmul.f32 %v982_v9, %v982_v9 }
 0x172   :  { %v803_v12 = vadd.f32 %v802_v8, %v772_v7  ;;  %704 = vst [vmem:[%s1425_s6 + $0x48] sm:$0xff] %v603_v10  ;;  %v735_v13 = vadd.f32 %v734_v6, %v603_v10  ;;  %v773_v14 = vmul.f32 %v603_v10, %v603_v10 }
 0x174   :  { %v736_v16 = vadd.f32 %v981_v3, %v735_v13  ;;  %v804_v17 = vadd.f32 %v803_v12, %v773_v14 }
 0x176   :  { %v805_v19 = vadd.f32 %v804_v17, %v774_v15  ;;  %v985_v20 = vpop.f32.mrb[12].mxu0  ;;  %v737_v21 = vadd.f32 %v982_v9, %v736_v16 }
 0x177   :  { %709 = vst [vmem:[%s1425_s6 + $0x70] sm:$0xff] %v985_v20  ;;  %v616_v22 = vpop.f32.mrb[13].mxu0  ;;  %v778_v31 = vmul.f32 %v985_v20, %v985_v20 }
 0x178   :  { %707 = vst [vmem:[%s1425_s6 + $0x60] sm:$0xff] %v616_v22  ;;  %v738_v23 = vadd.f32 %v737_v21, %v616_v22  ;;  %v776_v24 = vmul.f32 %v616_v22, %v616_v22  ;;  %v806_v25 = vadd.f32 %v805_v19, %v775_v18  ;;  %v986_v26 = vpop.f32.mrb[14].mxu0 }
 0x179   :  { %710 = vst [vmem:[%s1425_s6 + $0x78] sm:$0xff] %v986_v26  ;;  %v619_v27 = vpop.f32.mrb[15].mxu0  ;;  %v779_v34 = vmul.f32 %v986_v26, %v986_v26 }
 0x17a   :  { %v807_v28 = vadd.f32 %v806_v25, %v776_v24  ;;  %708 = vst [vmem:[%s1425_s6 + $0x68] sm:$0xff] %v619_v27  ;;  %v739_v29 = vadd.f32 %v738_v23, %v619_v27  ;;  %v777_v30 = vmul.f32 %v619_v27, %v619_v27 }
 0x17c   :  { %v740_v32 = vadd.f32 %v985_v20, %v739_v29  ;;  %v808_v1 = vadd.f32 %v807_v28, %v777_v30 }
 0x17d   :  { %v989_v33 = vpop.f32.mrb[0].mxu1 }
 0x17e   :  { %v809_v35 = vadd.f32 %v808_v1, %v778_v31  ;;  %713 = vst [vmem:[%s1425_s6 + $0x90] sm:$0xff] %v989_v33  ;;  %v632_v36 = vpop.f32.mrb[1].mxu1  ;;  %v741_v37 = vadd.f32 %v986_v26, %v740_v32  ;;  %v782_v45 = vmul.f32 %v989_v33, %v989_v33 }
 0x17f   :  { %711 = vst [vmem:[%s1425_s6 + $0x80] sm:$0xff] %v632_v36  ;;  %v780_v38 = vmul.f32 %v632_v36, %v632_v36  ;;  %v990_v39 = vpop.f32.mrb[2].mxu1 }
 0x180   :  { %v742_v11 = vadd.f32 %v741_v37, %v632_v36  ;;  %v810_v40 = vadd.f32 %v809_v35, %v779_v34  ;;  %714 = vst [vmem:[%s1425_s6 + $0x98] sm:$0xff] %v990_v39  ;;  %v635_v41 = vpop.f32.mrb[3].mxu1  ;;  %v783_v49 = vmul.f32 %v990_v39, %v990_v39 }
 0x181   :  { %712 = vst [vmem:[%s1425_s6 + $0x88] sm:$0xff] %v635_v41  ;;  %v781_v42 = vmul.f32 %v635_v41, %v635_v41 }
 0x182   :  { %v811_v43 = vadd.f32 %v810_v40, %v780_v38  ;;  %v743_v44 = vadd.f32 %v742_v11, %v635_v41 }
 0x184   :  { %v744_v46 = vadd.f32 %v989_v33, %v743_v44  ;;  %v812_v47 = vadd.f32 %v811_v43, %v781_v42 }
 0x185   :  { %v993_v48 = vpop.f32.mrb[4].mxu1 }
 0x186   :  { %v813_v50 = vadd.f32 %v812_v47, %v782_v45  ;;  %717 = vst [vmem:[%s1425_s6 + $0xb0] sm:$0xff] %v993_v48  ;;  %v648_v51 = vpop.f32.mrb[5].mxu1  ;;  %v745_v52 = vadd.f32 %v990_v39, %v744_v46  ;;  %v786_v61 = vmul.f32 %v993_v48, %v993_v48 }
 0x187   :  { %715 = vst [vmem:[%s1425_s6 + $0xa0] sm:$0xff] %v648_v51  ;;  %v784_v53 = vmul.f32 %v648_v51, %v648_v51  ;;  %v994_v54 = vpop.f32.mrb[6].mxu1 }
 0x188   :  { %v746_v55 = vadd.f32 %v745_v52, %v648_v51  ;;  %v814_v56 = vadd.f32 %v813_v50, %v783_v49  ;;  %718 = vst [vmem:[%s1425_s6 + $0xb8] sm:$0xff] %v994_v54  ;;  %v651_v57 = vpop.f32.mrb[7].mxu1  ;;  %v787_v2 = vmul.f32 %v994_v54, %v994_v54 }
 0x189   :  { %716 = vst [vmem:[%s1425_s6 + $0xa8] sm:$0xff] %v651_v57  ;;  %v785_v58 = vmul.f32 %v651_v57, %v651_v57 }
 0x18a   :  { %v815_v59 = vadd.f32 %v814_v56, %v784_v53  ;;  %v747_v60 = vadd.f32 %v746_v55, %v651_v57 }
 0x18c   :  { %v748_v62 = vadd.f32 %v993_v48, %v747_v60  ;;  %v816_v63 = vadd.f32 %v815_v59, %v785_v58 }
 0x18d   :  { %v997_v0 = vpop.f32.mrb[8].mxu1 }
 0x18e   :  { %v817_v3 = vadd.f32 %v816_v63, %v786_v61  ;;  %721 = vst [vmem:[%s1425_s6 + $0xd0] sm:$0xff] %v997_v0  ;;  %v664_v4 = vpop.f32.mrb[9].mxu1  ;;  %v749_v5 = vadd.f32 %v994_v54, %v748_v62  ;;  %v790_v15 = vmul.f32 %v997_v0, %v997_v0 }
 0x18f   :  { %719 = vst [vmem:[%s1425_s6 + $0xc0] sm:$0xff] %v664_v4  ;;  %v788_v6 = vmul.f32 %v664_v4, %v664_v4  ;;  %v998_v7 = vpop.f32.mrb[10].mxu1 }
 0x190   :  { %v750_v8 = vadd.f32 %v749_v5, %v664_v4  ;;  %v818_v9 = vadd.f32 %v817_v3, %v787_v2  ;;  %722 = vst [vmem:[%s1425_s6 + $0xd8] sm:$0xff] %v998_v7  ;;  %v667_v10 = vpop.f32.mrb[11].mxu1  ;;  %v791_v19 = vmul.f32 %v998_v7, %v998_v7 }
 0x191   :  { %720 = vst [vmem:[%s1425_s6 + $0xc8] sm:$0xff] %v667_v10  ;;  %v789_v12 = vmul.f32 %v667_v10, %v667_v10 }
 0x192   :  { %v819_v13 = vadd.f32 %v818_v9, %v788_v6  ;;  %v751_v14 = vadd.f32 %v750_v8, %v667_v10 }
 0x194   :  { %v752_v16 = vadd.f32 %v997_v0, %v751_v14  ;;  %v820_v17 = vadd.f32 %v819_v13, %v789_v12 }
 0x195   :  { %v1001_v18 = vpop.f32.mrb[12].mxu1 }
 0x196   :  { %v821_v20 = vadd.f32 %v820_v17, %v790_v15  ;;  %725 = vst [vmem:[%s1425_s6 + $0xf0] sm:$0xff] %v1001_v18  ;;  %v680_v21 = vpop.f32.mrb[13].mxu1  ;;  %v753_v22 = vadd.f32 %v998_v7, %v752_v16  ;;  %v794_v31 = vmul.f32 %v1001_v18, %v1001_v18 }
 0x197   :  { %723 = vst [vmem:[%s1425_s6 + $0xe0] sm:$0xff] %v680_v21  ;;  %v792_v23 = vmul.f32 %v680_v21, %v680_v21  ;;  %v1002_v24 = vpop.f32.mrb[14].mxu1 }
 0x198   :  { %v754_v25 = vadd.f32 %v753_v22, %v680_v21  ;;  %v822_v26 = vadd.f32 %v821_v20, %v791_v19  ;;  %726 = vst [vmem:[%s1425_s6 + $0xf8] sm:$0xff] %v1002_v24  ;;  %v683_v27 = vpop.f32.mrb[15].mxu1  ;;  %v795_v33 = vmul.f32 %v1002_v24, %v1002_v24 }
 0x199   :  { %724 = vst [vmem:[%s1425_s6 + $0xe8] sm:$0xff] %v683_v27  ;;  %v793_v28 = vmul.f32 %v683_v27, %v683_v27 }
 0x19a   :  { %v823_v29 = vadd.f32 %v822_v26, %v792_v23  ;;  %v755_v30 = vadd.f32 %v754_v25, %v683_v27 }
 0x19c   :  { %v756_v32 = vadd.f32 %v1001_v18, %v755_v30  ;;  %v824_v1 = vadd.f32 %v823_v29, %v793_v28 }
 0x19e   :  { %v757_v34 = vadd.f32 %v1002_v24, %v756_v32  ;;  %v825_v35 = vadd.f32 %v824_v1, %v794_v31 }
 0x1a0   :  { %v758_v36 = vrot.slane %v757_v34, 4  ;;  %v826_v37 = vadd.f32 %v825_v35, %v795_v33 }
 0x1a2   :  { %v759_v38 = vadd.f32 %v758_v36, %v757_v34  ;;  %v827_v39 = vrot.slane %v826_v37, 4 }
 0x1a4   :  { %v760_v11 = vrot.slane %v759_v38, 2  ;;  %v828_v40 = vadd.f32 %v827_v39, %v826_v37 }
 0x1a6   :  { %v761_v41 = vadd.f32 %v760_v11, %v759_v38  ;;  %v829_v42 = vrot.slane %v828_v40, 2 }
 0x1a8   :  { %v762_v43 = vrot.slane %v761_v41, 1  ;;  %v830_v44 = vadd.f32 %v829_v42, %v828_v40 }
 0x1aa   :  { %v831_v45 = vrot.slane %v830_v44, 1  ;;  %v763_v46 = vadd.f32 %v762_v43, %v761_v41 }
 0x1ac   :  { %v832_v47 = vadd.f32 %v831_v45, %v830_v44 }
 0x1ae   :  { %v834_v48 = vsel %vm833_vm0, %v763_v46, %v832_v47 }
 0x1af   :  { %835 = vst [vmem:[%s1426_s7] sm:$0x3] %v834_v48 }

// kernel: _lambda_.4
= control target key start
LH: loop header
LB: loop body
LE: loop exit
PB: predicated region body
PF: predicated region fallthrough
CT: control target
= control target key end

     0   :  { %12 = vsyncpa [#allocation3], 0  ;;  %s1718_s21 = smov [#allocation2]   ;;  %s1942_s0 = inlined_call_operand.vmem [shape: bf16[256,128], index: 0, kind: input, shape index: {}]   ;;  %s1943_s1 = inlined_call_operand.hbm [shape: bf16[128,128], index: 1, kind: input, shape index: {}]   ;;  %s1944_s2 = inlined_call_operand.vmem [shape: bf16[128,128], index: 2, kind: input, shape index: {}]   ;;  %s1945_s3 = inlined_call_operand.vmem [shape: bf16[256,128], index: 3, kind: output, shape index: {0}]   ;;  %s1946_s4 = inlined_call_operand.vmem [shape: f32[1,2,128], index: 4, kind: output, shape index: {1}]   ;;  %s1947_s5 = inlined_call_operand.vmem [shape: bf16[256,128], index: 5, kind: output, shape index: {2}]   ;;  %s1948_s6 = inlined_call_operand.vmem [shape: f32[1,2,128], index: 6, kind: output, shape index: {3}]  }
   0x1   :  { %s20_s22 = sshll.u32 %s1718_s21, 4  ;;  %s1694_s25 = scalar_lea.hbm %s1943_s1, 1024  ;;  %s21_s22 = int_to_ptr.vmem [resolvable:$true] %s20_s22 }
   0x2   :  { %p1695_p0 = scmp.ne.s32.totalorder %s1943_s1, %s1694_s25  ;;  %p1698_p1 = scmp.lt.u32.totalorder %s1694_s25, %s1943_s1 }
   0x4   :  { %p1700_p2 = pnand %p1698_p1, %p1695_p0 }
   0x6   :  { %1703 = shalt.err (!%p1700_p2)
}
   0x7   :  { %s1704_s30 = scalar_lea.vmem %s21_s22, 1024  ;;  %p1709_p4 = scmp.lt.s32.totalorder %s21_s22, %s21_s22 }
   0x8   :  { %p1705_p3 = scmp.ne.s32.totalorder %s21_s22, %s1704_s30  ;;  %p1710_p5 = scmp.lt.s32.totalorder %s1704_s30, %s1704_s30 }
   0xa   :  { %p1711_p6 = por %p1710_p5, %p1709_p4 }
   0xc   :  { %p1712_p7 = pnand %p1711_p6, %p1705_p3 }
   0xe   :  { %1715 = shalt.err (!%p1712_p7)
}
   0xf   :  { %s1719_s7 = smov 64   ;;  %s1720_s8 = smov 4  }
  0x10   :  { %26 = dma.hbm_to_vmem [thread:$0]  %s1943_s1, 1024, %s21_s22, [#allocation3], %s1719_s7, %s1719_s7, %s1720_s8  }
  0x11   :  { %1716 = dma.done.wait [#allocation3], 1024  }
  0x12   :  { %1717 = vsyncadd [#allocation3], 4294966272  ;;  %v1662_v0 = vld [vmem:[#allocation2] sm:$0xff]   ;;  %v1664_v2 = vld [vmem:[#allocation2 + $0x8] sm:$0xff]   ;;  %vm652_vm0 = vcmask 1040384  }
  0x13   :  { %v1663_v1 = vld [vmem:[%s1944_s2] sm:$0xff]   ;;  %1563 = vmatprep.subr.bf16.mxu0 %v1662_v0  ;;  %v1665_v3 = vld [vmem:[%s1944_s2 + $0x8] sm:$0xff]   ;;  %v1666_v4 = vld [vmem:[#allocation2 + $0x10] sm:$0xff]  }
  0x14   :  { %1611 = vmatprep.subr.bf16.mxu1 %v1663_v1  ;;  %1564 = vmatpush3.bf16.msra.mxu0 %v1662_v0  ;;  %v1667_v5 = vld [vmem:[%s1944_s2 + $0x10] sm:$0xff]   ;;  %v1668_v6 = vld [vmem:[#allocation2 + $0x18] sm:$0xff]   ;;  %v1670_v8 = vld [vmem:[#allocation2 + $0x20] sm:$0xff]  }
  0x15   :  { %1612 = vmatpush3.bf16.msra.mxu1 %v1663_v1  ;;  %1565 = vmatprep.subr.bf16.mxu0 %v1664_v2  ;;  %v1669_v7 = vld [vmem:[%s1944_s2 + $0x18] sm:$0xff]   ;;  %v1671_v9 = vld [vmem:[%s1944_s2 + $0x20] sm:$0xff]   ;;  %v1672_v10 = vld [vmem:[#allocation2 + $0x28] sm:$0xff]  }
  0x16   :  { %1613 = vmatprep.subr.bf16.mxu1 %v1665_v3  ;;  %v1678_v11 = vld [vmem:[%s1942_s0] sm:$0xff]   ;;  %v1673_v12 = vld [vmem:[%s1944_s2 + $0x28] sm:$0xff]   ;;  %v1674_v13 = vld [vmem:[#allocation2 + $0x30] sm:$0xff]  }
  0x17   :  { %1579 = vmatprep.mubr.bf16.mxu0 %v1678_v11  ;;  %1627 = vmatprep.mubr.bf16.mxu1 %v1678_v11  ;;  %v1675_v14 = vld [vmem:[%s1944_s2 + $0x30] sm:$0xff]   ;;  %v1676_v15 = vld [vmem:[#allocation2 + $0x38] sm:$0xff]   ;;  %v1679_v17 = vld [vmem:[%s1942_s0 + $0x8] sm:$0xff]  }
  0x18   :  { %1566 = vmatpush3.bf16.msra.mxu0 %v1664_v2  ;;  %v1677_v16 = vld [vmem:[%s1944_s2 + $0x38] sm:$0xff]   ;;  %v1680_v18 = vld [vmem:[%s1942_s0 + $0x10] sm:$0xff]   ;;  %v1682_v20 = vld [vmem:[%s1942_s0 + $0x20] sm:$0xff]  }
  0x19   :  { %1614 = vmatpush3.bf16.msra.mxu1 %v1665_v3  ;;  %1567 = vmatprep.subr.bf16.mxu0 %v1666_v4  ;;  %v1681_v19 = vld [vmem:[%s1942_s0 + $0x18] sm:$0xff]   ;;  %v1683_v21 = vld [vmem:[%s1942_s0 + $0x28] sm:$0xff]   ;;  %v1684_v22 = vld [vmem:[%s1942_s0 + $0x30] sm:$0xff]  }
  0x1a   :  { %1615 = vmatprep.subr.bf16.mxu1 %v1667_v5  ;;  %v1685_v23 = vld [vmem:[%s1942_s0 + $0x38] sm:$0xff]   ;;  %v1686_v24 = vld [vmem:[%s1942_s0 + $0x40] sm:$0xff]   ;;  %v1687_v25 = vld [vmem:[%s1942_s0 + $0x48] sm:$0xff]  }
  0x1b   :  { %v1688_v26 = vld [vmem:[%s1942_s0 + $0x50] sm:$0xff]   ;;  %v1689_v27 = vld [vmem:[%s1942_s0 + $0x58] sm:$0xff]   ;;  %v1690_v28 = vld [vmem:[%s1942_s0 + $0x60] sm:$0xff]  }
  0x1c   :  { %1568 = vmatpush3.bf16.msra.mxu0 %v1666_v4  ;;  %v1691_v29 = vld [vmem:[%s1942_s0 + $0x68] sm:$0xff]   ;;  %v1692_v30 = vld [vmem:[%s1942_s0 + $0x70] sm:$0xff]   ;;  %v1693_v31 = vld [vmem:[%s1942_s0 + $0x78] sm:$0xff]  }
  0x1d   :  { %1616 = vmatpush3.bf16.msra.mxu1 %v1667_v5  ;;  %1569 = vmatprep.subr.bf16.mxu0 %v1668_v6 }
  0x1e   :  { %1617 = vmatprep.subr.bf16.mxu1 %v1669_v7 }
  0x20   :  { %1570 = vmatpush3.bf16.msra.mxu0 %v1668_v6 }
  0x21   :  { %1618 = vmatpush3.bf16.msra.mxu1 %v1669_v7  ;;  %1571 = vmatprep.subr.bf16.mxu0 %v1670_v8 }
  0x22   :  { %1619 = vmatprep.subr.bf16.mxu1 %v1671_v9 }
  0x24   :  { %1572 = vmatpush3.bf16.msra.mxu0 %v1670_v8 }
  0x25   :  { %1620 = vmatpush3.bf16.msra.mxu1 %v1671_v9  ;;  %1573 = vmatprep.subr.bf16.mxu0 %v1672_v10 }
  0x26   :  { %1621 = vmatprep.subr.bf16.mxu1 %v1673_v12 }
  0x28   :  { %1574 = vmatpush3.bf16.msra.mxu0 %v1672_v10 }
  0x29   :  { %1622 = vmatpush3.bf16.msra.mxu1 %v1673_v12  ;;  %1575 = vmatprep.subr.bf16.mxu0 %v1674_v13 }
  0x2a   :  { %1623 = vmatprep.subr.bf16.mxu1 %v1675_v14 }
  0x2c   :  { %1576 = vmatpush3.bf16.msra.mxu0 %v1674_v13 }
  0x2d   :  { %1624 = vmatpush3.bf16.msra.mxu1 %v1675_v14  ;;  %1577 = vmatprep.subr.bf16.mxu0 %v1676_v15 }
  0x2e   :  { %1625 = vmatprep.subr.bf16.mxu1 %v1677_v16 }
  0x30   :  { %1578 = vmatpush3.bf16.msra.mxu0 %v1676_v15 }
  0x31   :  { %1626 = vmatpush3.bf16.msra.mxu1 %v1677_v16 }
  0x33   :  { %1580 = vmatmul.mubr.bf16.vlgmr.msra.gmra.mrb[0].mxu0 %v1679_v17 }
  0x34   :  { %1628 = vmatmul.mubr.bf16.vlgmr.msra.gmra.mrb[0].mxu1 %v1679_v17  ;;  %1583 = vmatprep.mubr.bf16.mxu0 %v1680_v18 }
  0x35   :  { %1631 = vmatprep.mubr.bf16.mxu1 %v1680_v18 }
  0x3b   :  { %1584 = vmatmul.mubr.bf16.gmra.mrb[4].mxu0 %v1681_v19 }
  0x3c   :  { %1632 = vmatmul.mubr.bf16.gmra.mrb[4].mxu1 %v1681_v19  ;;  %1587 = vmatprep.mubr.bf16.mxu0 %v1682_v20 }
  0x3d   :  { %1635 = vmatprep.mubr.bf16.mxu1 %v1682_v20 }
  0x43   :  { %1588 = vmatmul.mubr.bf16.gmra.mrb[8].mxu0 %v1683_v21 }
  0x44   :  { %1636 = vmatmul.mubr.bf16.gmra.mrb[8].mxu1 %v1683_v21  ;;  %1591 = vmatprep.mubr.bf16.mxu0 %v1684_v22 }
  0x45   :  { %1639 = vmatprep.mubr.bf16.mxu1 %v1684_v22 }
  0x4b   :  { %1592 = vmatmul.mubr.bf16.gmra.mrb[12].mxu0 %v1685_v23 }
  0x4c   :  { %1640 = vmatmul.mubr.bf16.gmra.mrb[12].mxu1 %v1685_v23  ;;  %1595 = vmatprep.mubr.bf16.mxu0 %v1686_v24 }
  0x4d   :  { %1643 = vmatprep.mubr.bf16.mxu1 %v1686_v24 }
  0x53   :  { %1596 = vmatmul.mubr.bf16.gmra.mrb[16].mxu0 %v1687_v25 }
  0x54   :  { %1644 = vmatmul.mubr.bf16.gmra.mrb[16].mxu1 %v1687_v25  ;;  %1599 = vmatprep.mubr.bf16.mxu0 %v1688_v26 }
  0x55   :  { %1647 = vmatprep.mubr.bf16.mxu1 %v1688_v26 }
  0x5b   :  { %1600 = vmatmul.mubr.bf16.gmra.mrb[20].mxu0 %v1689_v27 }
  0x5c   :  { %1648 = vmatmul.mubr.bf16.gmra.mrb[20].mxu1 %v1689_v27  ;;  %1603 = vmatprep.mubr.bf16.mxu0 %v1690_v28 }
  0x5d   :  { %1651 = vmatprep.mubr.bf16.mxu1 %v1690_v28 }
  0x63   :  { %1604 = vmatmul.mubr.bf16.gmra.mrb[24].mxu0 %v1691_v29 }
  0x64   :  { %1652 = vmatmul.mubr.bf16.gmra.mrb[24].mxu1 %v1691_v29  ;;  %1607 = vmatprep.mubr.bf16.mxu0 %v1692_v30 }
  0x65   :  { %1655 = vmatprep.mubr.bf16.mxu1 %v1692_v30 }
  0x6b   :  { %1608 = vmatmul.mubr.bf16.gmra.mrb[28].mxu0 %v1693_v31 }
  0x6c   :  { %1656 = vmatmul.mubr.bf16.gmra.mrb[28].mxu1 %v1693_v31 }
 0x106   :  { %v1581_v32 = vpop.f32.mrb[0].mxu0 }
 0x107   :  { %v1629_v33 = vpop.f32.mrb[0].mxu1  ;;  %v259_v34 = vpop.f32.mrb[1].mxu0  ;;  %v585_v50 = vmul.f32 %v1581_v32, %v1581_v32 }
 0x108   :  { %v753_v35 = vpop.f32.mrb[1].mxu1  ;;  %v1582_v36 = vpop.f32.mrb[2].mxu0  ;;  %v583_v37 = vmul.f32 %v259_v34, %v259_v34  ;;  %v1079_v52 = vmul.f32 %v1629_v33, %v1629_v33 }
 0x109   :  { %v1333_v38 = vpack.c.bf16 %v1582_v36, %v1581_v32  ;;  %v1630_v39 = vpop.f32.mrb[2].mxu1  ;;  %v262_v40 = vpop.f32.mrb[3].mxu0  ;;  %v1077_v41 = vmul.f32 %v753_v35, %v753_v35  ;;  %v586_v56 = vmul.f32 %v1582_v36, %v1582_v36 }
 0x10a   :  { %v1413_v42 = vpack.c.bf16 %v1630_v39, %v1629_v33  ;;  %v1328_v43 = vpack.c.bf16 %v262_v40, %v259_v34  ;;  %v546_v44 = vadd.f32 %v262_v40, %v259_v34  ;;  %v756_v45 = vpop.f32.mrb[3].mxu1  ;;  %v584_v46 = vmul.f32 %v262_v40, %v262_v40 }
 0x10b   :  { %1485 = vst [vmem:[%s1945_s3 + $0x8] sm:$0xff] %v1333_v38   ;;  %v1408_v47 = vpack.c.bf16 %v756_v45, %v753_v35  ;;  %v1040_v48 = vadd.f32 %v756_v45, %v753_v35  ;;  %v1078_v49 = vmul.f32 %v756_v45, %v756_v45  ;;  %v1080_v59 = vmul.f32 %v1630_v39, %v1630_v39 }
 0x10c   :  { %1500 = vst [vmem:[%s1947_s5 + $0x8] sm:$0xff] %v1413_v42   ;;  %1329 = vst [vmem:[%s1945_s3] sm:$0xff] %v1328_v43   ;;  %v547_v51 = vadd.f32 %v1581_v32, %v546_v44  ;;  %v615_v53 = vadd.f32 %v584_v46, %v583_v37 }
 0x10d   :  { %1409 = vst [vmem:[%s1947_s5] sm:$0xff] %v1408_v47   ;;  %v1041_v54 = vadd.f32 %v1629_v33, %v1040_v48  ;;  %v1109_v55 = vadd.f32 %v1078_v49, %v1077_v41 }
 0x10e   :  { %v1585_v57 = vpop.f32.mrb[4].mxu0  ;;  %v548_v58 = vadd.f32 %v1582_v36, %v547_v51  ;;  %v616_v60 = vadd.f32 %v615_v53, %v585_v50 }
 0x10f   :  { %v1110_v61 = vadd.f32 %v1109_v55, %v1079_v52  ;;  %v1633_v62 = vpop.f32.mrb[4].mxu1  ;;  %v275_v63 = vpop.f32.mrb[5].mxu0  ;;  %v1042_v0 = vadd.f32 %v1630_v39, %v1041_v54  ;;  %v589_v22 = vmul.f32 %v1585_v57, %v1585_v57 }
 0x110   :  { %v549_v1 = vadd.f32 %v548_v58, %v275_v63  ;;  %v587_v2 = vmul.f32 %v275_v63, %v275_v63  ;;  %v769_v3 = vpop.f32.mrb[5].mxu1  ;;  %v1586_v4 = vpop.f32.mrb[6].mxu0  ;;  %v617_v5 = vadd.f32 %v616_v60, %v586_v56  ;;  %v1083_v24 = vmul.f32 %v1633_v62, %v1633_v62 }
 0x111   :  { %v1043_v6 = vadd.f32 %v1042_v0, %v769_v3  ;;  %v1081_v7 = vmul.f32 %v769_v3, %v769_v3  ;;  %v1111_v8 = vadd.f32 %v1110_v61, %v1080_v59  ;;  %v1634_v9 = vpop.f32.mrb[6].mxu1  ;;  %v278_v10 = vpop.f32.mrb[7].mxu0  ;;  %v1343_v11 = vpack.c.bf16 %v1586_v4, %v1585_v57 }
 0x112   :  { %v1423_v12 = vpack.c.bf16 %v1634_v9, %v1633_v62  ;;  %v772_v13 = vpop.f32.mrb[7].mxu1  ;;  %v618_v14 = vadd.f32 %v617_v5, %v587_v2  ;;  %v1338_v16 = vpack.c.bf16 %v278_v10, %v275_v63  ;;  %v550_v17 = vadd.f32 %v549_v1, %v278_v10 }
 0x113   :  { %v1112_v15 = vadd.f32 %v1111_v8, %v1081_v7  ;;  %1487 = vst [vmem:[%s1945_s3 + $0x18] sm:$0xff] %v1343_v11   ;;  %v588_v18 = vmul.f32 %v278_v10, %v278_v10  ;;  %v1418_v19 = vpack.c.bf16 %v772_v13, %v769_v3  ;;  %v1044_v20 = vadd.f32 %v1043_v6, %v772_v13 }
 0x114   :  { %1502 = vst [vmem:[%s1947_s5 + $0x18] sm:$0xff] %v1423_v12   ;;  %v1082_v21 = vmul.f32 %v772_v13, %v772_v13  ;;  %1486 = vst [vmem:[%s1945_s3 + $0x10] sm:$0xff] %v1338_v16   ;;  %v551_v23 = vadd.f32 %v1585_v57, %v550_v17  ;;  %v590_v29 = vmul.f32 %v1586_v4, %v1586_v4 }
 0x115   :  { %v619_v25 = vadd.f32 %v618_v14, %v588_v18  ;;  %1501 = vst [vmem:[%s1947_s5 + $0x10] sm:$0xff] %v1418_v19   ;;  %v1045_v26 = vadd.f32 %v1633_v62, %v1044_v20  ;;  %v1084_v33 = vmul.f32 %v1634_v9, %v1634_v9 }
 0x116   :  { %v1113_v27 = vadd.f32 %v1112_v15, %v1082_v21  ;;  %v1589_v28 = vpop.f32.mrb[8].mxu0  ;;  %v552_v32 = vadd.f32 %v1586_v4, %v551_v23 }
 0x117   :  { %v1637_v30 = vpop.f32.mrb[8].mxu1  ;;  %v291_v31 = vpop.f32.mrb[9].mxu0  ;;  %v620_v34 = vadd.f32 %v619_v25, %v589_v22  ;;  %v1046_v40 = vadd.f32 %v1634_v9, %v1045_v26  ;;  %v593_v59 = vmul.f32 %v1589_v28, %v1589_v28 }
 0x118   :  { %v1114_v35 = vadd.f32 %v1113_v27, %v1083_v24  ;;  %v591_v36 = vmul.f32 %v291_v31, %v291_v31  ;;  %v785_v37 = vpop.f32.mrb[9].mxu1  ;;  %v1590_v38 = vpop.f32.mrb[10].mxu0  ;;  %v553_v39 = vadd.f32 %v552_v32, %v291_v31  ;;  %v1087_v62 = vmul.f32 %v1637_v30, %v1637_v30 }
 0x119   :  { %v1085_v41 = vmul.f32 %v785_v37, %v785_v37  ;;  %v1353_v42 = vpack.c.bf16 %v1590_v38, %v1589_v28  ;;  %v1638_v43 = vpop.f32.mrb[10].mxu1  ;;  %v294_v44 = vpop.f32.mrb[11].mxu0  ;;  %v621_v45 = vadd.f32 %v620_v34, %v590_v29  ;;  %v1047_v49 = vadd.f32 %v1046_v40, %v785_v37 }
 0x11a   :  { %v1115_v46 = vadd.f32 %v1114_v35, %v1084_v33  ;;  %v1433_v47 = vpack.c.bf16 %v1638_v43, %v1637_v30  ;;  %v788_v48 = vpop.f32.mrb[11].mxu1  ;;  %v1348_v50 = vpack.c.bf16 %v294_v44, %v291_v31  ;;  %v554_v51 = vadd.f32 %v553_v39, %v294_v44 }
 0x11b   :  { %1489 = vst [vmem:[%s1945_s3 + $0x28] sm:$0xff] %v1353_v42   ;;  %v622_v52 = vadd.f32 %v621_v45, %v591_v36  ;;  %v592_v54 = vmul.f32 %v294_v44, %v294_v44  ;;  %v1428_v55 = vpack.c.bf16 %v788_v48, %v785_v37  ;;  %v1048_v57 = vadd.f32 %v1047_v49, %v788_v48 }
 0x11c   :  { %v1116_v53 = vadd.f32 %v1115_v46, %v1085_v41  ;;  %1504 = vst [vmem:[%s1947_s5 + $0x28] sm:$0xff] %v1433_v47   ;;  %1488 = vst [vmem:[%s1945_s3 + $0x20] sm:$0xff] %v1348_v50   ;;  %v555_v56 = vadd.f32 %v1589_v28, %v554_v51  ;;  %v1086_v58 = vmul.f32 %v788_v48, %v788_v48 }
 0x11d   :  { %v623_v60 = vadd.f32 %v622_v52, %v592_v54  ;;  %1503 = vst [vmem:[%s1947_s5 + $0x20] sm:$0xff] %v1428_v55   ;;  %v1049_v63 = vadd.f32 %v1637_v30, %v1048_v57  ;;  %v594_v4 = vmul.f32 %v1590_v38, %v1590_v38  ;;  %v1088_v5 = vmul.f32 %v1638_v43, %v1638_v43 }
 0x11e   :  { %v1593_v61 = vpop.f32.mrb[12].mxu0  ;;  %v1117_v0 = vadd.f32 %v1116_v53, %v1086_v58  ;;  %v556_v3 = vadd.f32 %v1590_v38, %v555_v56 }
 0x11f   :  { %v1641_v1 = vpop.f32.mrb[12].mxu1  ;;  %v307_v2 = vpop.f32.mrb[13].mxu0  ;;  %v624_v6 = vadd.f32 %v623_v60, %v593_v59  ;;  %v1050_v12 = vadd.f32 %v1638_v43, %v1049_v63  ;;  %v597_v30 = vmul.f32 %v1593_v61, %v1593_v61 }
 0x120   :  { %v595_v7 = vmul.f32 %v307_v2, %v307_v2  ;;  %v801_v8 = vpop.f32.mrb[13].mxu1  ;;  %v1594_v9 = vpop.f32.mrb[14].mxu0  ;;  %v1118_v10 = vadd.f32 %v1117_v0, %v1087_v62  ;;  %v557_v11 = vadd.f32 %v556_v3, %v307_v2  ;;  %v1091_v34 = vmul.f32 %v1641_v1, %v1641_v1 }
 0x121   :  { %v1089_v13 = vmul.f32 %v801_v8, %v801_v8  ;;  %v1642_v14 = vpop.f32.mrb[14].mxu1  ;;  %v310_v15 = vpop.f32.mrb[15].mxu0  ;;  %v625_v16 = vadd.f32 %v624_v6, %v594_v4  ;;  %v1363_v17 = vpack.c.bf16 %v1594_v9, %v1593_v61  ;;  %v1051_v20 = vadd.f32 %v1050_v12, %v801_v8 }
 0x122   :  { %v1443_v18 = vpack.c.bf16 %v1642_v14, %v1641_v1  ;;  %v804_v19 = vpop.f32.mrb[15].mxu1  ;;  %v1119_v21 = vadd.f32 %v1118_v10, %v1088_v5  ;;  %v1358_v22 = vpack.c.bf16 %v310_v15, %v307_v2  ;;  %v558_v24 = vadd.f32 %v557_v11, %v310_v15 }
 0x123   :  { %v626_v23 = vadd.f32 %v625_v16, %v595_v7  ;;  %1491 = vst [vmem:[%s1945_s3 + $0x38] sm:$0xff] %v1363_v17   ;;  %v596_v25 = vmul.f32 %v310_v15, %v310_v15  ;;  %v1438_v26 = vpack.c.bf16 %v804_v19, %v801_v8  ;;  %v1052_v28 = vadd.f32 %v1051_v20, %v804_v19 }
 0x124   :  { %1506 = vst [vmem:[%s1947_s5 + $0x38] sm:$0xff] %v1443_v18   ;;  %v1120_v27 = vadd.f32 %v1119_v21, %v1089_v13  ;;  %1490 = vst [vmem:[%s1945_s3 + $0x30] sm:$0xff] %v1358_v22   ;;  %v1090_v29 = vmul.f32 %v804_v19, %v804_v19  ;;  %v559_v31 = vadd.f32 %v1593_v61, %v558_v24 }
 0x125   :  { %v627_v32 = vadd.f32 %v626_v23, %v596_v25  ;;  %1505 = vst [vmem:[%s1947_s5 + $0x30] sm:$0xff] %v1438_v26   ;;  %v598_v35 = vmul.f32 %v1594_v9, %v1594_v9  ;;  %v1053_v36 = vadd.f32 %v1641_v1, %v1052_v28  ;;  %v1092_v40 = vmul.f32 %v1642_v14, %v1642_v14 }
 0x126   :  { %v1597_v33 = vpop.f32.mrb[16].mxu0  ;;  %v1121_v37 = vadd.f32 %v1120_v27, %v1090_v29  ;;  %v560_v42 = vadd.f32 %v1594_v9, %v559_v31 }
 0x127   :  { %v1645_v38 = vpop.f32.mrb[16].mxu1  ;;  %v323_v39 = vpop.f32.mrb[17].mxu0  ;;  %v628_v41 = vadd.f32 %v627_v32, %v597_v30  ;;  %v1054_v47 = vadd.f32 %v1642_v14, %v1053_v36  ;;  %v601_v2 = vmul.f32 %v1597_v33, %v1597_v33 }
 0x128   :  { %v599_v43 = vmul.f32 %v323_v39, %v323_v39  ;;  %v817_v44 = vpop.f32.mrb[17].mxu1  ;;  %v1598_v45 = vpop.f32.mrb[18].mxu0  ;;  %v1122_v46 = vadd.f32 %v1121_v37, %v1091_v34  ;;  %v561_v52 = vadd.f32 %v560_v42, %v323_v39  ;;  %v1095_v6 = vmul.f32 %v1645_v38, %v1645_v38 }
 0x129   :  { %v1093_v48 = vmul.f32 %v817_v44, %v817_v44  ;;  %v1373_v49 = vpack.c.bf16 %v1598_v45, %v1597_v33  ;;  %v1646_v50 = vpop.f32.mrb[18].mxu1  ;;  %v326_v51 = vpop.f32.mrb[19].mxu0  ;;  %v629_v53 = vadd.f32 %v628_v41, %v598_v35  ;;  %v1055_v56 = vadd.f32 %v1054_v47, %v817_v44 }
 0x12a   :  { %v1453_v54 = vpack.c.bf16 %v1646_v50, %v1645_v38  ;;  %v820_v55 = vpop.f32.mrb[19].mxu1  ;;  %v1123_v57 = vadd.f32 %v1122_v46, %v1092_v40  ;;  %v1368_v58 = vpack.c.bf16 %v326_v51, %v323_v39  ;;  %v562_v60 = vadd.f32 %v561_v52, %v326_v51 }
 0x12b   :  { %1493 = vst [vmem:[%s1945_s3 + $0x48] sm:$0xff] %v1373_v49   ;;  %v630_v59 = vadd.f32 %v629_v53, %v599_v43  ;;  %v600_v61 = vmul.f32 %v326_v51, %v326_v51  ;;  %v1448_v62 = vpack.c.bf16 %v820_v55, %v817_v44  ;;  %v1056_v0 = vadd.f32 %v1055_v56, %v820_v55 }
 0x12c   :  { %1508 = vst [vmem:[%s1947_s5 + $0x48] sm:$0xff] %v1453_v54   ;;  %v1124_v63 = vadd.f32 %v1123_v57, %v1093_v48  ;;  %1492 = vst [vmem:[%s1945_s3 + $0x40] sm:$0xff] %v1368_v58   ;;  %v1094_v1 = vmul.f32 %v820_v55, %v820_v55  ;;  %v563_v3 = vadd.f32 %v1597_v33, %v562_v60 }
 0x12d   :  { %v631_v4 = vadd.f32 %v630_v59, %v600_v61  ;;  %1507 = vst [vmem:[%s1947_s5 + $0x40] sm:$0xff] %v1448_v62   ;;  %v602_v7 = vmul.f32 %v1598_v45, %v1598_v45  ;;  %v1057_v8 = vadd.f32 %v1645_v38, %v1056_v0  ;;  %v1096_v12 = vmul.f32 %v1646_v50, %v1646_v50 }
 0x12e   :  { %v1601_v5 = vpop.f32.mrb[20].mxu0  ;;  %v1125_v9 = vadd.f32 %v1124_v63, %v1094_v1  ;;  %v564_v14 = vadd.f32 %v1598_v45, %v563_v3 }
 0x12f   :  { %v1649_v10 = vpop.f32.mrb[20].mxu1  ;;  %v339_v11 = vpop.f32.mrb[21].mxu0  ;;  %v632_v13 = vadd.f32 %v631_v4, %v601_v2  ;;  %v1058_v19 = vadd.f32 %v1646_v50, %v1057_v8  ;;  %v605_v38 = vmul.f32 %v1601_v5, %v1601_v5 }
 0x130   :  { %v603_v15 = vmul.f32 %v339_v11, %v339_v11  ;;  %v833_v16 = vpop.f32.mrb[21].mxu1  ;;  %v1602_v17 = vpop.f32.mrb[22].mxu0  ;;  %v1126_v18 = vadd.f32 %v1125_v9, %v1095_v6  ;;  %v565_v24 = vadd.f32 %v564_v14, %v339_v11  ;;  %v1099_v42 = vmul.f32 %v1649_v10, %v1649_v10 }
 0x131   :  { %v1097_v20 = vmul.f32 %v833_v16, %v833_v16  ;;  %v1383_v21 = vpack.c.bf16 %v1602_v17, %v1601_v5  ;;  %v1650_v22 = vpop.f32.mrb[22].mxu1  ;;  %v342_v23 = vpop.f32.mrb[23].mxu0  ;;  %v633_v25 = vadd.f32 %v632_v13, %v602_v7  ;;  %v1059_v28 = vadd.f32 %v1058_v19, %v833_v16 }
 0x132   :  { %v1463_v26 = vpack.c.bf16 %v1650_v22, %v1649_v10  ;;  %v836_v27 = vpop.f32.mrb[23].mxu1  ;;  %v1127_v29 = vadd.f32 %v1126_v18, %v1096_v12  ;;  %v1378_v30 = vpack.c.bf16 %v342_v23, %v339_v11  ;;  %v566_v32 = vadd.f32 %v565_v24, %v342_v23 }
 0x133   :  { %1495 = vst [vmem:[%s1945_s3 + $0x58] sm:$0xff] %v1383_v21   ;;  %v634_v31 = vadd.f32 %v633_v25, %v603_v15  ;;  %v604_v33 = vmul.f32 %v342_v23, %v342_v23  ;;  %v1458_v34 = vpack.c.bf16 %v836_v27, %v833_v16  ;;  %v1060_v36 = vadd.f32 %v1059_v28, %v836_v27 }
 0x134   :  { %1510 = vst [vmem:[%s1947_s5 + $0x58] sm:$0xff] %v1463_v26   ;;  %v1128_v35 = vadd.f32 %v1127_v29, %v1097_v20  ;;  %1494 = vst [vmem:[%s1945_s3 + $0x50] sm:$0xff] %v1378_v30   ;;  %v1098_v37 = vmul.f32 %v836_v27, %v836_v27  ;;  %v567_v39 = vadd.f32 %v1601_v5, %v566_v32 }
 0x135   :  { %v635_v40 = vadd.f32 %v634_v31, %v604_v33  ;;  %1509 = vst [vmem:[%s1947_s5 + $0x50] sm:$0xff] %v1458_v34   ;;  %v606_v43 = vmul.f32 %v1602_v17, %v1602_v17  ;;  %v1061_v44 = vadd.f32 %v1649_v10, %v1060_v36  ;;  %v1100_v48 = vmul.f32 %v1650_v22, %v1650_v22 }
 0x136   :  { %v1605_v41 = vpop.f32.mrb[24].mxu0  ;;  %v1129_v45 = vadd.f32 %v1128_v35, %v1098_v37  ;;  %v568_v50 = vadd.f32 %v1602_v17, %v567_v39 }
 0x137   :  { %v1653_v46 = vpop.f32.mrb[24].mxu1  ;;  %v355_v47 = vpop.f32.mrb[25].mxu0  ;;  %v636_v49 = vadd.f32 %v635_v40, %v605_v38  ;;  %v1062_v55 = vadd.f32 %v1650_v22, %v1061_v44  ;;  %v609_v10 = vmul.f32 %v1605_v41, %v1605_v41 }
 0x138   :  { %v607_v51 = vmul.f32 %v355_v47, %v355_v47  ;;  %v849_v52 = vpop.f32.mrb[25].mxu1  ;;  %v1606_v53 = vpop.f32.mrb[26].mxu0  ;;  %v1130_v54 = vadd.f32 %v1129_v45, %v1099_v42  ;;  %v569_v60 = vadd.f32 %v568_v50, %v355_v47  ;;  %v1103_v14 = vmul.f32 %v1653_v46, %v1653_v46 }
 0x139   :  { %v1101_v56 = vmul.f32 %v849_v52, %v849_v52  ;;  %v1393_v57 = vpack.c.bf16 %v1606_v53, %v1605_v41  ;;  %v1654_v58 = vpop.f32.mrb[26].mxu1  ;;  %v358_v59 = vpop.f32.mrb[27].mxu0  ;;  %v637_v61 = vadd.f32 %v636_v49, %v606_v43  ;;  %v1063_v0 = vadd.f32 %v1062_v55, %v849_v52 }
 0x13a   :  { %v1473_v62 = vpack.c.bf16 %v1654_v58, %v1653_v46  ;;  %v852_v63 = vpop.f32.mrb[27].mxu1  ;;  %v1131_v1 = vadd.f32 %v1130_v54, %v1100_v48  ;;  %v1388_v2 = vpack.c.bf16 %v358_v59, %v355_v47  ;;  %v570_v4 = vadd.f32 %v569_v60, %v358_v59 }
 0x13b   :  { %1497 = vst [vmem:[%s1945_s3 + $0x68] sm:$0xff] %v1393_v57   ;;  %v638_v3 = vadd.f32 %v637_v61, %v607_v51  ;;  %v608_v5 = vmul.f32 %v358_v59, %v358_v59  ;;  %v1468_v6 = vpack.c.bf16 %v852_v63, %v849_v52  ;;  %v1064_v8 = vadd.f32 %v1063_v0, %v852_v63 }
 0x13c   :  { %1512 = vst [vmem:[%s1947_s5 + $0x68] sm:$0xff] %v1473_v62   ;;  %v1132_v7 = vadd.f32 %v1131_v1, %v1101_v56  ;;  %1496 = vst [vmem:[%s1945_s3 + $0x60] sm:$0xff] %v1388_v2   ;;  %v1102_v9 = vmul.f32 %v852_v63, %v852_v63  ;;  %v571_v11 = vadd.f32 %v1605_v41, %v570_v4 }
 0x13d   :  { %v639_v12 = vadd.f32 %v638_v3, %v608_v5  ;;  %1511 = vst [vmem:[%s1947_s5 + $0x60] sm:$0xff] %v1468_v6   ;;  %v610_v15 = vmul.f32 %v1606_v53, %v1606_v53  ;;  %v1065_v16 = vadd.f32 %v1653_v46, %v1064_v8  ;;  %v1104_v20 = vmul.f32 %v1654_v58, %v1654_v58 }
 0x13e   :  { %v1609_v13 = vpop.f32.mrb[28].mxu0  ;;  %v1133_v17 = vadd.f32 %v1132_v7, %v1102_v9  ;;  %v572_v22 = vadd.f32 %v1606_v53, %v571_v11 }
 0x13f   :  { %v1657_v18 = vpop.f32.mrb[28].mxu1  ;;  %v371_v19 = vpop.f32.mrb[29].mxu0  ;;  %v640_v21 = vadd.f32 %v639_v12, %v609_v10  ;;  %v1066_v27 = vadd.f32 %v1654_v58, %v1065_v16  ;;  %v613_v46 = vmul.f32 %v1609_v13, %v1609_v13 }
 0x140   :  { %v611_v23 = vmul.f32 %v371_v19, %v371_v19  ;;  %v865_v24 = vpop.f32.mrb[29].mxu1  ;;  %v1610_v25 = vpop.f32.mrb[30].mxu0  ;;  %v1134_v26 = vadd.f32 %v1133_v17, %v1103_v14  ;;  %v573_v32 = vadd.f32 %v572_v22, %v371_v19  ;;  %v1107_v49 = vmul.f32 %v1657_v18, %v1657_v18 }
 0x141   :  { %v1105_v28 = vmul.f32 %v865_v24, %v865_v24  ;;  %v1403_v29 = vpack.c.bf16 %v1610_v25, %v1609_v13  ;;  %v1658_v30 = vpop.f32.mrb[30].mxu1  ;;  %v374_v31 = vpop.f32.mrb[31].mxu0  ;;  %v641_v33 = vadd.f32 %v640_v21, %v610_v15  ;;  %v1067_v36 = vadd.f32 %v1066_v27, %v865_v24 }
 0x142   :  { %v1483_v34 = vpack.c.bf16 %v1658_v30, %v1657_v18  ;;  %v868_v35 = vpop.f32.mrb[31].mxu1  ;;  %v1135_v37 = vadd.f32 %v1134_v26, %v1104_v20  ;;  %v1398_v38 = vpack.c.bf16 %v374_v31, %v371_v19  ;;  %v574_v40 = vadd.f32 %v573_v32, %v374_v31 }
 0x143   :  { %1499 = vst [vmem:[%s1945_s3 + $0x78] sm:$0xff] %v1403_v29   ;;  %v642_v39 = vadd.f32 %v641_v33, %v611_v23  ;;  %v612_v41 = vmul.f32 %v374_v31, %v374_v31  ;;  %v1478_v42 = vpack.c.bf16 %v868_v35, %v865_v24  ;;  %v1068_v44 = vadd.f32 %v1067_v36, %v868_v35 }
 0x144   :  { %1514 = vst [vmem:[%s1947_s5 + $0x78] sm:$0xff] %v1483_v34   ;;  %v1136_v43 = vadd.f32 %v1135_v37, %v1105_v28  ;;  %1498 = vst [vmem:[%s1945_s3 + $0x70] sm:$0xff] %v1398_v38   ;;  %v1106_v45 = vmul.f32 %v868_v35, %v868_v35  ;;  %v575_v47 = vadd.f32 %v1609_v13, %v574_v40 }
 0x145   :  { %v643_v48 = vadd.f32 %v642_v39, %v612_v41  ;;  %1513 = vst [vmem:[%s1947_s5 + $0x70] sm:$0xff] %v1478_v42   ;;  %v1069_v50 = vadd.f32 %v1657_v18, %v1068_v44  ;;  %v614_v52 = vmul.f32 %v1610_v25, %v1610_v25  ;;  %v1108_v55 = vmul.f32 %v1658_v30, %v1658_v30 }
 0x146   :  { %v1137_v51 = vadd.f32 %v1136_v43, %v1106_v45  ;;  %v576_v53 = vadd.f32 %v1610_v25, %v575_v47 }
 0x147   :  { %v644_v54 = vadd.f32 %v643_v48, %v613_v46  ;;  %v1070_v56 = vadd.f32 %v1658_v30, %v1069_v50 }
 0x148   :  { %v1138_v57 = vadd.f32 %v1137_v51, %v1107_v49  ;;  %v577_v58 = vrot.slane %v576_v53, 4 }
 0x149   :  { %v645_v59 = vadd.f32 %v644_v54, %v614_v52  ;;  %v1071_v60 = vrot.slane %v1070_v56, 4 }
 0x14a   :  { %v1139_v61 = vadd.f32 %v1138_v57, %v1108_v55  ;;  %v578_v62 = vadd.f32 %v577_v58, %v576_v53 }
 0x14b   :  { %v646_v63 = vrot.slane %v645_v59, 4  ;;  %v1072_v0 = vadd.f32 %v1071_v60, %v1070_v56 }
 0x14c   :  { %v1140_v1 = vrot.slane %v1139_v61, 4  ;;  %v579_v2 = vrot.slane %v578_v62, 2 }
 0x14d   :  { %v647_v3 = vadd.f32 %v646_v63, %v645_v59  ;;  %v1073_v4 = vrot.slane %v1072_v0, 2 }
 0x14e   :  { %v1141_v5 = vadd.f32 %v1140_v1, %v1139_v61  ;;  %v580_v6 = vadd.f32 %v579_v2, %v578_v62 }
 0x14f   :  { %v648_v7 = vrot.slane %v647_v3, 2  ;;  %v1074_v8 = vadd.f32 %v1073_v4, %v1072_v0 }
 0x150   :  { %v1142_v9 = vrot.slane %v1141_v5, 2  ;;  %v581_v10 = vrot.slane %v580_v6, 1 }
 0x151   :  { %v649_v11 = vadd.f32 %v648_v7, %v647_v3  ;;  %v1075_v12 = vrot.slane %v1074_v8, 1 }
 0x152   :  { %v1143_v13 = vadd.f32 %v1142_v9, %v1141_v5  ;;  %v582_v16 = vadd.f32 %v581_v10, %v580_v6 }
 0x153   :  { %v650_v14 = vrot.slane %v649_v11, 1  ;;  %v1076_v18 = vadd.f32 %v1075_v12, %v1074_v8 }
 0x154   :  { %v1144_v15 = vrot.slane %v1143_v13, 1 }
 0x155   :  { %v651_v17 = vadd.f32 %v650_v14, %v649_v11 }
 0x156   :  { %v1145_v19 = vadd.f32 %v1144_v15, %v1143_v13 }
 0x157   :  { %v653_v20 = vsel %vm652_vm0, %v582_v16, %v651_v17 }
 0x158   :  { %654 = vst [vmem:[%s1946_s4] sm:$0x3] %v653_v20  ;;  %v1146_v21 = vsel %vm652_vm0, %v1076_v18, %v1145_v19 }
 0x159   :  { %1147 = vst [vmem:[%s1948_s6] sm:$0x3] %v1146_v21 }
 0x15a   :  { %1164 = vsyncpa [#allocation3], 1 }

// kernel: _lambda_.5
= control target key start
LH: loop header
LB: loop body
LE: loop exit
PB: predicated region body
PF: predicated region fallthrough
CT: control target
= control target key end

     0   :  { %s8658_s0 = inlined_call_operand.vmem [shape: bf16[2,128,128], index: 0, kind: input, shape index: {}]   ;;  %s8659_s1 = inlined_call_operand.vmem [shape: f32[128,1], index: 1, kind: input, shape index: {}]   ;;  %s8660_s2 = inlined_call_operand.vmem [shape: f32[80,1], index: 2, kind: input, shape index: {}]   ;;  %s8661_s3 = inlined_call_operand.vmem [shape: f32[2,128], index: 3, kind: input, shape index: {}]   ;;  %s8662_s4 = inlined_call_operand.vmem [shape: f32[1,128], index: 4, kind: input, shape index: {}]   ;;  %s8663_s5 = inlined_call_operand.vmem [shape: f32[1,128], index: 5, kind: input, shape index: {}]   ;;  %s8664_s6 = inlined_call_operand.hbm [shape: bf16[9,128,128], index: 6, kind: input, shape index: {}]   ;;  %s8665_s7 = inlined_call_operand.vmem [shape: bf16[9,128,128], index: 7, kind: input, shape index: {}]   ;;  %s8666_s8 = inlined_call_operand.vmem [shape: f32[1,128], index: 8, kind: input, shape index: {}]   ;;  %s8667_s9 = inlined_call_operand.vmem [shape: f32[128,128], index: 9, kind: input, shape index: {}]   ;;  %s8668_s10 = inlined_call_operand.vmem [shape: f32[1,128], index: 10, kind: input, shape index: {}]   ;;  %s8669_s11 = inlined_call_operand.vmem [shape: f32[128,10], index: 11, kind: input, shape index: {}]   ;;  %s8670_s12 = inlined_call_operand.vmem [shape: f32[1,10], index: 12, kind: input, shape index: {}]   ;;  %s8671_s13 = inlined_call_operand.vmem [shape: f32[10,40], index: 13, kind: input, shape index: {}]   ;;  %s8672_s14 = inlined_call_operand.vmem [shape: f32[1,40], index: 14, kind: input, shape index: {}]   ;;  %s8673_s15 = inlined_call_operand.vmem [shape: f32[10,1], index: 15, kind: input, shape index: {}]   ;;  %s8674_s16 = inlined_call_operand.<no memory space> [shape: f32[1,1], index: 16, kind: input, shape index: {}]   ;;  %s8675_s17 = inlined_call_operand.vmem [shape: bf16[2,128,128], index: 17, kind: output, shape index: {0}]   ;;  %s8676_s18 = inlined_call_operand.vmem [shape: f32[2,2,128], index: 18, kind: output, shape index: {1}]  }
   0x1   :  { %8721 = sst [smem:[#allocation38_spill]] %s8658_s0  ;;  %v24_v0 = vstv %s8674_s16 }
   0x2   :  { %8722 = sst [smem:[#allocation39_spill]] %s8659_s1  ;;  %25 = vst [vmem:[#allocation3] sm:$0x1] %v24_v0 }
   0x3   :  { %8723 = sst [smem:[#allocation40_spill]] %s8660_s2 }
   0x4   :  { %26 = vsyncpa [#allocation5], 0  ;;  %s7176_s29 = smov 0  }
   0x5 LB: > { %s7182_s30 = sadd.s32 4294967295, %s7064_s29   ;;  %p5223_p0 = scmp.ge.s32.totalorder %s7064_s29, 1  ;;  %s7064_s29 = sphi %s7176_s29, %s32_s29  }
   0x6   : > { %p451_p1 = scmp.lt.s32.totalorder %s7064_s29, 3  ;;  %s7066_s0 = smov [#allocation4]  }
   0x7   : > { %s478_s16 = sshll.u32 %s7066_s0, 4  ;;  %p8679_p3 = scmp.eq.s32.totalorder %s7182_s30, 0  ;;  %s479_s16 = int_to_ptr.vmem [resolvable:$true] %s478_s16 }
   0x8   : > { %p7186_p2 = pnand %p5223_p0, %p451_p1  ;;  %s7026_s22 = scalar_lea.hbm %s8664_s6, 9216 }
   0x9   : > { %p7027_p6 = scmp.ne.s32.totalorder %s8664_s6, %s7026_s22  ;;  %p7033_p10 = scmp.lt.u32.totalorder %s7026_s22, %s8664_s6 }
   0xa   : > { %s8724_s19 = scalar_select %p7186_p2, 1, 0 }
   0xb   : > { %p6822_p4 = pneg %p7186_p2 }
   0xd   : > { %p7195_p5 = pnand %p8679_p3, %p6822_p4 }
   0xf   : > { %p7028_p7 = pneg %p7195_p5 }
  0x11   : > { %p7029_p8 = pnand %p7028_p7, %p7027_p6 }
  0x13   : > { %p7030_p9 = pneg %p7029_p8 }
  0x15   : > { %p7035_p11 = pnand %p7033_p10, %p7030_p9 }
  0x17   : > { %7038 = shalt.err (!%p7035_p11)
}
  0x18   : > { %s7039_s26 = scalar_lea.vmem %s479_s16, 9216  ;;  %p7047_p1 = scmp.lt.s32.totalorder %s479_s16, %s479_s16 }
  0x19   : > { %p7040_p12 = scmp.ne.s32.totalorder %s479_s16, %s7039_s26  ;;  %p7048_p4 = scmp.lt.s32.totalorder %s7039_s26, %s7039_s26 }
  0x1b   : > { %p7042_p13 = pnand %p7040_p12, %p7028_p7  ;;  %p7049_p3 = por %p7048_p4, %p7047_p1 }
  0x1d   : > { %p7043_p0 = pneg %p7042_p13 }
  0x1f   : > { %p7050_p2 = pnand %p7049_p3, %p7043_p0 }
  0x21   : > { %7053 = shalt.err (!%p7050_p2)
}
  0x22   : > { %s7067_s27 = smov 64   ;;  %s7068_s28 = smov 4  }
  0x23   : > { %6825 = dma.hbm_to_vmem [thread:$0]  (!%p7195_p5), %s8664_s6, 9216, %s479_s16, [#allocation5], %s7067_s27, %s7067_s27, %s7068_s28  }
  0x24   : > { %p8726_p6 = scmp.ne.s32.totalorder %s8724_s19, 0 }
  0x26   : > { %532 = sbr.rel (%p8726_p6) target bundleno = 1924 (0x784), region = 88 }
  0x2d   : > { %p8727_p8 = scmp.eq.s32.totalorder %s7182_s30, 0 }
  0x2f   : > { %7059 = dma.done.wait (%p8727_p8), [#allocation5], 9216   ;;  %p8728_p7 = pmov %p8727_p8 }
  0x30   : > { %v7069_v1 = vmov 0   ;;  %s8729_s22 = sld [smem:[#allocation39_spill]]  ;;  %v966_v13 = vld [vmem:[%s8669_s11] sm:$0xff]  ;;  %v967_v14 = vld [vmem:[%s8669_s11 + $0x8] sm:$0xff]  ;;  %v8681_v17 = vmov 0.0|0.0   ;;  %v968_v20 = vld [vmem:[%s8669_s11 + $0x10] sm:$0xff]  ;;  %v621_v51 = vlaneseq }
  0x31   : > { %7061 = vsyncadd (%p8728_p7), [#allocation5], 4294958080  ;;  %6849 = vset.pattern.permute.xlu1 %v7069_v1  ;;  %849 = vst [vmem:[#allocation2] sm:$0xff] %v7069_v1  ;;  %6848 = vset.pattern.permute.xlu0 %v7069_v1  ;;  %v6633_v16 = vpack.c.bf16 %v967_v14, %v966_v13  ;;  %v969_v21 = vld [vmem:[%s8669_s11 + $0x18] sm:$0xff]  ;;  %v970_v24 = vld [vmem:[%s8669_s11 + $0x20] sm:$0xff]  ;;  %vm7071_vm0 = vmmov 0  }
  0x32   : > { %852 = vst [vmem:[#allocation2 + $0x50] sm:$0xff] %v7069_v1  ;;  %851 = vst [vmem:[#allocation2 + $0x48] sm:$0xff] %v7069_v1  ;;  %6632 = vmatprep.subr.bf16.mxu0 %v8681_v17  ;;  %6656 = vmatprep.subr.bf16.mxu1 %v8681_v17  ;;  %v6636_v22 = vpack.c.bf16 %v969_v21, %v968_v20  ;;  %v971_v25 = vld [vmem:[%s8669_s11 + $0x28] sm:$0xff]  ;;  %v972_v28 = vld [vmem:[%s8669_s11 + $0x30] sm:$0xff]  ;;  %v8683_v42 = vmov 0.0   ;;  %p590_p2 = scmp.lt.s32.totalorder %s7182_s30, 1 }
  0x33   : > { %6634 = vmatpush3.bf16.msra.mxu0 %v6633_v16  ;;  %v6639_v27 = vpack.c.bf16 %v971_v25, %v970_v24  ;;  %v973_v29 = vld [vmem:[%s8669_s11 + $0x38] sm:$0xff]  ;;  %v974_v31 = vld [vmem:[%s8669_s11 + $0x40] sm:$0xff]  ;;  %v975_v32 = vld [vmem:[%s8669_s11 + $0x48] sm:$0xff]  ;;  %5968 = vmatprep.mubr.msk.f32.mxu0 %vm7071_vm0, %v8683_v42  ;;  %v7073_v52 = vmov 1966171168   ;;  %v622_v54 = vshrl.u32 %v621_v51, 7 }
  0x34   : > { %6635 = vmatprep.subr.bf16.mxu0 %v8681_v17  ;;  %v6642_v30 = vpack.c.bf16 %v973_v29, %v972_v28  ;;  %v6645_v33 = vpack.c.bf16 %v975_v32, %v974_v31  ;;  %v976_v34 = vld [vmem:[%s8669_s11 + $0x50] sm:$0xff]  ;;  %v977_v35 = vld [vmem:[%s8669_s11 + $0x58] sm:$0xff]  ;;  %v978_v37 = vld [vmem:[%s8669_s11 + $0x60] sm:$0xff]  ;;  %5975 = vmatprep.mubr.msk.f32.mxu1 %vm7071_vm0, %v8683_v42  ;;  %v619_v53 = vunpack.c.l.s4 %v7073_v52  ;;  %s8822_s30 = smov (!%p590_p2, %s7182_s30), 1  ;;  %s8730_s24 = sld [smem:[#allocation38_spill]]  ;;  %vm926_vm1 = vcmask 1047552  }
  0x35   : > { %v6648_v36 = vpack.c.bf16 %v977_v35, %v976_v34  ;;  %v979_v38 = vld [vmem:[%s8669_s11 + $0x68] sm:$0xff]  ;;  %v980_v39 = vld [vmem:[%s8669_s11 + $0x70] sm:$0xff]  ;;  %v981_v40 = vld [vmem:[%s8669_s11 + $0x78] sm:$0xff]  ;;  %s5531_s21 = sshll.u32 %s8822_s30, 6  ;;  %v7342_v62 = vsub.s32 0, %v622_v54  ;;  %vm939_vm5 = vcmask 1040384  }
  0x36   : > { %v639_v2 = vld [vmem:[%s8729_s22 + $0x10] sm:$0xff]  ;;  %v637_v3 = vld [vmem:[%s8729_s22] sm:$0xff]  ;;  %v640_v4 = vld [vmem:[%s8729_s22 + $0x18] sm:$0xff]  ;;  %v6651_v41 = vpack.c.bf16 %v979_v38, %v978_v37  ;;  %v6654_v43 = vpack.c.bf16 %v981_v40, %v980_v39  ;;  %v620_v55 = vunpack.c.0.s8 %v619_v53  ;;  %vm927_vm2 = vsmask.f32 7938  ;;  %s7075_s16 = smov 108  }
  0x37   : > { %757 = vperm.xlu1 %6849, %v639_v2   ;;  %747 = vperm.xlu0 %6848, %v637_v3   ;;  %v638_v5 = vld [vmem:[%s8729_s22 + $0x8] sm:$0xff]  ;;  %v641_v7 = vld [vmem:[%s8729_s22 + $0x20] sm:$0xff]  ;;  %v644_v8 = vld [vmem:[%s8729_s22 + $0x38] sm:$0xff]  ;;  %vm853_vm3 = vsmask.f32 256  ;;  %vm1288_vm9 = vcmask 1046528  }
  0x38   : > { %v642_v6 = vld [vmem:[%s8729_s22 + $0x28] sm:$0xff]  ;;  %v643_v9 = vld [vmem:[%s8729_s22 + $0x30] sm:$0xff]  ;;  %v645_v11 = vld [vmem:[%s8729_s22 + $0x40] sm:$0xff]  ;;  %6637 = vmatpush3.bf16.msra.mxu0 %v6636_v22  ;;  %v623_v56 = vsub.s32 %v620_v55, %v622_v54  ;;  %vm1426_vm7 = vsmask.f32 7424  ;;  %vm1061_vm10 = vcmask 1041408  }
  0x39   : > { %v646_v10 = vld [vmem:[%s8729_s22 + $0x48] sm:$0xff]  ;;  %v648_v12 = vld [vmem:[%s8729_s22 + $0x58] sm:$0xff]  ;;  %v647_v15 = vld [vmem:[%s8729_s22 + $0x50] sm:$0xff]  ;;  %6638 = vmatprep.subr.bf16.mxu0 %v8681_v17  ;;  %vm1615_vm8 = vsmask.f32 6400  ;;  %vm7074_vm11 = vmmov 1  }
  0x3a   : > { %v650_v18 = vld [vmem:[%s8729_s22 + $0x68] sm:$0xff]  ;;  %v649_v19 = vld [vmem:[%s8729_s22 + $0x60] sm:$0xff]  ;;  %v652_v23 = vld [vmem:[%s8729_s22 + $0x78] sm:$0xff]  ;;  %s7349_s25 = scalar_lea.vmem %s8730_s24, %s5531_s21  ;;  %vm1057_vm13 = vcmask 80896   ;;  %s7076_s2 = smov 30  }
  0x3b   : > { %762 = vperm.xlu1 %6849, %v640_v4   ;;  %752 = vperm.xlu0 %6848, %v638_v5   ;;  %v651_v26 = vld [vmem:[%s8729_s22 + $0x70] sm:$0xff]  ;;  %v605_v44 = vld [vmem:[%s8661_s3] sm:$0x3]  ;;  %v5621_v0 = vld [vmem:[%s7349_s25 + $0x8] sm:$0xff]   ;;  %s8789_s24 = sld [smem:[#allocation40_spill]]  ;;  %s7077_s26 = smov 98  }
  0x3c   : > { %6640 = vmatpush3.bf16.msra.mxu0 %v6639_v27  ;;  %v608_v45 = vmul.f32 0.0078125, %v605_v44  ;;  %v606_v60 = vld [vmem:[%s8662_s4] sm:$0x1]  ;;  %v5555_v4 = vunpack.c.l.bf16 %v5621_v0  ;;  %v5556_v5 = vunpack.c.h.bf16 %v5621_v0  ;;  %v5625_v27 = vld [vmem:[%s7349_s25 + $0x28] sm:$0xff]   ;;  %v5626_v37 = vld [vmem:[%s7349_s25 + $0x30] sm:$0xff]  }
  0x3d   : > { %6641 = vmatprep.subr.bf16.mxu0 %v8681_v17  ;;  %v607_v1 = vld [vmem:[%s8663_s5] sm:$0x1]  ;;  %v7383_v38 = vld [vmem:[%s7349_s25 + $0x38] sm:$0xff]   ;;  %vm7445_vm4 = vmand %vm926_vm1, %vm927_vm2 }
  0x3e   : > { %v609_v46 = vmul.f32 %v608_v45, %v608_v45  ;;  %v5550_v2 = vld [vmem:[%s7349_s25] sm:$0xff]   ;;  %vm940_vm6 = vmand %vm939_vm5, %vm853_vm3 }
  0x3f   : > { %772 = vperm.xlu1 %6849, %v642_v6   ;;  %767 = vperm.xlu0 %6848, %v641_v7   ;;  %vm7856_vm12 = vmpackc.low %vm1061_vm10, %vm7074_vm11 }
  0x40   : > { %6643 = vmatpush3.bf16.msra.mxu0 %v6642_v30  ;;  %v611_v47 = vrot.slane %v609_v46, 7  ;;  %v5571_v46 = vunpack.c.l.bf16 %v5625_v27 }
  0x41   : > { %6644 = vmatprep.subr.bf16.mxu0 %v8681_v17 }
  0x42   : > { %v613_v48 = vsub.f32 %v608_v45, %v611_v47 }
  0x43   : > { %782 = vperm.xlu1 %6849, %v644_v8   ;;  %777 = vperm.xlu0 %6848, %v643_v9   ;;  %v5551_v8 = vunpack.c.l.bf16 %v5550_v2  ;;  %v5552_v9 = vunpack.c.h.bf16 %v5550_v2 }
  0x44   : > { %6646 = vmatpush3.bf16.msra.mxu0 %v6645_v33  ;;  %v614_v49 = vmax.f32 %v613_v48, 0.0  ;;  %v5576_v48 = vunpack.c.h.bf16 %v5626_v37 }
  0x45   : > { %6647 = vmatprep.subr.bf16.mxu0 %v8681_v17 }
  0x46   : > { %v615_v50 = vadd.f32 1e-05, %v614_v49  ;;  %v5575_v49 = vunpack.c.l.bf16 %v5626_v37 }
  0x47   : > { %792 = vperm.xlu1 %6849, %v646_v10   ;;  %787 = vperm.xlu0 %6848, %v645_v11   ;;  %v5622_v10 = vld [vmem:[%s7349_s25 + $0x10] sm:$0xff]  }
  0x48   : > { %6649 = vmatpush3.bf16.msra.mxu0 %v6648_v36  ;;  %6994 = vrsqrt.f32 %v615_v50  ;;  %v5572_v36 = vunpack.c.h.bf16 %v5625_v27  ;;  %v5580_v50 = vunpack.c.h.bf16 %v7383_v38 }
  0x49   : > { %6650 = vmatprep.subr.bf16.mxu0 %v8681_v17 }
  0x4b   : > { %802 = vperm.xlu1 %6849, %v648_v12   ;;  %797 = vperm.xlu0 %6848, %v647_v15   ;;  %v5623_v12 = vld [vmem:[%s7349_s25 + $0x18] sm:$0xff]  }
  0x4c   : > { %6652 = vmatpush3.bf16.msra.mxu0 %v6651_v41  ;;  %v5564_v21 = vunpack.c.h.bf16 %v5623_v12  ;;  %v5563_v25 = vunpack.c.l.bf16 %v5623_v12 }
  0x4d   : > { %6653 = vmatprep.subr.bf16.mxu0 %v8681_v17 }
  0x4f   : > { %812 = vperm.xlu1 %6849, %v650_v18   ;;  %807 = vperm.xlu0 %6848, %v649_v19   ;;  %v5560_v18 = vunpack.c.h.bf16 %v5622_v10  ;;  %v5559_v19 = vunpack.c.l.bf16 %v5622_v10 }
  0x50   : > { %6655 = vmatpush3.bf16.msra.mxu0 %v6654_v43 }
  0x51   : > { %5985 = vmatprep.subr.bf16.mxu0 %v8683_v42 }
  0x52   : > { %v6995_v57 = vpop.eup %6994 }
  0x53   : > { %822 = vperm.xlu1 %6849, %v652_v23   ;;  %817 = vperm.xlu0 %6848, %v651_v26   ;;  %v624_v58 = vrot.slane %v6995_v57, %v623_v56  ;;  %v5624_v26 = vld [vmem:[%s7349_s25 + $0x20] sm:$0xff]   ;;  %s599_s25 = scalar_lea.vmem %s8675_s17, %s5531_s21  ;;  %s5232_s21 = sshll.u32 %s8822_s30, 1 }
  0x54   : > { %v5568_v34 = vunpack.c.h.bf16 %v5624_v26  ;;  %v5567_v35 = vunpack.c.l.bf16 %v5624_v26  ;;  %s603_s28 = scalar_lea.vmem %s8676_s18, %s5232_s21 }
  0x55   : > { %v625_v59 = vcombine.high %v624_v58, %v624_v58 }
  0x57   : > { %v632_v61 = vrot.slane %v625_v59, %v623_v56 }
  0x59   : > { %v634_v63 = vmul.f32 %v632_v61, %v606_v60 }
  0x5b   : > { %v635_v3 = vmul.f32 %v634_v63, %v608_v45  ;;  %v7357_v7 = vrot.slane %v634_v63, %v7342_v62 }
  0x5d   : > { %v636_v6 = vsub.f32 %v607_v1, %v635_v3  ;;  %v693_v11 = vmul.f32 %v5555_v4, %v7357_v7  ;;  %v691_v14 = vmul.f32 %v5551_v8, %v7357_v7  ;;  %v694_v15 = vmul.f32 %v5556_v5, %v7357_v7 }
  0x5e   : > { %v692_v16 = vmul.f32 %v5552_v9, %v7357_v7  ;;  %v696_v28 = vmul.f32 %v5560_v18, %v7357_v7  ;;  %v695_v29 = vmul.f32 %v5559_v19, %v7357_v7  ;;  %v698_v33 = vmul.f32 %v5564_v21, %v7357_v7 }
  0x5f   : > { %v7363_v13 = vrot.slane %v636_v6, %v7342_v62  ;;  %v697_v43 = vmul.f32 %v5563_v25, %v7357_v7  ;;  %v700_v54 = vmul.f32 %v5568_v34, %v7357_v7  ;;  %v699_v55 = vmul.f32 %v5567_v35, %v7357_v7 }
  0x60   : > { %v702_v56 = vmul.f32 %v5572_v36, %v7357_v7  ;;  %v701_v0 = vmul.f32 %v5571_v46, %v7357_v7  ;;  %v5579_v1 = vunpack.c.l.bf16 %v7383_v38  ;;  %v704_v5 = vmul.f32 %v5576_v48, %v7357_v7 }
  0x61   : > { %v715_v20 = vadd.f32 %v7363_v13, %v693_v11  ;;  %v713_v22 = vadd.f32 %v7363_v13, %v691_v14  ;;  %v716_v23 = vadd.f32 %v7363_v13, %v694_v15  ;;  %v714_v24 = vadd.f32 %v7363_v13, %v692_v16 }
  0x62   : > { %v718_v44 = vadd.f32 %v7363_v13, %v696_v28  ;;  %v717_v45 = vadd.f32 %v7363_v13, %v695_v29  ;;  %v720_v53 = vadd.f32 %v7363_v13, %v698_v33  ;;  %v719_v60 = vadd.f32 %v7363_v13, %v697_v43 }
  0x63   : > { %v731_v30 = vmax.f32 %v715_v20, 0.0  ;;  %v729_v39 = vmax.f32 %v713_v22, 0.0  ;;  %v732_v40 = vmax.f32 %v716_v23, 0.0  ;;  %v730_v41 = vmax.f32 %v714_v24, 0.0 }
  0x64   : > { %v734_v61 = vmax.f32 %v718_v44, 0.0  ;;  %v733_v63 = vmax.f32 %v717_v45, 0.0  ;;  %v736_v9 = vmax.f32 %v720_v53, 0.0  ;;  %v722_v10 = vadd.f32 %v7363_v13, %v700_v54 }
  0x65   : > { %v721_v11 = vadd.f32 %v7363_v13, %v699_v55  ;;  %v703_v12 = vmul.f32 %v5575_v49, %v7357_v7  ;;  %v735_v16 = vmax.f32 %v719_v60, 0.0  ;;  %v724_v18 = vadd.f32 %v7363_v13, %v702_v56 }
  0x66   : > { %v723_v22 = vadd.f32 %v7363_v13, %v701_v0  ;;  %v738_v34 = vmax.f32 %v722_v10, 0.0  ;;  %v726_v43 = vadd.f32 %v7363_v13, %v704_v5  ;;  %v706_v49 = vmul.f32 %v5580_v50, %v7357_v7 }
  0x67   : > { %v737_v35 = vmax.f32 %v721_v11, 0.0  ;;  %v725_v44 = vadd.f32 %v7363_v13, %v703_v12 }
  0x68   : > { %v739_v10 = vmax.f32 %v723_v22, 0.0  ;;  %v728_v22 = vadd.f32 %v7363_v13, %v706_v49 }
  0xb6   : > { %v7376_v31 = vpop.permute.xlu1 %757  ;;  %v7378_v32 = vpop.permute.xlu0 %747 }
  0xb7   : > { %8731 = vst [vmem:[#allocation7_spill] sm:$0xff] %v7376_v31  ;;  %8732 = vst [vmem:[#allocation8_spill] sm:$0xff] %v7378_v32  ;;  %v7389_v47 = vmul.f32 %v7376_v31, %v731_v30  ;;  %v7401_v57 = vmul.f32 %v7378_v32, %v729_v39 }
  0xb9   : > { %8733 = vst [vmem:[#allocation9_spill] sm:$0xff] %v7389_v47 }
  0xba   : > { %v7392_v51 = vpop.permute.xlu1 %762  ;;  %v7394_v52 = vpop.permute.xlu0 %752 }
  0xbb   : > { %8734 = vst [vmem:[#allocation10_spill] sm:$0xff] %v7392_v51  ;;  %8735 = vst [vmem:[#allocation11_spill] sm:$0xff] %v7394_v52  ;;  %v7404_v58 = vmul.f32 %v7392_v51, %v732_v40  ;;  %v7407_v59 = vmul.f32 %v7394_v52, %v730_v41 }
  0xbd   : > { %8736 = vst [vmem:[#allocation12_spill] sm:$0xff] %v7404_v58  ;;  %8737 = vst [vmem:[#allocation13_spill] sm:$0xff] %v7407_v59  ;;  %v7414_v2 = vpack.c.bf16 %v7404_v58, %v7389_v47  ;;  %v7418_v3 = vpack.c.bf16 %v7407_v59, %v7401_v57  ;;  %v944_v4 = vadd.f32 %v7407_v59, %v7401_v57 }
  0xbe   : > { %v7423_v6 = vpop.permute.xlu1 %772  ;;  %v7425_v8 = vpop.permute.xlu0 %767 }
  0xbf   : > { %8738 = vst [vmem:[#allocation14_spill] sm:$0xff] %v7423_v6  ;;  %8739 = vst [vmem:[#allocation15_spill] sm:$0xff] %v7425_v8  ;;  %v862_v14 = vshrl.u32 %v7414_v2, 16  ;;  %v855_v15 = vshrl.u32 %v7418_v3, 16  ;;  %v945_v19 = vadd.f32 %v944_v4, %v7389_v47  ;;  %v7435_v20 = vmul.f32 %v7423_v6, %v734_v61 }
  0xc0   : > { %v7438_v21 = vmul.f32 %v7425_v8, %v733_v63  ;;  %v865_v24 = vshll.u32 %v7414_v2, 16  ;;  %v858_v26 = vshll.u32 %v7418_v3, 16  ;;  %v705_v61 = vmul.f32 %v5579_v1, %v7357_v7 }
  0xc1   : > { %8740 = vst [vmem:[#allocation16_spill] sm:$0xff] %v7435_v20  ;;  %v864_v23 = vrot.slane %v862_v14, 7  ;;  %v857_v25 = vrot.slane %v855_v15, 7  ;;  %v946_v29 = vadd.f32 %v945_v19, %v7404_v58  ;;  %v740_v4 = vmax.f32 %v724_v18, 0.0 }
  0xc2   : > { %8741 = vst [vmem:[#allocation17_spill] sm:$0xff] %v7438_v21  ;;  %v7451_v28 = vpack.c.bf16 %v7435_v20, %v7438_v21  ;;  %v7454_v30 = vpop.permute.xlu1 %782  ;;  %v7456_v33 = vpop.permute.xlu0 %777  ;;  %v742_v7 = vmax.f32 %v726_v43, 0.0  ;;  %v741_v19 = vmax.f32 %v725_v44, 0.0  ;;  %v744_v43 = vmax.f32 %v728_v22, 0.0 }
  0xc3   : > { %8744 = vst [vmem:[#allocation18_spill] sm:$0xff] %v7454_v30  ;;  %8745 = vst [vmem:[#allocation19_spill] sm:$0xff] %v7456_v33  ;;  %v867_v36 = vor.u32 %v865_v24, %v864_v23  ;;  %v860_v37 = vor.u32 %v858_v26, %v857_v25  ;;  %v7459_v38 = vmul.f32 %v7454_v30, %v736_v9 }
  0xc4   : > { %v7462_v39 = vmul.f32 %v7456_v33, %v735_v16  ;;  %v870_v40 = vshrl.u32 %v7451_v28, 16  ;;  %v947_v41 = vadd.f32 %v946_v29, %v7438_v21  ;;  %v873_v54 = vshll.u32 %v7451_v28, 16 }
  0xc5   : > { %8746 = vst [vmem:[#allocation20_spill] sm:$0xff] %v7459_v38  ;;  %v7469_v45 = vsel %vm853_vm3, %v857_v25, %v867_v36  ;;  %v7473_v46 = vsel %vm7445_vm4, %v860_v37, 0 }
  0xc6   : > { %8747 = vst [vmem:[#allocation21_spill] sm:$0xff] %v7462_v39  ;;  %v7477_v48 = vpack.c.bf16 %v7459_v38, %v7462_v39  ;;  %931 = vst [vmem:[#allocation2 + $0x8] sm:$0xff] %v7473_v46  ;;  %v872_v53 = vrot.slane %v870_v40, 7  ;;  %v948_v55 = vadd.f32 %v947_v41, %v7435_v20  ;;  %v7484_v56 = vpop.permute.xlu1 %792  ;;  %v7486_v60 = vpop.permute.xlu0 %787  ;;  %v8778_v21 = vshll.u32 %v7469_v45, 16 }
  0xc7   : > { %932 = vst [vmem:[#allocation2 + $0x10] sm:$0xff] %v7469_v45  ;;  %8748 = vst [vmem:[#allocation22_spill] sm:$0xff] %v7484_v56  ;;  %v7491_v0 = vmul.f32 %v7484_v56, %v738_v34  ;;  %v7494_v50 = vmul.f32 %v7486_v60, %v737_v35 }
  0xc8   : > { %8749 = vst [vmem:[#allocation23_spill] sm:$0xff] %v7486_v60  ;;  %v878_v63 = vshrl.u32 %v7477_v48, 16  ;;  %v875_v5 = vor.u32 %v873_v54, %v872_v53  ;;  %v949_v9 = vadd.f32 %v948_v55, %v7462_v39  ;;  %v881_v12 = vshll.u32 %v7477_v48, 16 }
  0xc9   : > { %8750 = vst [vmem:[#allocation24_spill] sm:$0xff] %v7491_v0  ;;  %8751 = vst [vmem:[#allocation25_spill] sm:$0xff] %v7494_v50  ;;  %v7500_v14 = vpack.c.bf16 %v7491_v0, %v7494_v50  ;;  %v1625_v58 = vrot.slane %v8778_v21, 2 }
  0xca   : > { %v880_v11 = vrot.slane %v878_v63, 7  ;;  %v7503_v1 = vsel %vm853_vm3, %v864_v23, %v875_v5  ;;  %v950_v15 = vadd.f32 %v949_v9, %v7459_v38  ;;  %v7506_v16 = vpop.permute.xlu1 %802  ;;  %v7508_v18 = vpop.permute.xlu0 %797  ;;  %v727_v23 = vadd.f32 %v7363_v13, %v705_v61 }
  0xcb   : > { %8752 = vst [vmem:[#allocation26_spill] sm:$0xff] %v7506_v16  ;;  %8753 = vst [vmem:[#allocation27_spill] sm:$0xff] %v7508_v18  ;;  %v886_v25 = vshrl.u32 %v7500_v14, 16  ;;  %v7514_v26 = vmul.f32 %v7506_v16, %v740_v4  ;;  %v7519_v29 = vmul.f32 %v7508_v18, %v739_v10  ;;  %v889_v36 = vshll.u32 %v7500_v14, 16 }
  0xcc   : > { %933 = vst [vmem:[#allocation2 + $0x18] sm:$0xff] %v7503_v1  ;;  %v883_v24 = vor.u32 %v881_v12, %v880_v11  ;;  %v951_v27 = vadd.f32 %v950_v15, %v7494_v50  ;;  %v743_v54 = vmax.f32 %v727_v23, 0.0  ;;  %v1443_v17 = vshll.u32 %v7503_v1, 16 }
  0xcd   : > { %8754 = vst [vmem:[#allocation28_spill] sm:$0xff] %v7514_v26  ;;  %8755 = vst [vmem:[#allocation29_spill] sm:$0xff] %v7519_v29  ;;  %v888_v35 = vrot.slane %v886_v25, 7  ;;  %v7528_v37 = vpack.c.bf16 %v7514_v26, %v7519_v29 }
  0xce   : > { %v7522_v34 = vsel %vm853_vm3, %v872_v53, %v883_v24  ;;  %v952_v40 = vadd.f32 %v951_v27, %v7491_v0  ;;  %v7531_v13 = vpop.permute.xlu1 %812  ;;  %v7533_v41 = vpop.permute.xlu0 %807  ;;  %v3147_v39 = vld [vmem:[#allocation2 + $0x10] sm:$0xff] }
  0xcf   : > { %934 = vst [vmem:[#allocation2 + $0x20] sm:$0xff] %v7522_v34  ;;  %8756 = vst [vmem:[#allocation30_spill] sm:$0xff] %v7531_v13  ;;  %v891_v44 = vor.u32 %v889_v36, %v888_v35  ;;  %v7536_v49 = vmul.f32 %v7531_v13, %v742_v7  ;;  %v7539_v53 = vmul.f32 %v7533_v41, %v741_v19  ;;  %v894_v55 = vshrl.u32 %v7528_v37, 16 }
  0xd0   : > { %8757 = vst [vmem:[#allocation31_spill] sm:$0xff] %v7533_v41  ;;  %v953_v61 = vadd.f32 %v952_v40, %v7519_v29  ;;  %v897_v9 = vshll.u32 %v7528_v37, 16  ;;  %v8764_v13 = vshrl.u32 %v7503_v1, 16 }
  0xd1   : > { %8758 = vst [vmem:[#allocation32_spill] sm:$0xff] %v7536_v49  ;;  %8759 = vst [vmem:[#allocation33_spill] sm:$0xff] %v7539_v53  ;;  %v7544_v63 = vsel %vm853_vm3, %v880_v11, %v891_v44  ;;  %v7548_v4 = vpack.c.bf16 %v7536_v49, %v7539_v53  ;;  %v896_v5 = vrot.slane %v894_v55, 7 }
  0xd2   : > { %935 = vst [vmem:[#allocation2 + $0x28] sm:$0xff] %v7544_v63  ;;  %v954_v10 = vadd.f32 %v953_v61, %v7514_v26  ;;  %v7553_v12 = vpop.permute.xlu1 %822  ;;  %v7555_v7 = vpop.permute.xlu0 %817  ;;  %v1628_v41 = vrot.slane %v8764_v13, 1  ;;  %v8766_v13 = vmov 0.0  }
  0xd3   : > { %8760 = vst [vmem:[#allocation34_spill] sm:$0xff] %v7553_v12  ;;  %8761 = vst [vmem:[#allocation35_spill] sm:$0xff] %v7555_v7  ;;  %v902_v15 = vshrl.u32 %v7548_v4, 16  ;;  %v7559_v11 = vmul.f32 %v7553_v12, %v744_v43  ;;  %v7562_v19 = vmul.f32 %v7555_v7, %v743_v54  ;;  %v899_v22 = vor.u32 %v897_v9, %v896_v5  ;;  %v941_v54 = vld [vmem:[#allocation2 + $0x48] sm:$0x1]  ;;  %v6850_v12 = vld [vmem:[%s8665_s7 + $0x40] sm:$0xff]  }
  0xd4   : > { %v955_v24 = vadd.f32 %v954_v10, %v7539_v53  ;;  %v905_v23 = vshll.u32 %v7548_v4, 16 }
  0xd5   : > { %8762 = vst [vmem:[#allocation36_spill] sm:$0xff] %v7559_v11  ;;  %8763 = vst [vmem:[#allocation37_spill] sm:$0xff] %v7562_v19  ;;  %v904_v25 = vrot.slane %v902_v15, 7  ;;  %v7568_v27 = vpack.c.bf16 %v7559_v11, %v7562_v19  ;;  %v7571_v36 = vsel %vm853_vm3, %v888_v35, %v899_v22  ;;  %v8685_v15 = vshll.u32 %v7469_v45, 16 }
  0xd6   : > { %v956_v40 = vadd.f32 %v955_v24, %v7536_v49  ;;  %936 = vst [vmem:[#allocation2 + $0x30] sm:$0xff] %v7571_v36  ;;  %v8765_v56 = vshrl.u32 %v7571_v36, 16 }
  0xd7   : > { %v907_v43 = vor.u32 %v905_v23, %v904_v25  ;;  %v910_v44 = vshrl.u32 %v7568_v27, 16  ;;  %v913_v10 = vshll.u32 %v7568_v27, 16 }
  0xd8   : > { %v957_v55 = vadd.f32 %v956_v40, %v7562_v19  ;;  %v1459_v40 = vshll.u32 %v7544_v63, 16  ;;  %v2197_v60 = vrot.slane %v8765_v56, 1 }
  0xd9   : > { %v908_v61 = vsel %vm853_vm3, %v896_v5, %v907_v43  ;;  %v912_v9 = vrot.slane %v910_v44, 7  ;;  %v7588_v43 = vrot.slane %v8685_v15, 1 }
  0xda   : > { %937 = vst [vmem:[#allocation2 + $0x38] sm:$0xff] %v908_v61  ;;  %v958_v35 = vadd.f32 %v957_v55, %v7559_v11  ;;  %v8686_v55 = vshrl.u32 %v7469_v45, 16  ;;  %v7591_v61 = vrot.slane %v1443_v17, 1  ;;  %v1637_v18 = vrot.slane %v1459_v40, 2 }
  0xdb   : > { %v915_v22 = vor.u32 %v913_v10, %v912_v9  ;;  %v942_v24 = vsel %vm940_vm6, %v912_v9, %v941_v54  ;;  %v7593_v54 = vrot.slane %v1459_v40, 1  ;;  %v1840_v10 = vshll.u32 %v7571_v36, 16 }
  0xdc   : > { %943 = vst [vmem:[#allocation2 + $0x48] sm:$0x1] %v942_v24  ;;  %v959_v23 = vrot.slane %v958_v35, 4 }
  0xdd   : > { %v916_v42 = vsel %vm853_vm3, %v904_v25, %v915_v22  ;;  %v1814_v25 = vor.u32 %v8686_v55, %v7588_v43  ;;  %v7611_v55 = vld [vmem:[#allocation2 + $0x10] sm:$0xfe]  ;;  %v2198_v30 = vrot.slane %v1840_v10, 2 }
  0xde   : > { %938 = vst [vmem:[#allocation2 + $0x40] sm:$0xff] %v916_v42  ;;  %v960_v5 = vadd.f32 %v959_v23, %v958_v35  ;;  %v1463_v42 = vshrl.u32 %v7544_v63, 16 }
  0xdf   : > { %v7603_v24 = vsel %vm1426_vm7, %v1814_v25, %v7591_v61  ;;  %v2199_v8 = vor.u32 %v2198_v30, %v2197_v60  ;;  %v7652_v30 = vld [vmem:[#allocation2 + $0x20] sm:$0xff]  ;;  %v7656_v60 = vld [vmem:[#allocation2 + $0x30] sm:$0xff] }
  0xe0   : > { %v961_v44 = vrot.slane %v960_v5, 2  ;;  %v7606_v23 = vor.u32 %v1463_v42, %v7593_v54  ;;  %v1636_v16 = vrot.slane %v1463_v42, 1  ;;  %v8769_v19 = vshrl.u32 %v7656_v60, 16 }
  0xe1   : > { %v2159_v25 = vld [vmem:[#allocation2 + $0x38] sm:$0x3]  ;;  %v8770_v53 = vshll.u32 %v7656_v60, 16 }
  0xe2   : > { %v962_v9 = vadd.f32 %v961_v44, %v960_v5  ;;  %v7608_v5 = vrot.slane %v1840_v10, 1  ;;  %v1629_v44 = vrot.slane %v1443_v17, 2  ;;  %v2202_v33 = vshrl.u32 %v2159_v25, 16 }
  0xe3   : > { %v2205_v6 = vshll.u32 %v2159_v25, 16  ;;  %v7633_v42 = vor.u32 %v1637_v18, %v1636_v16  ;;  %v7658_v18 = vld [vmem:[#allocation2 + $0x38] sm:$0xff]  ;;  %v2754_v49 = vrot.slane %v8769_v19, 1 }
  0xe4   : > { %v963_v35 = vrot.slane %v962_v9, 1  ;;  %v7619_v22 = vsel %vm1426_vm7, %v7606_v23, %v7608_v5  ;;  %v2204_v56 = vrot.slane %v2202_v33, 1  ;;  %v7635_v10 = vor.u32 %v1629_v44, %v1628_v41  ;;  %v7654_v33 = vld [vmem:[#allocation2 + $0x28] sm:$0xff]  ;;  %v6853_v41 = vld [vmem:[%s8665_s7 + $0x58] sm:$0xff]  }
  0xe5   : > { %v7639_v25 = vsel %vm1615_vm8, %v7633_v42, %v2199_v8  ;;  %v8708_v44 = vshll.u32 %v7652_v30, 16  ;;  %v2720_v31 = vld [vmem:[#allocation2 + $0x40] sm:$0x3]  ;;  %v8768_v32 = vshll.u32 %v7654_v33, 16  ;;  %v8771_v26 = vshrl.u32 %v7658_v18, 16 }
  0xe6   : > { %v964_v15 = vadd.f32 %v963_v35, %v962_v9  ;;  %v2178_v9 = vshrl.u32 %v7611_v55, 16  ;;  %v2181_v35 = vshll.u32 %v7611_v55, 16  ;;  %v8772_v29 = vshll.u32 %v7658_v18, 16 }
  0xe7   : > { %v2751_v11 = vrot.slane %v8768_v32, 2  ;;  %v6855_v32 = vld [vmem:[%s8665_s7 + $0x68] sm:$0xff]  }
  0xe8   : > { %v965_v7 = vmul.f32 0.015625, %v964_v15  ;;  %v6851_v15 = vld [vmem:[%s8665_s7 + $0x48] sm:$0xff]   ;;  %v2180_v17 = vrot.slane %v2178_v9, 1  ;;  %v2183_v40 = vrot.slane %v2181_v35, 2  ;;  %v6852_v9 = vld [vmem:[%s8665_s7 + $0x50] sm:$0xff]   ;;  %v8706_v35 = vshrl.u32 %v7652_v30, 16 }
  0xe9   : > { %v2759_v0 = vrot.slane %v8772_v29, 2 }
  0xea   : > { %5969 = vmatmul.mubr.f32.vlgmr.msra.gmra.mrb[0].mxu0 %v965_v7  ;;  %v2207_v7 = vrot.slane %v2205_v6, 2 }
  0xeb   : > { %5986 = vmatpush3.bf16.msra.mxu0 %v6850_v12  ;;  %6001 = vmatprep.mubr.msk.bf16.mxu0 %vm7071_vm0, %v8766_v13  ;;  %v2184_v12 = vor.u32 %v2183_v40, %v2180_v17  ;;  %v2747_v17 = vrot.slane %v8708_v44, 2  ;;  %v8767_v40 = vshrl.u32 %v7654_v33, 16  ;;  %v2755_v44 = vrot.slane %v8770_v53, 2 }
  0xec   : > { %5987 = vmatprep.subr.bf16.mxu0 %v8766_v13  ;;  %v2208_v51 = vor.u32 %v2207_v7, %v2204_v56  ;;  %v7686_v7 = vld [vmem:[#allocation2 + $0x18] sm:$0xff] }
  0xed   : > { %v7646_v16 = vsel %vm1615_vm8, %v2184_v12, %v7635_v10  ;;  %v2750_v56 = vrot.slane %v8767_v40, 1  ;;  %v2758_v40 = vrot.slane %v8771_v26, 1  ;;  %v2372_v19 = vshll.u32 %v7686_v7, 16 }
  0xee   : > { %v7650_v6 = vsel %vm1615_vm8, %v2199_v8, %v2208_v51  ;;  %v7666_v8 = vld [vmem:[#allocation2 + $0x18] sm:$0xfe]  ;;  %v6854_v51 = vld [vmem:[%s8665_s7 + $0x60] sm:$0xff]  }
  0xef   : > { %5988 = vmatpush3.bf16.msra.mxu0 %v6851_v15  ;;  %v2739_v12 = vshrl.u32 %v7666_v8, 16  ;;  %v2746_v15 = vrot.slane %v8706_v35, 1  ;;  %v2752_v38 = vor.u32 %v2751_v11, %v2750_v56  ;;  %v2760_v53 = vor.u32 %v2759_v0, %v2758_v40  ;;  %v6856_v0 = vld [vmem:[%s8665_s7 + $0x70] sm:$0xff]   ;;  %v6857_v40 = vld [vmem:[%s8665_s7 + $0x78] sm:$0xff]  }
  0xf0   : > { %5989 = vmatprep.subr.bf16.mxu0 %v8766_v13 }
  0xf1   : > { %v2741_v52 = vrot.slane %v2739_v12, 1  ;;  %v2748_v35 = vor.u32 %v2747_v17, %v2746_v15  ;;  %v2763_v12 = vshrl.u32 %v2720_v31, 16  ;;  %v2756_v15 = vor.u32 %v2755_v44, %v2754_v49 }
  0xf2   : > { %v3181_v17 = vshll.u32 %v3147_v39, 16  ;;  %v3185_v44 = vshrl.u32 %v3147_v39, 16 }
  0xf3   : > { %5990 = vmatpush3.bf16.msra.mxu0 %v6852_v9  ;;  %v2742_v9 = vshll.u32 %v7666_v8, 16  ;;  %v2765_v29 = vrot.slane %v2763_v12, 1  ;;  %v7710_v11 = vsel %vm1615_vm8, %v2752_v38, %v2756_v15 }
  0xf4   : > { %5991 = vmatprep.subr.bf16.mxu0 %v8766_v13  ;;  %v7720_v49 = vrot.slane %v3181_v17, 1  ;;  %v6859_v17 = vld [vmem:[%s8665_s7 + $0x8] sm:$0xff]  }
  0xf7   : > { %5992 = vmatpush3.bf16.msra.mxu0 %v6853_v41  ;;  %v2744_v41 = vrot.slane %v2742_v9, 2  ;;  %v2766_v9 = vshll.u32 %v2720_v31, 16 }
  0xf8   : > { %5993 = vmatprep.subr.bf16.mxu0 %v8766_v13 }
  0xf9   : > { %v2745_v50 = vor.u32 %v2744_v41, %v2741_v52  ;;  %v7707_v52 = vsel %vm1615_vm8, %v2748_v35, %v2752_v38  ;;  %v2768_v31 = vrot.slane %v2766_v9, 2  ;;  %v7727_v41 = vld [vmem:[#allocation2 + $0x8] sm:$0xfe]  ;;  %v4036_v9 = vld [vmem:[#allocation2 + $0x18] sm:$0xff] }
  0xfa   : > { %v1289_v39 = vrot.slane %v7727_v41, 1 }
  0xfb   : > { %5994 = vmatpush3.bf16.msra.mxu0 %v6854_v51  ;;  %v7704_v26 = vsel %vm1615_vm8, %v2745_v50, %v2748_v35  ;;  %v7713_v51 = vsel %vm1615_vm8, %v2756_v15, %v2760_v53  ;;  %v2769_v56 = vor.u32 %v2768_v31, %v2765_v29  ;;  %v7718_v50 = vrot.slane %v2372_v19, 1  ;;  %v6858_v15 = vld [vmem:[%s8665_s7] sm:$0xff]  }
  0xfc   : > { %5995 = vmatprep.subr.bf16.mxu0 %v8766_v13  ;;  %v3187_v35 = vor.u32 %v3185_v44, %v7720_v49  ;;  %v1290_v19 = vrot.slane %v7469_v45, 1 }
  0xfd   : > { %v7724_v38 = vsel %vm1615_vm8, %v2760_v53, %v2769_v56  ;;  %v7757_v56 = vrot.slane %v7503_v1, 1 }
  0xfe   : > { %v7734_v12 = vsel %vm1426_vm7, %v3187_v35, %v7718_v50  ;;  %v1291_v29 = vsel %vm1288_vm9, %v1289_v39, %v1290_v19 }
  0xff   : > { %5996 = vmatpush3.bf16.msra.mxu0 %v6855_v32  ;;  %v4468_v32 = vshll.u32 %v4036_v9, 16  ;;  %v1293_v44 = vsel %vm1288_vm9, %v1290_v19, %v7757_v56  ;;  %v6862_v9 = vld [vmem:[%s8665_s7 + $0x20] sm:$0xff]   ;;  %v7788_v19 = vrot.slane %v7544_v63, 1  ;;  %v6865_v63 = vld [vmem:[%s8665_s7 + $0x38] sm:$0xff]  }
 0x100   : > { %5997 = vmatprep.subr.bf16.mxu0 %v8766_v13 }
 0x101   : > { %v7743_v53 = vrot.slane %v4468_v32, 1  ;;  %v6863_v32 = vld [vmem:[%s8665_s7 + $0x28] sm:$0xff]  }
 0x103   : > { %5998 = vmatpush3.bf16.msra.mxu0 %v6856_v0  ;;  %v7748_v31 = vsel %vm1426_vm7, %v3187_v35, %v7743_v53  ;;  %v6860_v0 = vld [vmem:[%s8665_s7 + $0x10] sm:$0xff]   ;;  %v6861_v35 = vld [vmem:[%s8665_s7 + $0x18] sm:$0xff]  }
 0x104   : > { %5999 = vmatprep.subr.bf16.mxu0 %v8766_v13 }
 0x107   : > { %6000 = vmatpush3.bf16.msra.mxu0 %v6857_v40  ;;  %v1294_v40 = vrot.slane %v7522_v34, 1 }
 0x108   : > { %6021 = vmatprep.subr.bf16.mxu0 %v8766_v13 }
 0x109   : > { %v7778_v39 = vsel %vm1288_vm9, %v7757_v56, %v1294_v40 }
 0x10a   : > { %6002 = vmatmul.mubr.bf16.vlgmr.msra.gmra.mrb[4].mxu0 %v1291_v29  ;;  %v7796_v29 = vsel %vm1288_vm9, %v1294_v40, %v7788_v19 }
 0x10b   : > { %6005 = vmatprep.mubr.msk.bf16.mxu0 %vm7071_vm0, %v8766_v13  ;;  %6022 = vmatpush3.bf16.msra.mxu0 %v6858_v15  ;;  %v6864_v15 = vld [vmem:[%s8665_s7 + $0x30] sm:$0xff]  }
 0x10c   : > { %6023 = vmatprep.subr.bf16.mxu0 %v8766_v13 }
 0x10f   : > { %6024 = vmatpush3.bf16.msra.mxu0 %v6859_v17  ;;  %v7799_v17 = vld [vmem:[#allocation2 + $0x30] sm:$0x1] }
 0x110   : > { %6025 = vmatprep.subr.bf16.mxu0 %v8766_v13 }
 0x112   : > { %6006 = vmatmul.mubr.bf16.gmra.mrb[8].mxu0 %v1293_v44  ;;  %v1430_v44 = vshll.u32 %v7473_v46, 16 }
 0x113   : > { %6009 = vmatprep.mubr.msk.bf16.mxu0 %vm7071_vm0, %v8766_v13  ;;  %6026 = vmatpush3.bf16.msra.mxu0 %v6860_v0  ;;  %v1298_v0 = vrot.slane %v7799_v17, 1 }
 0x114   : > { %6027 = vmatprep.subr.bf16.mxu0 %v8766_v13  ;;  %v1432_v40 = vrot.slane %v1430_v44, 1  ;;  %v6869_v44 = vld [vmem:[%s8665_s7 + $0x98] sm:$0xff]  }
 0x117   : > { %6028 = vmatpush3.bf16.msra.mxu0 %v6861_v35  ;;  %v1299_v35 = vsel %vm1288_vm9, %v7788_v19, %v1298_v0  ;;  %v6867_v0 = vld [vmem:[%s8665_s7 + $0x88] sm:$0xff]  }
 0x118   : > { %6029 = vmatprep.subr.bf16.mxu0 %v8766_v13 }
 0x11a   : > { %6010 = vmatmul.mubr.bf16.gmra.mrb[12].mxu0 %v7778_v39 }
 0x11b   : > { %6013 = vmatprep.mubr.msk.bf16.mxu0 %vm7071_vm0, %v8766_v13  ;;  %6030 = vmatpush3.bf16.msra.mxu0 %v6862_v9  ;;  %v1428_v9 = vshrl.u32 %v7473_v46, 16  ;;  %v6868_v46 = vld [vmem:[%s8665_s7 + $0x90] sm:$0xff]  }
 0x11c   : > { %6031 = vmatprep.subr.bf16.mxu0 %v8766_v13 }
 0x11f   : > { %6032 = vmatpush3.bf16.msra.mxu0 %v6863_v32  ;;  %v1433_v32 = vor.u32 %v1432_v40, %v1428_v9  ;;  %v8773_v40 = vshrl.u32 %v7503_v1, 16 }
 0x120   : > { %6033 = vmatprep.subr.bf16.mxu0 %v8766_v13 }
 0x121   : > { %v1449_v9 = vor.u32 %v8773_v40, %v7591_v61  ;;  %v8776_v40 = vmov 0.0|0.0   ;;  %v2939_v61 = vld [vmem:[%s8789_s24 + $0x28] sm:$0xff] }
 0x122   : > { %6014 = vmatmul.mubr.bf16.gmra.mrb[16].mxu0 %v7796_v29 }
 0x123   : > { %6017 = vmatprep.mubr.msk.bf16.mxu0 %vm7071_vm0, %v8766_v13  ;;  %6034 = vmatpush3.bf16.msra.mxu0 %v6864_v15  ;;  %v6866_v15 = vld [vmem:[%s8665_s7 + $0x80] sm:$0xff]  }
 0x124   : > { %6035 = vmatprep.subr.bf16.mxu0 %v8766_v13 }
 0x127   : > { %6036 = vmatpush3.bf16.msra.mxu0 %v6865_v63  ;;  %v1438_v63 = vsel %vm1426_vm7, %v1433_v32, %v7588_v43  ;;  %v8715_v43 = vshll.u32 %v7522_v34, 16  ;;  %v6870_v32 = vld [vmem:[%s8665_s7 + $0xa0] sm:$0xff]  }
 0x128   : > { %6057 = vmatprep.subr.bf16.mxu0 %v8766_v13 }
 0x12a   : > { %6018 = vmatmul.mubr.bf16.gmra.mrb[20].mxu0 %v1299_v35  ;;  %v1453_v35 = vrot.slane %v8715_v43, 1 }
 0x12b   : > { %6037 = vmatprep.mubr.msk.bf16.mxu0 %vm7071_vm0, %v8766_v13 }
 0x132   : > { %6038 = vmatmul.mubr.bf16.vlgmr.msra.gmra.mrb[24].mxu0 %v1438_v63  ;;  %v1055_v63 = vld [vmem:[%s8671_s13 + $0x8] sm:$0x3] }
 0x133   : > { %6041 = vmatprep.mubr.msk.bf16.mxu0 %vm7071_vm0, %v8766_v13  ;;  %6058 = vmatpush3.bf16.msra.mxu0 %v6866_v15  ;;  %v1054_v15 = vld [vmem:[%s8671_s13] sm:$0xff] }
 0x134   : > { %6059 = vmatprep.subr.bf16.mxu0 %v8766_v13  ;;  %v6657_v1 = vpack.c.bf16 %v1055_v63, %v1054_v15  ;;  %v6872_v15 = vld [vmem:[%s8665_s7 + $0xb0] sm:$0xff]   ;;  %v1467_v63 = vshll.u32 %v7799_v17, 16 }
 0x136   : > { %6659 = vmatpush3.bf16.msk.msra.mxu1 %vm7856_vm12, %v6657_v1  ;;  %v1617_v1 = vshrl.u32 %v7727_v41, 16 }
 0x137   : > { %6060 = vmatpush3.bf16.msra.mxu0 %v6867_v0  ;;  %v7854_v0 = vsel %vm1426_vm7, %v1449_v9, %v1453_v35  ;;  %6660 = vmatprep.subr.bf16.mxu1 %v8776_v40 }
 0x138   : > { %6061 = vmatprep.subr.bf16.mxu0 %v8766_v13 }
 0x13a   : > { %6042 = vmatmul.mubr.bf16.gmra.mrb[28].mxu0 %v7603_v24 }
 0x13b   : > { %6045 = vmatprep.mubr.msk.bf16.mxu0 %vm7071_vm0, %v8766_v13  ;;  %6062 = vmatpush3.bf16.msra.mxu0 %v6868_v46  ;;  %v6871_v46 = vld [vmem:[%s8665_s7 + $0xa8] sm:$0xff]  }
 0x13c   : > { %6063 = vmatprep.subr.bf16.mxu0 %v8766_v13 }
 0x13f   : > { %6064 = vmatpush3.bf16.msra.mxu0 %v6869_v44  ;;  %v1455_v44 = vshrl.u32 %v7522_v34, 16 }
 0x140   : > { %6065 = vmatprep.subr.bf16.mxu0 %v8766_v13 }
 0x141   : > { %v1457_v9 = vor.u32 %v1455_v44, %v1453_v35  ;;  %v6873_v35 = vld [vmem:[%s8665_s7 + $0xb8] sm:$0xff]   ;;  %v1632_v21 = vrot.slane %v1455_v44, 1  ;;  %v6878_v44 = vld [vmem:[%s8665_s7 + $0xe0] sm:$0xff]  }
 0x142   : > { %6046 = vmatmul.mubr.bf16.gmra.mrb[32].mxu0 %v7854_v0 }
 0x143   : > { %6049 = vmatprep.mubr.msk.bf16.mxu0 %vm7071_vm0, %v8766_v13  ;;  %6066 = vmatpush3.bf16.msra.mxu0 %v6870_v32  ;;  %v7877_v32 = vsel %vm1426_vm7, %v1457_v9, %v7593_v54  ;;  %v1469_v54 = vrot.slane %v1467_v63, 1  ;;  %v1619_v9 = vrot.slane %v1617_v1, 1  ;;  %v6875_v1 = vld [vmem:[%s8665_s7 + $0xc8] sm:$0xff]  }
 0x144   : > { %6067 = vmatprep.subr.bf16.mxu0 %v8766_v13 }
 0x145   : > { %v1470_v17 = vsel %vm1426_vm7, %v7606_v23, %v1469_v54 }
 0x147   : > { %6068 = vmatpush3.bf16.msra.mxu0 %v6871_v46  ;;  %v1620_v46 = vshll.u32 %v7727_v41, 16 }
 0x148   : > { %6069 = vmatprep.subr.bf16.mxu0 %v8766_v13 }
 0x149   : > { %v1622_v43 = vrot.slane %v1620_v46, 2  ;;  %v6877_v46 = vld [vmem:[%s8665_s7 + $0xd8] sm:$0xff]  }
 0x14a   : > { %6050 = vmatmul.mubr.bf16.gmra.mrb[36].mxu0 %v7877_v32 }
 0x14b   : > { %6053 = vmatprep.mubr.msk.bf16.mxu0 %vm7071_vm0, %v8766_v13  ;;  %6070 = vmatpush3.bf16.msra.mxu0 %v6872_v15  ;;  %v8777_v15 = vshrl.u32 %v7469_v45, 16  ;;  %v1623_v41 = vor.u32 %v1622_v43, %v1619_v9  ;;  %v8779_v45 = vshll.u32 %v7522_v34, 16  ;;  %v6879_v9 = vld [vmem:[%s8665_s7 + $0xe8] sm:$0xff]  }
 0x14c   : > { %6071 = vmatprep.subr.bf16.mxu0 %v8766_v13 }
 0x14d   : > { %v1624_v20 = vrot.slane %v8777_v15, 1  ;;  %v1633_v43 = vrot.slane %v8779_v45, 2  ;;  %v6883_v45 = vld [vmem:[%s8665_s7 + $0x108] sm:$0xff]  }
 0x14f   : > { %6072 = vmatpush3.bf16.msra.mxu0 %v6873_v35  ;;  %v1626_v63 = vor.u32 %v1625_v58, %v1624_v20  ;;  %v6874_v35 = vld [vmem:[%s8665_s7 + $0xc0] sm:$0xff]   ;;  %v6876_v58 = vld [vmem:[%s8665_s7 + $0xd0] sm:$0xff]   ;;  %v1634_v54 = vor.u32 %v1633_v43, %v1632_v21 }
 0x150   : > { %6093 = vmatprep.subr.bf16.mxu0 %v8766_v13  ;;  %v6882_v21 = vld [vmem:[%s8665_s7 + $0x100] sm:$0xff]  }
 0x151   : > { %v1627_v23 = vsel %vm1615_vm8, %v1623_v41, %v1626_v63  ;;  %v1631_v20 = vsel %vm1615_vm8, %v1626_v63, %v7635_v10  ;;  %v7928_v34 = vsel %vm1615_vm8, %v7635_v10, %v1634_v54  ;;  %v6880_v10 = vld [vmem:[%s8665_s7 + $0xf0] sm:$0xff]   ;;  %v7943_v63 = vsel %vm1615_vm8, %v1634_v54, %v7633_v42  ;;  %v6886_v43 = vld [vmem:[%s8665_s7 + $0x120] sm:$0xff]  }
 0x152   : > { %6054 = vmatmul.mubr.bf16.gmra.mrb[40].mxu0 %v1470_v17  ;;  %v1597_v17 = vld [vmem:[#allocation2 + $0x30] sm:$0x3] }
 0x153   : > { %6073 = vmatprep.mubr.msk.bf16.mxu0 %vm7071_vm0, %v8766_v13  ;;  %v1641_v15 = vshrl.u32 %v1597_v17, 16  ;;  %v1644_v41 = vshll.u32 %v1597_v17, 16  ;;  %v6888_v54 = vld [vmem:[%s8665_s7 + $0x130] sm:$0xff]  }
 0x15a   : > { %6074 = vmatmul.mubr.bf16.vlgmr.msra.gmra.mrb[44].mxu0 %v1627_v23  ;;  %v1646_v23 = vrot.slane %v1644_v41, 2  ;;  %v2012_v41 = vrot.slane %v7611_v55, 1  ;;  %v6892_v55 = vld [vmem:[%s8665_s7 + $0x150] sm:$0xff]  }
 0x15b   : > { %6077 = vmatprep.mubr.msk.bf16.mxu0 %vm7071_vm0, %v8766_v13  ;;  %6094 = vmatpush3.bf16.msra.mxu0 %v6874_v35  ;;  %v1643_v35 = vrot.slane %v1641_v15, 1 }
 0x15c   : > { %6095 = vmatprep.subr.bf16.mxu0 %v8766_v13 }
 0x15f   : > { %6096 = vmatpush3.bf16.msra.mxu0 %v6875_v1  ;;  %v6881_v1 = vld [vmem:[%s8665_s7 + $0xf8] sm:$0xff]  }
 0x160   : > { %6097 = vmatprep.subr.bf16.mxu0 %v8766_v13 }
 0x162   : > { %6078 = vmatmul.mubr.bf16.gmra.mrb[48].mxu0 %v1631_v20 }
 0x163   : > { %6081 = vmatprep.mubr.msk.bf16.mxu0 %vm7071_vm0, %v8766_v13  ;;  %6098 = vmatpush3.bf16.msra.mxu0 %v6876_v58  ;;  %v1647_v58 = vor.u32 %v1646_v23, %v1643_v35  ;;  %v2014_v35 = vsel %vm1288_vm9, %v2012_v41, %v7757_v56  ;;  %v6893_v56 = vld [vmem:[%s8665_s7 + $0x158] sm:$0xff]   ;;  %v6894_v23 = vld [vmem:[%s8665_s7 + $0x160] sm:$0xff]  }
 0x164   : > { %6099 = vmatprep.subr.bf16.mxu0 %v8766_v13 }
 0x165   : > { %v1648_v20 = vsel %vm1615_vm8, %v7633_v42, %v1647_v58  ;;  %v6884_v42 = vld [vmem:[%s8665_s7 + $0x110] sm:$0xff]  }
 0x167   : > { %6100 = vmatpush3.bf16.msra.mxu0 %v6877_v46  ;;  %v7989_v46 = vld [vmem:[#allocation2 + $0x38] sm:$0x1] }
 0x168   : > { %6101 = vmatprep.subr.bf16.mxu0 %v8766_v13 }
 0x16a   : > { %6082 = vmatmul.mubr.bf16.gmra.mrb[52].mxu0 %v7928_v34 }
 0x16b   : > { %6085 = vmatprep.mubr.msk.bf16.mxu0 %vm7071_vm0, %v8766_v13  ;;  %6102 = vmatpush3.bf16.msra.mxu0 %v6878_v44  ;;  %v6889_v44 = vld [vmem:[%s8665_s7 + $0x138] sm:$0xff]  }
 0x16c   : > { %6103 = vmatprep.subr.bf16.mxu0 %v8766_v13 }
 0x16f   : > { %6104 = vmatpush3.bf16.msra.mxu0 %v6879_v9  ;;  %v8780_v9 = vshrl.u32 %v7571_v36, 16 }
 0x170   : > { %6105 = vmatprep.subr.bf16.mxu0 %v8766_v13 }
 0x171   : > { %v1846_v15 = vor.u32 %v8780_v9, %v7608_v5  ;;  %v6891_v5 = vld [vmem:[%s8665_s7 + $0x148] sm:$0xff]  }
 0x172   : > { %6086 = vmatmul.mubr.bf16.gmra.mrb[56].mxu0 %v7943_v63 }
 0x173   : > { %6089 = vmatprep.mubr.msk.bf16.mxu0 %vm7071_vm0, %v8766_v13  ;;  %6106 = vmatpush3.bf16.msra.mxu0 %v6880_v10  ;;  %v6890_v10 = vld [vmem:[%s8665_s7 + $0x140] sm:$0xff]  }
 0x174   : > { %6107 = vmatprep.subr.bf16.mxu0 %v8766_v13 }
 0x177   : > { %6108 = vmatpush3.bf16.msra.mxu0 %v6881_v1  ;;  %v6895_v1 = vld [vmem:[%s8665_s7 + $0x168] sm:$0xff]  }
 0x178   : > { %6129 = vmatprep.subr.bf16.mxu0 %v8766_v13 }
 0x17a   : > { %6090 = vmatmul.mubr.bf16.gmra.mrb[60].mxu0 %v1648_v20  ;;  %v2019_v20 = vrot.slane %v7571_v36, 1  ;;  %v6897_v36 = vld [vmem:[%s8665_s7 + $0x178] sm:$0xff]  }
 0x17b   : > { %6109 = vmatprep.mubr.msk.bf16.mxu0 %vm7071_vm0, %v8766_v13 }
 0x182   : > { %6110 = vmatmul.mubr.bf16.vlgmr.msra.gmra.mrb[64].mxu0 %v7603_v24  ;;  %v6885_v24 = vld [vmem:[%s8665_s7 + $0x118] sm:$0xff]  }
 0x183   : > { %6113 = vmatprep.mubr.msk.bf16.mxu0 %vm7071_vm0, %v8766_v13  ;;  %6130 = vmatpush3.bf16.msra.mxu0 %v6882_v21 }
 0x184   : > { %6131 = vmatprep.subr.bf16.mxu0 %v8766_v13 }
 0x187   : > { %6132 = vmatpush3.bf16.msra.mxu0 %v6883_v45 }
 0x188   : > { %6133 = vmatprep.subr.bf16.mxu0 %v8766_v13 }
 0x18a   : > { %6114 = vmatmul.mubr.bf16.gmra.mrb[68].mxu0 %v7854_v0  ;;  %v6887_v0 = vld [vmem:[%s8665_s7 + $0x128] sm:$0xff]  }
 0x18b   : > { %6117 = vmatprep.mubr.msk.bf16.mxu0 %vm7071_vm0, %v8766_v13  ;;  %6134 = vmatpush3.bf16.msra.mxu0 %v6884_v42 }
 0x18c   : > { %6135 = vmatprep.subr.bf16.mxu0 %v8766_v13 }
 0x18f   : > { %6136 = vmatpush3.bf16.msra.mxu0 %v6885_v24  ;;  %v2020_v24 = vsel %vm1288_vm9, %v7788_v19, %v2019_v20 }
 0x190   : > { %6137 = vmatprep.subr.bf16.mxu0 %v8766_v13 }
 0x192   : > { %6118 = vmatmul.mubr.bf16.gmra.mrb[72].mxu0 %v7877_v32  ;;  %v1848_v32 = vshll.u32 %v7989_v46, 16 }
 0x193   : > { %6121 = vmatprep.mubr.msk.bf16.mxu0 %vm7071_vm0, %v8766_v13  ;;  %6138 = vmatpush3.bf16.msra.mxu0 %v6886_v43  ;;  %v2021_v43 = vrot.slane %v7989_v46, 1  ;;  %v6899_v46 = vld [vmem:[%s8665_s7 + $0x188] sm:$0xff]  }
 0x194   : > { %6139 = vmatprep.subr.bf16.mxu0 %v8766_v13  ;;  %v1850_v17 = vrot.slane %v1848_v32, 1 }
 0x195   : > { %v2022_v19 = vsel %vm1288_vm9, %v2019_v20, %v2021_v43 }
 0x197   : > { %6140 = vmatpush3.bf16.msra.mxu0 %v6887_v0  ;;  %v6898_v0 = vld [vmem:[%s8665_s7 + $0x180] sm:$0xff]  }
 0x198   : > { %6141 = vmatprep.subr.bf16.mxu0 %v8766_v13 }
 0x19a   : > { %6122 = vmatmul.mubr.bf16.gmra.mrb[76].mxu0 %v7619_v22  ;;  %v1851_v22 = vsel %vm1426_vm7, %v1846_v15, %v1850_v17  ;;  %v6903_v15 = vld [vmem:[%s8665_s7 + $0x1a8] sm:$0xff]  }
 0x19b   : > { %6125 = vmatprep.mubr.msk.bf16.mxu0 %vm7071_vm0, %v8766_v13  ;;  %6142 = vmatpush3.bf16.msra.mxu0 %v6888_v54  ;;  %v6900_v54 = vld [vmem:[%s8665_s7 + $0x190] sm:$0xff]  }
 0x19c   : > { %6143 = vmatprep.subr.bf16.mxu0 %v8766_v13 }
 0x19f   : > { %6144 = vmatpush3.bf16.msra.mxu0 %v6889_v44 }
 0x1a0   : > { %6165 = vmatprep.subr.bf16.mxu0 %v8766_v13 }
 0x1a2   : > { %6126 = vmatmul.mubr.bf16.gmra.mrb[80].mxu0 %v1851_v22 }
 0x1a3   : > { %6145 = vmatprep.mubr.msk.bf16.mxu0 %vm7071_vm0, %v8766_v13 }
 0x1aa   : > { %6146 = vmatmul.mubr.bf16.vlgmr.msra.gmra.mrb[84].mxu0 %v2014_v35 }
 0x1ab   : > { %6149 = vmatprep.mubr.msk.bf16.mxu0 %vm7071_vm0, %v8766_v13  ;;  %6166 = vmatpush3.bf16.msra.mxu0 %v6890_v10 }
 0x1ac   : > { %6167 = vmatprep.subr.bf16.mxu0 %v8766_v13 }
 0x1af   : > { %6168 = vmatpush3.bf16.msra.mxu0 %v6891_v5  ;;  %v6905_v5 = vld [vmem:[%s8665_s7 + $0x1b8] sm:$0xff]  }
 0x1b0   : > { %6169 = vmatprep.subr.bf16.mxu0 %v8766_v13 }
 0x1b2   : > { %6150 = vmatmul.mubr.bf16.gmra.mrb[88].mxu0 %v7778_v39  ;;  %v982_v39 = vld [vmem:[%s8670_s12] sm:$0x1] }
 0x1b3   : > { %6153 = vmatprep.mubr.msk.bf16.mxu0 %vm7071_vm0, %v8766_v13  ;;  %6170 = vmatpush3.bf16.msra.mxu0 %v6892_v55 }
 0x1b4   : > { %6171 = vmatprep.subr.bf16.mxu0 %v8766_v13 }
 0x1b7   : > { %6172 = vmatpush3.bf16.msra.mxu0 %v6893_v56 }
 0x1b8   : > { %6173 = vmatprep.subr.bf16.mxu0 %v8766_v13 }
 0x1ba   : > { %6154 = vmatmul.mubr.bf16.gmra.mrb[92].mxu0 %v7796_v29  ;;  %v6896_v29 = vld [vmem:[%s8665_s7 + $0x170] sm:$0xff]  }
 0x1bb   : > { %6157 = vmatprep.mubr.msk.bf16.mxu0 %vm7071_vm0, %v8766_v13  ;;  %6174 = vmatpush3.bf16.msra.mxu0 %v6894_v23 }
 0x1bc   : > { %6175 = vmatprep.subr.bf16.mxu0 %v8766_v13 }
 0x1bd   : > { %v1049_v58 = vpop.f32.mrb[0].mxu0 }
 0x1be   : > { %v1050_v21 = vadd.f32 %v1049_v58, %v982_v39  ;;  %v5970_v45 = vpop.f32.mrb[1].mxu0  ;;  %v8781_v58 = vshll.u32 %v7652_v30, 16 }
 0x1bf   : > { %6176 = vmatpush3.bf16.msra.mxu0 %v6895_v1  ;;  %v2370_v1 = vshrl.u32 %v7686_v7, 16  ;;  %v6907_v7 = vld [vmem:[%s8665_s7 + $0x1c8] sm:$0xff]  }
 0x1c0   : > { %v1053_v42 = vmax.f32 %v1050_v21, 0.0  ;;  %6177 = vmatprep.subr.bf16.mxu0 %v8766_v13  ;;  %v2379_v20 = vrot.slane %v8781_v58, 1  ;;  %v6910_v58 = vld [vmem:[%s8665_s7 + $0x1e0] sm:$0xff]  }
 0x1c2   : > { %6158 = vmatmul.mubr.bf16.gmra.mrb[96].mxu0 %v2020_v24  ;;  %5976 = vmatmul.mubr.msk.f32.vlgmr.msra.gmra.mrb[0].mxu1 %vm1057_vm13, %v1053_v42  ;;  %v6906_v42 = vld [vmem:[%s8665_s7 + $0x1c0] sm:$0xff]  }
 0x1c3   : > { %6161 = vmatprep.mubr.msk.bf16.mxu0 %vm7071_vm0, %v8766_v13  ;;  %6178 = vmatpush3.bf16.msra.mxu0 %v6896_v29  ;;  %v2375_v29 = vor.u32 %v7718_v50, %v2370_v1 }
 0x1c4   : > { %6179 = vmatprep.subr.bf16.mxu0 %v8766_v13  ;;  %5982 = vmatprep.mubr.msk.f32.mxu1 %vm7071_vm0, %v8766_v13 }
 0x1c5   : > { %v8139_v24 = vsel %vm1426_vm7, %v2375_v29, %v2379_v20 }
 0x1c7   : > { %6180 = vmatpush3.bf16.msra.mxu0 %v6897_v36  ;;  %v8782_v36 = vshll.u32 %v7654_v33, 16 }
 0x1c8   : > { %6201 = vmatprep.subr.bf16.mxu0 %v8766_v13 }
 0x1c9   : > { %v2387_v43 = vrot.slane %v8782_v36, 1 }
 0x1ca   : > { %6162 = vmatmul.mubr.bf16.gmra.mrb[100].mxu0 %v2022_v19 }
 0x1cb   : > { %6181 = vmatprep.mubr.msk.bf16.mxu0 %vm7071_vm0, %v8766_v13 }
 0x1d2   : > { %6182 = vmatmul.mubr.bf16.vlgmr.msra.gmra.mrb[104].mxu0 %v7646_v16  ;;  %v6901_v16 = vld [vmem:[%s8665_s7 + $0x198] sm:$0xff]  }
 0x1d3   : > { %6185 = vmatprep.mubr.msk.bf16.mxu0 %vm7071_vm0, %v8766_v13  ;;  %6202 = vmatpush3.bf16.msra.mxu0 %v6898_v0 }
 0x1d4   : > { %6203 = vmatprep.subr.bf16.mxu0 %v8766_v13 }
 0x1d7   : > { %6204 = vmatpush3.bf16.msra.mxu0 %v6899_v46  ;;  %v8783_v46 = vshrl.u32 %v7652_v30, 16 }
 0x1d8   : > { %6205 = vmatprep.subr.bf16.mxu0 %v8766_v13 }
 0x1da   : > { %6186 = vmatmul.mubr.bf16.gmra.mrb[108].mxu0 %v7928_v34  ;;  %v6902_v34 = vld [vmem:[%s8665_s7 + $0x1a0] sm:$0xff]  }
 0x1db   : > { %6189 = vmatprep.mubr.msk.bf16.mxu0 %vm7071_vm0, %v8766_v13  ;;  %6206 = vmatpush3.bf16.msra.mxu0 %v6900_v54  ;;  %v2383_v54 = vor.u32 %v8783_v46, %v2379_v20  ;;  %v8787_v46 = vshrl.u32 %v7656_v60, 16 }
 0x1dc   : > { %6207 = vmatprep.subr.bf16.mxu0 %v8766_v13 }
 0x1dd   : > { %v8089_v32 = vpop.f32.mrb[4].mxu0 }
 0x1de   : > { %v6003_v44 = vpop.f32.mrb[5].mxu0 }
 0x1df   : > { %v8091_v17 = vpop.f32.mrb[6].mxu0  ;;  %6208 = vmatpush3.bf16.msra.mxu0 %v6901_v16  ;;  %v6908_v16 = vld [vmem:[%s8665_s7 + $0x1d0] sm:$0xff]  }
 0x1e0   : > { %v6004_v9 = vpop.f32.mrb[7].mxu0  ;;  %6209 = vmatprep.subr.bf16.mxu0 %v8766_v13 }
 0x1e1   : > { %v6909_v9 = vld [vmem:[%s8665_s7 + $0x1d8] sm:$0xff]  }
 0x1e2   : > { %6190 = vmatmul.mubr.bf16.gmra.mrb[112].mxu0 %v7943_v63  ;;  %v6904_v63 = vld [vmem:[%s8665_s7 + $0x1b0] sm:$0xff]  }
 0x1e3   : > { %6193 = vmatprep.mubr.msk.bf16.mxu0 %vm7071_vm0, %v8766_v13  ;;  %6210 = vmatpush3.bf16.msra.mxu0 %v6902_v34  ;;  %v8161_v34 = vsel %vm1426_vm7, %v2383_v54, %v2387_v43 }
 0x1e4   : > { %6211 = vmatprep.subr.bf16.mxu0 %v8766_v13 }
 0x1e5   : > { %v8104_v22 = vpop.f32.mrb[8].mxu0 }
 0x1e6   : > { %v6007_v41 = vpop.f32.mrb[9].mxu0 }
 0x1e7   : > { %v8106_v10 = vpop.f32.mrb[10].mxu0  ;;  %6212 = vmatpush3.bf16.msra.mxu0 %v6903_v15  ;;  %v8784_v41 = vshll.u32 %v7656_v60, 16 }
 0x1e8   : > { %v6008_v35 = vpop.f32.mrb[11].mxu0  ;;  %6213 = vmatprep.subr.bf16.mxu0 %v8766_v13 }
 0x1ea   : > { %6194 = vmatmul.mubr.bf16.gmra.mrb[116].mxu0 %v7639_v25 }
 0x1eb   : > { %6197 = vmatprep.mubr.msk.bf16.mxu0 %vm7071_vm0, %v8766_v13  ;;  %6214 = vmatpush3.bf16.msra.mxu0 %v6904_v63  ;;  %v2395_v63 = vrot.slane %v8784_v41, 1  ;;  %v6913_v41 = vld [vmem:[%s8665_s7 + $0x1f8] sm:$0xff]  }
 0x1ec   : > { %6215 = vmatprep.subr.bf16.mxu0 %v8766_v13 }
 0x1ed   : > { %v8119_v55 = vpop.f32.mrb[12].mxu0  ;;  %v2399_v54 = vor.u32 %v8787_v46, %v2395_v63 }
 0x1ee   : > { %v6011_v56 = vpop.f32.mrb[13].mxu0 }
 0x1ef   : > { %v8121_v23 = vpop.f32.mrb[14].mxu0  ;;  %6216 = vmatpush3.bf16.msra.mxu0 %v6905_v5 }
 0x1f0   : > { %v6012_v39 = vpop.f32.mrb[15].mxu0  ;;  %6237 = vmatprep.subr.bf16.mxu0 %v8766_v13 }
 0x1f1   : > { %v8785_v39 = vshrl.u32 %v7654_v33, 16 }
 0x1f2   : > { %6198 = vmatmul.mubr.bf16.gmra.mrb[120].mxu0 %v7650_v6 }
 0x1f3   : > { %6217 = vmatprep.mubr.msk.bf16.mxu0 %vm7071_vm0, %v8766_v13  ;;  %v2391_v1 = vor.u32 %v8785_v39, %v2387_v43  ;;  %v8199_v43 = vld [vmem:[#allocation2 + $0x40] sm:$0x1] }
 0x1f5   : > { %v8127_v25 = vpop.f32.mrb[16].mxu0  ;;  %v8185_v29 = vsel %vm1426_vm7, %v2391_v1, %v2395_v63  ;;  %v8788_v1 = vshrl.u32 %v7658_v18, 16 }
 0x1f6   : > { %v6015_v21 = vpop.f32.mrb[17].mxu0 }
 0x1f7   : > { %v8132_v45 = vpop.f32.mrb[18].mxu0 }
 0x1f8   : > { %v6016_v6 = vpop.f32.mrb[19].mxu0 }
 0x1fa   : > { %6218 = vmatmul.mubr.bf16.vlgmr.msra.gmra.mrb[124].mxu0 %v8139_v24 }
 0x1fb   : > { %6221 = vmatprep.mubr.msk.bf16.mxu0 %vm7071_vm0, %v8766_v13  ;;  %6238 = vmatpush3.bf16.msra.mxu0 %v6906_v42  ;;  %v8786_v42 = vshll.u32 %v7658_v18, 16 }
 0x1fc   : > { %6239 = vmatprep.subr.bf16.mxu0 %v8766_v13 }
 0x1fd   : > { %v8148_v50 = vpop.f32.mrb[20].mxu0  ;;  %v2403_v6 = vrot.slane %v8786_v42, 1  ;;  %v8231_v42 = vrot.slane %v7652_v30, 1  ;;  %v2576_v30 = vrot.slane %v7654_v33, 1 }
 0x1fe   : > { %v6019_v19 = vpop.f32.mrb[21].mxu0 }
 0x1ff   : > { %v8152_v0 = vpop.f32.mrb[22].mxu0  ;;  %6240 = vmatpush3.bf16.msra.mxu0 %v6907_v7 }
 0x200   : > { %v6020_v44 = vpop.f32.mrb[23].mxu0  ;;  %6241 = vmatprep.subr.bf16.mxu0 %v8766_v13 }
 0x202   : > { %6222 = vmatmul.mubr.bf16.gmra.mrb[128].mxu0 %v8161_v34 }
 0x203   : > { %6225 = vmatprep.mubr.msk.bf16.mxu0 %vm7071_vm0, %v8766_v13  ;;  %6242 = vmatpush3.bf16.msra.mxu0 %v6908_v16  ;;  %v6912_v16 = vld [vmem:[%s8665_s7 + $0x1f0] sm:$0xff]  }
 0x204   : > { %6243 = vmatprep.subr.bf16.mxu0 %v8766_v13 }
 0x205   : > { %v1558_v15 = vpop.f32.mrb[24].mxu0 }
 0x206   : > { %v8173_v35 = vadd.f32 %v1558_v15, %v8089_v32  ;;  %v6039_v5 = vpop.f32.mrb[25].mxu0  ;;  %v6911_v32 = vld [vmem:[%s8665_s7 + $0x1e8] sm:$0xff]   ;;  %v2409_v15 = vshll.u32 %v8199_v43, 16 }
 0x207   : > { %v1561_v56 = vpop.f32.mrb[26].mxu0  ;;  %6244 = vmatpush3.bf16.msra.mxu0 %v6909_v9 }
 0x208   : > { %v8181_v20 = vadd.f32 %v1561_v56, %v8091_v17  ;;  %v6040_v21 = vpop.f32.mrb[27].mxu0  ;;  %6245 = vmatprep.subr.bf16.mxu0 %v8766_v13  ;;  %v2411_v63 = vrot.slane %v2409_v15, 1 }
 0x20a   : > { %6226 = vmatmul.mubr.bf16.gmra.mrb[132].mxu0 %v8185_v29 }
 0x20b   : > { %6229 = vmatprep.mubr.msk.bf16.mxu0 %vm7071_vm0, %v8766_v13  ;;  %6246 = vmatpush3.bf16.msra.mxu0 %v6910_v58  ;;  %v2407_v58 = vor.u32 %v8788_v1, %v2403_v6 }
 0x20c   : > { %6247 = vmatprep.subr.bf16.mxu0 %v8766_v13 }
 0x20d   : > { %v1566_v17 = vpop.f32.mrb[28].mxu0 }
 0x20e   : > { %v8197_v7 = vadd.f32 %v1566_v17, %v8104_v22  ;;  %v6043_v36 = vpop.f32.mrb[29].mxu0  ;;  %v8209_v22 = vsel %vm1426_vm7, %v2399_v54, %v2403_v6  ;;  %v8225_v17 = vsel %vm1426_vm7, %v2407_v58, %v2411_v63 }
 0x20f   : > { %v1569_v19 = vpop.f32.mrb[30].mxu0  ;;  %6248 = vmatpush3.bf16.msra.mxu0 %v6911_v32 }
 0x210   : > { %v1570_v44 = vadd.f32 %v1569_v19, %v8106_v10  ;;  %v6044_v9 = vpop.f32.mrb[31].mxu0  ;;  %6249 = vmatprep.subr.bf16.mxu0 %v8766_v13 }
 0x212   : > { %6230 = vmatmul.mubr.bf16.gmra.mrb[136].mxu0 %v8209_v22 }
 0x213   : > { %6233 = vmatprep.mubr.msk.bf16.mxu0 %vm7071_vm0, %v8766_v13  ;;  %6250 = vmatpush3.bf16.msra.mxu0 %v6912_v16 }
 0x214   : > { %6251 = vmatprep.subr.bf16.mxu0 %v8766_v13 }
 0x215   : > { %v1574_v10 = vpop.f32.mrb[32].mxu0 }
 0x216   : > { %v1575_v5 = vadd.f32 %v1574_v10, %v8119_v55  ;;  %v6047_v56 = vpop.f32.mrb[33].mxu0 }
 0x217   : > { %v1577_v39 = vpop.f32.mrb[34].mxu0  ;;  %6252 = vmatpush3.bf16.msra.mxu0 %v6913_v41  ;;  %v2578_v56 = vrot.slane %v7656_v60, 1 }
 0x218   : > { %v1578_v21 = vadd.f32 %v1577_v39, %v8121_v23  ;;  %v6048_v32 = vpop.f32.mrb[35].mxu0  ;;  %6664 = vmatprep.subr.bf16.mxu0 %v8776_v40  ;;  %v2573_v23 = vrot.slane %v7666_v8, 1 }
 0x219   : > { %v8254_v58 = vsel %vm1288_vm9, %v2576_v30, %v2578_v56 }
 0x21a   : > { %6234 = vmatmul.mubr.bf16.gmra.mrb[140].mxu0 %v8225_v17  ;;  %v2575_v16 = vsel %vm1288_vm9, %v2573_v23, %v8231_v42 }
 0x21b   : > { %6253 = vmatprep.mubr.msk.bf16.mxu0 %vm7071_vm0, %v8766_v13 }
 0x21d   : > { %v1582_v55 = vpop.f32.mrb[36].mxu0 }
 0x21e   : > { %v1583_v6 = vadd.f32 %v1582_v55, %v8127_v25  ;;  %v6051_v36 = vpop.f32.mrb[37].mxu0  ;;  %v2580_v55 = vrot.slane %v7658_v18, 1 }
 0x21f   : > { %v1585_v19 = vpop.f32.mrb[38].mxu0 }
 0x220   : > { %v1586_v46 = vadd.f32 %v1585_v19, %v8132_v45  ;;  %v6052_v54 = vpop.f32.mrb[39].mxu0  ;;  %v8245_v45 = vsel %vm1288_vm9, %v8231_v42, %v2576_v30 }
 0x222   : > { %6254 = vmatmul.mubr.bf16.vlgmr.msra.gmra.mrb[144].mxu0 %v2575_v16  ;;  %v2582_v16 = vrot.slane %v8199_v43, 1 }
 0x223   : > { %6257 = vmatprep.mubr.msk.bf16.mxu0 %vm7071_vm0, %v8766_v13 }
 0x225   : > { %v1590_v9 = vpop.f32.mrb[40].mxu0 }
 0x226   : > { %v1591_v15 = vadd.f32 %v1590_v9, %v8148_v50  ;;  %v6055_v25 = vpop.f32.mrb[41].mxu0 }
 0x227   : > { %v1593_v41 = vpop.f32.mrb[42].mxu0 }
 0x228   : > { %v1594_v10 = vadd.f32 %v1593_v41, %v8152_v0  ;;  %v6056_v8 = vpop.f32.mrb[43].mxu0  ;;  %v8269_v41 = vsel %vm1288_vm9, %v2580_v55, %v2582_v16 }
 0x22a   : > { %6258 = vmatmul.mubr.bf16.gmra.mrb[148].mxu0 %v8245_v45 }
 0x22b   : > { %6261 = vmatprep.mubr.msk.bf16.mxu0 %vm7071_vm0, %v8766_v13 }
 0x22d   : > { %v1736_v63 = vpop.f32.mrb[44].mxu0 }
 0x22e   : > { %v1775_v33 = vadd.f32 %v1736_v63, %v8173_v35  ;;  %v6075_v50 = vpop.f32.mrb[45].mxu0 }
 0x22f   : > { %v1739_v39 = vpop.f32.mrb[46].mxu0 }
 0x230   : > { %v1776_v1 = vadd.f32 %v1739_v39, %v8181_v20  ;;  %v6076_v0 = vpop.f32.mrb[47].mxu0  ;;  %v8262_v20 = vsel %vm1288_vm9, %v2578_v56, %v2580_v55 }
 0x232   : > { %6262 = vmatmul.mubr.bf16.gmra.mrb[152].mxu0 %v8254_v58 }
 0x233   : > { %6265 = vmatprep.mubr.msk.bf16.mxu0 %vm7071_vm0, %v8766_v13 }
 0x235   : > { %v1744_v32 = vpop.f32.mrb[48].mxu0 }
 0x236   : > { %v1777_v60 = vadd.f32 %v1744_v32, %v8197_v7  ;;  %v6079_v36 = vpop.f32.mrb[49].mxu0 }
 0x237   : > { %v1747_v35 = vpop.f32.mrb[50].mxu0 }
 0x238   : > { %v1778_v19 = vadd.f32 %v1747_v35, %v1570_v44  ;;  %v6080_v23 = vpop.f32.mrb[51].mxu0 }
 0x23a   : > { %6266 = vmatmul.mubr.bf16.gmra.mrb[156].mxu0 %v8262_v20 }
 0x23b   : > { %6269 = vmatprep.mubr.msk.bf16.mxu0 %vm7071_vm0, %v8766_v13 }
 0x23d   : > { %v1752_v54 = vpop.f32.mrb[52].mxu0 }
 0x23e   : > { %v1779_v9 = vadd.f32 %v1752_v54, %v1575_v5  ;;  %v6083_v30 = vpop.f32.mrb[53].mxu0 }
 0x23f   : > { %v1755_v18 = vpop.f32.mrb[54].mxu0 }
 0x240   : > { %v1780_v25 = vadd.f32 %v1755_v18, %v1578_v21  ;;  %v6084_v7 = vpop.f32.mrb[55].mxu0 }
 0x242   : > { %6270 = vmatmul.mubr.bf16.gmra.mrb[160].mxu0 %v8269_v41 }
 0x243   : > { %6341 = vmatprep.mubr.msk.f32.mxu0 %vm7071_vm0, %v8766_v13 }
 0x245   : > { %v1760_v44 = vpop.f32.mrb[56].mxu0 }
 0x246   : > { %v1781_v8 = vadd.f32 %v1760_v44, %v1583_v6  ;;  %v6087_v63 = vpop.f32.mrb[57].mxu0 }
 0x247   : > { %v1763_v56 = vpop.f32.mrb[58].mxu0 }
 0x248   : > { %v1782_v50 = vadd.f32 %v1763_v56, %v1586_v46  ;;  %v6088_v39 = vpop.f32.mrb[59].mxu0 }
 0x24d   : > { %v1768_v43 = vpop.f32.mrb[60].mxu0 }
 0x24e   : > { %v1783_v5 = vadd.f32 %v1768_v43, %v1591_v15  ;;  %v6091_v0 = vpop.f32.mrb[61].mxu0 }
 0x24f   : > { %v1771_v32 = vpop.f32.mrb[62].mxu0 }
 0x250   : > { %v1784_v21 = vadd.f32 %v1771_v32, %v1594_v10  ;;  %v6092_v36 = vpop.f32.mrb[63].mxu0 }
 0x255   : > { %v1939_v35 = vpop.f32.mrb[64].mxu0 }
 0x256   : > { %v1978_v55 = vadd.f32 %v1939_v35, %v1775_v33  ;;  %v6111_v23 = vpop.f32.mrb[65].mxu0 }
 0x257   : > { %v1942_v54 = vpop.f32.mrb[66].mxu0 }
 0x258   : > { %v1979_v16 = vadd.f32 %v1942_v54, %v1776_v1  ;;  %v6112_v30 = vpop.f32.mrb[67].mxu0 }
 0x25d   : > { %v1947_v18 = vpop.f32.mrb[68].mxu0 }
 0x25e   : > { %v1980_v7 = vadd.f32 %v1947_v18, %v1777_v60  ;;  %v6115_v47 = vpop.f32.mrb[69].mxu0 }
 0x25f   : > { %v1950_v6 = vpop.f32.mrb[70].mxu0 }
 0x260   : > { %v1981_v44 = vadd.f32 %v1950_v6, %v1778_v19  ;;  %v6116_v63 = vpop.f32.mrb[71].mxu0 }
 0x265   : > { %v1955_v46 = vpop.f32.mrb[72].mxu0 }
 0x266   : > { %v1982_v56 = vadd.f32 %v1955_v46, %v1779_v9  ;;  %v6119_v39 = vpop.f32.mrb[73].mxu0 }
 0x267   : > { %v1958_v15 = vpop.f32.mrb[74].mxu0 }
 0x268   : > { %v1983_v43 = vadd.f32 %v1958_v15, %v1780_v25  ;;  %v6120_v0 = vpop.f32.mrb[75].mxu0 }
 0x26d   : > { %v1963_v10 = vpop.f32.mrb[76].mxu0 }
 0x26e   : > { %v1984_v32 = vadd.f32 %v1963_v10, %v1781_v8  ;;  %v6123_v36 = vpop.f32.mrb[77].mxu0 }
 0x26f   : > { %v1966_v33 = vpop.f32.mrb[78].mxu0 }
 0x270   : > { %v1985_v35 = vadd.f32 %v1966_v33, %v1782_v50  ;;  %v6124_v23 = vpop.f32.mrb[79].mxu0 }
 0x275   : > { %v1971_v1 = vpop.f32.mrb[80].mxu0 }
 0x276   : > { %v1986_v54 = vadd.f32 %v1971_v1, %v1783_v5  ;;  %v6127_v30 = vpop.f32.mrb[81].mxu0 }
 0x277   : > { %v1974_v60 = vpop.f32.mrb[82].mxu0 }
 0x278   : > { %v1987_v47 = vadd.f32 %v1974_v60, %v1784_v21  ;;  %v6128_v18 = vpop.f32.mrb[83].mxu0  ;;  %v1056_v21 = vld [vmem:[%s8672_s14] sm:$0x1] }
 0x27d   : > { %v2110_v19 = vpop.f32.mrb[84].mxu0 }
 0x27e   : > { %v2149_v6 = vadd.f32 %v2110_v19, %v1978_v55  ;;  %v6147_v63 = vpop.f32.mrb[85].mxu0 }
 0x27f   : > { %v2113_v9 = vpop.f32.mrb[86].mxu0 }
 0x280   : > { %v2150_v46 = vadd.f32 %v2113_v9, %v1979_v16  ;;  %v6148_v39 = vpop.f32.mrb[87].mxu0 }
 0x285   : > { %v2118_v25 = vpop.f32.mrb[88].mxu0 }
 0x286   : > { %v2151_v15 = vadd.f32 %v2118_v25, %v1980_v7  ;;  %v6151_v0 = vpop.f32.mrb[89].mxu0 }
 0x287   : > { %v2121_v8 = vpop.f32.mrb[90].mxu0 }
 0x288   : > { %v2152_v10 = vadd.f32 %v2121_v8, %v1981_v44  ;;  %v6152_v36 = vpop.f32.mrb[91].mxu0 }
 0x28d   : > { %v2126_v50 = vpop.f32.mrb[92].mxu0 }
 0x28e   : > { %v2153_v33 = vadd.f32 %v2126_v50, %v1982_v56  ;;  %v6155_v23 = vpop.f32.mrb[93].mxu0 }
 0x28f   : > { %v2129_v5 = vpop.f32.mrb[94].mxu0 }
 0x290   : > { %v2154_v1 = vadd.f32 %v2129_v5, %v1983_v43  ;;  %v6156_v30 = vpop.f32.mrb[95].mxu0 }
 0x295   : > { %v2134_v55 = vpop.f32.mrb[96].mxu0  ;;  %v1131_v60 = vpop.f32.mrb[0].mxu1 }
 0x296   : > { %v2155_v16 = vadd.f32 %v2134_v55, %v1984_v32  ;;  %v8277_v18 = vadd.f32 %v1131_v60, %v1056_v21  ;;  %v6159_v7 = vpop.f32.mrb[97].mxu0  ;;  %v5977_v19 = vpop.f32.mrb[1].mxu1 }
 0x297   : > { %v2137_v63 = vpop.f32.mrb[98].mxu0 }
 0x298   : > { %6996 = vtanh.f32 %v8277_v18  ;;  %v2156_v44 = vadd.f32 %v2137_v63, %v1985_v35  ;;  %v6160_v56 = vpop.f32.mrb[99].mxu0 }
 0x29d   : > { %v2142_v9 = vpop.f32.mrb[100].mxu0 }
 0x29e   : > { %v2157_v39 = vadd.f32 %v2142_v9, %v1986_v54  ;;  %v6163_v43 = vpop.f32.mrb[101].mxu0 }
 0x29f   : > { %v2145_v25 = vpop.f32.mrb[102].mxu0 }
 0x2a0   : > { %v2158_v0 = vadd.f32 %v2145_v25, %v1987_v47  ;;  %v6164_v8 = vpop.f32.mrb[103].mxu0 }
 0x2a2   : > { %v6997_v36 = vpop.eup %6996 }
 0x2a3   : > { %1143 = vrot.lane.b32.xlu0 %v6997_v36, %s7075_s16 }
 0x2a5   : > { %v2297_v50 = vpop.f32.mrb[104].mxu0 }
 0x2a6   : > { %v2336_v32 = vadd.f32 %v2297_v50, %v2149_v6  ;;  %v6183_v23 = vpop.f32.mrb[105].mxu0 }
 0x2a7   : > { %v2300_v5 = vpop.f32.mrb[106].mxu0 }
 0x2a8   : > { %v2337_v30 = vadd.f32 %v2300_v5, %v2150_v46  ;;  %v6184_v21 = vpop.f32.mrb[107].mxu0 }
 0x2ad   : > { %v2305_v55 = vpop.f32.mrb[108].mxu0 }
 0x2ae   : > { %v2338_v60 = vadd.f32 %v2305_v55, %v2151_v15  ;;  %v6187_v7 = vpop.f32.mrb[109].mxu0 }
 0x2af   : > { %v2308_v35 = vpop.f32.mrb[110].mxu0 }
 0x2b0   : > { %v2339_v19 = vadd.f32 %v2308_v35, %v2152_v10  ;;  %v6188_v63 = vpop.f32.mrb[111].mxu0 }
 0x2b5   : > { %v2313_v54 = vpop.f32.mrb[112].mxu0 }
 0x2b6   : > { %v2340_v56 = vadd.f32 %v2313_v54, %v2153_v33  ;;  %v6191_v9 = vpop.f32.mrb[113].mxu0 }
 0x2b7   : > { %v2316_v47 = vpop.f32.mrb[114].mxu0 }
 0x2b8   : > { %v2341_v43 = vadd.f32 %v2316_v47, %v2154_v1  ;;  %v6192_v25 = vpop.f32.mrb[115].mxu0 }
 0x2bd   : > { %v2321_v8 = vpop.f32.mrb[116].mxu0 }
 0x2be   : > { %v2342_v36 = vadd.f32 %v2321_v8, %v2155_v16  ;;  %v6195_v59 = vpop.f32.mrb[117].mxu0 }
 0x2bf   : > { %v2324_v6 = vpop.f32.mrb[118].mxu0 }
 0x2c0   : > { %v2343_v50 = vadd.f32 %v2324_v6, %v2156_v44  ;;  %v6196_v23 = vpop.f32.mrb[119].mxu0 }
 0x2c5   : > { %v2329_v46 = vpop.f32.mrb[120].mxu0 }
 0x2c6   : > { %v2344_v5 = vadd.f32 %v2329_v46, %v2157_v39  ;;  %v6199_v21 = vpop.f32.mrb[121].mxu0 }
 0x2c7   : > { %v2332_v15 = vpop.f32.mrb[122].mxu0 }
 0x2c8   : > { %v2345_v55 = vadd.f32 %v2332_v15, %v2158_v0  ;;  %v6200_v7 = vpop.f32.mrb[123].mxu0 }
 0x2cd   : > { %v2500_v10 = vpop.f32.mrb[124].mxu0 }
 0x2ce   : > { %v2539_v35 = vadd.f32 %v2500_v10, %v2336_v32  ;;  %v6219_v63 = vpop.f32.mrb[125].mxu0 }
 0x2cf   : > { %v2503_v33 = vpop.f32.mrb[126].mxu0 }
 0x2d0   : > { %v2540_v54 = vadd.f32 %v2503_v33, %v2337_v30  ;;  %v6220_v9 = vpop.f32.mrb[127].mxu0 }
 0x2d5   : > { %v2508_v1 = vpop.f32.mrb[128].mxu0 }
 0x2d6   : > { %v2541_v47 = vadd.f32 %v2508_v1, %v2338_v60  ;;  %v6223_v25 = vpop.f32.mrb[129].mxu0 }
 0x2d7   : > { %v2511_v16 = vpop.f32.mrb[130].mxu0 }
 0x2d8   : > { %v2542_v59 = vadd.f32 %v2511_v16, %v2339_v19  ;;  %v6224_v8 = vpop.f32.mrb[131].mxu0  ;;  %v5235_v16 = vmul.f32 -1.442695, %v8277_v18 }
 0x2da   : > { %6998 = vpow2.f32 %v5235_v16 }
 0x2dd   : > { %v2516_v44 = vpop.f32.mrb[132].mxu0 }
 0x2de   : > { %v2543_v6 = vadd.f32 %v2516_v44, %v2340_v56  ;;  %v6227_v23 = vpop.f32.mrb[133].mxu0 }
 0x2df   : > { %v2519_v39 = vpop.f32.mrb[134].mxu0 }
 0x2e0   : > { %v2544_v46 = vadd.f32 %v2519_v39, %v2341_v43  ;;  %v6228_v21 = vpop.f32.mrb[135].mxu0 }
 0x2e5   : > { %v2524_v0 = vpop.f32.mrb[136].mxu0 }
 0x2e6   : > { %v2545_v15 = vadd.f32 %v2524_v0, %v2342_v36  ;;  %v6231_v7 = vpop.f32.mrb[137].mxu0  ;;  %v6999_v0 = vpop.eup %6998 }
 0x2e7   : > { %v2527_v32 = vpop.f32.mrb[138].mxu0 }
 0x2e8   : > { %v2546_v10 = vadd.f32 %v2527_v32, %v2343_v50  ;;  %v6232_v63 = vpop.f32.mrb[139].mxu0 }
 0x2ed   : > { %v2532_v30 = vpop.f32.mrb[140].mxu0 }
 0x2ee   : > { %v2547_v33 = vadd.f32 %v2532_v30, %v2344_v5  ;;  %v6235_v9 = vpop.f32.mrb[141].mxu0 }
 0x2ef   : > { %v2535_v60 = vpop.f32.mrb[142].mxu0 }
 0x2f0   : > { %v2548_v1 = vadd.f32 %v2535_v60, %v2345_v55  ;;  %v6236_v25 = vpop.f32.mrb[143].mxu0 }
 0x2f5   : > { %v2671_v19 = vpop.f32.mrb[144].mxu0 }
 0x2f6   : > { %v8281_v56 = vadd.f32 %v2671_v19, %v2539_v35  ;;  %v6255_v8 = vpop.f32.mrb[145].mxu0  ;;  %v1138_v35 = vadd.f32 1.0, %v6999_v0  ;;  %v2942_v0 = vld [vmem:[%s8789_s24 + $0x40] sm:$0xff] }
 0x2f7   : > { %v2674_v43 = vpop.f32.mrb[146].mxu0 }
 0x2f8   : > { %v8283_v44 = vadd.f32 %v2674_v43, %v2540_v54  ;;  %v6256_v36 = vpop.f32.mrb[147].mxu0  ;;  %7000 = vrcp.f32 %v1138_v35 }
 0x2fd   : > { %v2679_v23 = vpop.f32.mrb[148].mxu0 }
 0x2fe   : > { %v8285_v50 = vadd.f32 %v2679_v23, %v2541_v47  ;;  %v6259_v39 = vpop.f32.mrb[149].mxu0 }
 0x2ff   : > { %v2682_v5 = vpop.f32.mrb[150].mxu0 }
 0x300   : > { %v8287_v21 = vadd.f32 %v2682_v5, %v2542_v59  ;;  %v6260_v55 = vpop.f32.mrb[151].mxu0 }
 0x302   : > { %v7001_v16 = vpop.eup %7000 }
 0x305   : > { %v2687_v7 = vpop.f32.mrb[152].mxu0 }
 0x306   : > { %v8289_v32 = vadd.f32 %v2687_v7, %v2543_v6  ;;  %v6263_v18 = vpop.f32.mrb[153].mxu0  ;;  %v1153_v7 = vld [vmem:[%s8673_s15] sm:$0xff] }
 0x307   : > { %v2690_v63 = vpop.f32.mrb[154].mxu0  ;;  %v1154_v18 = vld [vmem:[%s8673_s15 + $0x8] sm:$0x3] }
 0x308   : > { %v8291_v30 = vadd.f32 %v2690_v63, %v2544_v46  ;;  %v6264_v54 = vpop.f32.mrb[155].mxu0  ;;  %v6661_v35 = vpack.c.bf16 %v1154_v18, %v1153_v7  ;;  %v6926_v7 = vld [vmem:[#allocation4 + $0x60] sm:$0xff]   ;;  %v6928_v18 = vld [vmem:[#allocation4 + $0x70] sm:$0xff]  }
 0x30a   : > { %6663 = vmatpush3.bf16.msk.msra.mxu1 %vm7856_vm12, %v6661_v35  ;;  %v7012_v35 = vld [vmem:[#allocation2] sm:$0xff] }
 0x30b   : > { %6273 = vmatprep.subr.bf16.mxu1 %v8766_v13 }
 0x30d   : > { %v2695_v9 = vpop.f32.mrb[156].mxu0 }
 0x30e   : > { %v8293_v60 = vadd.f32 %v2695_v9, %v2545_v15  ;;  %v6267_v47 = vpop.f32.mrb[157].mxu0  ;;  %v2934_v15 = vld [vmem:[%s8789_s24] sm:$0xff]  ;;  %v2935_v9 = vld [vmem:[%s8789_s24 + $0x8] sm:$0xff] }
 0x30f   : > { %v2698_v25 = vpop.f32.mrb[158].mxu0  ;;  %v2937_v47 = vld [vmem:[%s8789_s24 + $0x18] sm:$0xff] }
 0x310   : > { %v8295_v19 = vadd.f32 %v2698_v25, %v2546_v10  ;;  %v6268_v59 = vpop.f32.mrb[159].mxu0  ;;  %v2936_v10 = vld [vmem:[%s8789_s24 + $0x10] sm:$0xff]  ;;  %v2941_v25 = vld [vmem:[%s8789_s24 + $0x38] sm:$0xff] }
 0x311   : > { %v2943_v59 = vld [vmem:[%s8789_s24 + $0x48] sm:$0xff] }
 0x315   : > { %v2703_v8 = vpop.f32.mrb[160].mxu0  ;;  %v1144_v43 = vpop.permute.xlu0 %1143 }
 0x316   : > { %v8297_v6 = vadd.f32 %v2703_v8, %v2547_v33  ;;  %v1146_v36 = vmul.f32 %v7001_v16, %v1144_v43  ;;  %v6271_v23 = vpop.f32.mrb[161].mxu0  ;;  %v2938_v33 = vld [vmem:[%s8789_s24 + $0x20] sm:$0xff]  ;;  %v6915_v43 = vld [vmem:[%s8665_s7 + $0x208] sm:$0xff]  }
 0x317   : > { %v2706_v39 = vpop.f32.mrb[162].mxu0  ;;  %v6917_v23 = vld [vmem:[%s8665_s7 + $0x218] sm:$0xff]  }
 0x318   : > { %7002 = vtanh.f32 %v1146_v36  ;;  %v8299_v46 = vadd.f32 %v2706_v39, %v2548_v1  ;;  %v6272_v5 = vpop.f32.mrb[163].mxu0  ;;  %v2940_v1 = vld [vmem:[%s8789_s24 + $0x30] sm:$0xff]  ;;  %v6918_v39 = vld [vmem:[%s8665_s7 + $0x220] sm:$0xff]  }
 0x319   : > { %v6916_v36 = vld [vmem:[%s8665_s7 + $0x210] sm:$0xff]   ;;  %v6919_v5 = vld [vmem:[%s8665_s7 + $0x228] sm:$0xff]  }
 0x322   : > { %v7003_v55 = vpop.eup %7002 }
 0x323   : > { %1149 = vrot.lane.b32.xlu1 %v7003_v55, %s7076_s2  ;;  %v6920_v55 = vld [vmem:[%s8665_s7 + $0x230] sm:$0xff]  }
 0x327   : > { %2946 = vperm.xlu1 %6849, %v2934_v15   ;;  %v6921_v15 = vld [vmem:[%s8665_s7 + $0x238] sm:$0xff]  }
 0x32b   : > { %2956 = vperm.xlu1 %6849, %v2936_v10   ;;  %v6922_v10 = vld [vmem:[#allocation4 + $0x40] sm:$0xff]  }
 0x32f   : > { %2966 = vperm.xlu1 %6849, %v2938_v33   ;;  %v6923_v33 = vld [vmem:[#allocation4 + $0x48] sm:$0xff]  }
 0x333   : > { %2976 = vperm.xlu1 %6849, %v2940_v1   ;;  %v6924_v1 = vld [vmem:[#allocation4 + $0x50] sm:$0xff]  }
 0x337   : > { %2986 = vperm.xlu1 %6849, %v2942_v0   ;;  %v6925_v0 = vld [vmem:[#allocation4 + $0x58] sm:$0xff]  }
 0x395   : > { %v1150_v63 = vpop.permute.xlu1 %1149 }
 0x396   : > { %v1152_v54 = vmul.f32 %v7001_v16, %v1150_v63  ;;  %v6914_v16 = vld [vmem:[%s8665_s7 + $0x200] sm:$0xff]   ;;  %v3168_v63 = vshll.u32 %v7012_v35, 16 }
 0x398   : > { %1157 = vrot.lane.b32.xlu0 %v1152_v54, %s7077_s26  ;;  %v6929_v54 = vld [vmem:[#allocation4 + $0x78] sm:$0xff]  }
 0x39c   : > { %2951 = vperm.xlu0 %6848, %v2935_v9   ;;  %v3166_v9 = vshrl.u32 %v7012_v35, 16 }
 0x3a0   : > { %2961 = vperm.xlu0 %6848, %v2937_v47   ;;  %v3170_v47 = vrot.slane %v3168_v63, 1  ;;  %v8402_v63 = vld [vmem:[#allocation2 + $0x38] sm:$0xff] }
 0x3a4   : > { %2971 = vperm.xlu0 %6848, %v2939_v61  }
 0x3a8   : > { %2981 = vperm.xlu0 %6848, %v2941_v25   ;;  %v3171_v25 = vor.u32 %v3170_v47, %v3166_v9  ;;  %v6946_v9 = vld [vmem:[#allocation4 + $0xc0] sm:$0xff]   ;;  %v8406_v47 = vld [vmem:[#allocation2 + $0x10] sm:$0xff] }
 0x3ac   : > { %2991 = vperm.xlu0 %6848, %v2943_v59  }
 0x40a   : > { %v1158_v8 = vpop.permute.xlu0 %1157 }
 0x40b   : > { %5983 = vmatmul.mubr.msk.f32.vlgmr.msra.gmra.mrb[2].mxu1 %vm1057_vm13, %v1158_v8 }
 0x40c   : > { %6274 = vmatpush3.bf16.msra.mxu1 %v6914_v16  ;;  %6289 = vmatprep.mubr.msk.bf16.mxu1 %vm7071_vm0, %v8766_v13 }
 0x40d   : > { %6275 = vmatprep.subr.bf16.mxu1 %v8766_v13 }
 0x410   : > { %6276 = vmatpush3.bf16.msra.mxu1 %v6915_v43  ;;  %v6931_v43 = vld [vmem:[#allocation4 + $0x8] sm:$0xff]  }
 0x411   : > { %6277 = vmatprep.subr.bf16.mxu1 %v8766_v13 }
 0x414   : > { %6278 = vmatpush3.bf16.msra.mxu1 %v6916_v36 }
 0x415   : > { %6279 = vmatprep.subr.bf16.mxu1 %v8766_v13 }
 0x418   : > { %6280 = vmatpush3.bf16.msra.mxu1 %v6917_v23  ;;  %v6933_v23 = vld [vmem:[#allocation4 + $0x18] sm:$0xff]  }
 0x419   : > { %6281 = vmatprep.subr.bf16.mxu1 %v8766_v13 }
 0x41c   : > { %6282 = vmatpush3.bf16.msra.mxu1 %v6918_v39  ;;  %v6935_v39 = vld [vmem:[#allocation4 + $0x28] sm:$0xff]  }
 0x41d   : > { %6283 = vmatprep.subr.bf16.mxu1 %v8766_v13 }
 0x420   : > { %6284 = vmatpush3.bf16.msra.mxu1 %v6919_v5  ;;  %v6941_v5 = vld [vmem:[#allocation4 + $0x98] sm:$0xff]  }
 0x421   : > { %6285 = vmatprep.subr.bf16.mxu1 %v8766_v13 }
 0x424   : > { %6286 = vmatpush3.bf16.msra.mxu1 %v6920_v55  ;;  %v7014_v55 = vld [vmem:[#allocation2 + $0x18] sm:$0xff] }
 0x425   : > { %6287 = vmatprep.subr.bf16.mxu1 %v8766_v13 }
 0x428   : > { %6288 = vmatpush3.bf16.msra.mxu1 %v6921_v15  ;;  %v6942_v15 = vld [vmem:[#allocation4 + $0xa0] sm:$0xff]  }
 0x429   : > { %6344 = vmatprep.subr.bf16.mxu1 %v6922_v10 }
 0x42b   : > { %6290 = vmatmul.mubr.bf16.vlgmr.msra.gmra.mrb[4].mxu1 %v7704_v26  ;;  %v6927_v26 = vld [vmem:[#allocation4 + $0x68] sm:$0xff]  }
 0x42c   : > { %6293 = vmatprep.mubr.msk.bf16.mxu1 %vm7071_vm0, %v8766_v13  ;;  %6345 = vmatpush3.bf16.msra.mxu1 %v6922_v10  ;;  %v6943_v10 = vld [vmem:[#allocation4 + $0xa8] sm:$0xff]  }
 0x42d   : > { %6346 = vmatprep.subr.bf16.mxu1 %v6923_v33 }
 0x430   : > { %6347 = vmatpush3.bf16.msra.mxu1 %v6923_v33  ;;  %v7016_v33 = vld [vmem:[#allocation2 + $0x28] sm:$0xff] }
 0x431   : > { %6348 = vmatprep.subr.bf16.mxu1 %v6924_v1 }
 0x433   : > { %6294 = vmatmul.mubr.bf16.gmra.mrb[8].mxu1 %v7707_v52  ;;  %v8383_v52 = vld [vmem:[#allocation2 + $0x8] sm:$0xff] }
 0x434   : > { %6297 = vmatprep.mubr.msk.bf16.mxu1 %vm7071_vm0, %v8766_v13  ;;  %6349 = vmatpush3.bf16.msra.mxu1 %v6924_v1  ;;  %v3173_v61 = vshll.u32 %v8383_v52, 16  ;;  %v7017_v1 = vld [vmem:[#allocation2 + $0x30] sm:$0xff] }
 0x435   : > { %6350 = vmatprep.subr.bf16.mxu1 %v6925_v0 }
 0x436   : > { %v3175_v59 = vrot.slane %v3173_v61, 1  ;;  %v8409_v61 = vrot.slane %v8406_v47, 1 }
 0x438   : > { %6351 = vmatpush3.bf16.msra.mxu1 %v6925_v0  ;;  %v3176_v16 = vsel %vm1426_vm7, %v3171_v25, %v3175_v59  ;;  %v3482_v0 = vld [vmem:[#allocation2] sm:$0xfe] }
 0x439   : > { %6352 = vmatprep.subr.bf16.mxu1 %v6926_v7 }
 0x43b   : > { %6298 = vmatmul.mubr.bf16.gmra.mrb[12].mxu1 %v7710_v11  ;;  %v6930_v11 = vld [vmem:[#allocation4] sm:$0xff]  }
 0x43c   : > { %6301 = vmatprep.mubr.msk.bf16.mxu1 %vm7071_vm0, %v8766_v13  ;;  %6353 = vmatpush3.bf16.msra.mxu1 %v6926_v7  ;;  %v6944_v7 = vld [vmem:[#allocation4 + $0xb0] sm:$0xff]  }
 0x43d   : > { %6354 = vmatprep.subr.bf16.mxu1 %v6927_v26 }
 0x440   : > { %6355 = vmatpush3.bf16.msra.mxu1 %v6927_v26  ;;  %v3504_v26 = vrot.slane %v3482_v0, 1  ;;  %v3031_v0 = vld [vmem:[%s8667_s9 + $0x58] sm:$0xff] }
 0x441   : > { %6356 = vmatprep.subr.bf16.mxu1 %v6928_v18 }
 0x443   : > { %6302 = vmatmul.mubr.bf16.gmra.mrb[16].mxu1 %v7713_v51  ;;  %v3177_v51 = vshrl.u32 %v8383_v52, 16 }
 0x444   : > { %6305 = vmatprep.mubr.msk.bf16.mxu1 %vm7071_vm0, %v8766_v13  ;;  %6357 = vmatpush3.bf16.msra.mxu1 %v6928_v18  ;;  %v6932_v13 = vld [vmem:[#allocation4 + $0x10] sm:$0xff]   ;;  %v3505_v18 = vrot.slane %v8383_v52, 1 }
 0x445   : > { %6358 = vmatprep.subr.bf16.mxu1 %v6929_v54  ;;  %v3179_v8 = vor.u32 %v3177_v51, %v3175_v59  ;;  %v6947_v59 = vld [vmem:[#allocation4 + $0xc8] sm:$0xff]  }
 0x447   : > { %v3184_v36 = vsel %vm1426_vm7, %v3179_v8, %v7720_v49  ;;  %v6936_v49 = vld [vmem:[#allocation4 + $0x30] sm:$0xff]  }
 0x448   : > { %6359 = vmatpush3.bf16.msra.mxu1 %v6929_v54  ;;  %v3506_v54 = vsel %vm1288_vm9, %v3504_v26, %v3505_v18  ;;  %v6948_v8 = vld [vmem:[#allocation4 + $0xd0] sm:$0xff]  }
 0x449   : > { %6376 = vmatprep.subr.bf16.mxu1 %v6930_v11 }
 0x44b   : > { %6306 = vmatmul.mubr.bf16.gmra.mrb[20].mxu1 %v7724_v38  ;;  %v6934_v38 = vld [vmem:[#allocation4 + $0x20] sm:$0xff]  }
 0x44c   : > { %6360 = vmatprep.mubr.bf16.mxu1 %v3176_v16  ;;  %v3508_v16 = vsel %vm1288_vm9, %v3505_v18, %v8409_v61  ;;  %v7020_v18 = vld [vmem:[#allocation2 + $0x20] sm:$0xff] }
 0x453   : > { %6361 = vmatmul.mubr.bf16.vlgmr.msra.gmra.mrb[24].mxu1 %v3184_v36  ;;  %v3020_v36 = vld [vmem:[%s8667_s9] sm:$0xff] }
 0x454   : > { %6364 = vmatprep.mubr.bf16.mxu1 %v7734_v12  ;;  %6377 = vmatpush3.bf16.msra.mxu1 %v6930_v11  ;;  %v6937_v12 = vld [vmem:[#allocation4 + $0x38] sm:$0xff]  }
 0x455   : > { %6378 = vmatprep.subr.bf16.mxu1 %v6931_v43  ;;  %v7019_v11 = vld [vmem:[#allocation2 + $0x18] sm:$0xff] }
 0x456   : > { %v3509_v25 = vrot.slane %v7019_v11, 1 }
 0x458   : > { %6379 = vmatpush3.bf16.msra.mxu1 %v6931_v43  ;;  %v3510_v51 = vsel %vm1288_vm9, %v8409_v61, %v3509_v25  ;;  %v6949_v43 = vld [vmem:[#allocation4 + $0xd8] sm:$0xff]  }
 0x459   : > { %6380 = vmatprep.subr.bf16.mxu1 %v6932_v13 }
 0x45b   : > { %6365 = vmatmul.mubr.bf16.gmra.mrb[28].mxu1 %v8139_v24  ;;  %v6938_v24 = vld [vmem:[#allocation4 + $0x80] sm:$0xff]  }
 0x45c   : > { %6368 = vmatprep.mubr.bf16.mxu1 %v8161_v34  ;;  %6381 = vmatpush3.bf16.msra.mxu1 %v6932_v13  ;;  %v6939_v34 = vld [vmem:[#allocation4 + $0x88] sm:$0xff]  }
 0x45d   : > { %6382 = vmatprep.subr.bf16.mxu1 %v6933_v23  ;;  %v3021_v13 = vld [vmem:[%s8667_s9 + $0x8] sm:$0xff] }
 0x460   : > { %6383 = vmatpush3.bf16.msra.mxu1 %v6933_v23  ;;  %v3511_v23 = vsel %vm1288_vm9, %v3509_v25, %v8231_v42 }
 0x461   : > { %6384 = vmatprep.subr.bf16.mxu1 %v6934_v38 }
 0x463   : > { %6369 = vmatmul.mubr.bf16.gmra.mrb[32].mxu1 %v8185_v29  ;;  %v7013_v29 = vld [vmem:[#allocation2 + $0x10] sm:$0xff] }
 0x464   : > { %6372 = vmatprep.mubr.bf16.mxu1 %v8209_v22  ;;  %6385 = vmatpush3.bf16.msra.mxu1 %v6934_v38  ;;  %v6940_v22 = vld [vmem:[#allocation4 + $0x90] sm:$0xff]   ;;  %v6665_v38 = vpack.c.bf16 %v3021_v13, %v3020_v36  ;;  %v7023_v36 = vld [vmem:[#allocation2 + $0x38] sm:$0xff] }
 0x465   : > { %6386 = vmatprep.subr.bf16.mxu1 %v6935_v39  ;;  %v6960_v13 = vld [vmem:[#allocation4 + $0x130] sm:$0xff]  }
 0x466   : > { %6666 = vmatpush3.bf16.msra.mxu0 %v6665_v38  ;;  %v8478_v38 = vld [vmem:[#allocation2 + $0x40] sm:$0xff] }
 0x467   : > { %6667 = vmatprep.subr.bf16.mxu0 %v8776_v40 }
 0x468   : > { %6387 = vmatpush3.bf16.msra.mxu1 %v6935_v39  ;;  %v6950_v39 = vld [vmem:[#allocation4 + $0xe0] sm:$0xff]  }
 0x469   : > { %6388 = vmatprep.subr.bf16.mxu1 %v6936_v49 }
 0x46b   : > { %6373 = vmatmul.mubr.bf16.gmra.mrb[36].mxu1 %v8225_v17  ;;  %v7015_v17 = vld [vmem:[#allocation2 + $0x20] sm:$0xff] }
 0x46c   : > { %6389 = vmatpush3.bf16.msra.mxu1 %v6936_v49  ;;  %6392 = vmatprep.mubr.bf16.mxu1 %v7012_v35  ;;  %v6945_v35 = vld [vmem:[#allocation4 + $0xb8] sm:$0xff]  }
 0x46d   : > { %6390 = vmatprep.subr.bf16.mxu1 %v6937_v12  ;;  %v3022_v49 = vld [vmem:[%s8667_s9 + $0x10] sm:$0xff] }
 0x470   : > { %6391 = vmatpush3.bf16.msra.mxu1 %v6937_v12  ;;  %v3023_v12 = vld [vmem:[%s8667_s9 + $0x18] sm:$0xff] }
 0x471   : > { %6408 = vmatprep.subr.bf16.mxu1 %v6938_v24  ;;  %v6668_v42 = vpack.c.bf16 %v3023_v12, %v3022_v49  ;;  %v6964_v49 = vld [vmem:[#allocation4 + $0x150] sm:$0xff]   ;;  %v6965_v12 = vld [vmem:[#allocation4 + $0x158] sm:$0xff]  }
 0x473   : > { %6393 = vmatmul.mubr.bf16.vlgmr.msra.gmra.mrb[24].mxu1 %v8383_v52  ;;  %6669 = vmatpush3.bf16.msra.mxu0 %v6668_v42 }
 0x474   : > { %6396 = vmatprep.mubr.bf16.mxu1 %v7013_v29  ;;  %6409 = vmatpush3.bf16.msra.mxu1 %v6938_v24  ;;  %v6951_v24 = vld [vmem:[#allocation4 + $0xe8] sm:$0xff]  }
 0x475   : > { %6410 = vmatprep.subr.bf16.mxu1 %v6939_v34  ;;  %6670 = vmatprep.subr.bf16.mxu0 %v8776_v40 }
 0x478   : > { %6411 = vmatpush3.bf16.msra.mxu1 %v6939_v34  ;;  %v3025_v34 = vld [vmem:[%s8667_s9 + $0x28] sm:$0xff] }
 0x479   : > { %6412 = vmatprep.subr.bf16.mxu1 %v6940_v22 }
 0x47b   : > { %6397 = vmatmul.mubr.bf16.gmra.mrb[28].mxu1 %v7014_v55  ;;  %v6955_v55 = vld [vmem:[#allocation4 + $0x108] sm:$0xff]  }
 0x47c   : > { %6400 = vmatprep.mubr.bf16.mxu1 %v7015_v17  ;;  %6413 = vmatpush3.bf16.msra.mxu1 %v6940_v22  ;;  %v6952_v22 = vld [vmem:[#allocation4 + $0xf0] sm:$0xff]   ;;  %v3027_v17 = vld [vmem:[%s8667_s9 + $0x38] sm:$0xff] }
 0x47d   : > { %6414 = vmatprep.subr.bf16.mxu1 %v6941_v5 }
 0x480   : > { %6415 = vmatpush3.bf16.msra.mxu1 %v6941_v5  ;;  %v6953_v5 = vld [vmem:[#allocation4 + $0xf8] sm:$0xff]  }
 0x481   : > { %6416 = vmatprep.subr.bf16.mxu1 %v6942_v15 }
 0x483   : > { %6401 = vmatmul.mubr.bf16.gmra.mrb[32].mxu1 %v7016_v33 }
 0x484   : > { %6404 = vmatprep.mubr.bf16.mxu1 %v7017_v1  ;;  %6417 = vmatpush3.bf16.msra.mxu1 %v6942_v15  ;;  %v3029_v15 = vld [vmem:[%s8667_s9 + $0x48] sm:$0xff]  ;;  %v3030_v1 = vld [vmem:[%s8667_s9 + $0x50] sm:$0xff] }
 0x485   : > { %6418 = vmatprep.subr.bf16.mxu1 %v6943_v10  ;;  %v6680_v26 = vpack.c.bf16 %v3031_v0, %v3030_v1  ;;  %v6974_v1 = vld [vmem:[#allocation4 + $0x1a0] sm:$0xff]  }
 0x488   : > { %6419 = vmatpush3.bf16.msra.mxu1 %v6943_v10  ;;  %v6956_v10 = vld [vmem:[#allocation4 + $0x110] sm:$0xff]  }
 0x489   : > { %6420 = vmatprep.subr.bf16.mxu1 %v6944_v7 }
 0x48b   : > { %6405 = vmatmul.mubr.bf16.gmra.mrb[36].mxu1 %v8402_v63 }
 0x48c   : > { %6421 = vmatpush3.bf16.msra.mxu1 %v6944_v7  ;;  %6424 = vmatprep.mubr.bf16.mxu1 %v3506_v54  ;;  %v6957_v7 = vld [vmem:[#allocation4 + $0x118] sm:$0xff]   ;;  %v3033_v54 = vld [vmem:[%s8667_s9 + $0x68] sm:$0xff] }
 0x48d   : > { %6422 = vmatprep.subr.bf16.mxu1 %v6945_v35 }
 0x490   : > { %6423 = vmatpush3.bf16.msra.mxu1 %v6945_v35  ;;  %v3032_v35 = vld [vmem:[%s8667_s9 + $0x60] sm:$0xff] }
 0x491   : > { %6440 = vmatprep.subr.bf16.mxu1 %v6946_v9  ;;  %v6683_v25 = vpack.c.bf16 %v3033_v54, %v3032_v35  ;;  %v8531_v54 = vrot.slane %v8478_v38, 1 }
 0x493   : > { %6425 = vmatmul.mubr.bf16.vlgmr.msra.gmra.mrb[24].mxu1 %v3508_v16  ;;  %v3035_v16 = vld [vmem:[%s8667_s9 + $0x78] sm:$0xff] }
 0x494   : > { %6428 = vmatprep.mubr.bf16.mxu1 %v3510_v51  ;;  %6441 = vmatpush3.bf16.msra.mxu1 %v6946_v9  ;;  %v7021_v9 = vld [vmem:[#allocation2 + $0x28] sm:$0xff] }
 0x495   : > { %6442 = vmatprep.subr.bf16.mxu1 %v6947_v59  ;;  %v6959_v51 = vld [vmem:[#allocation4 + $0x128] sm:$0xff]  }
 0x498   : > { %6443 = vmatpush3.bf16.msra.mxu1 %v6947_v59  ;;  %v3034_v59 = vld [vmem:[%s8667_s9 + $0x70] sm:$0xff] }
 0x499   : > { %6444 = vmatprep.subr.bf16.mxu1 %v6948_v8 }
 0x49b   : > { %6429 = vmatmul.mubr.bf16.gmra.mrb[28].mxu1 %v3511_v23  ;;  %v6961_v23 = vld [vmem:[#allocation4 + $0x138] sm:$0xff]  }
 0x49c   : > { %6432 = vmatprep.mubr.bf16.mxu1 %v8245_v45  ;;  %6445 = vmatpush3.bf16.msra.mxu1 %v6948_v8  ;;  %v3024_v45 = vld [vmem:[%s8667_s9 + $0x20] sm:$0xff]  ;;  %v6686_v8 = vpack.c.bf16 %v3035_v16, %v3034_v59 }
 0x49d   : > { %6446 = vmatprep.subr.bf16.mxu1 %v6949_v43  ;;  %v6671_v29 = vpack.c.bf16 %v3025_v34, %v3024_v45  ;;  %v6968_v45 = vld [vmem:[#allocation4 + $0x170] sm:$0xff]   ;;  %v6975_v16 = vld [vmem:[#allocation4 + $0x1a8] sm:$0xff]  }
 0x49f   : > { %6672 = vmatpush3.bf16.msra.mxu0 %v6671_v29  ;;  %v8493_v29 = vld [vmem:[#allocation2 + $0x20] sm:$0xff] }
 0x4a0   : > { %6447 = vmatpush3.bf16.msra.mxu1 %v6949_v43  ;;  %6673 = vmatprep.subr.bf16.mxu0 %v8776_v40  ;;  %v7022_v43 = vld [vmem:[#allocation2 + $0x30] sm:$0xff] }
 0x4a1   : > { %6448 = vmatprep.subr.bf16.mxu1 %v6950_v39 }
 0x4a3   : > { %6433 = vmatmul.mubr.bf16.gmra.mrb[32].mxu1 %v8254_v58  ;;  %v6954_v58 = vld [vmem:[#allocation4 + $0x100] sm:$0xff]  }
 0x4a4   : > { %6436 = vmatprep.mubr.bf16.mxu1 %v8262_v20  ;;  %6449 = vmatpush3.bf16.msra.mxu1 %v6950_v39  ;;  %v3026_v20 = vld [vmem:[%s8667_s9 + $0x30] sm:$0xff]  ;;  %v6962_v39 = vld [vmem:[#allocation4 + $0x140] sm:$0xff]  }
 0x4a5   : > { %6450 = vmatprep.subr.bf16.mxu1 %v6951_v24 }
 0x4a8   : > { %6451 = vmatpush3.bf16.msra.mxu1 %v6951_v24 }
 0x4a9   : > { %6452 = vmatprep.subr.bf16.mxu1 %v6952_v22 }
 0x4ab   : > { %6437 = vmatmul.mubr.bf16.gmra.mrb[36].mxu1 %v8269_v41  ;;  %v6674_v41 = vpack.c.bf16 %v3027_v17, %v3026_v20  ;;  %v8508_v20 = vld [vmem:[#allocation2 + $0x28] sm:$0xff]  ;;  %v8511_v17 = vld [vmem:[#allocation2 + $0x30] sm:$0xff] }
 0x4ac   : > { %6453 = vmatpush3.bf16.msra.mxu1 %v6952_v22  ;;  %6456 = vmatprep.mubr.bf16.mxu1 %v8383_v52  ;;  %v3028_v52 = vld [vmem:[%s8667_s9 + $0x40] sm:$0xff] }
 0x4ad   : > { %6454 = vmatprep.subr.bf16.mxu1 %v6953_v5  ;;  %6675 = vmatpush3.bf16.msra.mxu0 %v6674_v41  ;;  %v6677_v33 = vpack.c.bf16 %v3029_v15, %v3028_v52  ;;  %v6972_v41 = vld [vmem:[#allocation4 + $0x190] sm:$0xff]   ;;  %v4076_v52 = vrot.slane %v8508_v20, 1  ;;  %v4078_v15 = vrot.slane %v8511_v17, 1 }
 0x4ae   : > { %6676 = vmatprep.subr.bf16.mxu0 %v8776_v40 }
 0x4b0   : > { %6455 = vmatpush3.bf16.msra.mxu1 %v6953_v5  ;;  %v4074_v5 = vrot.slane %v8493_v29, 1 }
 0x4b1   : > { %6472 = vmatprep.subr.bf16.mxu1 %v6954_v58  ;;  %6678 = vmatpush3.bf16.msra.mxu0 %v6677_v33  ;;  %v8520_v33 = vsel %vm1288_vm9, %v4076_v52, %v4078_v15 }
 0x4b2   : > { %6679 = vmatprep.subr.bf16.mxu0 %v8776_v40 }
 0x4b3   : > { %6457 = vmatmul.mubr.bf16.vlgmr.msra.gmra.mrb[24].mxu1 %v8406_v47 }
 0x4b4   : > { %6460 = vmatprep.mubr.bf16.mxu1 %v7019_v11  ;;  %6473 = vmatpush3.bf16.msra.mxu1 %v6954_v58  ;;  %v6958_v11 = vld [vmem:[#allocation4 + $0x120] sm:$0xff]   ;;  %v6971_v58 = vld [vmem:[#allocation4 + $0x188] sm:$0xff]  }
 0x4b5   : > { %6474 = vmatprep.subr.bf16.mxu1 %v6955_v55  ;;  %6681 = vmatpush3.bf16.msra.mxu0 %v6680_v26  ;;  %v4080_v26 = vrot.slane %v8402_v63, 1 }
 0x4b6   : > { %6682 = vmatprep.subr.bf16.mxu0 %v8776_v40 }
 0x4b8   : > { %6475 = vmatpush3.bf16.msra.mxu1 %v6955_v55 }
 0x4b9   : > { %6476 = vmatprep.subr.bf16.mxu1 %v6956_v10  ;;  %6684 = vmatpush3.bf16.msra.mxu0 %v6683_v25 }
 0x4ba   : > { %6685 = vmatprep.subr.bf16.mxu0 %v8776_v40  ;;  %v6963_v40 = vld [vmem:[#allocation4 + $0x148] sm:$0xff]  }
 0x4bb   : > { %6461 = vmatmul.mubr.bf16.gmra.mrb[28].mxu1 %v7020_v18 }
 0x4bc   : > { %6464 = vmatprep.mubr.bf16.mxu1 %v7021_v9  ;;  %6477 = vmatpush3.bf16.msra.mxu1 %v6956_v10  ;;  %v8516_v10 = vsel %vm1288_vm9, %v4074_v5, %v4076_v52 }
 0x4bd   : > { %6478 = vmatprep.subr.bf16.mxu1 %v6957_v7  ;;  %6687 = vmatpush3.bf16.msra.mxu0 %v6686_v8 }
 0x4c0   : > { %6479 = vmatpush3.bf16.msra.mxu1 %v6957_v7  ;;  %v8526_v7 = vld [vmem:[%s8666_s8] ss:$0 sm:$0xff] }
 0x4c1   : > { %6480 = vmatprep.subr.bf16.mxu1 %v6958_v11 }
 0x4c3   : > { %6465 = vmatmul.mubr.bf16.gmra.mrb[32].mxu1 %v7022_v43 }
 0x4c4   : > { %6468 = vmatprep.mubr.bf16.mxu1 %v7023_v36  ;;  %6481 = vmatpush3.bf16.msra.mxu1 %v6958_v11  ;;  %v2947_v36 = vpop.permute.xlu1 %2946 }
 0x4c5   : > { %6482 = vmatprep.subr.bf16.mxu1 %v6959_v51 }
 0x4c8   : > { %6483 = vmatpush3.bf16.msra.mxu1 %v6959_v51  ;;  %v8536_v51 = vsel %vm1288_vm9, %v4078_v15, %v4080_v26  ;;  %v6978_v15 = vld [vmem:[#allocation4 + $0x1c0] sm:$0xff]  }
 0x4c9   : > { %6484 = vmatprep.subr.bf16.mxu1 %v6960_v13 }
 0x4cb   : > { %6469 = vmatmul.mubr.bf16.gmra.mrb[36].mxu1 %v8478_v38 }
 0x4cc   : > { %6485 = vmatpush3.bf16.msra.mxu1 %v6960_v13  ;;  %6488 = vmatprep.mubr.bf16.mxu1 %v7418_v3  ;;  %v6966_v3 = vld [vmem:[#allocation4 + $0x160] sm:$0xff]   ;;  %v4042_v13 = vld [vmem:[#allocation2 + $0x48] sm:$0x1] }
 0x4cd   : > { %6486 = vmatprep.subr.bf16.mxu1 %v6961_v23 }
 0x4d0   : > { %6487 = vmatpush3.bf16.msra.mxu1 %v6961_v23  ;;  %v6976_v23 = vld [vmem:[#allocation4 + $0x1b0] sm:$0xff]  }
 0x4d1   : > { %6504 = vmatprep.subr.bf16.mxu1 %v6962_v39 }
 0x4d3   : > { %6489 = vmatmul.mubr.bf16.vlgmr.msra.gmra.mrb[24].mxu1 %v7414_v2  ;;  %v6967_v2 = vld [vmem:[#allocation4 + $0x168] sm:$0xff]  }
 0x4d4   : > { %6492 = vmatprep.mubr.bf16.mxu1 %v7451_v28  ;;  %6505 = vmatpush3.bf16.msra.mxu1 %v6962_v39  ;;  %v4034_v28 = vld [vmem:[#allocation2 + $0x8] sm:$0xfe]  ;;  %v2952_v39 = vpop.permute.xlu0 %2951 }
 0x4d5   : > { %6506 = vmatprep.subr.bf16.mxu1 %v6963_v40 }
 0x4d8   : > { %6507 = vmatpush3.bf16.msra.mxu1 %v6963_v40 }
 0x4d9   : > { %6508 = vmatprep.subr.bf16.mxu1 %v6964_v49 }
 0x4db   : > { %6493 = vmatmul.mubr.bf16.gmra.mrb[28].mxu1 %v7477_v48  ;;  %v4069_v48 = vrot.slane %v4034_v28, 1  ;;  %v4084_v28 = vrot.slane %v4042_v13, 1 }
 0x4dc   : > { %6496 = vmatprep.mubr.bf16.mxu1 %v7500_v14  ;;  %6509 = vmatpush3.bf16.msra.mxu1 %v6964_v49  ;;  %v6969_v14 = vld [vmem:[#allocation4 + $0x178] sm:$0xff]  }
 0x4dd   : > { %6510 = vmatprep.subr.bf16.mxu1 %v6965_v12  ;;  %v4071_v34 = vsel %vm1288_vm9, %v4069_v48, %v8409_v61 }
 0x4de   : > { %v8486_v42 = vpop.f32.mrb[2].mxu1 }
 0x4df   : > { %v5984_v24 = vpop.f32.mrb[3].mxu1 }
 0x4e0   : > { %6511 = vmatpush3.bf16.msra.mxu1 %v6965_v12 }
 0x4e1   : > { %6512 = vmatprep.subr.bf16.mxu1 %v6966_v3 }
 0x4e3   : > { %6497 = vmatmul.mubr.bf16.gmra.mrb[32].mxu1 %v7528_v37  ;;  %v6970_v37 = vld [vmem:[#allocation4 + $0x180] sm:$0xff]  }
 0x4e4   : > { %6500 = vmatprep.mubr.bf16.mxu1 %v7548_v4  ;;  %6513 = vmatpush3.bf16.msra.mxu1 %v6966_v3  ;;  %v8495_v4 = vld [vmem:[#allocation2 + $0x18] sm:$0xff] }
 0x4e5   : > { %6514 = vmatprep.subr.bf16.mxu1 %v6967_v2  ;;  %v8498_v22 = vrot.slane %v8495_v4, 1 }
 0x4e7   : > { %v8506_v55 = vsel %vm1288_vm9, %v8498_v22, %v4074_v5  ;;  %v4085_v5 = vsel %vm1288_vm9, %v8531_v54, %v4084_v28 }
 0x4e8   : > { %6515 = vmatpush3.bf16.msra.mxu1 %v6967_v2 }
 0x4e9   : > { %6516 = vmatprep.subr.bf16.mxu1 %v6968_v45 }
 0x4eb   : > { %6501 = vmatmul.mubr.bf16.gmra.mrb[36].mxu1 %v7568_v27  ;;  %v4073_v27 = vsel %vm1288_vm9, %v8409_v61, %v8498_v22  ;;  %v6973_v61 = vld [vmem:[#allocation4 + $0x198] sm:$0xff]  }
 0x4ec   : > { %6517 = vmatpush3.bf16.msra.mxu1 %v6968_v45  ;;  %6520 = vmatprep.mubr.bf16.mxu1 %v4071_v34 }
 0x4ed   : > { %6518 = vmatprep.subr.bf16.mxu1 %v6969_v14 }
 0x4f0   : > { %6519 = vmatpush3.bf16.msra.mxu1 %v6969_v14 }
 0x4f1   : > { %6536 = vmatprep.subr.bf16.mxu1 %v6970_v37 }
 0x4f3   : > { %6521 = vmatmul.mubr.bf16.vlgmr.msra.gmra.mrb[24].mxu1 %v4073_v27 }
 0x4f4   : > { %6524 = vmatprep.mubr.bf16.mxu1 %v8506_v55  ;;  %6537 = vmatpush3.bf16.msra.mxu1 %v6970_v37  ;;  %v6977_v37 = vld [vmem:[#allocation4 + $0x1b8] sm:$0xff]  }
 0x4f5   : > { %6538 = vmatprep.subr.bf16.mxu1 %v6971_v58 }
 0x4f8   : > { %6539 = vmatpush3.bf16.msra.mxu1 %v6971_v58 }
 0x4f9   : > { %6540 = vmatprep.subr.bf16.mxu1 %v6972_v41 }
 0x4fb   : > { %6525 = vmatmul.mubr.bf16.gmra.mrb[28].mxu1 %v8516_v10 }
 0x4fc   : > { %6528 = vmatprep.mubr.bf16.mxu1 %v8520_v33  ;;  %6541 = vmatpush3.bf16.msra.mxu1 %v6972_v41 }
 0x4fd   : > { %6542 = vmatprep.subr.bf16.mxu1 %v6973_v61 }
 0x4fe   : > { %v2858_v0 = vpop.f32.mrb[4].mxu1 }
 0x4ff   : > { %v2897_v18 = vadd.f32 %v2858_v0, %v8281_v56  ;;  %v6291_v35 = vpop.f32.mrb[5].mxu1  ;;  %v8542_v56 = vsel %vm1288_vm9, %v4080_v26, %v8531_v54 }
 0x500   : > { %v2861_v9 = vpop.f32.mrb[6].mxu1  ;;  %6543 = vmatpush3.bf16.msra.mxu1 %v6973_v61  ;;  %v2962_v61 = vpop.permute.xlu0 %2961 }
 0x501   : > { %v2914_v11 = vadd.f32 %v8526_v7, %v2897_v18  ;;  %v2898_v25 = vadd.f32 %v2861_v9, %v8283_v44  ;;  %v6292_v59 = vpop.f32.mrb[7].mxu1  ;;  %6544 = vmatprep.subr.bf16.mxu1 %v6974_v1 }
 0x503   : > { %v2924_v8 = vmax.f32 %v2914_v11, 0.0  ;;  %v2915_v43 = vadd.f32 %v8526_v7, %v2898_v25  ;;  %6529 = vmatmul.mubr.bf16.gmra.mrb[32].mxu1 %v8536_v51 }
 0x504   : > { %6532 = vmatprep.mubr.bf16.mxu1 %v8542_v56  ;;  %6545 = vmatpush3.bf16.msra.mxu1 %v6974_v1  ;;  %v2972_v13 = vpop.permute.xlu0 %2971 }
 0x505   : > { %v2925_v44 = vmax.f32 %v2915_v43, 0.0  ;;  %6546 = vmatprep.subr.bf16.mxu1 %v6975_v16  ;;  %v2994_v49 = vmul.f32 %v2947_v36, %v2924_v8 }
 0x506   : > { %v2866_v40 = vpop.f32.mrb[8].mxu1 }
 0x507   : > { %v2995_v12 = vmul.f32 %v2952_v39, %v2925_v44  ;;  %v2899_v3 = vadd.f32 %v2866_v40, %v8285_v50  ;;  %v6295_v24 = vpop.f32.mrb[9].mxu1  ;;  %v2957_v50 = vpop.permute.xlu1 %2956  ;;  %v6980_v44 = vld [vmem:[#allocation4 + $0x1d0] sm:$0xff]  }
 0x508   : > { %v2869_v2 = vpop.f32.mrb[10].mxu1  ;;  %6547 = vmatpush3.bf16.msra.mxu1 %v6975_v16 }
 0x509   : > { %v3004_v45 = vadd.f32 %v2995_v12, %v2994_v49  ;;  %v2916_v48 = vadd.f32 %v8526_v7, %v2899_v3  ;;  %v2900_v14 = vadd.f32 %v2869_v2, %v8287_v21  ;;  %v6296_v34 = vpop.f32.mrb[11].mxu1  ;;  %6548 = vmatprep.subr.bf16.mxu1 %v6976_v23 }
 0x50b   : > { %v2926_v58 = vmax.f32 %v2916_v48, 0.0  ;;  %v2917_v27 = vadd.f32 %v8526_v7, %v2900_v14  ;;  %6533 = vmatmul.mubr.bf16.gmra.mrb[36].mxu1 %v4085_v5  ;;  %v2967_v43 = vpop.permute.xlu1 %2966  ;;  %v6982_v5 = vld [vmem:[#allocation4 + $0x1e0] sm:$0xff]  }
 0x50c   : > { %6549 = vmatpush3.bf16.msra.mxu1 %v6976_v23  ;;  %6552 = vmatprep.mubr.bf16.mxu1 %v8406_v47  ;;  %v6979_v47 = vld [vmem:[#allocation4 + $0x1c8] sm:$0xff]  }
 0x50d   : > { %v2996_v41 = vmul.f32 %v2957_v50, %v2926_v58  ;;  %v2927_v52 = vmax.f32 %v2917_v27, 0.0  ;;  %6550 = vmatprep.subr.bf16.mxu1 %v6977_v37  ;;  %v2982_v58 = vpop.permute.xlu0 %2981 }
 0x50e   : > { %v2874_v21 = vpop.f32.mrb[12].mxu1 }
 0x50f   : > { %v3005_v1 = vadd.f32 %v3004_v45, %v2996_v41  ;;  %v2997_v0 = vmul.f32 %v2962_v61, %v2927_v52  ;;  %v2901_v26 = vadd.f32 %v2874_v21, %v8289_v32  ;;  %v6299_v18 = vpop.f32.mrb[13].mxu1  ;;  %v6981_v45 = vld [vmem:[#allocation4 + $0x1d8] sm:$0xff]   ;;  %v2977_v34 = vpop.permute.xlu1 %2976 }
 0x510   : > { %v2877_v35 = vpop.f32.mrb[14].mxu1  ;;  %6551 = vmatpush3.bf16.msra.mxu1 %v6977_v37 }
 0x511   : > { %v3006_v9 = vadd.f32 %v3005_v1, %v2997_v0  ;;  %v2918_v11 = vadd.f32 %v8526_v7, %v2901_v26  ;;  %v2902_v25 = vadd.f32 %v2877_v35, %v8291_v30  ;;  %v6300_v59 = vpop.f32.mrb[15].mxu1  ;;  %6568 = vmatprep.subr.bf16.mxu1 %v6978_v15  ;;  %v6983_v26 = vld [vmem:[#allocation4 + $0x1e8] sm:$0xff]  }
 0x512   : > { %v2992_v59 = vpop.permute.xlu0 %2991 }
 0x513   : > { %v2928_v16 = vmax.f32 %v2918_v11, 0.0  ;;  %v2919_v8 = vadd.f32 %v8526_v7, %v2902_v25  ;;  %6553 = vmatmul.mubr.bf16.vlgmr.msra.gmra.mrb[24].mxu1 %v8495_v4  ;;  %v6984_v25 = vld [vmem:[#allocation4 + $0x1f0] sm:$0xff]  }
 0x514   : > { %6556 = vmatprep.mubr.bf16.mxu1 %v8493_v29  ;;  %6569 = vmatpush3.bf16.msra.mxu1 %v6978_v15 }
 0x515   : > { %v2998_v32 = vmul.f32 %v2967_v43, %v2928_v16  ;;  %v2929_v36 = vmax.f32 %v2919_v8, 0.0  ;;  %6570 = vmatprep.subr.bf16.mxu1 %v6979_v47  ;;  %v6985_v8 = vld [vmem:[#allocation4 + $0x1f8] sm:$0xff]   ;;  %v4476_v43 = vshll.u32 %v8493_v29, 16 }
 0x516   : > { %v2882_v23 = vpop.f32.mrb[16].mxu1 }
 0x517   : > { %v3007_v39 = vadd.f32 %v3006_v9, %v2998_v32  ;;  %v2999_v30 = vmul.f32 %v2972_v13, %v2929_v36  ;;  %v2903_v40 = vadd.f32 %v2882_v23, %v8293_v60  ;;  %v6303_v49 = vpop.f32.mrb[17].mxu1  ;;  %v2987_v9 = vpop.permute.xlu1 %2986  ;;  %v4484_v36 = vshll.u32 %v8508_v20, 16  ;;  %v6986_v23 = vld [vmem:[#allocation4 + $0x200] sm:$0xff]  }
 0x518   : > { %v2885_v12 = vpop.f32.mrb[18].mxu1  ;;  %6571 = vmatpush3.bf16.msra.mxu1 %v6979_v47  ;;  %v4478_v13 = vrot.slane %v4476_v43, 1 }
 0x519   : > { %v3008_v3 = vadd.f32 %v3007_v39, %v2999_v30  ;;  %v2920_v24 = vadd.f32 %v8526_v7, %v2903_v40  ;;  %v2904_v2 = vadd.f32 %v2885_v12, %v8295_v19  ;;  %v6304_v28 = vpop.f32.mrb[19].mxu1  ;;  %6572 = vmatprep.subr.bf16.mxu1 %v6980_v44  ;;  %v4472_v39 = vshrl.u32 %v8495_v4, 16 }
 0x51a   : > { %v4480_v40 = vshrl.u32 %v8493_v29, 16  ;;  %v4486_v49 = vrot.slane %v4484_v36, 1  ;;  %v4492_v28 = vshll.u32 %v8511_v17, 16  ;;  %v4500_v4 = vshll.u32 %v8402_v63, 16 }
 0x51b   : > { %v2930_v48 = vmax.f32 %v2920_v24, 0.0  ;;  %v2921_v14 = vadd.f32 %v8526_v7, %v2904_v2  ;;  %6557 = vmatmul.mubr.bf16.gmra.mrb[28].mxu1 %v8508_v20  ;;  %v4474_v12 = vor.u32 %v4472_v39, %v7743_v53  ;;  %v6987_v2 = vld [vmem:[#allocation4 + $0x208] sm:$0xff]  }
 0x51c   : > { %6560 = vmatprep.mubr.bf16.mxu1 %v8511_v17  ;;  %6573 = vmatpush3.bf16.msra.mxu1 %v6980_v44  ;;  %v4482_v24 = vor.u32 %v4480_v40, %v4478_v13  ;;  %v4494_v53 = vrot.slane %v4492_v28, 1 }
 0x51d   : > { %v3000_v60 = vmul.f32 %v2977_v34, %v2930_v48  ;;  %v2931_v37 = vmax.f32 %v2921_v14, 0.0  ;;  %6574 = vmatprep.subr.bf16.mxu1 %v6981_v45  ;;  %v6988_v14 = vld [vmem:[#allocation4 + $0x210] sm:$0xff]   ;;  %v4488_v34 = vshrl.u32 %v8508_v20, 16  ;;  %v6990_v20 = vld [vmem:[#allocation4 + $0x220] sm:$0xff]  }
 0x51e   : > { %v2890_v27 = vpop.f32.mrb[20].mxu1  ;;  %v4487_v48 = vsel %vm1426_vm7, %v4482_v24, %v4486_v49 }
 0x51f   : > { %v3009_v50 = vadd.f32 %v3008_v3, %v3000_v60  ;;  %v3001_v19 = vmul.f32 %v2982_v58, %v2931_v37  ;;  %v2905_v41 = vadd.f32 %v2890_v27, %v8297_v6  ;;  %v6307_v52 = vpop.f32.mrb[21].mxu1  ;;  %v4496_v37 = vshrl.u32 %v8511_v17, 16 }
 0x520   : > { %v2893_v15 = vpop.f32.mrb[22].mxu1  ;;  %6575 = vmatpush3.bf16.msra.mxu1 %v6981_v45  ;;  %v4508_v58 = vshll.u32 %v8478_v38, 16  ;;  %v4490_v27 = vor.u32 %v4488_v34, %v4486_v49  ;;  %v4512_v17 = vshrl.u32 %v8478_v38, 16 }
 0x521   : > { %v3010_v61 = vadd.f32 %v3009_v50, %v3001_v19  ;;  %v2922_v21 = vadd.f32 %v8526_v7, %v2905_v41  ;;  %v2906_v1 = vadd.f32 %v2893_v15, %v8299_v46  ;;  %v6308_v0 = vpop.f32.mrb[23].mxu1  ;;  %6576 = vmatprep.subr.bf16.mxu1 %v6982_v5  ;;  %v4498_v50 = vor.u32 %v4496_v37, %v4494_v53  ;;  %v6989_v19 = vld [vmem:[#allocation4 + $0x218] sm:$0xff]  }
 0x522   : > { %v4495_v41 = vsel %vm1426_vm7, %v4490_v27, %v4494_v53  ;;  %v4510_v15 = vrot.slane %v4508_v58, 1  ;;  %v1155_v37 = vld [vmem:[#allocation3] sm:$0x1] }
 0x523   : > { %v2932_v18 = vmax.f32 %v2922_v21, 0.0  ;;  %v2923_v35 = vadd.f32 %v8526_v7, %v2906_v1  ;;  %6561 = vmatmul.mubr.bf16.gmra.mrb[32].mxu1 %v8402_v63  ;;  %v8571_v7 = vld [vmem:[#allocation2 + $0x48] sm:$0xff]  ;;  %v4504_v21 = vshrl.u32 %v8402_v63, 16 }
 0x524   : > { %6564 = vmatprep.mubr.bf16.mxu1 %v8478_v38  ;;  %6577 = vmatpush3.bf16.msra.mxu1 %v6982_v5  ;;  %v4502_v5 = vrot.slane %v4500_v4, 1  ;;  %v4514_v1 = vor.u32 %v4512_v17, %v4510_v15  ;;  %v4520_v38 = vshrl.u32 %v8571_v7, 16 }
 0x525   : > { %v3002_v6 = vmul.f32 %v2987_v9, %v2932_v18  ;;  %v2933_v11 = vmax.f32 %v2923_v35, 0.0  ;;  %6578 = vmatprep.subr.bf16.mxu1 %v6983_v26  ;;  %v6991_v18 = vld [vmem:[#allocation4 + $0x228] sm:$0xff]   ;;  %v4442_v35 = vld [vmem:[#allocation2 + $0x50] sm:$0x1] }
 0x526   : > { %v4503_v52 = vsel %vm1426_vm7, %v4498_v50, %v4502_v5  ;;  %v4506_v0 = vor.u32 %v4504_v21, %v4502_v5  ;;  %v1231_v5 = vadd.f32 %v8486_v42, %v1155_v37 }
 0x527   : > { %v3011_v47 = vadd.f32 %v3010_v61, %v3002_v6  ;;  %v3003_v16 = vmul.f32 %v2992_v59, %v2933_v11  ;;  %v4516_v61 = vshll.u32 %v8571_v7, 16  ;;  %v4524_v6 = vshll.u32 %v4442_v35, 16 }
 0x528   : > { %6579 = vmatpush3.bf16.msra.mxu1 %v6983_v26  ;;  %v4511_v9 = vsel %vm1426_vm7, %v4506_v0, %v4510_v15  ;;  %v1234_v58 = vmax.f32 %v1231_v5, 0.0 }
 0x529   : > { %v3012_v46 = vadd.f32 %v3011_v47, %v3003_v16  ;;  %6580 = vmatprep.subr.bf16.mxu1 %v6984_v25  ;;  %v4518_v26 = vrot.slane %v4516_v61, 1  ;;  %v4526_v59 = vrot.slane %v4524_v6, 1  ;;  %v4697_v47 = vld [vmem:[#allocation2 + $0x10] sm:$0xfe] }
 0x52a   : > { %v4724_v16 = vrot.slane %v4697_v47, 1  ;;  %v5238_v27 = vmul.f32 -1.442695, %v1234_v58 }
 0x52b   : > { %v3013_v32 = vrot.slane %v3012_v46, 4  ;;  %6565 = vmatmul.mubr.bf16.gmra.mrb[36].mxu1 %v8571_v7  ;;  %v4519_v11 = vsel %vm1426_vm7, %v4514_v1, %v4518_v26  ;;  %v4522_v63 = vor.u32 %v4520_v38, %v4518_v26 }
 0x52c   : > { %6581 = vmatpush3.bf16.msra.mxu1 %v6984_v25  ;;  %6584 = vmatprep.mubr.bf16.mxu1 %v7748_v31  ;;  %v4479_v31 = vsel %vm1426_vm7, %v4474_v12, %v4478_v13  ;;  %v6992_v25 = vld [vmem:[#allocation4 + $0x230] sm:$0xff]   ;;  %v4726_v43 = vsel %vm1288_vm9, %v4724_v16, %v8498_v22  ;;  %v4739_v22 = vrot.slane %v4442_v35, 1 }
 0x52d   : > { %v3014_v44 = vadd.f32 %v3013_v32, %v3012_v46  ;;  %6582 = vmatprep.subr.bf16.mxu1 %v6985_v8  ;;  %v6993_v46 = vld [vmem:[#allocation4 + $0x238] sm:$0xff]   ;;  %v4737_v32 = vrot.slane %v8571_v7, 1 }
 0x52f   : > { %v3015_v30 = vrot.slane %v3014_v44, 2  ;;  %v4738_v36 = vsel %vm1288_vm9, %v8531_v54, %v4737_v32 }
 0x530   : > { %6583 = vmatpush3.bf16.msra.mxu1 %v6985_v8  ;;  %v4527_v8 = vsel %vm1426_vm7, %v4522_v63, %v4526_v59 }
 0x531   : > { %v3016_v3 = vadd.f32 %v3015_v30, %v3014_v44  ;;  %6600 = vmatprep.subr.bf16.mxu1 %v6986_v23  ;;  %v4740_v44 = vsel %vm1288_vm9, %v4737_v32, %v4739_v22  ;;  %v8790_v22 = vld [vmem:[#allocation13_spill] sm:$0xff] }
 0x533   : > { %v3017_v45 = vrot.slane %v3016_v3, 1  ;;  %6585 = vmatmul.mubr.bf16.vlgmr.msra.gmra.mrb[24].mxu1 %v4479_v31 }
 0x534   : > { %6588 = vmatprep.mubr.bf16.mxu1 %v4487_v48  ;;  %6601 = vmatpush3.bf16.msra.mxu1 %v6986_v23 }
 0x535   : > { %6602 = vmatprep.subr.bf16.mxu1 %v6987_v2  ;;  %v3018_v29 = vadd.f32 %v3017_v45, %v3016_v3 }
 0x537   : > { %v3019_v60 = vmul.f32 0.11111111, %v3018_v29 }
 0x538   : > { %6603 = vmatpush3.bf16.msra.mxu1 %v6987_v2 }
 0x539   : > { %6342 = vmatmul.mubr.f32.vlgmr.msra.gmra.mrb[2].mxu0 %v3019_v60  ;;  %6604 = vmatprep.subr.bf16.mxu1 %v6988_v14 }
 0x53b   : > { %6589 = vmatmul.mubr.bf16.gmra.mrb[28].mxu1 %v4495_v41 }
 0x53c   : > { %6592 = vmatprep.mubr.bf16.mxu1 %v4503_v52  ;;  %6605 = vmatpush3.bf16.msra.mxu1 %v6988_v14 }
 0x53d   : > { %6606 = vmatprep.subr.bf16.mxu1 %v6989_v19 }
 0x540   : > { %6607 = vmatpush3.bf16.msra.mxu1 %v6989_v19 }
 0x541   : > { %6608 = vmatprep.subr.bf16.mxu1 %v6990_v20 }
 0x543   : > { %6593 = vmatmul.mubr.bf16.gmra.mrb[32].mxu1 %v4511_v9 }
 0x544   : > { %6596 = vmatprep.mubr.bf16.mxu1 %v4519_v11  ;;  %6609 = vmatpush3.bf16.msra.mxu1 %v6990_v20  ;;  %v7025_v20 = vld [vmem:[#allocation2] sm:$0xff] }
 0x545   : > { %6610 = vmatprep.subr.bf16.mxu1 %v6991_v18 }
 0x548   : > { %6611 = vmatpush3.bf16.msra.mxu1 %v6991_v18 }
 0x549   : > { %6612 = vmatprep.subr.bf16.mxu1 %v6992_v25 }
 0x54b   : > { %6597 = vmatmul.mubr.bf16.gmra.mrb[36].mxu1 %v4527_v8 }
 0x54c   : > { %6613 = vmatpush3.bf16.msra.mxu1 %v6992_v25  ;;  %6616 = vmatprep.mubr.bf16.mxu1 %v4726_v43 }
 0x54d   : > { %6614 = vmatprep.subr.bf16.mxu1 %v6993_v46 }
 0x550   : > { %6615 = vmatpush3.bf16.msra.mxu1 %v6993_v46 }
 0x553   : > { %6617 = vmatmul.mubr.bf16.vlgmr.msra.gmra.mrb[24].mxu1 %v8506_v55  ;;  %v3036_v55 = vld [vmem:[%s8668_s10] sm:$0x1] }
 0x554   : > { %6620 = vmatprep.mubr.bf16.mxu1 %v8516_v10 }
 0x55b   : > { %6621 = vmatmul.mubr.bf16.gmra.mrb[28].mxu1 %v8520_v33 }
 0x55c   : > { %6624 = vmatprep.mubr.bf16.mxu1 %v8536_v51 }
 0x563   : > { %6625 = vmatmul.mubr.bf16.gmra.mrb[32].mxu1 %v8542_v56 }
 0x564   : > { %6628 = vmatprep.mubr.bf16.mxu1 %v4738_v36 }
 0x56b   : > { %6629 = vmatmul.mubr.bf16.gmra.mrb[36].mxu1 %v4740_v44 }
 0x60c   : > { %v3103_v10 = vpop.f32.mrb[2].mxu0 }
 0x60d   : > { %v3104_v33 = vadd.f32 %v3103_v10, %v3036_v55  ;;  %v6343_v13 = vpop.f32.mrb[3].mxu0  ;;  %v8791_v55 = vld [vmem:[#allocation9_spill] sm:$0xff] }
 0x60f   : > { %v3107_v51 = vmax.f32 %v3104_v33, 0.0  ;;  %v8792_v33 = vld [vmem:[#allocation12_spill] sm:$0xff] }
 0x611   : > { %v5440_v23 = vmul.f32 -1.442695, %v3107_v51  ;;  %v8793_v51 = vld [vmem:[#allocation17_spill] sm:$0xff] }
 0x613   : > { %7004 = vpow2.f32 %v5440_v23 }
 0x61d   : > { %v7005_v7 = vpop.eup %7004 }
 0x61e   : > { %v3111_v56 = vadd.f32 1.0, %v7005_v7  ;;  %v8794_v7 = vld [vmem:[#allocation16_spill] sm:$0xff] }
 0x620   : > { %7006 = vrcp.f32 %v3111_v56 }
 0x621   : > { %7008 = vpow2.f32 %v5238_v27 }
 0x626   : > { %v6618_v39 = vpop.f32.mrb[24].mxu1 }
 0x627   : > { %v4831_v54 = vpop.f32.mrb[25].mxu1 }
 0x628   : > { %v6619_v30 = vpop.f32.mrb[26].mxu1 }
 0x629   : > { %v4834_v40 = vpop.f32.mrb[27].mxu1 }
 0x62a   : > { %v7007_v49 = vpop.eup %7006 }
 0x62b   : > { %v6817_v12 = vround.rtne.f32 %v7007_v49  ;;  %v7009_v50 = vpop.eup %7008 }
 0x62c   : > { %v1238_v19 = vadd.f32 1.0, %v7009_v50 }
 0x62d   : > { %v3117_v3 = vsel %vm939_vm5, %v6817_v12, 0.0 }
 0x62e   : > { %v6622_v24 = vpop.f32.mrb[28].mxu1  ;;  %3118 = vadd.xlane.f32.xlu1 %v3117_v3  ;;  %7010 = vrcp.f32 %v1238_v19 }
 0x62f   : > { %v4847_v2 = vpop.f32.mrb[29].mxu1 }
 0x630   : > { %v6623_v28 = vpop.f32.mrb[30].mxu1 }
 0x631   : > { %v4850_v31 = vpop.f32.mrb[31].mxu1 }
 0x636   : > { %v6626_v45 = vpop.f32.mrb[32].mxu1 }
 0x637   : > { %v4863_v48 = vpop.f32.mrb[33].mxu1 }
 0x638   : > { %v6627_v4 = vpop.f32.mrb[34].mxu1  ;;  %v7011_v41 = vpop.eup %7010 }
 0x639   : > { %v4866_v29 = vpop.f32.mrb[35].mxu1  ;;  %v6816_v52 = vround.rtne.f32 %v7011_v41 }
 0x63b   : > { %vm3115_vm14 = vcmp.ne.f32.partialorder %v6816_v52, 0.0 }
 0x63e   : > { %v6630_v53 = vpop.f32.mrb[36].mxu1 }
 0x63f   : > { %v4879_v14 = vpop.f32.mrb[37].mxu1 }
 0x640   : > { %v6631_v34 = vpop.f32.mrb[38].mxu1 }
 0x641   : > { %v4882_v60 = vpop.f32.mrb[39].mxu1 }
 0x6bb   : > { %v3119_v15 = vpop.xlane.xlu1 %3118 }
 0x6bc   : > { %vm3120_vm15 = vcmp.ne.f32.partialorder %v3119_v15, 0.0 }
 0x6bd   : > { %vm3121_vm0 = vmand %vm3115_vm14, %vm3120_vm15 }
 0x6be   : > { %v3122_v17 = vsel %vm3121_vm0, 1, %v7025_v20 }
 0x6bf   : > { %3124 = vperm.xlu0 %6848, %v3122_v17  }
 0x73e   : > { %v3125_v61 = vpop.permute.xlu0 %3124 }
 0x73f   : > { %vm3126_vm1 = vcmp.eq.s32.totalorder %v3125_v61, 1 }
 0x740   : > { %v3127_v21 = vsel %vm3126_vm1, %v6817_v12, 0.0  ;;  %v8798_v12 = vld [vmem:[#allocation24_spill] sm:$0xff] }
 0x741   : > { %v4913_v42 = vrot.slane %v3127_v21, %v7342_v62  ;;  %v4930_v1 = vsub.f32 1.0, %v3127_v21 }
 0x743   : > { %v4914_v0 = vmul.f32 %v4913_v42, %v4831_v54  ;;  %v4915_v26 = vmul.f32 %v4913_v42, %v4834_v40  ;;  %v4916_v18 = vmul.f32 %v6618_v39, %v4913_v42  ;;  %v4917_v35 = vmul.f32 %v6619_v30, %v4913_v42  ;;  %v8795_v39 = vld [vmem:[#allocation21_spill] sm:$0xff]  ;;  %v8796_v30 = vld [vmem:[#allocation20_spill] sm:$0xff] }
 0x744   : > { %v4918_v9 = vmul.f32 %v4913_v42, %v4847_v2  ;;  %v4919_v6 = vmul.f32 %v4913_v42, %v4850_v31  ;;  %v4920_v11 = vmul.f32 %v6622_v24, %v4913_v42  ;;  %v4921_v38 = vmul.f32 %v6623_v28, %v4913_v42  ;;  %v8797_v40 = vld [vmem:[#allocation25_spill] sm:$0xff]  ;;  %v8800_v2 = vld [vmem:[#allocation28_spill] sm:$0xff] }
 0x745   : > { %v4922_v25 = vmul.f32 %v4913_v42, %v4863_v48  ;;  %v4923_v63 = vmul.f32 %v4913_v42, %v4866_v29  ;;  %v4924_v59 = vmul.f32 %v6626_v45, %v4913_v42  ;;  %v4925_v47 = vmul.f32 %v6627_v4, %v4913_v42  ;;  %v8799_v24 = vld [vmem:[#allocation29_spill] sm:$0xff]  ;;  %v8802_v48 = vld [vmem:[#allocation32_spill] sm:$0xff] }
 0x746   : > { %v4934_v16 = vrot.slane %v4930_v1, %v7342_v62  ;;  %v4926_v46 = vmul.f32 %v4913_v42, %v4879_v14  ;;  %v4927_v8 = vmul.f32 %v4913_v42, %v4882_v60  ;;  %v4928_v43 = vmul.f32 %v6630_v53, %v4913_v42  ;;  %v8801_v31 = vld [vmem:[#allocation33_spill] sm:$0xff]  ;;  %v8804_v14 = vld [vmem:[#allocation36_spill] sm:$0xff] }
 0x747   : > { %v4929_v32 = vmul.f32 %v6631_v34, %v4913_v42  ;;  %v8803_v29 = vld [vmem:[#allocation37_spill] sm:$0xff] }
 0x748   : > { %v4935_v36 = vmul.f32 %v4934_v16, %v7401_v57  ;;  %v4936_v44 = vmul.f32 %v4934_v16, %v8790_v22  ;;  %v4937_v10 = vmul.f32 %v4934_v16, %v8791_v55  ;;  %v4938_v13 = vmul.f32 %v4934_v16, %v8792_v33  ;;  %v8805_v22 = vld [vmem:[#allocation8_spill] sm:$0xff]  ;;  %v8816_v33 = vld [vmem:[#allocation26_spill] sm:$0xff] }
 0x749   : > { %v4939_v23 = vmul.f32 %v4934_v16, %v8793_v51  ;;  %v4940_v56 = vmul.f32 %v4934_v16, %v8794_v7  ;;  %v4941_v54 = vmul.f32 %v4934_v16, %v8795_v39  ;;  %v4942_v62 = vmul.f32 %v4934_v16, %v8796_v30  ;;  %v8817_v51 = vld [vmem:[#allocation31_spill] sm:$0xff]  ;;  %v8818_v7 = vld [vmem:[#allocation30_spill] sm:$0xff] }
 0x74a   : > { %v4943_v49 = vmul.f32 %v4934_v16, %v8797_v40  ;;  %v4944_v3 = vmul.f32 %v4934_v16, %v8798_v12  ;;  %v4945_v57 = vmul.f32 %v4934_v16, %v8799_v24  ;;  %v4946_v28 = vmul.f32 %v4934_v16, %v8800_v2  ;;  %v8819_v39 = vld [vmem:[#allocation35_spill] sm:$0xff]  ;;  %v8820_v30 = vld [vmem:[#allocation34_spill] sm:$0xff] }
 0x74b   : > { %v4947_v45 = vmul.f32 %v4934_v16, %v8801_v31  ;;  %v4948_v4 = vmul.f32 %v4934_v16, %v8802_v48  ;;  %v4949_v53 = vmul.f32 %v4934_v16, %v8803_v29  ;;  %v4950_v34 = vmul.f32 %v4934_v16, %v8804_v14  ;;  %v8806_v16 = vld [vmem:[#allocation11_spill] sm:$0xff] }
 0x74c   : > { %v4951_v60 = vadd.f32 %v4935_v36, %v4914_v0  ;;  %v4952_v37 = vadd.f32 %v4936_v44, %v4915_v26  ;;  %v4953_v5 = vadd.f32 %v4937_v10, %v4916_v18  ;;  %v4954_v58 = vadd.f32 %v4938_v13, %v4917_v35  ;;  %v8807_v26 = vld [vmem:[#allocation7_spill] sm:$0xff]  ;;  %v8808_v35 = vld [vmem:[#allocation10_spill] sm:$0xff] }
 0x74d   : > { %v4955_v27 = vadd.f32 %v4939_v23, %v4918_v9  ;;  %v4956_v50 = vadd.f32 %v4940_v56, %v4919_v6  ;;  %v4957_v19 = vadd.f32 %v4941_v54, %v4920_v11  ;;  %v4958_v41 = vadd.f32 %v4942_v62, %v4921_v38  ;;  %v8809_v6 = vld [vmem:[#allocation15_spill] sm:$0xff]  ;;  %v8810_v38 = vld [vmem:[#allocation14_spill] sm:$0xff] }
 0x74e   : > { %v4959_v52 = vadd.f32 %v4943_v49, %v4922_v25  ;;  %v4960_v15 = vadd.f32 %v4944_v3, %v4923_v63  ;;  %v4961_v20 = vadd.f32 %v4945_v57, %v4924_v59  ;;  %v4962_v17 = vadd.f32 %v4946_v28, %v4925_v47  ;;  %v8811_v63 = vld [vmem:[#allocation19_spill] sm:$0xff]  ;;  %v8812_v47 = vld [vmem:[#allocation18_spill] sm:$0xff] }
 0x74f   : > { %v4963_v61 = vadd.f32 %v4947_v45, %v4926_v46  ;;  %v4964_v21 = vadd.f32 %v4948_v4, %v4927_v8  ;;  %v4965_v42 = vadd.f32 %v4949_v53, %v4928_v43  ;;  %v4966_v1 = vadd.f32 %v4950_v34, %v4929_v32  ;;  %v8813_v36 = vld [vmem:[#allocation23_spill] sm:$0xff]  ;;  %v8814_v43 = vld [vmem:[#allocation22_spill] sm:$0xff] }
 0x750   : > { %v4967_v55 = vmul.f32 %v4951_v60, %v8805_v22  ;;  %v4968_v0 = vmul.f32 %v4952_v37, %v8806_v16  ;;  %v4969_v18 = vmul.f32 %v4953_v5, %v8807_v26  ;;  %v4970_v9 = vmul.f32 %v4954_v58, %v8808_v35  ;;  %v8815_v44 = vld [vmem:[#allocation27_spill] sm:$0xff] }
 0x751   : > { %v4971_v11 = vmul.f32 %v4955_v27, %v8809_v6  ;;  %v4972_v25 = vmul.f32 %v4956_v50, %v8810_v38  ;;  %v4973_v59 = vmul.f32 %v4957_v19, %v8811_v63  ;;  %v4974_v46 = vmul.f32 %v4958_v41, %v8812_v47 }
 0x752   : > { %v4975_v8 = vmul.f32 %v4959_v52, %v8813_v36  ;;  %v4976_v32 = vmul.f32 %v4960_v15, %v8814_v43  ;;  %v4977_v10 = vmul.f32 %v4961_v20, %v8815_v44  ;;  %v4978_v13 = vmul.f32 %v4962_v17, %v8816_v33 }
 0x753   : > { %v4979_v23 = vmul.f32 %v4963_v61, %v8817_v51  ;;  %v4980_v56 = vmul.f32 %v4964_v21, %v8818_v7  ;;  %v4981_v54 = vmul.f32 %v4965_v42, %v8819_v39  ;;  %v4982_v62 = vmul.f32 %v4966_v1, %v8820_v30 }
 0x754   : > { %v5584_v40 = vpack.c.bf16 %v4968_v0, %v4967_v55  ;;  %v5589_v49 = vpack.c.bf16 %v4970_v9, %v4969_v18  ;;  %v5594_v12 = vpack.c.bf16 %v4972_v25, %v4971_v11  ;;  %v5599_v3 = vpack.c.bf16 %v4974_v46, %v4973_v59 }
 0x755   : > { %v5604_v24 = vpack.c.bf16 %v4976_v32, %v4975_v8  ;;  %v5609_v57 = vpack.c.bf16 %v4978_v13, %v4977_v10  ;;  %v5614_v2 = vpack.c.bf16 %v4980_v56, %v4979_v23  ;;  %v5619_v28 = vpack.c.bf16 %v4982_v62, %v4981_v54 }
 0x756   : > { %5585 = vst [vmem:[%s599_s25] sm:$0xff] %v5584_v40   ;;  %5628 = vst [vmem:[%s599_s25 + $0x8] sm:$0xff] %v5589_v49   ;;  %v5063_v31 = vadd.f32 %v4968_v0, %v4967_v55  ;;  %v5084_v45 = vmul.f32 %v4967_v55, %v4967_v55  ;;  %v5085_v48 = vmul.f32 %v4968_v0, %v4968_v0 }
 0x757   : > { %5629 = vst [vmem:[%s599_s25 + $0x10] sm:$0xff] %v5594_v12   ;;  %5630 = vst [vmem:[%s599_s25 + $0x18] sm:$0xff] %v5599_v3   ;;  %v5086_v53 = vmul.f32 %v4969_v18, %v4969_v18  ;;  %v5087_v60 = vmul.f32 %v4970_v9, %v4970_v9  ;;  %v5088_v58 = vmul.f32 %v4971_v11, %v4971_v11 }
 0x758   : > { %5631 = vst [vmem:[%s599_s25 + $0x20] sm:$0xff] %v5604_v24   ;;  %5632 = vst [vmem:[%s599_s25 + $0x28] sm:$0xff] %v5609_v57   ;;  %v5064_v4 = vadd.f32 %v5063_v31, %v4969_v18  ;;  %v5100_v14 = vadd.f32 %v5085_v48, %v5084_v45  ;;  %v5089_v19 = vmul.f32 %v4972_v25, %v4972_v25 }
 0x759   : > { %5633 = vst [vmem:[%s599_s25 + $0x30] sm:$0xff] %v5614_v2   ;;  %5634 = vst [vmem:[%s599_s25 + $0x38] sm:$0xff] %v5619_v28   ;;  %v5090_v15 = vmul.f32 %v4973_v59, %v4973_v59  ;;  %v5091_v61 = vmul.f32 %v4974_v46, %v4974_v46  ;;  %v5092_v1 = vmul.f32 %v4975_v8, %v4975_v8 }
 0x75a   : > { %v5065_v29 = vadd.f32 %v5064_v4, %v4970_v9  ;;  %v5101_v37 = vadd.f32 %v5100_v14, %v5086_v53  ;;  %v5093_v16 = vmul.f32 %v4976_v32, %v4976_v32  ;;  %v5094_v18 = vmul.f32 %v4977_v10, %v4977_v10 }
 0x75b   : > { %v5095_v6 = vmul.f32 %v4978_v13, %v4978_v13  ;;  %v5097_v47 = vmul.f32 %v4980_v56, %v4980_v56  ;;  %v5098_v43 = vmul.f32 %v4981_v54, %v4981_v54  ;;  %v5099_v33 = vmul.f32 %v4982_v62, %v4982_v62 }
 0x75c   : > { %v5066_v34 = vadd.f32 %v5065_v29, %v4971_v11  ;;  %v5102_v27 = vadd.f32 %v5101_v37, %v5087_v60 }
 0x75e   : > { %v5067_v5 = vadd.f32 %v5066_v34, %v4972_v25  ;;  %v5103_v41 = vadd.f32 %v5102_v27, %v5088_v58  ;;  %v5096_v25 = vmul.f32 %v4979_v23, %v4979_v23 }
 0x760   : > { %v5068_v50 = vadd.f32 %v5067_v5, %v4973_v59  ;;  %v5104_v20 = vadd.f32 %v5103_v41, %v5089_v19 }
 0x762   : > { %v5069_v52 = vadd.f32 %v5068_v50, %v4974_v46  ;;  %v5105_v21 = vadd.f32 %v5104_v20, %v5090_v15 }
 0x764   : > { %v5070_v17 = vadd.f32 %v5069_v52, %v4975_v8  ;;  %v5106_v22 = vadd.f32 %v5105_v21, %v5091_v61 }
 0x766   : > { %v5071_v42 = vadd.f32 %v5070_v17, %v4976_v32  ;;  %v5107_v0 = vadd.f32 %v5106_v22, %v5092_v1 }
 0x768   : > { %v5072_v55 = vadd.f32 %v5071_v42, %v4977_v10  ;;  %v5108_v35 = vadd.f32 %v5107_v0, %v5093_v16 }
 0x76a   : > { %v5073_v26 = vadd.f32 %v5072_v55, %v4978_v13  ;;  %v5109_v11 = vadd.f32 %v5108_v35, %v5094_v18 }
 0x76c   : > { %v5074_v9 = vadd.f32 %v5073_v26, %v4979_v23  ;;  %v5110_v63 = vadd.f32 %v5109_v11, %v5095_v6 }
 0x76e   : > { %v5075_v38 = vadd.f32 %v5074_v9, %v4980_v56  ;;  %v5111_v36 = vadd.f32 %v5110_v63, %v5096_v25 }
 0x770   : > { %v5076_v59 = vadd.f32 %v5075_v38, %v4981_v54  ;;  %v5112_v8 = vadd.f32 %v5111_v36, %v5097_v47 }
 0x772   : > { %v5077_v46 = vadd.f32 %v5076_v59, %v4982_v62  ;;  %v5113_v32 = vadd.f32 %v5112_v8, %v5098_v43 }
 0x774   : > { %v5078_v44 = vrot.slane %v5077_v46, 4  ;;  %v5114_v7 = vadd.f32 %v5113_v32, %v5099_v33 }
 0x776   : > { %v5079_v51 = vadd.f32 %v5078_v44, %v5077_v46  ;;  %v5115_v39 = vrot.slane %v5114_v7, 4 }
 0x778   : > { %v5080_v10 = vrot.slane %v5079_v51, 2  ;;  %v5116_v13 = vadd.f32 %v5115_v39, %v5114_v7 }
 0x77a   : > { %v5081_v30 = vadd.f32 %v5080_v10, %v5079_v51  ;;  %v5117_v40 = vrot.slane %v5116_v13, 2 }
 0x77c   : > { %v5082_v49 = vrot.slane %v5081_v30, 1  ;;  %v5118_v23 = vadd.f32 %v5117_v40, %v5116_v13 }
 0x77e   : > { %v5119_v12 = vrot.slane %v5118_v23, 1  ;;  %v5083_v56 = vadd.f32 %v5082_v49, %v5081_v30 }
 0x780   : > { %v5120_v54 = vadd.f32 %v5119_v12, %v5118_v23 }
 0x782   : > { %v5121_v62 = vsel %vm939_vm5, %v5083_v56, %v5120_v54 }
 0x783   : > { %5122 = vst [vmem:[%s603_s28] sm:$0x3] %v5121_v62 }
 0x784 PF: > { %s32_s29 = sadd.s32 1, %s7064_s29  }
 0x785   : > { %p29_p3 = scmp.ge.s32.totalorder %s32_s29, 4  }
 0x787   :  { %31 = sbr.rel (!%p29_p3) target bundleno = 5 (0x5), region = 151 }
 0x78e   :  { %5158 = vsyncpa [#allocation5], 1 }
 0x78f   :  { %5160 = vsyncpa [#allocation5 + $0x1], 1 }

</bundles_post_ra>
